<compile_context>
chip_gen: v7x
topology: tpu7x:2x2x1
jax: 0.10.0
libtpu: 0.0.40
codegen_flags: <defaults>
</compile_context>

<pallas_src>
import numpy as np
import jax
import jax.numpy as jnp
from jax.experimental import pallas as pl
from jax.experimental.pallas import tpu as pltpu


# ----------------------------- configuration (small, shape-consistent) -------
B = 2             # batch (num RoIs)
C_IN = 16         # in_channels            (256 in the original module)
C_ENC = 32        # seq_encoder out chans  (256 in the original module)
ROI_H, ROI_W = 8, 16          # in_roi_size            ((16, 64) originally)
H_IN, W_IN = 5, 12            # RoI feature spatial size before rescale
HIDDEN = 32       # hidden_dim             (512 in the original module)
VOCAB = 40        # len(charset)
T_STEPS = 8       # decoder target length  (max_len = 32 originally)
BOS_TOKEN = 0
X_OH = ROI_W // 2             # x_onehot_size
Y_OH = ROI_H // 2             # y_onehot_size
D_ENC = C_ENC + X_OH + Y_OH   # channel dim of seq_decoder_input_reshape

HW_IN = H_IN * W_IN           # 60
HW1 = ROI_H * ROI_W           # 128  (post-rescale spatial)
HW2 = Y_OH * X_OH             # 32   (post-pool spatial)

assert ROI_H % 2 == 0 and ROI_W % 2 == 0   # ceil_mode pool == floor pool here

_SLAB_LANES = 128


# ------------------------------ parameter slab layout --------------------------
def _ceil8(n):
    return -(-n // 8) * 8


def _slab_layout():
    blocks = [
        ('r1',    9 * HW1,  HW_IN),        # bilinear-resize ∘ conv1 tap shift, per tap
        ('pool',  4 * HW2,  HW1),          # 2x2/2 max-pool row-selection matrices
        ('s2',    9 * HW2,  HW2),          # conv2 tap shift matrices
        ('w1',    9 * C_IN, C_IN),         # conv1 weights, rows = (tap, cin)
        ('w2',    9 * C_IN, C_ENC),        # conv2 weights
        ('pos',   HW2,      X_OH + Y_OH),  # coordinate one-hots [x | y]
        ('wihc',  D_ENC,    3 * HIDDEN),   # GRU W_ih (context half), transposed
        ('whcat', HIDDEN,   4 * HIDDEN),   # [attn W_h | GRU W_hh], transposed (128 lanes)
        ('waet',  D_ENC,    HIDDEN),       # attn W_e, transposed
        ('woutt', HIDDEN,   VOCAB),        # output linear, transposed
        ('bias',  8,        _SLAB_LANES),  # rows: b1, b2, b_gx, bhcat, v, bout
    ]
    layout, off = {}, 0
    for name, rows, cols in blocks:
        layout[name] = (off, rows, cols)
        off += _ceil8(rows)                # keep every block start 8-sublane aligned
    return layout, off


_LAYOUT, _SLAB_ROWS = _slab_layout()


# ------------------------------ static geometry constants ----------------------
def _bilinear_matrix(out_size, in_size):
    """nn.Upsample(mode='bilinear', align_corners=False) as a 1-D interpolation matrix."""
    m = np.zeros((out_size, in_size), np.float32)
    scale = in_size / out_size
    for i in range(out_size):
        src = max(scale * (i + 0.5) - 0.5, 0.0)
        i0 = min(int(np.floor(src)), in_size - 1)
        i1 = min(i0 + 1, in_size - 1)
        lam = src - i0
        m[i, i0] += 1.0 - lam
        m[i, i1] += lam
    return m


def _conv3x3_tap_matrices(h, w):
    """(9, h*w, h*w) 0/1 matrices: tap k=3*ky+kx maps output (y,x) to input (y+ky-1, x+kx-1),
    zero row when out of bounds (= zero padding)."""
    mats = np.zeros((9, h * w, h * w), np.float32)
    for ky in range(3):
        for kx in range(3):
            k = 3 * ky + kx
            for y in range(h):
                for x in range(w):
                    yy, xx = y + ky - 1, x + kx - 1
                    if 0 <= yy < h and 0 <= xx < w:
                        mats[k, y * w + x, yy * w + xx] = 1.0
    return mats


def _maxpool_select_matrices(h, w):
    """(4, (h//2)*(w//2), h*w) row selections for 2x2 / stride-2 max pool (even h, w)."""
    ho, wo = h // 2, w // 2
    mats = np.zeros((4, ho * wo, h * w), np.float32)
    for j, (dy, dx) in enumerate(((0, 0), (0, 1), (1, 0), (1, 1))):
        for y in range(ho):
            for x in range(wo):
                mats[j, y * wo + x, (2 * y + dy) * w + (2 * x + dx)] = 1.0
    return mats


def _pos_onehot():
    """(HW2, X_OH + Y_OH); channel order [x_onehot | y_onehot], matching the torch cat."""
    pos = np.zeros((HW2, X_OH + Y_OH), np.float32)
    for y in range(Y_OH):
        for x in range(X_OH):
            pos[y * X_OH + x, x] = 1.0
            pos[y * X_OH + x, X_OH + y] = 1.0
    return pos


# --------------------------------- fused kernel --------------------------------
def _fused_kernel(x_ref, slab_ref, tgx_ref, tok_in_ref, tok_tgt_ref, loss_ref):
    f32 = jnp.float32

    def blk(name):
        off, rows, cols = _LAYOUT[name]
        return slab_ref[off:off + rows, :cols]

    def tap(name, k, rows_per):
        off, _, cols = _LAYOUT[name]
        start = off + k * rows_per
        return slab_ref[start:start + rows_per, :cols]

    bias = blk('bias')                               # (8, 128) -> one vreg
    b1 = bias[0:1, :C_IN]
    b2 = bias[1:2, :C_ENC]
    b_gx = bias[2:3, :3 * HIDDEN]
    bhcat = bias[3:4, :4 * HIDDEN]
    v = bias[4:5, :HIDDEN]
    bout = bias[5:6, :VOCAB]
    pos = blk('pos')                                 # (HW2, X_OH + Y_OH)
    waet = blk('waet')                               # (D_ENC, HIDDEN)

    # ---------- encoder: rescale -> conv3x3+ReLU -> 2x2 maxpool -> conv3x3+ReLU ----------
    # All spatial ops are dense matmuls against precomputed selection / interpolation
    # matrices (resize folded into the conv1 taps), so the MXU does all the work.
    enc_list, encp_list = [], []
    for b in range(B):
        xb = x_ref[b]                                # (HW_IN, C_IN), channels on lanes
        acc1 = jnp.zeros((HW1, C_IN), f32)
        for k in range(9):
            acc1 = acc1 + jnp.dot(
                tap('r1', k, HW1),
                jnp.dot(xb, tap('w1', k, C_IN), preferred_element_type=f32),
                preferred_element_type=f32)
        c1 = jnp.maximum(acc1 + b1, 0.0)             # (HW1, C_IN)

        pooled = None                                # max-pool fused as 4 row-selects + max
        for j in range(4):
            s = jnp.dot(tap('pool', j, HW2), c1, preferred_element_type=f32)
            pooled = s if pooled is None else jnp.maximum(pooled, s)

        acc2 = jnp.zeros((HW2, C_ENC), f32)
        for k in range(9):
            acc2 = acc2 + jnp.dot(
                tap('s2', k, HW2),
                jnp.dot(pooled, tap('w2', k, C_IN), preferred_element_type=f32),
                preferred_element_type=f32)
        c2 = jnp.maximum(acc2 + b2, 0.0)             # (HW2, C_ENC)

        enc_b = jnp.concatenate([c2, pos], axis=1)   # (HW2, D_ENC) = [feat | x_oh | y_oh]
        enc_list.append(enc_b)
        # step-invariant encoder half of the attention Linear, computed once
        encp_list.append(jnp.dot(enc_b, waet, preferred_element_type=f32))
    encp = jnp.stack(encp_list, axis=0)              # (B, HW2, HIDDEN)

    # ---------- teacher-forced decoder: fully unrolled in-kernel time loop --------------
    whcat = blk('whcat')                             # (HIDDEN, 4*HIDDEN)
    wihc = blk('wihc')                               # (D_ENC, 3*HIDDEN)
    woutt = blk('woutt')                             # (HIDDEN, VOCAB)
    lane_iota = jax.lax.broadcasted_iota(jnp.int32, (1, VOCAB), 1)

    def step(t, carry):
        h, lacc = carry
        # merged hidden-side projection [attn-hidden | GRU r,z,n gates] -> 128 dense lanes
        hcat = jnp.dot(h, whcat, preferred_element_type=f32) + bhcat     # (B, 4H)
        hid_proj = hcat[:, :HIDDEN]
        gh = hcat[:, HIDDEN:]

        # Bahdanau attention over the HW2 positions
        energy = jnp.tanh(encp + hid_proj[:, None, :])                   # (B, HW2, H)
        scores = jnp.sum(energy * v[:, None, :], axis=-1)                # (B, HW2)
        scores = scores - jnp.max(scores, axis=-1, keepdims=True)
        e = jnp.exp(scores)
        attw = e / jnp.sum(e, axis=-1, keepdims=True)                    # (B, HW2)
        ctx = jnp.concatenate(
            [jnp.dot(attw[b:b + 1, :], enc_list[b], preferred_element_type=f32)
             for b in range(B)], axis=0)                                 # (B, D_ENC)

        # token contribution to the GRU input gates: direct row gather from the folded
        # (identity-embedding ∘ word_linear ∘ W_ih[word]) lookup table (no one-hot matmul)
        tok_rows = jnp.concatenate(
            [tgx_ref[tok_in_ref[t, b]] for b in range(B)], axis=0)       # (B, 3H)
        gx = tok_rows + b_gx + jnp.dot(ctx, wihc, preferred_element_type=f32)

        # GRUCell (torch gate order r, z, n)
        r = jax.nn.sigmoid(gx[:, :HIDDEN] + gh[:, :HIDDEN])
        z = jax.nn.sigmoid(gx[:, HIDDEN:2 * HIDDEN] + gh[:, HIDDEN:2 * HIDDEN])
        n = jnp.tanh(gx[:, 2 * HIDDEN:] + r * gh[:, 2 * HIDDEN:])
        h_new = (1.0 - z) * n + z * h

        # output linear + log_softmax + NLLLoss(ignore_index=-1, reduction='none')
        logits = jnp.dot(h_new, woutt, preferred_element_type=f32) + bout     # (B, V)
        lmax = jnp.max(logits, axis=-1, keepdims=True)
        lse = jnp.log(jnp.sum(jnp.exp(logits - lmax), axis=-1, keepdims=True)) + lmax
        logp = logits - lse
        nll = []
        for b in range(B):
            tgt = tok_tgt_ref[t, b]
            mask = jnp.logical_and(lane_iota == tgt, tgt >= 0)
            nll.append(-jnp.sum(jnp.where(mask, logp[b:b + 1, :], 0.0),
                                axis=-1, keepdims=True))                 # (1, 1)
        return h_new, lacc + jnp.concatenate(nll, axis=0)

    h0 = jnp.zeros((B, HIDDEN), f32)
    l0 = jnp.zeros((B, 1), f32)
    _, lacc = jax.lax.fori_loop(0, T_STEPS, step, (h0, l0), unroll=True)

    # matches torch: loss.sum() / loss.size(0) * 0.02  (ignored targets contribute 0)
    loss_ref[...] = (0.02 * jnp.sum(lacc) / B).reshape(1, 1)


# --------------------------- weight folding / packing --------------------------
def _pack_params(params):
    """Fold + pack all weights and static matrices into one (rows, 128) f32 slab plus the
    (VOCAB, 1, 3*HIDDEN) token -> GRU-input-gate lookup table."""
    mk = np.kron(_bilinear_matrix(ROI_H, H_IN), _bilinear_matrix(ROI_W, W_IN))   # (HW1, HW_IN)
    sh1 = _conv3x3_tap_matrices(ROI_H, ROI_W)                                    # (9, HW1, HW1)
    r1 = np.einsum('kpq,qj->kpj', sh1, mk).astype(np.float32)                    # (9, HW1, HW_IN)
    pool = _maxpool_select_matrices(ROI_H, ROI_W)                                # (4, HW2, HW1)
    s2 = _conv3x3_tap_matrices(Y_OH, X_OH)                                       # (9, HW2, HW2)
    pos = _pos_onehot()                                                          # (HW2, 12)

    wih_word = params['wih'][:, :HIDDEN]                      # (3H, H)
    wih_ctx = params['wih'][:, HIDDEN:]                       # (3H, D_ENC)
    tgx = (wih_word @ params['wl']).T                         # (VOCAB, 3H) token lookup
    b_gx = params['bl'] @ wih_word.T + params['bih']          # (1, 3H)
    whcat = jnp.concatenate([params['wah'].T, params['whh'].T], axis=1)    # (H, 4H)
    bhcat = jnp.concatenate([params['ba'], params['bhh']], axis=1)         # (1, 4H)

    bias = jnp.zeros((8, _SLAB_LANES), jnp.float32)
    bias = bias.at[0, :C_IN].set(params['conv1_b'][0])
    bias = bias.at[1, :C_ENC].set(params['conv2_b'][0])
    bias = bias.at[2, :3 * HIDDEN].set(b_gx[0])
    bias = bias.at[3, :4 * HIDDEN].set(bhcat[0])
    bias = bias.at[4, :HIDDEN].set(params['v'][0])
    bias = bias.at[5, :VOCAB].set(params['bout'][0])

    entries = {
        'r1': r1.reshape(9 * HW1, HW_IN),
        'pool': pool.reshape(4 * HW2, HW1),
        's2': s2.reshape(9 * HW2, HW2),
        'w1': jnp.reshape(params['conv1_w'], (9 * C_IN, C_IN)),
        'w2': jnp.reshape(params['conv2_w'], (9 * C_IN, C_ENC)),
        'pos': pos,
        'wihc': wih_ctx.T,
        'whcat': whcat,
        'waet': params['wae'].T,
        'woutt': params['wout'].T,
        'bias': bias,
    }
    slab = jnp.zeros((_SLAB_ROWS, _SLAB_LANES), jnp.float32)
    for name, arr in entries.items():
        off, rows, cols = _LAYOUT[name]
        slab = slab.at[off:off + rows, :cols].set(jnp.asarray(arr, jnp.float32))
    return slab, tgx.reshape(VOCAB, 1, 3 * HIDDEN)


# ------------------------------------ wrapper -----------------------------------
def spatial_att_seq_head_train_forward(x_nchw, decoder_targets, word_targets, params):
    # NCHW -> NHWC, flatten spatial row-major (channels-last => channels on the lane dim)
    x = jnp.transpose(x_nchw, (0, 2, 3, 1)).astype(jnp.float32)
    x_flat = x.reshape(B, HW_IN, C_IN)

    slab, tgx = _pack_params(params)

    # teacher-forced decoder inputs: BOS then shifted targets (teacher_force_ratio = 1.0)
    dec_in = jnp.concatenate(
        [jnp.full((B, 1), BOS_TOKEN, jnp.int32), decoder_targets[:, :-1].astype(jnp.int32)],
        axis=1)
    tok_in = dec_in.T                                    # (T, B) int32 -> SMEM
    tok_tgt = word_targets.astype(jnp.int32).T           # (T, B) int32 -> SMEM

    # NOTE: for production sizes (C=256, HIDDEN=512, T=32, many RoIs) add a leading
    # 'parallel' RoI grid axis so v7x can shard it across its 2 TensorCores and
    # re-derive the VMEM budget; at these shapes one invocation fits trivially.
    loss = pl.pallas_call(
        _fused_kernel,
        out_shape=jax.ShapeDtypeStruct((1, 1), jnp.float32),
        in_specs=[
            pl.BlockSpec(memory_space=pltpu.MemorySpace.VMEM),   # x_flat
            pl.BlockSpec(memory_space=pltpu.MemorySpace.VMEM),   # packed parameter slab
            pl.BlockSpec(memory_space=pltpu.MemorySpace.VMEM),   # token -> gx lookup table
            pl.BlockSpec(memory_space=pltpu.MemorySpace.SMEM),   # decoder input token ids
            pl.BlockSpec(memory_space=pltpu.MemorySpace.SMEM),   # target token ids
        ],
        out_specs=pl.BlockSpec(memory_space=pltpu.MemorySpace.VMEM),
    )(x_flat, slab, tgx, tok_in, tok_tgt)
    return loss[0, 0]


# --------------------------- pure-JAX reference (validation) --------------------
def _reference_forward(x_nchw, decoder_targets, word_targets, params):
    with jax.default_matmul_precision('float32'):
        x = jnp.transpose(x_nchw, (0, 2, 3, 1)).astype(jnp.float32)
        mk = jnp.asarray(np.kron(_bilinear_matrix(ROI_H, H_IN),
                                 _bilinear_matrix(ROI_W, W_IN)), jnp.float32)
        up = jnp.einsum('pq,bqc->bpc', mk, x.reshape(B, HW_IN, C_IN)).reshape(
            B, ROI_H, ROI_W, C_IN)
        dn = ('NHWC', 'HWIO', 'NHWC')
        c1 = jax.lax.conv_general_dilated(up, params['conv1_w'], (1, 1), 'SAME',
                                          dimension_numbers=dn)
        c1 = jnp.maximum(c1 + params['conv1_b'].reshape(1, 1, 1, -1), 0.0)
        p = jax.lax.reduce_window(c1, -jnp.inf, jax.lax.max,
                                  (1, 2, 2, 1), (1, 2, 2, 1), 'VALID')
        c2 = jax.lax.conv_general_dilated(p, params['conv2_w'], (1, 1), 'SAME',
                                          dimension_numbers=dn)
        c2 = jnp.maximum(c2 + params['conv2_b'].reshape(1, 1, 1, -1), 0.0)
        xpos = jnp.broadcast_to(jnp.eye(X_OH, dtype=jnp.float32)[None, None],
                                (B, Y_OH, X_OH, X_OH))
        ypos = jnp.broadcast_to(jnp.eye(Y_OH, dtype=jnp.float32)[None, :, None, :],
                                (B, Y_OH, X_OH, Y_OH))
        enc = jnp.concatenate([c2, xpos, ypos], axis=-1).reshape(B, HW2, D_ENC)

        dec_in = jnp.concatenate(
            [jnp.full((B, 1), BOS_TOKEN, jnp.int32),
             decoder_targets[:, :-1].astype(jnp.int32)], axis=1)
        h = jnp.zeros((B, HIDDEN), jnp.float32)
        loss_b = jnp.zeros((B,), jnp.float32)
        encp = jnp.einsum('bkd,hd->bkh', enc, params['wae'])
        for t in range(T_STEPS):
            emb = jax.nn.one_hot(dec_in[:, t], VOCAB, dtype=jnp.float32) @ params['wl'].T \
                  + params['bl']
            hid_proj = h @ params['wah'].T + params['ba']
            energy = jnp.tanh(encp + hid_proj[:, None, :])
            scores = jnp.einsum('bkh,h->bk', energy, params['v'][0])
            attw = jax.nn.softmax(scores, axis=-1)
            ctx = jnp.einsum('bk,bkd->bd', attw, enc)
            gx = jnp.concatenate([emb, ctx], axis=1) @ params['wih'].T + params['bih']
            gh = h @ params['whh'].T + params['bhh']
            r = jax.nn.sigmoid(gx[:, :HIDDEN] + gh[:, :HIDDEN])
            z = jax.nn.sigmoid(gx[:, HIDDEN:2 * HIDDEN] + gh[:, HIDDEN:2 * HIDDEN])
            n = jnp.tanh(gx[:, 2 * HIDDEN:] + r * gh[:, 2 * HIDDEN:])
            h = (1.0 - z) * n + z * h
            logits = h @ params['wout'].T + params['bout']
            logp = jax.nn.log_softmax(logits, axis=-1)
            tgt = word_targets[:, t]
            picked = jnp.take_along_axis(logp, jnp.maximum(tgt, 0)[:, None], axis=1)[:, 0]
            loss_b = loss_b + jnp.where(tgt >= 0, -picked, 0.0)
        return 0.02 * jnp.sum(loss_b) / B


# --------------------------------- parameters -----------------------------------
def init_params(key):
    ks = jax.random.split(key, 9)
    s = 0.1
    return {
        'conv1_w': jax.random.normal(ks[0], (3, 3, C_IN, C_IN), jnp.float32) * s,
        'conv1_b': jnp.zeros((1, C_IN), jnp.float32),
        'conv2_w': jax.random.normal(ks[1], (3, 3, C_IN, C_ENC), jnp.float32) * s,
        'conv2_b': jnp.zeros((1, C_ENC), jnp.float32),
        # word_linear: Linear(embed=V -> HIDDEN); embedding weight is identity
        'wl': jax.random.normal(ks[2], (HIDDEN, VOCAB), jnp.float32) * s,
        'bl': jnp.zeros((1, HIDDEN), jnp.float32),
        # attn Linear(HIDDEN + D_ENC -> HIDDEN) split into [hidden | encoder] halves
        'wah': jax.random.normal(ks[3], (HIDDEN, HIDDEN), jnp.float32) * s,
        'wae': jax.random.normal(ks[4], (HIDDEN, D_ENC), jnp.float32) * s,
        'ba': jnp.zeros((1, HIDDEN), jnp.float32),
        'v': jax.random.normal(ks[5], (1, HIDDEN), jnp.float32) / np.sqrt(HIDDEN),
        # GRUCell(HIDDEN + D_ENC -> HIDDEN), gates [r, z, n]
        'wih': jax.random.normal(ks[6], (3 * HIDDEN, HIDDEN + D_ENC), jnp.float32) * s,
        'bih': jnp.zeros((1, 3 * HIDDEN), jnp.float32),
        'whh': jax.random.normal(ks[7], (3 * HIDDEN, HIDDEN), jnp.float32) * s,
        'bhh': jnp.zeros((1, 3 * HIDDEN), jnp.float32),
        # out: Linear(HIDDEN -> VOCAB)
        'wout': jax.random.normal(ks[8], (VOCAB, HIDDEN), jnp.float32) * s,
        'bout': jnp.zeros((1, VOCAB), jnp.float32),
    }


# ------------------------------------ main ---------------------------------------
if __name__ == "__main__":
    key = jax.random.PRNGKey(0)
    kx, kt, kp = jax.random.split(key, 3)
    x = jax.random.normal(kx, (B, C_IN, H_IN, W_IN), jnp.float32)
    decoder_targets = jax.random.randint(kt, (B, T_STEPS), 3, VOCAB).astype(jnp.int32)
    word_targets = decoder_targets.at[0, -1].set(-1)   # exercise ignore_index = -1
    params = init_params(kp)

    fwd = jax.jit(spatial_att_seq_head_train_forward)
    loss = jax.block_until_ready(fwd(x, decoder_targets, word_targets, params))

    ref = jax.block_until_ready(
        _reference_forward(x, decoder_targets, word_targets, params))
    np.testing.assert_allclose(np.asarray(loss), np.asarray(ref), rtol=2e-2, atol=1e-3)
    assert np.isfinite(np.asarray(loss)).all()
    print("KERNEL_OK")
</pallas_src>

<mosaic_0001>
module attributes {stable_mosaic.version = 11 : i64} {
  func.func @_fused_kernel(%arg0: memref<2x60x16xf32, #tpu.memory_space<vmem>>, %arg1: memref<2056x128xf32, #tpu.memory_space<vmem>>, %arg2: memref<40x1x96xf32, #tpu.memory_space<vmem>>, %arg3: memref<8x2xi32, #tpu.memory_space<smem>>, %arg4: memref<8x2xi32, #tpu.memory_space<smem>>, %arg5: memref<1x1xf32, #tpu.memory_space<vmem>>) attributes {dimension_semantics = [], scalar_prefetch = 0 : i64, scratch_operands = 0 : i64, tpu.core_type = #tpu.core_type<tc>} {
    %c2048 = arith.constant 2048 : index
    %c0 = arith.constant 0 : index
    %0 = vector.load %arg1[%c2048, %c0] : memref<2056x128xf32, #tpu.memory_space<vmem>>, vector<8x128xf32>
    %1 = vector.extract_strided_slice %0 {offsets = [0, 0], sizes = [1, 16], strides = [1, 1]} : vector<8x128xf32> to vector<1x16xf32>
    %2 = vector.extract_strided_slice %0 {offsets = [1, 0], sizes = [1, 32], strides = [1, 1]} : vector<8x128xf32> to vector<1x32xf32>
    %3 = vector.extract_strided_slice %0 {offsets = [2, 0], sizes = [1, 96], strides = [1, 1]} : vector<8x128xf32> to vector<1x96xf32>
    %4 = vector.extract_strided_slice %0 {offsets = [3, 0], sizes = [1, 128], strides = [1, 1]} : vector<8x128xf32> to vector<1x128xf32>
    %5 = vector.extract_strided_slice %0 {offsets = [4, 0], sizes = [1, 32], strides = [1, 1]} : vector<8x128xf32> to vector<1x32xf32>
    %6 = vector.extract_strided_slice %0 {offsets = [5, 0], sizes = [1, 40], strides = [1, 1]} : vector<8x128xf32> to vector<1x40xf32>
    %c1856 = arith.constant 1856 : index
    %c0_0 = arith.constant 0 : index
    %7 = vector.load %arg1[%c1856, %c0_0] : memref<2056x128xf32, #tpu.memory_space<vmem>>, vector<32x12xf32>
    %c1968 = arith.constant 1968 : index
    %c0_1 = arith.constant 0 : index
    %8 = vector.load %arg1[%c1968, %c0_1] : memref<2056x128xf32, #tpu.memory_space<vmem>>, vector<44x32xf32>
    %c0_2 = arith.constant 0 : index
    %c0_3 = arith.constant 0 : index
    %c0_4 = arith.constant 0 : index
    %9 = vector.load %arg0[%c0_2, %c0_3, %c0_4] : memref<2x60x16xf32, #tpu.memory_space<vmem>>, vector<1x60x16xf32>
    %10 = vector.shape_cast %9 : vector<1x60x16xf32> to vector<60x16xf32>
    %cst = arith.constant 0.000000e+00 : f32
    %11 = vector.broadcast %cst : f32 to vector<128x16xf32>
    %c0_5 = arith.constant 0 : index
    %c0_6 = arith.constant 0 : index
    %12 = vector.load %arg1[%c0_5, %c0_6] : memref<2056x128xf32, #tpu.memory_space<vmem>>, vector<128x60xf32>
    %c1568 = arith.constant 1568 : index
    %c0_7 = arith.constant 0 : index
    %13 = vector.load %arg1[%c1568, %c0_7] : memref<2056x128xf32, #tpu.memory_space<vmem>>, vector<16x16xf32>
    %cst_8 = arith.constant dense<0.000000e+00> : vector<60x16xf32>
    %14 = tpu.matmul %10, %13, %cst_8 {dimension_numbers = #tpu.dot_dimension_numbers<[1], [0], [0], [1], [0, 0, 1, 1], [], []>} : vector<60x16xf32>, vector<16x16xf32>, vector<60x16xf32> -> vector<60x16xf32>
    %cst_9 = arith.constant dense<0.000000e+00> : vector<128x16xf32>
    %15 = tpu.matmul %12, %14, %cst_9 {dimension_numbers = #tpu.dot_dimension_numbers<[1], [0], [0], [1], [0, 0, 1, 1], [], []>} : vector<128x60xf32>, vector<60x16xf32>, vector<128x16xf32> -> vector<128x16xf32>
    %16 = arith.addf %11, %15 : vector<128x16xf32>
    %c128 = arith.constant 128 : index
    %c0_10 = arith.constant 0 : index
    %17 = vector.load %arg1[%c128, %c0_10] : memref<2056x128xf32, #tpu.memory_space<vmem>>, vector<128x60xf32>
    %c1584 = arith.constant 1584 : index
    %c0_11 = arith.constant 0 : index
    %18 = vector.load %arg1[%c1584, %c0_11] : memref<2056x128xf32, #tpu.memory_space<vmem>>, vector<16x16xf32>
    %cst_12 = arith.constant dense<0.000000e+00> : vector<60x16xf32>
    %19 = tpu.matmul %10, %18, %cst_12 {dimension_numbers = #tpu.dot_dimension_numbers<[1], [0], [0], [1], [0, 0, 1, 1], [], []>} : vector<60x16xf32>, vector<16x16xf32>, vector<60x16xf32> -> vector<60x16xf32>
    %cst_13 = arith.constant dense<0.000000e+00> : vector<128x16xf32>
    %20 = tpu.matmul %17, %19, %cst_13 {dimension_numbers = #tpu.dot_dimension_numbers<[1], [0], [0], [1], [0, 0, 1, 1], [], []>} : vector<128x60xf32>, vector<60x16xf32>, vector<128x16xf32> -> vector<128x16xf32>
    %21 = arith.addf %16, %20 : vector<128x16xf32>
    %c256 = arith.constant 256 : index
    %c0_14 = arith.constant 0 : index
    %22 = vector.load %arg1[%c256, %c0_14] : memref<2056x128xf32, #tpu.memory_space<vmem>>, vector<128x60xf32>
    %c1600 = arith.constant 1600 : index
    %c0_15 = arith.constant 0 : index
    %23 = vector.load %arg1[%c1600, %c0_15] : memref<2056x128xf32, #tpu.memory_space<vmem>>, vector<16x16xf32>
    %cst_16 = arith.constant dense<0.000000e+00> : vector<60x16xf32>
    %24 = tpu.matmul %10, %23, %cst_16 {dimension_numbers = #tpu.dot_dimension_numbers<[1], [0], [0], [1], [0, 0, 1, 1], [], []>} : vector<60x16xf32>, vector<16x16xf32>, vector<60x16xf32> -> vector<60x16xf32>
    %cst_17 = arith.constant dense<0.000000e+00> : vector<128x16xf32>
    %25 = tpu.matmul %22, %24, %cst_17 {dimension_numbers = #tpu.dot_dimension_numbers<[1], [0], [0], [1], [0, 0, 1, 1], [], []>} : vector<128x60xf32>, vector<60x16xf32>, vector<128x16xf32> -> vector<128x16xf32>
    %26 = arith.addf %21, %25 : vector<128x16xf32>
    %c384 = arith.constant 384 : index
    %c0_18 = arith.constant 0 : index
    %27 = vector.load %arg1[%c384, %c0_18] : memref<2056x128xf32, #tpu.memory_space<vmem>>, vector<128x60xf32>
    %c1616 = arith.constant 1616 : index
    %c0_19 = arith.constant 0 : index
    %28 = vector.load %arg1[%c1616, %c0_19] : memref<2056x128xf32, #tpu.memory_space<vmem>>, vector<16x16xf32>
    %cst_20 = arith.constant dense<0.000000e+00> : vector<60x16xf32>
    %29 = tpu.matmul %10, %28, %cst_20 {dimension_numbers = #tpu.dot_dimension_numbers<[1], [0], [0], [1], [0, 0, 1, 1], [], []>} : vector<60x16xf32>, vector<16x16xf32>, vector<60x16xf32> -> vector<60x16xf32>
    %cst_21 = arith.constant dense<0.000000e+00> : vector<128x16xf32>
    %30 = tpu.matmul %27, %29, %cst_21 {dimension_numbers = #tpu.dot_dimension_numbers<[1], [0], [0], [1], [0, 0, 1, 1], [], []>} : vector<128x60xf32>, vector<60x16xf32>, vector<128x16xf32> -> vector<128x16xf32>
    %31 = arith.addf %26, %30 : vector<128x16xf32>
    %c512 = arith.constant 512 : index
    %c0_22 = arith.constant 0 : index
    %32 = vector.load %arg1[%c512, %c0_22] : memref<2056x128xf32, #tpu.memory_space<vmem>>, vector<128x60xf32>
    %c1632 = arith.constant 1632 : index
    %c0_23 = arith.constant 0 : index
    %33 = vector.load %arg1[%c1632, %c0_23] : memref<2056x128xf32, #tpu.memory_space<vmem>>, vector<16x16xf32>
    %cst_24 = arith.constant dense<0.000000e+00> : vector<60x16xf32>
    %34 = tpu.matmul %10, %33, %cst_24 {dimension_numbers = #tpu.dot_dimension_numbers<[1], [0], [0], [1], [0, 0, 1, 1], [], []>} : vector<60x16xf32>, vector<16x16xf32>, vector<60x16xf32> -> vector<60x16xf32>
    %cst_25 = arith.constant dense<0.000000e+00> : vector<128x16xf32>
    %35 = tpu.matmul %32, %34, %cst_25 {dimension_numbers = #tpu.dot_dimension_numbers<[1], [0], [0], [1], [0, 0, 1, 1], [], []>} : vector<128x60xf32>, vector<60x16xf32>, vector<128x16xf32> -> vector<128x16xf32>
    %36 = arith.addf %31, %35 : vector<128x16xf32>
    %c640 = arith.constant 640 : index
    %c0_26 = arith.constant 0 : index
    %37 = vector.load %arg1[%c640, %c0_26] : memref<2056x128xf32, #tpu.memory_space<vmem>>, vector<128x60xf32>
    %c1648 = arith.constant 1648 : index
    %c0_27 = arith.constant 0 : index
    %38 = vector.load %arg1[%c1648, %c0_27] : memref<2056x128xf32, #tpu.memory_space<vmem>>, vector<16x16xf32>
    %cst_28 = arith.constant dense<0.000000e+00> : vector<60x16xf32>
    %39 = tpu.matmul %10, %38, %cst_28 {dimension_numbers = #tpu.dot_dimension_numbers<[1], [0], [0], [1], [0, 0, 1, 1], [], []>} : vector<60x16xf32>, vector<16x16xf32>, vector<60x16xf32> -> vector<60x16xf32>
    %cst_29 = arith.constant dense<0.000000e+00> : vector<128x16xf32>
    %40 = tpu.matmul %37, %39, %cst_29 {dimension_numbers = #tpu.dot_dimension_numbers<[1], [0], [0], [1], [0, 0, 1, 1], [], []>} : vector<128x60xf32>, vector<60x16xf32>, vector<128x16xf32> -> vector<128x16xf32>
    %41 = arith.addf %36, %40 : vector<128x16xf32>
    %c768 = arith.constant 768 : index
    %c0_30 = arith.constant 0 : index
    %42 = vector.load %arg1[%c768, %c0_30] : memref<2056x128xf32, #tpu.memory_space<vmem>>, vector<128x60xf32>
    %c1664 = arith.constant 1664 : index
    %c0_31 = arith.constant 0 : index
    %43 = vector.load %arg1[%c1664, %c0_31] : memref<2056x128xf32, #tpu.memory_space<vmem>>, vector<16x16xf32>
    %cst_32 = arith.constant dense<0.000000e+00> : vector<60x16xf32>
    %44 = tpu.matmul %10, %43, %cst_32 {dimension_numbers = #tpu.dot_dimension_numbers<[1], [0], [0], [1], [0, 0, 1, 1], [], []>} : vector<60x16xf32>, vector<16x16xf32>, vector<60x16xf32> -> vector<60x16xf32>
    %cst_33 = arith.constant dense<0.000000e+00> : vector<128x16xf32>
    %45 = tpu.matmul %42, %44, %cst_33 {dimension_numbers = #tpu.dot_dimension_numbers<[1], [0], [0], [1], [0, 0, 1, 1], [], []>} : vector<128x60xf32>, vector<60x16xf32>, vector<128x16xf32> -> vector<128x16xf32>
    %46 = arith.addf %41, %45 : vector<128x16xf32>
    %c896 = arith.constant 896 : index
    %c0_34 = arith.constant 0 : index
    %47 = vector.load %arg1[%c896, %c0_34] : memref<2056x128xf32, #tpu.memory_space<vmem>>, vector<128x60xf32>
    %c1680 = arith.constant 1680 : index
    %c0_35 = arith.constant 0 : index
    %48 = vector.load %arg1[%c1680, %c0_35] : memref<2056x128xf32, #tpu.memory_space<vmem>>, vector<16x16xf32>
    %cst_36 = arith.constant dense<0.000000e+00> : vector<60x16xf32>
    %49 = tpu.matmul %10, %48, %cst_36 {dimension_numbers = #tpu.dot_dimension_numbers<[1], [0], [0], [1], [0, 0, 1, 1], [], []>} : vector<60x16xf32>, vector<16x16xf32>, vector<60x16xf32> -> vector<60x16xf32>
    %cst_37 = arith.constant dense<0.000000e+00> : vector<128x16xf32>
    %50 = tpu.matmul %47, %49, %cst_37 {dimension_numbers = #tpu.dot_dimension_numbers<[1], [0], [0], [1], [0, 0, 1, 1], [], []>} : vector<128x60xf32>, vector<60x16xf32>, vector<128x16xf32> -> vector<128x16xf32>
    %51 = arith.addf %46, %50 : vector<128x16xf32>
    %c1024 = arith.constant 1024 : index
    %c0_38 = arith.constant 0 : index
    %52 = vector.load %arg1[%c1024, %c0_38] : memref<2056x128xf32, #tpu.memory_space<vmem>>, vector<128x60xf32>
    %c1696 = arith.constant 1696 : index
    %c0_39 = arith.constant 0 : index
    %53 = vector.load %arg1[%c1696, %c0_39] : memref<2056x128xf32, #tpu.memory_space<vmem>>, vector<16x16xf32>
    %cst_40 = arith.constant dense<0.000000e+00> : vector<60x16xf32>
    %54 = tpu.matmul %10, %53, %cst_40 {dimension_numbers = #tpu.dot_dimension_numbers<[1], [0], [0], [1], [0, 0, 1, 1], [], []>} : vector<60x16xf32>, vector<16x16xf32>, vector<60x16xf32> -> vector<60x16xf32>
    %cst_41 = arith.constant dense<0.000000e+00> : vector<128x16xf32>
    %55 = tpu.matmul %52, %54, %cst_41 {dimension_numbers = #tpu.dot_dimension_numbers<[1], [0], [0], [1], [0, 0, 1, 1], [], []>} : vector<128x60xf32>, vector<60x16xf32>, vector<128x16xf32> -> vector<128x16xf32>
    %56 = arith.addf %51, %55 : vector<128x16xf32>
    %57 = vector.broadcast %1 : vector<1x16xf32> to vector<128x16xf32>
    %58 = arith.addf %56, %57 : vector<128x16xf32>
    %cst_42 = arith.constant 0.000000e+00 : f32
    %59 = vector.broadcast %cst_42 : f32 to vector<128x16xf32>
    %60 = arith.maximumf %58, %59 : vector<128x16xf32>
    %c1152 = arith.constant 1152 : index
    %c0_43 = arith.constant 0 : index
    %61 = vector.load %arg1[%c1152, %c0_43] : memref<2056x128xf32, #tpu.memory_space<vmem>>, vector<32x128xf32>
    %cst_44 = arith.constant dense<0.000000e+00> : vector<32x16xf32>
    %62 = tpu.matmul %61, %60, %cst_44 {dimension_numbers = #tpu.dot_dimension_numbers<[1], [0], [0], [1], [0, 0, 1, 1], [], []>} : vector<32x128xf32>, vector<128x16xf32>, vector<32x16xf32> -> vector<32x16xf32>
    %c1184 = arith.constant 1184 : index
    %c0_45 = arith.constant 0 : index
    %63 = vector.load %arg1[%c1184, %c0_45] : memref<2056x128xf32, #tpu.memory_space<vmem>>, vector<32x128xf32>
    %cst_46 = arith.constant dense<0.000000e+00> : vector<32x16xf32>
    %64 = tpu.matmul %63, %60, %cst_46 {dimension_numbers = #tpu.dot_dimension_numbers<[1], [0], [0], [1], [0, 0, 1, 1], [], []>} : vector<32x128xf32>, vector<128x16xf32>, vector<32x16xf32> -> vector<32x16xf32>
    %65 = arith.maximumf %62, %64 : vector<32x16xf32>
    %c1216 = arith.constant 1216 : index
    %c0_47 = arith.constant 0 : index
    %66 = vector.load %arg1[%c1216, %c0_47] : memref<2056x128xf32, #tpu.memory_space<vmem>>, vector<32x128xf32>
    %cst_48 = arith.constant dense<0.000000e+00> : vector<32x16xf32>
    %67 = tpu.matmul %66, %60, %cst_48 {dimension_numbers = #tpu.dot_dimension_numbers<[1], [0], [0], [1], [0, 0, 1, 1], [], []>} : vector<32x128xf32>, vector<128x16xf32>, vector<32x16xf32> -> vector<32x16xf32>
    %68 = arith.maximumf %65, %67 : vector<32x16xf32>
    %c1248 = arith.constant 1248 : index
    %c0_49 = arith.constant 0 : index
    %69 = vector.load %arg1[%c1248, %c0_49] : memref<2056x128xf32, #tpu.memory_space<vmem>>, vector<32x128xf32>
    %cst_50 = arith.constant dense<0.000000e+00> : vector<32x16xf32>
    %70 = tpu.matmul %69, %60, %cst_50 {dimension_numbers = #tpu.dot_dimension_numbers<[1], [0], [0], [1], [0, 0, 1, 1], [], []>} : vector<32x128xf32>, vector<128x16xf32>, vector<32x16xf32> -> vector<32x16xf32>
    %71 = arith.maximumf %68, %70 : vector<32x16xf32>
    %cst_51 = arith.constant 0.000000e+00 : f32
    %72 = vector.broadcast %cst_51 : f32 to vector<32x32xf32>
    %c1280 = arith.constant 1280 : index
    %c0_52 = arith.constant 0 : index
    %73 = vector.load %arg1[%c1280, %c0_52] : memref<2056x128xf32, #tpu.memory_space<vmem>>, vector<32x32xf32>
    %c1712 = arith.constant 1712 : index
    %c0_53 = arith.constant 0 : index
    %74 = vector.load %arg1[%c1712, %c0_53] : memref<2056x128xf32, #tpu.memory_space<vmem>>, vector<16x32xf32>
    %cst_54 = arith.constant dense<0.000000e+00> : vector<32x32xf32>
    %75 = tpu.matmul %71, %74, %cst_54 {dimension_numbers = #tpu.dot_dimension_numbers<[1], [0], [0], [1], [0, 0, 1, 1], [], []>} : vector<32x16xf32>, vector<16x32xf32>, vector<32x32xf32> -> vector<32x32xf32>
    %cst_55 = arith.constant dense<0.000000e+00> : vector<32x32xf32>
    %76 = tpu.matmul %73, %75, %cst_55 {dimension_numbers = #tpu.dot_dimension_numbers<[1], [0], [0], [1], [0, 0, 1, 1], [], []>} : vector<32x32xf32>, vector<32x32xf32>, vector<32x32xf32> -> vector<32x32xf32>
    %77 = arith.addf %72, %76 : vector<32x32xf32>
    %c1312 = arith.constant 1312 : index
    %c0_56 = arith.constant 0 : index
    %78 = vector.load %arg1[%c1312, %c0_56] : memref<2056x128xf32, #tpu.memory_space<vmem>>, vector<32x32xf32>
    %c1728 = arith.constant 1728 : index
    %c0_57 = arith.constant 0 : index
    %79 = vector.load %arg1[%c1728, %c0_57] : memref<2056x128xf32, #tpu.memory_space<vmem>>, vector<16x32xf32>
    %cst_58 = arith.constant dense<0.000000e+00> : vector<32x32xf32>
    %80 = tpu.matmul %71, %79, %cst_58 {dimension_numbers = #tpu.dot_dimension_numbers<[1], [0], [0], [1], [0, 0, 1, 1], [], []>} : vector<32x16xf32>, vector<16x32xf32>, vector<32x32xf32> -> vector<32x32xf32>
    %cst_59 = arith.constant dense<0.000000e+00> : vector<32x32xf32>
    %81 = tpu.matmul %78, %80, %cst_59 {dimension_numbers = #tpu.dot_dimension_numbers<[1], [0], [0], [1], [0, 0, 1, 1], [], []>} : vector<32x32xf32>, vector<32x32xf32>, vector<32x32xf32> -> vector<32x32xf32>
    %82 = arith.addf %77, %81 : vector<32x32xf32>
    %c1344 = arith.constant 1344 : index
    %c0_60 = arith.constant 0 : index
    %83 = vector.load %arg1[%c1344, %c0_60] : memref<2056x128xf32, #tpu.memory_space<vmem>>, vector<32x32xf32>
    %c1744 = arith.constant 1744 : index
    %c0_61 = arith.constant 0 : index
    %84 = vector.load %arg1[%c1744, %c0_61] : memref<2056x128xf32, #tpu.memory_space<vmem>>, vector<16x32xf32>
    %cst_62 = arith.constant dense<0.000000e+00> : vector<32x32xf32>
    %85 = tpu.matmul %71, %84, %cst_62 {dimension_numbers = #tpu.dot_dimension_numbers<[1], [0], [0], [1], [0, 0, 1, 1], [], []>} : vector<32x16xf32>, vector<16x32xf32>, vector<32x32xf32> -> vector<32x32xf32>
    %cst_63 = arith.constant dense<0.000000e+00> : vector<32x32xf32>
    %86 = tpu.matmul %83, %85, %cst_63 {dimension_numbers = #tpu.dot_dimension_numbers<[1], [0], [0], [1], [0, 0, 1, 1], [], []>} : vector<32x32xf32>, vector<32x32xf32>, vector<32x32xf32> -> vector<32x32xf32>
    %87 = arith.addf %82, %86 : vector<32x32xf32>
    %c1376 = arith.constant 1376 : index
    %c0_64 = arith.constant 0 : index
    %88 = vector.load %arg1[%c1376, %c0_64] : memref<2056x128xf32, #tpu.memory_space<vmem>>, vector<32x32xf32>
    %c1760 = arith.constant 1760 : index
    %c0_65 = arith.constant 0 : index
    %89 = vector.load %arg1[%c1760, %c0_65] : memref<2056x128xf32, #tpu.memory_space<vmem>>, vector<16x32xf32>
    %cst_66 = arith.constant dense<0.000000e+00> : vector<32x32xf32>
    %90 = tpu.matmul %71, %89, %cst_66 {dimension_numbers = #tpu.dot_dimension_numbers<[1], [0], [0], [1], [0, 0, 1, 1], [], []>} : vector<32x16xf32>, vector<16x32xf32>, vector<32x32xf32> -> vector<32x32xf32>
    %cst_67 = arith.constant dense<0.000000e+00> : vector<32x32xf32>
    %91 = tpu.matmul %88, %90, %cst_67 {dimension_numbers = #tpu.dot_dimension_numbers<[1], [0], [0], [1], [0, 0, 1, 1], [], []>} : vector<32x32xf32>, vector<32x32xf32>, vector<32x32xf32> -> vector<32x32xf32>
    %92 = arith.addf %87, %91 : vector<32x32xf32>
    %c1408 = arith.constant 1408 : index
    %c0_68 = arith.constant 0 : index
    %93 = vector.load %arg1[%c1408, %c0_68] : memref<2056x128xf32, #tpu.memory_space<vmem>>, vector<32x32xf32>
    %c1776 = arith.constant 1776 : index
    %c0_69 = arith.constant 0 : index
    %94 = vector.load %arg1[%c1776, %c0_69] : memref<2056x128xf32, #tpu.memory_space<vmem>>, vector<16x32xf32>
    %cst_70 = arith.constant dense<0.000000e+00> : vector<32x32xf32>
    %95 = tpu.matmul %71, %94, %cst_70 {dimension_numbers = #tpu.dot_dimension_numbers<[1], [0], [0], [1], [0, 0, 1, 1], [], []>} : vector<32x16xf32>, vector<16x32xf32>, vector<32x32xf32> -> vector<32x32xf32>
    %cst_71 = arith.constant dense<0.000000e+00> : vector<32x32xf32>
    %96 = tpu.matmul %93, %95, %cst_71 {dimension_numbers = #tpu.dot_dimension_numbers<[1], [0], [0], [1], [0, 0, 1, 1], [], []>} : vector<32x32xf32>, vector<32x32xf32>, vector<32x32xf32> -> vector<32x32xf32>
    %97 = arith.addf %92, %96 : vector<32x32xf32>
    %c1440 = arith.constant 1440 : index
    %c0_72 = arith.constant 0 : index
    %98 = vector.load %arg1[%c1440, %c0_72] : memref<2056x128xf32, #tpu.memory_space<vmem>>, vector<32x32xf32>
    %c1792 = arith.constant 1792 : index
    %c0_73 = arith.constant 0 : index
    %99 = vector.load %arg1[%c1792, %c0_73] : memref<2056x128xf32, #tpu.memory_space<vmem>>, vector<16x32xf32>
    %cst_74 = arith.constant dense<0.000000e+00> : vector<32x32xf32>
    %100 = tpu.matmul %71, %99, %cst_74 {dimension_numbers = #tpu.dot_dimension_numbers<[1], [0], [0], [1], [0, 0, 1, 1], [], []>} : vector<32x16xf32>, vector<16x32xf32>, vector<32x32xf32> -> vector<32x32xf32>
    %cst_75 = arith.constant dense<0.000000e+00> : vector<32x32xf32>
    %101 = tpu.matmul %98, %100, %cst_75 {dimension_numbers = #tpu.dot_dimension_numbers<[1], [0], [0], [1], [0, 0, 1, 1], [], []>} : vector<32x32xf32>, vector<32x32xf32>, vector<32x32xf32> -> vector<32x32xf32>
    %102 = arith.addf %97, %101 : vector<32x32xf32>
    %c1472 = arith.constant 1472 : index
    %c0_76 = arith.constant 0 : index
    %103 = vector.load %arg1[%c1472, %c0_76] : memref<2056x128xf32, #tpu.memory_space<vmem>>, vector<32x32xf32>
    %c1808 = arith.constant 1808 : index
    %c0_77 = arith.constant 0 : index
    %104 = vector.load %arg1[%c1808, %c0_77] : memref<2056x128xf32, #tpu.memory_space<vmem>>, vector<16x32xf32>
    %cst_78 = arith.constant dense<0.000000e+00> : vector<32x32xf32>
    %105 = tpu.matmul %71, %104, %cst_78 {dimension_numbers = #tpu.dot_dimension_numbers<[1], [0], [0], [1], [0, 0, 1, 1], [], []>} : vector<32x16xf32>, vector<16x32xf32>, vector<32x32xf32> -> vector<32x32xf32>
    %cst_79 = arith.constant dense<0.000000e+00> : vector<32x32xf32>
    %106 = tpu.matmul %103, %105, %cst_79 {dimension_numbers = #tpu.dot_dimension_numbers<[1], [0], [0], [1], [0, 0, 1, 1], [], []>} : vector<32x32xf32>, vector<32x32xf32>, vector<32x32xf32> -> vector<32x32xf32>
    %107 = arith.addf %102, %106 : vector<32x32xf32>
    %c1504 = arith.constant 1504 : index
    %c0_80 = arith.constant 0 : index
    %108 = vector.load %arg1[%c1504, %c0_80] : memref<2056x128xf32, #tpu.memory_space<vmem>>, vector<32x32xf32>
    %c1824 = arith.constant 1824 : index
    %c0_81 = arith.constant 0 : index
    %109 = vector.load %arg1[%c1824, %c0_81] : memref<2056x128xf32, #tpu.memory_space<vmem>>, vector<16x32xf32>
    %cst_82 = arith.constant dense<0.000000e+00> : vector<32x32xf32>
    %110 = tpu.matmul %71, %109, %cst_82 {dimension_numbers = #tpu.dot_dimension_numbers<[1], [0], [0], [1], [0, 0, 1, 1], [], []>} : vector<32x16xf32>, vector<16x32xf32>, vector<32x32xf32> -> vector<32x32xf32>
    %cst_83 = arith.constant dense<0.000000e+00> : vector<32x32xf32>
    %111 = tpu.matmul %108, %110, %cst_83 {dimension_numbers = #tpu.dot_dimension_numbers<[1], [0], [0], [1], [0, 0, 1, 1], [], []>} : vector<32x32xf32>, vector<32x32xf32>, vector<32x32xf32> -> vector<32x32xf32>
    %112 = arith.addf %107, %111 : vector<32x32xf32>
    %c1536 = arith.constant 1536 : index
    %c0_84 = arith.constant 0 : index
    %113 = vector.load %arg1[%c1536, %c0_84] : memref<2056x128xf32, #tpu.memory_space<vmem>>, vector<32x32xf32>
    %c1840 = arith.constant 1840 : index
    %c0_85 = arith.constant 0 : index
    %114 = vector.load %arg1[%c1840, %c0_85] : memref<2056x128xf32, #tpu.memory_space<vmem>>, vector<16x32xf32>
    %cst_86 = arith.constant dense<0.000000e+00> : vector<32x32xf32>
    %115 = tpu.matmul %71, %114, %cst_86 {dimension_numbers = #tpu.dot_dimension_numbers<[1], [0], [0], [1], [0, 0, 1, 1], [], []>} : vector<32x16xf32>, vector<16x32xf32>, vector<32x32xf32> -> vector<32x32xf32>
    %cst_87 = arith.constant dense<0.000000e+00> : vector<32x32xf32>
    %116 = tpu.matmul %113, %115, %cst_87 {dimension_numbers = #tpu.dot_dimension_numbers<[1], [0], [0], [1], [0, 0, 1, 1], [], []>} : vector<32x32xf32>, vector<32x32xf32>, vector<32x32xf32> -> vector<32x32xf32>
    %117 = arith.addf %112, %116 : vector<32x32xf32>
    %118 = vector.broadcast %2 : vector<1x32xf32> to vector<32x32xf32>
    %119 = arith.addf %117, %118 : vector<32x32xf32>
    %cst_88 = arith.constant 0.000000e+00 : f32
    %120 = vector.broadcast %cst_88 : f32 to vector<32x32xf32>
    %121 = arith.maximumf %119, %120 : vector<32x32xf32>
    %122 = tpu.concatenate %121, %7 in 1 : vector<32x32xf32>, vector<32x12xf32> -> vector<32x44xf32>
    %cst_89 = arith.constant dense<0.000000e+00> : vector<32x32xf32>
    %123 = tpu.matmul %122, %8, %cst_89 {dimension_numbers = #tpu.dot_dimension_numbers<[1], [0], [0], [1], [0, 0, 1, 1], [], []>} : vector<32x44xf32>, vector<44x32xf32>, vector<32x32xf32> -> vector<32x32xf32>
    %c1 = arith.constant 1 : index
    %c0_90 = arith.constant 0 : index
    %c0_91 = arith.constant 0 : index
    %124 = vector.load %arg0[%c1, %c0_90, %c0_91] : memref<2x60x16xf32, #tpu.memory_space<vmem>>, vector<1x60x16xf32>
    %125 = vector.shape_cast %124 : vector<1x60x16xf32> to vector<60x16xf32>
    %cst_92 = arith.constant 0.000000e+00 : f32
    %126 = vector.broadcast %cst_92 : f32 to vector<128x16xf32>
    %c0_93 = arith.constant 0 : index
    %c0_94 = arith.constant 0 : index
    %127 = vector.load %arg1[%c0_93, %c0_94] : memref<2056x128xf32, #tpu.memory_space<vmem>>, vector<128x60xf32>
    %c1568_95 = arith.constant 1568 : index
    %c0_96 = arith.constant 0 : index
    %128 = vector.load %arg1[%c1568_95, %c0_96] : memref<2056x128xf32, #tpu.memory_space<vmem>>, vector<16x16xf32>
    %cst_97 = arith.constant dense<0.000000e+00> : vector<60x16xf32>
    %129 = tpu.matmul %125, %128, %cst_97 {dimension_numbers = #tpu.dot_dimension_numbers<[1], [0], [0], [1], [0, 0, 1, 1], [], []>} : vector<60x16xf32>, vector<16x16xf32>, vector<60x16xf32> -> vector<60x16xf32>
    %cst_98 = arith.constant dense<0.000000e+00> : vector<128x16xf32>
    %130 = tpu.matmul %127, %129, %cst_98 {dimension_numbers = #tpu.dot_dimension_numbers<[1], [0], [0], [1], [0, 0, 1, 1], [], []>} : vector<128x60xf32>, vector<60x16xf32>, vector<128x16xf32> -> vector<128x16xf32>
    %131 = arith.addf %126, %130 : vector<128x16xf32>
    %c128_99 = arith.constant 128 : index
    %c0_100 = arith.constant 0 : index
    %132 = vector.load %arg1[%c128_99, %c0_100] : memref<2056x128xf32, #tpu.memory_space<vmem>>, vector<128x60xf32>
    %c1584_101 = arith.constant 1584 : index
    %c0_102 = arith.constant 0 : index
    %133 = vector.load %arg1[%c1584_101, %c0_102] : memref<2056x128xf32, #tpu.memory_space<vmem>>, vector<16x16xf32>
    %cst_103 = arith.constant dense<0.000000e+00> : vector<60x16xf32>
    %134 = tpu.matmul %125, %133, %cst_103 {dimension_numbers = #tpu.dot_dimension_numbers<[1], [0], [0], [1], [0, 0, 1, 1], [], []>} : vector<60x16xf32>, vector<16x16xf32>, vector<60x16xf32> -> vector<60x16xf32>
    %cst_104 = arith.constant dense<0.000000e+00> : vector<128x16xf32>
    %135 = tpu.matmul %132, %134, %cst_104 {dimension_numbers = #tpu.dot_dimension_numbers<[1], [0], [0], [1], [0, 0, 1, 1], [], []>} : vector<128x60xf32>, vector<60x16xf32>, vector<128x16xf32> -> vector<128x16xf32>
    %136 = arith.addf %131, %135 : vector<128x16xf32>
    %c256_105 = arith.constant 256 : index
    %c0_106 = arith.constant 0 : index
    %137 = vector.load %arg1[%c256_105, %c0_106] : memref<2056x128xf32, #tpu.memory_space<vmem>>, vector<128x60xf32>
    %c1600_107 = arith.constant 1600 : index
    %c0_108 = arith.constant 0 : index
    %138 = vector.load %arg1[%c1600_107, %c0_108] : memref<2056x128xf32, #tpu.memory_space<vmem>>, vector<16x16xf32>
    %cst_109 = arith.constant dense<0.000000e+00> : vector<60x16xf32>
    %139 = tpu.matmul %125, %138, %cst_109 {dimension_numbers = #tpu.dot_dimension_numbers<[1], [0], [0], [1], [0, 0, 1, 1], [], []>} : vector<60x16xf32>, vector<16x16xf32>, vector<60x16xf32> -> vector<60x16xf32>
    %cst_110 = arith.constant dense<0.000000e+00> : vector<128x16xf32>
    %140 = tpu.matmul %137, %139, %cst_110 {dimension_numbers = #tpu.dot_dimension_numbers<[1], [0], [0], [1], [0, 0, 1, 1], [], []>} : vector<128x60xf32>, vector<60x16xf32>, vector<128x16xf32> -> vector<128x16xf32>
    %141 = arith.addf %136, %140 : vector<128x16xf32>
    %c384_111 = arith.constant 384 : index
    %c0_112 = arith.constant 0 : index
    %142 = vector.load %arg1[%c384_111, %c0_112] : memref<2056x128xf32, #tpu.memory_space<vmem>>, vector<128x60xf32>
    %c1616_113 = arith.constant 1616 : index
    %c0_114 = arith.constant 0 : index
    %143 = vector.load %arg1[%c1616_113, %c0_114] : memref<2056x128xf32, #tpu.memory_space<vmem>>, vector<16x16xf32>
    %cst_115 = arith.constant dense<0.000000e+00> : vector<60x16xf32>
    %144 = tpu.matmul %125, %143, %cst_115 {dimension_numbers = #tpu.dot_dimension_numbers<[1], [0], [0], [1], [0, 0, 1, 1], [], []>} : vector<60x16xf32>, vector<16x16xf32>, vector<60x16xf32> -> vector<60x16xf32>
    %cst_116 = arith.constant dense<0.000000e+00> : vector<128x16xf32>
    %145 = tpu.matmul %142, %144, %cst_116 {dimension_numbers = #tpu.dot_dimension_numbers<[1], [0], [0], [1], [0, 0, 1, 1], [], []>} : vector<128x60xf32>, vector<60x16xf32>, vector<128x16xf32> -> vector<128x16xf32>
    %146 = arith.addf %141, %145 : vector<128x16xf32>
    %c512_117 = arith.constant 512 : index
    %c0_118 = arith.constant 0 : index
    %147 = vector.load %arg1[%c512_117, %c0_118] : memref<2056x128xf32, #tpu.memory_space<vmem>>, vector<128x60xf32>
    %c1632_119 = arith.constant 1632 : index
    %c0_120 = arith.constant 0 : index
    %148 = vector.load %arg1[%c1632_119, %c0_120] : memref<2056x128xf32, #tpu.memory_space<vmem>>, vector<16x16xf32>
    %cst_121 = arith.constant dense<0.000000e+00> : vector<60x16xf32>
    %149 = tpu.matmul %125, %148, %cst_121 {dimension_numbers = #tpu.dot_dimension_numbers<[1], [0], [0], [1], [0, 0, 1, 1], [], []>} : vector<60x16xf32>, vector<16x16xf32>, vector<60x16xf32> -> vector<60x16xf32>
    %cst_122 = arith.constant dense<0.000000e+00> : vector<128x16xf32>
    %150 = tpu.matmul %147, %149, %cst_122 {dimension_numbers = #tpu.dot_dimension_numbers<[1], [0], [0], [1], [0, 0, 1, 1], [], []>} : vector<128x60xf32>, vector<60x16xf32>, vector<128x16xf32> -> vector<128x16xf32>
    %151 = arith.addf %146, %150 : vector<128x16xf32>
    %c640_123 = arith.constant 640 : index
    %c0_124 = arith.constant 0 : index
    %152 = vector.load %arg1[%c640_123, %c0_124] : memref<2056x128xf32, #tpu.memory_space<vmem>>, vector<128x60xf32>
    %c1648_125 = arith.constant 1648 : index
    %c0_126 = arith.constant 0 : index
    %153 = vector.load %arg1[%c1648_125, %c0_126] : memref<2056x128xf32, #tpu.memory_space<vmem>>, vector<16x16xf32>
    %cst_127 = arith.constant dense<0.000000e+00> : vector<60x16xf32>
    %154 = tpu.matmul %125, %153, %cst_127 {dimension_numbers = #tpu.dot_dimension_numbers<[1], [0], [0], [1], [0, 0, 1, 1], [], []>} : vector<60x16xf32>, vector<16x16xf32>, vector<60x16xf32> -> vector<60x16xf32>
    %cst_128 = arith.constant dense<0.000000e+00> : vector<128x16xf32>
    %155 = tpu.matmul %152, %154, %cst_128 {dimension_numbers = #tpu.dot_dimension_numbers<[1], [0], [0], [1], [0, 0, 1, 1], [], []>} : vector<128x60xf32>, vector<60x16xf32>, vector<128x16xf32> -> vector<128x16xf32>
    %156 = arith.addf %151, %155 : vector<128x16xf32>
    %c768_129 = arith.constant 768 : index
    %c0_130 = arith.constant 0 : index
    %157 = vector.load %arg1[%c768_129, %c0_130] : memref<2056x128xf32, #tpu.memory_space<vmem>>, vector<128x60xf32>
    %c1664_131 = arith.constant 1664 : index
    %c0_132 = arith.constant 0 : index
    %158 = vector.load %arg1[%c1664_131, %c0_132] : memref<2056x128xf32, #tpu.memory_space<vmem>>, vector<16x16xf32>
    %cst_133 = arith.constant dense<0.000000e+00> : vector<60x16xf32>
    %159 = tpu.matmul %125, %158, %cst_133 {dimension_numbers = #tpu.dot_dimension_numbers<[1], [0], [0], [1], [0, 0, 1, 1], [], []>} : vector<60x16xf32>, vector<16x16xf32>, vector<60x16xf32> -> vector<60x16xf32>
    %cst_134 = arith.constant dense<0.000000e+00> : vector<128x16xf32>
    %160 = tpu.matmul %157, %159, %cst_134 {dimension_numbers = #tpu.dot_dimension_numbers<[1], [0], [0], [1], [0, 0, 1, 1], [], []>} : vector<128x60xf32>, vector<60x16xf32>, vector<128x16xf32> -> vector<128x16xf32>
    %161 = arith.addf %156, %160 : vector<128x16xf32>
    %c896_135 = arith.constant 896 : index
    %c0_136 = arith.constant 0 : index
    %162 = vector.load %arg1[%c896_135, %c0_136] : memref<2056x128xf32, #tpu.memory_space<vmem>>, vector<128x60xf32>
    %c1680_137 = arith.constant 1680 : index
    %c0_138 = arith.constant 0 : index
    %163 = vector.load %arg1[%c1680_137, %c0_138] : memref<2056x128xf32, #tpu.memory_space<vmem>>, vector<16x16xf32>
    %cst_139 = arith.constant dense<0.000000e+00> : vector<60x16xf32>
    %164 = tpu.matmul %125, %163, %cst_139 {dimension_numbers = #tpu.dot_dimension_numbers<[1], [0], [0], [1], [0, 0, 1, 1], [], []>} : vector<60x16xf32>, vector<16x16xf32>, vector<60x16xf32> -> vector<60x16xf32>
    %cst_140 = arith.constant dense<0.000000e+00> : vector<128x16xf32>
    %165 = tpu.matmul %162, %164, %cst_140 {dimension_numbers = #tpu.dot_dimension_numbers<[1], [0], [0], [1], [0, 0, 1, 1], [], []>} : vector<128x60xf32>, vector<60x16xf32>, vector<128x16xf32> -> vector<128x16xf32>
    %166 = arith.addf %161, %165 : vector<128x16xf32>
    %c1024_141 = arith.constant 1024 : index
    %c0_142 = arith.constant 0 : index
    %167 = vector.load %arg1[%c1024_141, %c0_142] : memref<2056x128xf32, #tpu.memory_space<vmem>>, vector<128x60xf32>
    %c1696_143 = arith.constant 1696 : index
    %c0_144 = arith.constant 0 : index
    %168 = vector.load %arg1[%c1696_143, %c0_144] : memref<2056x128xf32, #tpu.memory_space<vmem>>, vector<16x16xf32>
    %cst_145 = arith.constant dense<0.000000e+00> : vector<60x16xf32>
    %169 = tpu.matmul %125, %168, %cst_145 {dimension_numbers = #tpu.dot_dimension_numbers<[1], [0], [0], [1], [0, 0, 1, 1], [], []>} : vector<60x16xf32>, vector<16x16xf32>, vector<60x16xf32> -> vector<60x16xf32>
    %cst_146 = arith.constant dense<0.000000e+00> : vector<128x16xf32>
    %170 = tpu.matmul %167, %169, %cst_146 {dimension_numbers = #tpu.dot_dimension_numbers<[1], [0], [0], [1], [0, 0, 1, 1], [], []>} : vector<128x60xf32>, vector<60x16xf32>, vector<128x16xf32> -> vector<128x16xf32>
    %171 = arith.addf %166, %170 : vector<128x16xf32>
    %172 = vector.broadcast %1 : vector<1x16xf32> to vector<128x16xf32>
    %173 = arith.addf %171, %172 : vector<128x16xf32>
    %cst_147 = arith.constant 0.000000e+00 : f32
    %174 = vector.broadcast %cst_147 : f32 to vector<128x16xf32>
    %175 = arith.maximumf %173, %174 : vector<128x16xf32>
    %c1152_148 = arith.constant 1152 : index
    %c0_149 = arith.constant 0 : index
    %176 = vector.load %arg1[%c1152_148, %c0_149] : memref<2056x128xf32, #tpu.memory_space<vmem>>, vector<32x128xf32>
    %cst_150 = arith.constant dense<0.000000e+00> : vector<32x16xf32>
    %177 = tpu.matmul %176, %175, %cst_150 {dimension_numbers = #tpu.dot_dimension_numbers<[1], [0], [0], [1], [0, 0, 1, 1], [], []>} : vector<32x128xf32>, vector<128x16xf32>, vector<32x16xf32> -> vector<32x16xf32>
    %c1184_151 = arith.constant 1184 : index
    %c0_152 = arith.constant 0 : index
    %178 = vector.load %arg1[%c1184_151, %c0_152] : memref<2056x128xf32, #tpu.memory_space<vmem>>, vector<32x128xf32>
    %cst_153 = arith.constant dense<0.000000e+00> : vector<32x16xf32>
    %179 = tpu.matmul %178, %175, %cst_153 {dimension_numbers = #tpu.dot_dimension_numbers<[1], [0], [0], [1], [0, 0, 1, 1], [], []>} : vector<32x128xf32>, vector<128x16xf32>, vector<32x16xf32> -> vector<32x16xf32>
    %180 = arith.maximumf %177, %179 : vector<32x16xf32>
    %c1216_154 = arith.constant 1216 : index
    %c0_155 = arith.constant 0 : index
    %181 = vector.load %arg1[%c1216_154, %c0_155] : memref<2056x128xf32, #tpu.memory_space<vmem>>, vector<32x128xf32>
    %cst_156 = arith.constant dense<0.000000e+00> : vector<32x16xf32>
    %182 = tpu.matmul %181, %175, %cst_156 {dimension_numbers = #tpu.dot_dimension_numbers<[1], [0], [0], [1], [0, 0, 1, 1], [], []>} : vector<32x128xf32>, vector<128x16xf32>, vector<32x16xf32> -> vector<32x16xf32>
    %183 = arith.maximumf %180, %182 : vector<32x16xf32>
    %c1248_157 = arith.constant 1248 : index
    %c0_158 = arith.constant 0 : index
    %184 = vector.load %arg1[%c1248_157, %c0_158] : memref<2056x128xf32, #tpu.memory_space<vmem>>, vector<32x128xf32>
    %cst_159 = arith.constant dense<0.000000e+00> : vector<32x16xf32>
    %185 = tpu.matmul %184, %175, %cst_159 {dimension_numbers = #tpu.dot_dimension_numbers<[1], [0], [0], [1], [0, 0, 1, 1], [], []>} : vector<32x128xf32>, vector<128x16xf32>, vector<32x16xf32> -> vector<32x16xf32>
    %186 = arith.maximumf %183, %185 : vector<32x16xf32>
    %cst_160 = arith.constant 0.000000e+00 : f32
    %187 = vector.broadcast %cst_160 : f32 to vector<32x32xf32>
    %c1280_161 = arith.constant 1280 : index
    %c0_162 = arith.constant 0 : index
    %188 = vector.load %arg1[%c1280_161, %c0_162] : memref<2056x128xf32, #tpu.memory_space<vmem>>, vector<32x32xf32>
    %c1712_163 = arith.constant 1712 : index
    %c0_164 = arith.constant 0 : index
    %189 = vector.load %arg1[%c1712_163, %c0_164] : memref<2056x128xf32, #tpu.memory_space<vmem>>, vector<16x32xf32>
    %cst_165 = arith.constant dense<0.000000e+00> : vector<32x32xf32>
    %190 = tpu.matmul %186, %189, %cst_165 {dimension_numbers = #tpu.dot_dimension_numbers<[1], [0], [0], [1], [0, 0, 1, 1], [], []>} : vector<32x16xf32>, vector<16x32xf32>, vector<32x32xf32> -> vector<32x32xf32>
    %cst_166 = arith.constant dense<0.000000e+00> : vector<32x32xf32>
    %191 = tpu.matmul %188, %190, %cst_166 {dimension_numbers = #tpu.dot_dimension_numbers<[1], [0], [0], [1], [0, 0, 1, 1], [], []>} : vector<32x32xf32>, vector<32x32xf32>, vector<32x32xf32> -> vector<32x32xf32>
    %192 = arith.addf %187, %191 : vector<32x32xf32>
    %c1312_167 = arith.constant 1312 : index
    %c0_168 = arith.constant 0 : index
    %193 = vector.load %arg1[%c1312_167, %c0_168] : memref<2056x128xf32, #tpu.memory_space<vmem>>, vector<32x32xf32>
    %c1728_169 = arith.constant 1728 : index
    %c0_170 = arith.constant 0 : index
    %194 = vector.load %arg1[%c1728_169, %c0_170] : memref<2056x128xf32, #tpu.memory_space<vmem>>, vector<16x32xf32>
    %cst_171 = arith.constant dense<0.000000e+00> : vector<32x32xf32>
    %195 = tpu.matmul %186, %194, %cst_171 {dimension_numbers = #tpu.dot_dimension_numbers<[1], [0], [0], [1], [0, 0, 1, 1], [], []>} : vector<32x16xf32>, vector<16x32xf32>, vector<32x32xf32> -> vector<32x32xf32>
    %cst_172 = arith.constant dense<0.000000e+00> : vector<32x32xf32>
    %196 = tpu.matmul %193, %195, %cst_172 {dimension_numbers = #tpu.dot_dimension_numbers<[1], [0], [0], [1], [0, 0, 1, 1], [], []>} : vector<32x32xf32>, vector<32x32xf32>, vector<32x32xf32> -> vector<32x32xf32>
    %197 = arith.addf %192, %196 : vector<32x32xf32>
    %c1344_173 = arith.constant 1344 : index
    %c0_174 = arith.constant 0 : index
    %198 = vector.load %arg1[%c1344_173, %c0_174] : memref<2056x128xf32, #tpu.memory_space<vmem>>, vector<32x32xf32>
    %c1744_175 = arith.constant 1744 : index
    %c0_176 = arith.constant 0 : index
    %199 = vector.load %arg1[%c1744_175, %c0_176] : memref<2056x128xf32, #tpu.memory_space<vmem>>, vector<16x32xf32>
    %cst_177 = arith.constant dense<0.000000e+00> : vector<32x32xf32>
    %200 = tpu.matmul %186, %199, %cst_177 {dimension_numbers = #tpu.dot_dimension_numbers<[1], [0], [0], [1], [0, 0, 1, 1], [], []>} : vector<32x16xf32>, vector<16x32xf32>, vector<32x32xf32> -> vector<32x32xf32>
    %cst_178 = arith.constant dense<0.000000e+00> : vector<32x32xf32>
    %201 = tpu.matmul %198, %200, %cst_178 {dimension_numbers = #tpu.dot_dimension_numbers<[1], [0], [0], [1], [0, 0, 1, 1], [], []>} : vector<32x32xf32>, vector<32x32xf32>, vector<32x32xf32> -> vector<32x32xf32>
    %202 = arith.addf %197, %201 : vector<32x32xf32>
    %c1376_179 = arith.constant 1376 : index
    %c0_180 = arith.constant 0 : index
    %203 = vector.load %arg1[%c1376_179, %c0_180] : memref<2056x128xf32, #tpu.memory_space<vmem>>, vector<32x32xf32>
    %c1760_181 = arith.constant 1760 : index
    %c0_182 = arith.constant 0 : index
    %204 = vector.load %arg1[%c1760_181, %c0_182] : memref<2056x128xf32, #tpu.memory_space<vmem>>, vector<16x32xf32>
    %cst_183 = arith.constant dense<0.000000e+00> : vector<32x32xf32>
    %205 = tpu.matmul %186, %204, %cst_183 {dimension_numbers = #tpu.dot_dimension_numbers<[1], [0], [0], [1], [0, 0, 1, 1], [], []>} : vector<32x16xf32>, vector<16x32xf32>, vector<32x32xf32> -> vector<32x32xf32>
    %cst_184 = arith.constant dense<0.000000e+00> : vector<32x32xf32>
    %206 = tpu.matmul %203, %205, %cst_184 {dimension_numbers = #tpu.dot_dimension_numbers<[1], [0], [0], [1], [0, 0, 1, 1], [], []>} : vector<32x32xf32>, vector<32x32xf32>, vector<32x32xf32> -> vector<32x32xf32>
    %207 = arith.addf %202, %206 : vector<32x32xf32>
    %c1408_185 = arith.constant 1408 : index
    %c0_186 = arith.constant 0 : index
    %208 = vector.load %arg1[%c1408_185, %c0_186] : memref<2056x128xf32, #tpu.memory_space<vmem>>, vector<32x32xf32>
    %c1776_187 = arith.constant 1776 : index
    %c0_188 = arith.constant 0 : index
    %209 = vector.load %arg1[%c1776_187, %c0_188] : memref<2056x128xf32, #tpu.memory_space<vmem>>, vector<16x32xf32>
    %cst_189 = arith.constant dense<0.000000e+00> : vector<32x32xf32>
    %210 = tpu.matmul %186, %209, %cst_189 {dimension_numbers = #tpu.dot_dimension_numbers<[1], [0], [0], [1], [0, 0, 1, 1], [], []>} : vector<32x16xf32>, vector<16x32xf32>, vector<32x32xf32> -> vector<32x32xf32>
    %cst_190 = arith.constant dense<0.000000e+00> : vector<32x32xf32>
    %211 = tpu.matmul %208, %210, %cst_190 {dimension_numbers = #tpu.dot_dimension_numbers<[1], [0], [0], [1], [0, 0, 1, 1], [], []>} : vector<32x32xf32>, vector<32x32xf32>, vector<32x32xf32> -> vector<32x32xf32>
    %212 = arith.addf %207, %211 : vector<32x32xf32>
    %c1440_191 = arith.constant 1440 : index
    %c0_192 = arith.constant 0 : index
    %213 = vector.load %arg1[%c1440_191, %c0_192] : memref<2056x128xf32, #tpu.memory_space<vmem>>, vector<32x32xf32>
    %c1792_193 = arith.constant 1792 : index
    %c0_194 = arith.constant 0 : index
    %214 = vector.load %arg1[%c1792_193, %c0_194] : memref<2056x128xf32, #tpu.memory_space<vmem>>, vector<16x32xf32>
    %cst_195 = arith.constant dense<0.000000e+00> : vector<32x32xf32>
    %215 = tpu.matmul %186, %214, %cst_195 {dimension_numbers = #tpu.dot_dimension_numbers<[1], [0], [0], [1], [0, 0, 1, 1], [], []>} : vector<32x16xf32>, vector<16x32xf32>, vector<32x32xf32> -> vector<32x32xf32>
    %cst_196 = arith.constant dense<0.000000e+00> : vector<32x32xf32>
    %216 = tpu.matmul %213, %215, %cst_196 {dimension_numbers = #tpu.dot_dimension_numbers<[1], [0], [0], [1], [0, 0, 1, 1], [], []>} : vector<32x32xf32>, vector<32x32xf32>, vector<32x32xf32> -> vector<32x32xf32>
    %217 = arith.addf %212, %216 : vector<32x32xf32>
    %c1472_197 = arith.constant 1472 : index
    %c0_198 = arith.constant 0 : index
    %218 = vector.load %arg1[%c1472_197, %c0_198] : memref<2056x128xf32, #tpu.memory_space<vmem>>, vector<32x32xf32>
    %c1808_199 = arith.constant 1808 : index
    %c0_200 = arith.constant 0 : index
    %219 = vector.load %arg1[%c1808_199, %c0_200] : memref<2056x128xf32, #tpu.memory_space<vmem>>, vector<16x32xf32>
    %cst_201 = arith.constant dense<0.000000e+00> : vector<32x32xf32>
    %220 = tpu.matmul %186, %219, %cst_201 {dimension_numbers = #tpu.dot_dimension_numbers<[1], [0], [0], [1], [0, 0, 1, 1], [], []>} : vector<32x16xf32>, vector<16x32xf32>, vector<32x32xf32> -> vector<32x32xf32>
    %cst_202 = arith.constant dense<0.000000e+00> : vector<32x32xf32>
    %221 = tpu.matmul %218, %220, %cst_202 {dimension_numbers = #tpu.dot_dimension_numbers<[1], [0], [0], [1], [0, 0, 1, 1], [], []>} : vector<32x32xf32>, vector<32x32xf32>, vector<32x32xf32> -> vector<32x32xf32>
    %222 = arith.addf %217, %221 : vector<32x32xf32>
    %c1504_203 = arith.constant 1504 : index
    %c0_204 = arith.constant 0 : index
    %223 = vector.load %arg1[%c1504_203, %c0_204] : memref<2056x128xf32, #tpu.memory_space<vmem>>, vector<32x32xf32>
    %c1824_205 = arith.constant 1824 : index
    %c0_206 = arith.constant 0 : index
    %224 = vector.load %arg1[%c1824_205, %c0_206] : memref<2056x128xf32, #tpu.memory_space<vmem>>, vector<16x32xf32>
    %cst_207 = arith.constant dense<0.000000e+00> : vector<32x32xf32>
    %225 = tpu.matmul %186, %224, %cst_207 {dimension_numbers = #tpu.dot_dimension_numbers<[1], [0], [0], [1], [0, 0, 1, 1], [], []>} : vector<32x16xf32>, vector<16x32xf32>, vector<32x32xf32> -> vector<32x32xf32>
    %cst_208 = arith.constant dense<0.000000e+00> : vector<32x32xf32>
    %226 = tpu.matmul %223, %225, %cst_208 {dimension_numbers = #tpu.dot_dimension_numbers<[1], [0], [0], [1], [0, 0, 1, 1], [], []>} : vector<32x32xf32>, vector<32x32xf32>, vector<32x32xf32> -> vector<32x32xf32>
    %227 = arith.addf %222, %226 : vector<32x32xf32>
    %c1536_209 = arith.constant 1536 : index
    %c0_210 = arith.constant 0 : index
    %228 = vector.load %arg1[%c1536_209, %c0_210] : memref<2056x128xf32, #tpu.memory_space<vmem>>, vector<32x32xf32>
    %c1840_211 = arith.constant 1840 : index
    %c0_212 = arith.constant 0 : index
    %229 = vector.load %arg1[%c1840_211, %c0_212] : memref<2056x128xf32, #tpu.memory_space<vmem>>, vector<16x32xf32>
    %cst_213 = arith.constant dense<0.000000e+00> : vector<32x32xf32>
    %230 = tpu.matmul %186, %229, %cst_213 {dimension_numbers = #tpu.dot_dimension_numbers<[1], [0], [0], [1], [0, 0, 1, 1], [], []>} : vector<32x16xf32>, vector<16x32xf32>, vector<32x32xf32> -> vector<32x32xf32>
    %cst_214 = arith.constant dense<0.000000e+00> : vector<32x32xf32>
    %231 = tpu.matmul %228, %230, %cst_214 {dimension_numbers = #tpu.dot_dimension_numbers<[1], [0], [0], [1], [0, 0, 1, 1], [], []>} : vector<32x32xf32>, vector<32x32xf32>, vector<32x32xf32> -> vector<32x32xf32>
    %232 = arith.addf %227, %231 : vector<32x32xf32>
    %233 = vector.broadcast %2 : vector<1x32xf32> to vector<32x32xf32>
    %234 = arith.addf %232, %233 : vector<32x32xf32>
    %cst_215 = arith.constant 0.000000e+00 : f32
    %235 = vector.broadcast %cst_215 : f32 to vector<32x32xf32>
    %236 = arith.maximumf %234, %235 : vector<32x32xf32>
    %237 = tpu.concatenate %236, %7 in 1 : vector<32x32xf32>, vector<32x12xf32> -> vector<32x44xf32>
    %cst_216 = arith.constant dense<0.000000e+00> : vector<32x32xf32>
    %238 = tpu.matmul %237, %8, %cst_216 {dimension_numbers = #tpu.dot_dimension_numbers<[1], [0], [0], [1], [0, 0, 1, 1], [], []>} : vector<32x44xf32>, vector<44x32xf32>, vector<32x32xf32> -> vector<32x32xf32>
    %239 = vector.shape_cast %123 : vector<32x32xf32> to vector<1x32x32xf32>
    %240 = vector.shape_cast %238 : vector<32x32xf32> to vector<1x32x32xf32>
    %241 = tpu.concatenate %239, %240 in 0 : vector<1x32x32xf32>, vector<1x32x32xf32> -> vector<2x32x32xf32>
    %c1936 = arith.constant 1936 : index
    %c0_217 = arith.constant 0 : index
    %242 = vector.load %arg1[%c1936, %c0_217] : memref<2056x128xf32, #tpu.memory_space<vmem>>, vector<32x128xf32>
    %c1888 = arith.constant 1888 : index
    %c0_218 = arith.constant 0 : index
    %243 = vector.load %arg1[%c1888, %c0_218] : memref<2056x128xf32, #tpu.memory_space<vmem>>, vector<44x96xf32>
    %c2016 = arith.constant 2016 : index
    %c0_219 = arith.constant 0 : index
    %244 = vector.load %arg1[%c2016, %c0_219] : memref<2056x128xf32, #tpu.memory_space<vmem>>, vector<32x40xf32>
    %245 = tpu.iota {dimensions = array<i32: 1>} : vector<1x40xi32>
    %cst_220 = arith.constant 0.000000e+00 : f32
    %246 = vector.broadcast %cst_220 : f32 to vector<2x32xf32>
    %cst_221 = arith.constant 0.000000e+00 : f32
    %247 = vector.broadcast %cst_221 : f32 to vector<2x1xf32>
    %c0_i32 = arith.constant 0 : i32
    %cst_222 = arith.constant dense<0.000000e+00> : vector<2x128xf32>
    %248 = tpu.matmul %246, %242, %cst_222 {dimension_numbers = #tpu.dot_dimension_numbers<[1], [0], [0], [1], [0, 0, 1, 1], [], []>} : vector<2x32xf32>, vector<32x128xf32>, vector<2x128xf32> -> vector<2x128xf32>
    %249 = vector.broadcast %4 : vector<1x128xf32> to vector<2x128xf32>
    %250 = arith.addf %248, %249 : vector<2x128xf32>
    %251 = vector.extract_strided_slice %250 {offsets = [0, 0], sizes = [2, 32], strides = [1, 1]} : vector<2x128xf32> to vector<2x32xf32>
    %252 = vector.extract_strided_slice %250 {offsets = [0, 32], sizes = [2, 96], strides = [1, 1]} : vector<2x128xf32> to vector<2x96xf32>
    %253 = vector.shape_cast %251 : vector<2x32xf32> to vector<2x1x32xf32>
    %254 = vector.broadcast %253 : vector<2x1x32xf32> to vector<2x32x32xf32>
    %255 = arith.addf %241, %254 : vector<2x32x32xf32>
    %256 = math.tanh %255 : vector<2x32x32xf32>
    %257 = vector.shape_cast %5 : vector<1x32xf32> to vector<1x1x32xf32>
    %258 = vector.broadcast %257 : vector<1x1x32xf32> to vector<2x32x32xf32>
    %259 = arith.mulf %256, %258 : vector<2x32x32xf32>
    %cst_223 = arith.constant dense<0.000000e+00> : vector<2x32xf32>
    %260 = vector.multi_reduction <add>, %259, %cst_223 [2] : vector<2x32x32xf32> to vector<2x32xf32>
    %cst_224 = arith.constant dense<0xFF800000> : vector<2xf32>
    %261 = vector.multi_reduction <maximumf>, %260, %cst_224 [1] : vector<2x32xf32> to vector<2xf32>
    %262 = vector.shape_cast %261 : vector<2xf32> to vector<2x1xf32>
    %263 = vector.broadcast %262 : vector<2x1xf32> to vector<2x32xf32>
    %264 = arith.subf %260, %263 : vector<2x32xf32>
    %265 = math.exp %264 : vector<2x32xf32>
    %cst_225 = arith.constant dense<0.000000e+00> : vector<2xf32>
    %266 = vector.multi_reduction <add>, %265, %cst_225 [1] : vector<2x32xf32> to vector<2xf32>
    %267 = vector.shape_cast %266 : vector<2xf32> to vector<2x1xf32>
    %268 = vector.broadcast %267 : vector<2x1xf32> to vector<2x32xf32>
    %269 = arith.divf %265, %268 : vector<2x32xf32>
    %270 = vector.extract_strided_slice %269 {offsets = [0, 0], sizes = [1, 32], strides = [1, 1]} : vector<2x32xf32> to vector<1x32xf32>
    %cst_226 = arith.constant dense<0.000000e+00> : vector<1x44xf32>
    %271 = tpu.matmul %270, %122, %cst_226 {dimension_numbers = #tpu.dot_dimension_numbers<[1], [0], [0], [1], [0, 0, 1, 1], [], []>} : vector<1x32xf32>, vector<32x44xf32>, vector<1x44xf32> -> vector<1x44xf32>
    %272 = vector.extract_strided_slice %269 {offsets = [1, 0], sizes = [1, 32], strides = [1, 1]} : vector<2x32xf32> to vector<1x32xf32>
    %cst_227 = arith.constant dense<0.000000e+00> : vector<1x44xf32>
    %273 = tpu.matmul %272, %237, %cst_227 {dimension_numbers = #tpu.dot_dimension_numbers<[1], [0], [0], [1], [0, 0, 1, 1], [], []>} : vector<1x32xf32>, vector<32x44xf32>, vector<1x44xf32> -> vector<1x44xf32>
    %274 = tpu.concatenate %271, %273 in 0 : vector<1x44xf32>, vector<1x44xf32> -> vector<2x44xf32>
    %275 = arith.index_cast %c0_i32 : i32 to index
    %c0_228 = arith.constant 0 : index
    %276 = memref.load %arg3[%275, %c0_228] : memref<8x2xi32, #tpu.memory_space<smem>>
    %277 = arith.index_cast %276 : i32 to index
    %c0_229 = arith.constant 0 : index
    %c0_230 = arith.constant 0 : index
    %278 = vector.load %arg2[%277, %c0_229, %c0_230] : memref<40x1x96xf32, #tpu.memory_space<vmem>>, vector<1x1x96xf32>
    %279 = vector.shape_cast %278 : vector<1x1x96xf32> to vector<1x96xf32>
    %280 = arith.index_cast %c0_i32 : i32 to index
    %c1_231 = arith.constant 1 : index
    %281 = memref.load %arg3[%280, %c1_231] : memref<8x2xi32, #tpu.memory_space<smem>>
    %282 = arith.index_cast %281 : i32 to index
    %c0_232 = arith.constant 0 : index
    %c0_233 = arith.constant 0 : index
    %283 = vector.load %arg2[%282, %c0_232, %c0_233] : memref<40x1x96xf32, #tpu.memory_space<vmem>>, vector<1x1x96xf32>
    %284 = vector.shape_cast %283 : vector<1x1x96xf32> to vector<1x96xf32>
    %285 = tpu.concatenate %279, %284 in 0 : vector<1x96xf32>, vector<1x96xf32> -> vector<2x96xf32>
    %286 = vector.broadcast %3 : vector<1x96xf32> to vector<2x96xf32>
    %287 = arith.addf %285, %286 : vector<2x96xf32>
    %cst_234 = arith.constant dense<0.000000e+00> : vector<2x96xf32>
    %288 = tpu.matmul %274, %243, %cst_234 {dimension_numbers = #tpu.dot_dimension_numbers<[1], [0], [0], [1], [0, 0, 1, 1], [], []>} : vector<2x44xf32>, vector<44x96xf32>, vector<2x96xf32> -> vector<2x96xf32>
    %289 = arith.addf %287, %288 : vector<2x96xf32>
    %290 = vector.extract_strided_slice %289 {offsets = [0, 0], sizes = [2, 32], strides = [1, 1]} : vector<2x96xf32> to vector<2x32xf32>
    %291 = vector.extract_strided_slice %252 {offsets = [0, 0], sizes = [2, 32], strides = [1, 1]} : vector<2x96xf32> to vector<2x32xf32>
    %292 = arith.addf %290, %291 : vector<2x32xf32>
    %293 = arith.negf %292 : vector<2x32xf32>
    %294 = math.exp %293 : vector<2x32xf32>
    %cst_235 = arith.constant 1.000000e+00 : f32
    %295 = vector.broadcast %cst_235 : f32 to vector<2x32xf32>
    %296 = arith.addf %295, %294 : vector<2x32xf32>
    %297 = arith.divf %295, %296 : vector<2x32xf32>
    %298 = vector.extract_strided_slice %289 {offsets = [0, 32], sizes = [2, 32], strides = [1, 1]} : vector<2x96xf32> to vector<2x32xf32>
    %299 = vector.extract_strided_slice %252 {offsets = [0, 32], sizes = [2, 32], strides = [1, 1]} : vector<2x96xf32> to vector<2x32xf32>
    %300 = arith.addf %298, %299 : vector<2x32xf32>
    %301 = arith.negf %300 : vector<2x32xf32>
    %302 = math.exp %301 : vector<2x32xf32>
    %cst_236 = arith.constant 1.000000e+00 : f32
    %303 = vector.broadcast %cst_236 : f32 to vector<2x32xf32>
    %304 = arith.addf %303, %302 : vector<2x32xf32>
    %305 = arith.divf %303, %304 : vector<2x32xf32>
    %306 = vector.extract_strided_slice %289 {offsets = [0, 64], sizes = [2, 32], strides = [1, 1]} : vector<2x96xf32> to vector<2x32xf32>
    %307 = vector.extract_strided_slice %252 {offsets = [0, 64], sizes = [2, 32], strides = [1, 1]} : vector<2x96xf32> to vector<2x32xf32>
    %308 = arith.mulf %297, %307 : vector<2x32xf32>
    %309 = arith.addf %306, %308 : vector<2x32xf32>
    %310 = math.tanh %309 : vector<2x32xf32>
    %cst_237 = arith.constant 1.000000e+00 : f32
    %311 = vector.broadcast %cst_237 : f32 to vector<2x32xf32>
    %312 = arith.subf %311, %305 : vector<2x32xf32>
    %313 = arith.mulf %312, %310 : vector<2x32xf32>
    %314 = arith.mulf %305, %246 : vector<2x32xf32>
    %315 = arith.addf %313, %314 : vector<2x32xf32>
    %cst_238 = arith.constant dense<0.000000e+00> : vector<2x40xf32>
    %316 = tpu.matmul %315, %244, %cst_238 {dimension_numbers = #tpu.dot_dimension_numbers<[1], [0], [0], [1], [0, 0, 1, 1], [], []>} : vector<2x32xf32>, vector<32x40xf32>, vector<2x40xf32> -> vector<2x40xf32>
    %317 = vector.broadcast %6 : vector<1x40xf32> to vector<2x40xf32>
    %318 = arith.addf %316, %317 : vector<2x40xf32>
    %cst_239 = arith.constant dense<0xFF800000> : vector<2xf32>
    %319 = vector.multi_reduction <maximumf>, %318, %cst_239 [1] : vector<2x40xf32> to vector<2xf32>
    %320 = vector.shape_cast %319 : vector<2xf32> to vector<2x1xf32>
    %321 = vector.broadcast %320 : vector<2x1xf32> to vector<2x40xf32>
    %322 = arith.subf %318, %321 : vector<2x40xf32>
    %323 = math.exp %322 : vector<2x40xf32>
    %cst_240 = arith.constant dense<0.000000e+00> : vector<2xf32>
    %324 = vector.multi_reduction <add>, %323, %cst_240 [1] : vector<2x40xf32> to vector<2xf32>
    %325 = vector.shape_cast %324 : vector<2xf32> to vector<2x1xf32>
    %326 = math.log %325 : vector<2x1xf32>
    %327 = arith.addf %326, %320 : vector<2x1xf32>
    %328 = vector.broadcast %327 : vector<2x1xf32> to vector<2x40xf32>
    %329 = arith.subf %318, %328 : vector<2x40xf32>
    %330 = arith.index_cast %c0_i32 : i32 to index
    %c0_241 = arith.constant 0 : index
    %331 = memref.load %arg4[%330, %c0_241] : memref<8x2xi32, #tpu.memory_space<smem>>
    %332 = vector.broadcast %331 : i32 to vector<1x40xi32>
    %333 = arith.cmpi eq, %245, %332 : vector<1x40xi32>
    %c0_i32_242 = arith.constant 0 : i32
    %334 = arith.cmpi sge, %331, %c0_i32_242 : i32
    %335 = vector.broadcast %334 : i1 to vector<1x40xi1>
    %336 = arith.andi %333, %335 : vector<1x40xi1>
    %337 = vector.extract_strided_slice %329 {offsets = [0, 0], sizes = [1, 40], strides = [1, 1]} : vector<2x40xf32> to vector<1x40xf32>
    %cst_243 = arith.constant 0.000000e+00 : f32
    %338 = vector.broadcast %cst_243 : f32 to vector<1x40xf32>
    %339 = arith.select %336, %337, %338 : vector<1x40xi1>, vector<1x40xf32>
    %cst_244 = arith.constant dense<0.000000e+00> : vector<1xf32>
    %340 = vector.multi_reduction <add>, %339, %cst_244 [1] : vector<1x40xf32> to vector<1xf32>
    %341 = vector.shape_cast %340 : vector<1xf32> to vector<1x1xf32>
    %cst_245 = arith.constant 0.000000e+00 : f32
    %342 = vector.broadcast %cst_245 : f32 to vector<1x1xf32>
    %343 = arith.subf %342, %341 : vector<1x1xf32>
    %344 = arith.index_cast %c0_i32 : i32 to index
    %c1_246 = arith.constant 1 : index
    %345 = memref.load %arg4[%344, %c1_246] : memref<8x2xi32, #tpu.memory_space<smem>>
    %346 = vector.broadcast %345 : i32 to vector<1x40xi32>
    %347 = arith.cmpi eq, %245, %346 : vector<1x40xi32>
    %c0_i32_247 = arith.constant 0 : i32
    %348 = arith.cmpi sge, %345, %c0_i32_247 : i32
    %349 = vector.broadcast %348 : i1 to vector<1x40xi1>
    %350 = arith.andi %347, %349 : vector<1x40xi1>
    %351 = vector.extract_strided_slice %329 {offsets = [1, 0], sizes = [1, 40], strides = [1, 1]} : vector<2x40xf32> to vector<1x40xf32>
    %cst_248 = arith.constant 0.000000e+00 : f32
    %352 = vector.broadcast %cst_248 : f32 to vector<1x40xf32>
    %353 = arith.select %350, %351, %352 : vector<1x40xi1>, vector<1x40xf32>
    %cst_249 = arith.constant dense<0.000000e+00> : vector<1xf32>
    %354 = vector.multi_reduction <add>, %353, %cst_249 [1] : vector<1x40xf32> to vector<1xf32>
    %355 = vector.shape_cast %354 : vector<1xf32> to vector<1x1xf32>
    %cst_250 = arith.constant 0.000000e+00 : f32
    %356 = vector.broadcast %cst_250 : f32 to vector<1x1xf32>
    %357 = arith.subf %356, %355 : vector<1x1xf32>
    %358 = tpu.concatenate %343, %357 in 0 : vector<1x1xf32>, vector<1x1xf32> -> vector<2x1xf32>
    %359 = arith.addf %247, %358 : vector<2x1xf32>
    %c1_i32 = arith.constant 1 : i32
    %cst_251 = arith.constant dense<0.000000e+00> : vector<2x128xf32>
    %360 = tpu.matmul %315, %242, %cst_251 {dimension_numbers = #tpu.dot_dimension_numbers<[1], [0], [0], [1], [0, 0, 1, 1], [], []>} : vector<2x32xf32>, vector<32x128xf32>, vector<2x128xf32> -> vector<2x128xf32>
    %361 = vector.broadcast %4 : vector<1x128xf32> to vector<2x128xf32>
    %362 = arith.addf %360, %361 : vector<2x128xf32>
    %363 = vector.extract_strided_slice %362 {offsets = [0, 0], sizes = [2, 32], strides = [1, 1]} : vector<2x128xf32> to vector<2x32xf32>
    %364 = vector.extract_strided_slice %362 {offsets = [0, 32], sizes = [2, 96], strides = [1, 1]} : vector<2x128xf32> to vector<2x96xf32>
    %365 = vector.shape_cast %363 : vector<2x32xf32> to vector<2x1x32xf32>
    %366 = vector.broadcast %365 : vector<2x1x32xf32> to vector<2x32x32xf32>
    %367 = arith.addf %241, %366 : vector<2x32x32xf32>
    %368 = math.tanh %367 : vector<2x32x32xf32>
    %369 = vector.shape_cast %5 : vector<1x32xf32> to vector<1x1x32xf32>
    %370 = vector.broadcast %369 : vector<1x1x32xf32> to vector<2x32x32xf32>
    %371 = arith.mulf %368, %370 : vector<2x32x32xf32>
    %cst_252 = arith.constant dense<0.000000e+00> : vector<2x32xf32>
    %372 = vector.multi_reduction <add>, %371, %cst_252 [2] : vector<2x32x32xf32> to vector<2x32xf32>
    %cst_253 = arith.constant dense<0xFF800000> : vector<2xf32>
    %373 = vector.multi_reduction <maximumf>, %372, %cst_253 [1] : vector<2x32xf32> to vector<2xf32>
    %374 = vector.shape_cast %373 : vector<2xf32> to vector<2x1xf32>
    %375 = vector.broadcast %374 : vector<2x1xf32> to vector<2x32xf32>
    %376 = arith.subf %372, %375 : vector<2x32xf32>
    %377 = math.exp %376 : vector<2x32xf32>
    %cst_254 = arith.constant dense<0.000000e+00> : vector<2xf32>
    %378 = vector.multi_reduction <add>, %377, %cst_254 [1] : vector<2x32xf32> to vector<2xf32>
    %379 = vector.shape_cast %378 : vector<2xf32> to vector<2x1xf32>
    %380 = vector.broadcast %379 : vector<2x1xf32> to vector<2x32xf32>
    %381 = arith.divf %377, %380 : vector<2x32xf32>
    %382 = vector.extract_strided_slice %381 {offsets = [0, 0], sizes = [1, 32], strides = [1, 1]} : vector<2x32xf32> to vector<1x32xf32>
    %cst_255 = arith.constant dense<0.000000e+00> : vector<1x44xf32>
    %383 = tpu.matmul %382, %122, %cst_255 {dimension_numbers = #tpu.dot_dimension_numbers<[1], [0], [0], [1], [0, 0, 1, 1], [], []>} : vector<1x32xf32>, vector<32x44xf32>, vector<1x44xf32> -> vector<1x44xf32>
    %384 = vector.extract_strided_slice %381 {offsets = [1, 0], sizes = [1, 32], strides = [1, 1]} : vector<2x32xf32> to vector<1x32xf32>
    %cst_256 = arith.constant dense<0.000000e+00> : vector<1x44xf32>
    %385 = tpu.matmul %384, %237, %cst_256 {dimension_numbers = #tpu.dot_dimension_numbers<[1], [0], [0], [1], [0, 0, 1, 1], [], []>} : vector<1x32xf32>, vector<32x44xf32>, vector<1x44xf32> -> vector<1x44xf32>
    %386 = tpu.concatenate %383, %385 in 0 : vector<1x44xf32>, vector<1x44xf32> -> vector<2x44xf32>
    %387 = arith.index_cast %c1_i32 : i32 to index
    %c0_257 = arith.constant 0 : index
    %388 = memref.load %arg3[%387, %c0_257] : memref<8x2xi32, #tpu.memory_space<smem>>
    %389 = arith.index_cast %388 : i32 to index
    %c0_258 = arith.constant 0 : index
    %c0_259 = arith.constant 0 : index
    %390 = vector.load %arg2[%389, %c0_258, %c0_259] : memref<40x1x96xf32, #tpu.memory_space<vmem>>, vector<1x1x96xf32>
    %391 = vector.shape_cast %390 : vector<1x1x96xf32> to vector<1x96xf32>
    %392 = arith.index_cast %c1_i32 : i32 to index
    %c1_260 = arith.constant 1 : index
    %393 = memref.load %arg3[%392, %c1_260] : memref<8x2xi32, #tpu.memory_space<smem>>
    %394 = arith.index_cast %393 : i32 to index
    %c0_261 = arith.constant 0 : index
    %c0_262 = arith.constant 0 : index
    %395 = vector.load %arg2[%394, %c0_261, %c0_262] : memref<40x1x96xf32, #tpu.memory_space<vmem>>, vector<1x1x96xf32>
    %396 = vector.shape_cast %395 : vector<1x1x96xf32> to vector<1x96xf32>
    %397 = tpu.concatenate %391, %396 in 0 : vector<1x96xf32>, vector<1x96xf32> -> vector<2x96xf32>
    %398 = vector.broadcast %3 : vector<1x96xf32> to vector<2x96xf32>
    %399 = arith.addf %397, %398 : vector<2x96xf32>
    %cst_263 = arith.constant dense<0.000000e+00> : vector<2x96xf32>
    %400 = tpu.matmul %386, %243, %cst_263 {dimension_numbers = #tpu.dot_dimension_numbers<[1], [0], [0], [1], [0, 0, 1, 1], [], []>} : vector<2x44xf32>, vector<44x96xf32>, vector<2x96xf32> -> vector<2x96xf32>
    %401 = arith.addf %399, %400 : vector<2x96xf32>
    %402 = vector.extract_strided_slice %401 {offsets = [0, 0], sizes = [2, 32], strides = [1, 1]} : vector<2x96xf32> to vector<2x32xf32>
    %403 = vector.extract_strided_slice %364 {offsets = [0, 0], sizes = [2, 32], strides = [1, 1]} : vector<2x96xf32> to vector<2x32xf32>
    %404 = arith.addf %402, %403 : vector<2x32xf32>
    %405 = arith.negf %404 : vector<2x32xf32>
    %406 = math.exp %405 : vector<2x32xf32>
    %cst_264 = arith.constant 1.000000e+00 : f32
    %407 = vector.broadcast %cst_264 : f32 to vector<2x32xf32>
    %408 = arith.addf %407, %406 : vector<2x32xf32>
    %409 = arith.divf %407, %408 : vector<2x32xf32>
    %410 = vector.extract_strided_slice %401 {offsets = [0, 32], sizes = [2, 32], strides = [1, 1]} : vector<2x96xf32> to vector<2x32xf32>
    %411 = vector.extract_strided_slice %364 {offsets = [0, 32], sizes = [2, 32], strides = [1, 1]} : vector<2x96xf32> to vector<2x32xf32>
    %412 = arith.addf %410, %411 : vector<2x32xf32>
    %413 = arith.negf %412 : vector<2x32xf32>
    %414 = math.exp %413 : vector<2x32xf32>
    %cst_265 = arith.constant 1.000000e+00 : f32
    %415 = vector.broadcast %cst_265 : f32 to vector<2x32xf32>
    %416 = arith.addf %415, %414 : vector<2x32xf32>
    %417 = arith.divf %415, %416 : vector<2x32xf32>
    %418 = vector.extract_strided_slice %401 {offsets = [0, 64], sizes = [2, 32], strides = [1, 1]} : vector<2x96xf32> to vector<2x32xf32>
    %419 = vector.extract_strided_slice %364 {offsets = [0, 64], sizes = [2, 32], strides = [1, 1]} : vector<2x96xf32> to vector<2x32xf32>
    %420 = arith.mulf %409, %419 : vector<2x32xf32>
    %421 = arith.addf %418, %420 : vector<2x32xf32>
    %422 = math.tanh %421 : vector<2x32xf32>
    %cst_266 = arith.constant 1.000000e+00 : f32
    %423 = vector.broadcast %cst_266 : f32 to vector<2x32xf32>
    %424 = arith.subf %423, %417 : vector<2x32xf32>
    %425 = arith.mulf %424, %422 : vector<2x32xf32>
    %426 = arith.mulf %417, %315 : vector<2x32xf32>
    %427 = arith.addf %425, %426 : vector<2x32xf32>
    %cst_267 = arith.constant dense<0.000000e+00> : vector<2x40xf32>
    %428 = tpu.matmul %427, %244, %cst_267 {dimension_numbers = #tpu.dot_dimension_numbers<[1], [0], [0], [1], [0, 0, 1, 1], [], []>} : vector<2x32xf32>, vector<32x40xf32>, vector<2x40xf32> -> vector<2x40xf32>
    %429 = vector.broadcast %6 : vector<1x40xf32> to vector<2x40xf32>
    %430 = arith.addf %428, %429 : vector<2x40xf32>
    %cst_268 = arith.constant dense<0xFF800000> : vector<2xf32>
    %431 = vector.multi_reduction <maximumf>, %430, %cst_268 [1] : vector<2x40xf32> to vector<2xf32>
    %432 = vector.shape_cast %431 : vector<2xf32> to vector<2x1xf32>
    %433 = vector.broadcast %432 : vector<2x1xf32> to vector<2x40xf32>
    %434 = arith.subf %430, %433 : vector<2x40xf32>
    %435 = math.exp %434 : vector<2x40xf32>
    %cst_269 = arith.constant dense<0.000000e+00> : vector<2xf32>
    %436 = vector.multi_reduction <add>, %435, %cst_269 [1] : vector<2x40xf32> to vector<2xf32>
    %437 = vector.shape_cast %436 : vector<2xf32> to vector<2x1xf32>
    %438 = math.log %437 : vector<2x1xf32>
    %439 = arith.addf %438, %432 : vector<2x1xf32>
    %440 = vector.broadcast %439 : vector<2x1xf32> to vector<2x40xf32>
    %441 = arith.subf %430, %440 : vector<2x40xf32>
    %442 = arith.index_cast %c1_i32 : i32 to index
    %c0_270 = arith.constant 0 : index
    %443 = memref.load %arg4[%442, %c0_270] : memref<8x2xi32, #tpu.memory_space<smem>>
    %444 = vector.broadcast %443 : i32 to vector<1x40xi32>
    %445 = arith.cmpi eq, %245, %444 : vector<1x40xi32>
    %c0_i32_271 = arith.constant 0 : i32
    %446 = arith.cmpi sge, %443, %c0_i32_271 : i32
    %447 = vector.broadcast %446 : i1 to vector<1x40xi1>
    %448 = arith.andi %445, %447 : vector<1x40xi1>
    %449 = vector.extract_strided_slice %441 {offsets = [0, 0], sizes = [1, 40], strides = [1, 1]} : vector<2x40xf32> to vector<1x40xf32>
    %cst_272 = arith.constant 0.000000e+00 : f32
    %450 = vector.broadcast %cst_272 : f32 to vector<1x40xf32>
    %451 = arith.select %448, %449, %450 : vector<1x40xi1>, vector<1x40xf32>
    %cst_273 = arith.constant dense<0.000000e+00> : vector<1xf32>
    %452 = vector.multi_reduction <add>, %451, %cst_273 [1] : vector<1x40xf32> to vector<1xf32>
    %453 = vector.shape_cast %452 : vector<1xf32> to vector<1x1xf32>
    %cst_274 = arith.constant 0.000000e+00 : f32
    %454 = vector.broadcast %cst_274 : f32 to vector<1x1xf32>
    %455 = arith.subf %454, %453 : vector<1x1xf32>
    %456 = arith.index_cast %c1_i32 : i32 to index
    %c1_275 = arith.constant 1 : index
    %457 = memref.load %arg4[%456, %c1_275] : memref<8x2xi32, #tpu.memory_space<smem>>
    %458 = vector.broadcast %457 : i32 to vector<1x40xi32>
    %459 = arith.cmpi eq, %245, %458 : vector<1x40xi32>
    %c0_i32_276 = arith.constant 0 : i32
    %460 = arith.cmpi sge, %457, %c0_i32_276 : i32
    %461 = vector.broadcast %460 : i1 to vector<1x40xi1>
    %462 = arith.andi %459, %461 : vector<1x40xi1>
    %463 = vector.extract_strided_slice %441 {offsets = [1, 0], sizes = [1, 40], strides = [1, 1]} : vector<2x40xf32> to vector<1x40xf32>
    %cst_277 = arith.constant 0.000000e+00 : f32
    %464 = vector.broadcast %cst_277 : f32 to vector<1x40xf32>
    %465 = arith.select %462, %463, %464 : vector<1x40xi1>, vector<1x40xf32>
    %cst_278 = arith.constant dense<0.000000e+00> : vector<1xf32>
    %466 = vector.multi_reduction <add>, %465, %cst_278 [1] : vector<1x40xf32> to vector<1xf32>
    %467 = vector.shape_cast %466 : vector<1xf32> to vector<1x1xf32>
    %cst_279 = arith.constant 0.000000e+00 : f32
    %468 = vector.broadcast %cst_279 : f32 to vector<1x1xf32>
    %469 = arith.subf %468, %467 : vector<1x1xf32>
    %470 = tpu.concatenate %455, %469 in 0 : vector<1x1xf32>, vector<1x1xf32> -> vector<2x1xf32>
    %471 = arith.addf %359, %470 : vector<2x1xf32>
    %c2_i32 = arith.constant 2 : i32
    %cst_280 = arith.constant dense<0.000000e+00> : vector<2x128xf32>
    %472 = tpu.matmul %427, %242, %cst_280 {dimension_numbers = #tpu.dot_dimension_numbers<[1], [0], [0], [1], [0, 0, 1, 1], [], []>} : vector<2x32xf32>, vector<32x128xf32>, vector<2x128xf32> -> vector<2x128xf32>
    %473 = vector.broadcast %4 : vector<1x128xf32> to vector<2x128xf32>
    %474 = arith.addf %472, %473 : vector<2x128xf32>
    %475 = vector.extract_strided_slice %474 {offsets = [0, 0], sizes = [2, 32], strides = [1, 1]} : vector<2x128xf32> to vector<2x32xf32>
    %476 = vector.extract_strided_slice %474 {offsets = [0, 32], sizes = [2, 96], strides = [1, 1]} : vector<2x128xf32> to vector<2x96xf32>
    %477 = vector.shape_cast %475 : vector<2x32xf32> to vector<2x1x32xf32>
    %478 = vector.broadcast %477 : vector<2x1x32xf32> to vector<2x32x32xf32>
    %479 = arith.addf %241, %478 : vector<2x32x32xf32>
    %480 = math.tanh %479 : vector<2x32x32xf32>
    %481 = vector.shape_cast %5 : vector<1x32xf32> to vector<1x1x32xf32>
    %482 = vector.broadcast %481 : vector<1x1x32xf32> to vector<2x32x32xf32>
    %483 = arith.mulf %480, %482 : vector<2x32x32xf32>
    %cst_281 = arith.constant dense<0.000000e+00> : vector<2x32xf32>
    %484 = vector.multi_reduction <add>, %483, %cst_281 [2] : vector<2x32x32xf32> to vector<2x32xf32>
    %cst_282 = arith.constant dense<0xFF800000> : vector<2xf32>
    %485 = vector.multi_reduction <maximumf>, %484, %cst_282 [1] : vector<2x32xf32> to vector<2xf32>
    %486 = vector.shape_cast %485 : vector<2xf32> to vector<2x1xf32>
    %487 = vector.broadcast %486 : vector<2x1xf32> to vector<2x32xf32>
    %488 = arith.subf %484, %487 : vector<2x32xf32>
    %489 = math.exp %488 : vector<2x32xf32>
    %cst_283 = arith.constant dense<0.000000e+00> : vector<2xf32>
    %490 = vector.multi_reduction <add>, %489, %cst_283 [1] : vector<2x32xf32> to vector<2xf32>
    %491 = vector.shape_cast %490 : vector<2xf32> to vector<2x1xf32>
    %492 = vector.broadcast %491 : vector<2x1xf32> to vector<2x32xf32>
    %493 = arith.divf %489, %492 : vector<2x32xf32>
    %494 = vector.extract_strided_slice %493 {offsets = [0, 0], sizes = [1, 32], strides = [1, 1]} : vector<2x32xf32> to vector<1x32xf32>
    %cst_284 = arith.constant dense<0.000000e+00> : vector<1x44xf32>
    %495 = tpu.matmul %494, %122, %cst_284 {dimension_numbers = #tpu.dot_dimension_numbers<[1], [0], [0], [1], [0, 0, 1, 1], [], []>} : vector<1x32xf32>, vector<32x44xf32>, vector<1x44xf32> -> vector<1x44xf32>
    %496 = vector.extract_strided_slice %493 {offsets = [1, 0], sizes = [1, 32], strides = [1, 1]} : vector<2x32xf32> to vector<1x32xf32>
    %cst_285 = arith.constant dense<0.000000e+00> : vector<1x44xf32>
    %497 = tpu.matmul %496, %237, %cst_285 {dimension_numbers = #tpu.dot_dimension_numbers<[1], [0], [0], [1], [0, 0, 1, 1], [], []>} : vector<1x32xf32>, vector<32x44xf32>, vector<1x44xf32> -> vector<1x44xf32>
    %498 = tpu.concatenate %495, %497 in 0 : vector<1x44xf32>, vector<1x44xf32> -> vector<2x44xf32>
    %499 = arith.index_cast %c2_i32 : i32 to index
    %c0_286 = arith.constant 0 : index
    %500 = memref.load %arg3[%499, %c0_286] : memref<8x2xi32, #tpu.memory_space<smem>>
    %501 = arith.index_cast %500 : i32 to index
    %c0_287 = arith.constant 0 : index
    %c0_288 = arith.constant 0 : index
    %502 = vector.load %arg2[%501, %c0_287, %c0_288] : memref<40x1x96xf32, #tpu.memory_space<vmem>>, vector<1x1x96xf32>
    %503 = vector.shape_cast %502 : vector<1x1x96xf32> to vector<1x96xf32>
    %504 = arith.index_cast %c2_i32 : i32 to index
    %c1_289 = arith.constant 1 : index
    %505 = memref.load %arg3[%504, %c1_289] : memref<8x2xi32, #tpu.memory_space<smem>>
    %506 = arith.index_cast %505 : i32 to index
    %c0_290 = arith.constant 0 : index
    %c0_291 = arith.constant 0 : index
    %507 = vector.load %arg2[%506, %c0_290, %c0_291] : memref<40x1x96xf32, #tpu.memory_space<vmem>>, vector<1x1x96xf32>
    %508 = vector.shape_cast %507 : vector<1x1x96xf32> to vector<1x96xf32>
    %509 = tpu.concatenate %503, %508 in 0 : vector<1x96xf32>, vector<1x96xf32> -> vector<2x96xf32>
    %510 = vector.broadcast %3 : vector<1x96xf32> to vector<2x96xf32>
    %511 = arith.addf %509, %510 : vector<2x96xf32>
    %cst_292 = arith.constant dense<0.000000e+00> : vector<2x96xf32>
    %512 = tpu.matmul %498, %243, %cst_292 {dimension_numbers = #tpu.dot_dimension_numbers<[1], [0], [0], [1], [0, 0, 1, 1], [], []>} : vector<2x44xf32>, vector<44x96xf32>, vector<2x96xf32> -> vector<2x96xf32>
    %513 = arith.addf %511, %512 : vector<2x96xf32>
    %514 = vector.extract_strided_slice %513 {offsets = [0, 0], sizes = [2, 32], strides = [1, 1]} : vector<2x96xf32> to vector<2x32xf32>
    %515 = vector.extract_strided_slice %476 {offsets = [0, 0], sizes = [2, 32], strides = [1, 1]} : vector<2x96xf32> to vector<2x32xf32>
    %516 = arith.addf %514, %515 : vector<2x32xf32>
    %517 = arith.negf %516 : vector<2x32xf32>
    %518 = math.exp %517 : vector<2x32xf32>
    %cst_293 = arith.constant 1.000000e+00 : f32
    %519 = vector.broadcast %cst_293 : f32 to vector<2x32xf32>
    %520 = arith.addf %519, %518 : vector<2x32xf32>
    %521 = arith.divf %519, %520 : vector<2x32xf32>
    %522 = vector.extract_strided_slice %513 {offsets = [0, 32], sizes = [2, 32], strides = [1, 1]} : vector<2x96xf32> to vector<2x32xf32>
    %523 = vector.extract_strided_slice %476 {offsets = [0, 32], sizes = [2, 32], strides = [1, 1]} : vector<2x96xf32> to vector<2x32xf32>
    %524 = arith.addf %522, %523 : vector<2x32xf32>
    %525 = arith.negf %524 : vector<2x32xf32>
    %526 = math.exp %525 : vector<2x32xf32>
    %cst_294 = arith.constant 1.000000e+00 : f32
    %527 = vector.broadcast %cst_294 : f32 to vector<2x32xf32>
    %528 = arith.addf %527, %526 : vector<2x32xf32>
    %529 = arith.divf %527, %528 : vector<2x32xf32>
    %530 = vector.extract_strided_slice %513 {offsets = [0, 64], sizes = [2, 32], strides = [1, 1]} : vector<2x96xf32> to vector<2x32xf32>
    %531 = vector.extract_strided_slice %476 {offsets = [0, 64], sizes = [2, 32], strides = [1, 1]} : vector<2x96xf32> to vector<2x32xf32>
    %532 = arith.mulf %521, %531 : vector<2x32xf32>
    %533 = arith.addf %530, %532 : vector<2x32xf32>
    %534 = math.tanh %533 : vector<2x32xf32>
    %cst_295 = arith.constant 1.000000e+00 : f32
    %535 = vector.broadcast %cst_295 : f32 to vector<2x32xf32>
    %536 = arith.subf %535, %529 : vector<2x32xf32>
    %537 = arith.mulf %536, %534 : vector<2x32xf32>
    %538 = arith.mulf %529, %427 : vector<2x32xf32>
    %539 = arith.addf %537, %538 : vector<2x32xf32>
    %cst_296 = arith.constant dense<0.000000e+00> : vector<2x40xf32>
    %540 = tpu.matmul %539, %244, %cst_296 {dimension_numbers = #tpu.dot_dimension_numbers<[1], [0], [0], [1], [0, 0, 1, 1], [], []>} : vector<2x32xf32>, vector<32x40xf32>, vector<2x40xf32> -> vector<2x40xf32>
    %541 = vector.broadcast %6 : vector<1x40xf32> to vector<2x40xf32>
    %542 = arith.addf %540, %541 : vector<2x40xf32>
    %cst_297 = arith.constant dense<0xFF800000> : vector<2xf32>
    %543 = vector.multi_reduction <maximumf>, %542, %cst_297 [1] : vector<2x40xf32> to vector<2xf32>
    %544 = vector.shape_cast %543 : vector<2xf32> to vector<2x1xf32>
    %545 = vector.broadcast %544 : vector<2x1xf32> to vector<2x40xf32>
    %546 = arith.subf %542, %545 : vector<2x40xf32>
    %547 = math.exp %546 : vector<2x40xf32>
    %cst_298 = arith.constant dense<0.000000e+00> : vector<2xf32>
    %548 = vector.multi_reduction <add>, %547, %cst_298 [1] : vector<2x40xf32> to vector<2xf32>
    %549 = vector.shape_cast %548 : vector<2xf32> to vector<2x1xf32>
    %550 = math.log %549 : vector<2x1xf32>
    %551 = arith.addf %550, %544 : vector<2x1xf32>
    %552 = vector.broadcast %551 : vector<2x1xf32> to vector<2x40xf32>
    %553 = arith.subf %542, %552 : vector<2x40xf32>
    %554 = arith.index_cast %c2_i32 : i32 to index
    %c0_299 = arith.constant 0 : index
    %555 = memref.load %arg4[%554, %c0_299] : memref<8x2xi32, #tpu.memory_space<smem>>
    %556 = vector.broadcast %555 : i32 to vector<1x40xi32>
    %557 = arith.cmpi eq, %245, %556 : vector<1x40xi32>
    %c0_i32_300 = arith.constant 0 : i32
    %558 = arith.cmpi sge, %555, %c0_i32_300 : i32
    %559 = vector.broadcast %558 : i1 to vector<1x40xi1>
    %560 = arith.andi %557, %559 : vector<1x40xi1>
    %561 = vector.extract_strided_slice %553 {offsets = [0, 0], sizes = [1, 40], strides = [1, 1]} : vector<2x40xf32> to vector<1x40xf32>
    %cst_301 = arith.constant 0.000000e+00 : f32
    %562 = vector.broadcast %cst_301 : f32 to vector<1x40xf32>
    %563 = arith.select %560, %561, %562 : vector<1x40xi1>, vector<1x40xf32>
    %cst_302 = arith.constant dense<0.000000e+00> : vector<1xf32>
    %564 = vector.multi_reduction <add>, %563, %cst_302 [1] : vector<1x40xf32> to vector<1xf32>
    %565 = vector.shape_cast %564 : vector<1xf32> to vector<1x1xf32>
    %cst_303 = arith.constant 0.000000e+00 : f32
    %566 = vector.broadcast %cst_303 : f32 to vector<1x1xf32>
    %567 = arith.subf %566, %565 : vector<1x1xf32>
    %568 = arith.index_cast %c2_i32 : i32 to index
    %c1_304 = arith.constant 1 : index
    %569 = memref.load %arg4[%568, %c1_304] : memref<8x2xi32, #tpu.memory_space<smem>>
    %570 = vector.broadcast %569 : i32 to vector<1x40xi32>
    %571 = arith.cmpi eq, %245, %570 : vector<1x40xi32>
    %c0_i32_305 = arith.constant 0 : i32
    %572 = arith.cmpi sge, %569, %c0_i32_305 : i32
    %573 = vector.broadcast %572 : i1 to vector<1x40xi1>
    %574 = arith.andi %571, %573 : vector<1x40xi1>
    %575 = vector.extract_strided_slice %553 {offsets = [1, 0], sizes = [1, 40], strides = [1, 1]} : vector<2x40xf32> to vector<1x40xf32>
    %cst_306 = arith.constant 0.000000e+00 : f32
    %576 = vector.broadcast %cst_306 : f32 to vector<1x40xf32>
    %577 = arith.select %574, %575, %576 : vector<1x40xi1>, vector<1x40xf32>
    %cst_307 = arith.constant dense<0.000000e+00> : vector<1xf32>
    %578 = vector.multi_reduction <add>, %577, %cst_307 [1] : vector<1x40xf32> to vector<1xf32>
    %579 = vector.shape_cast %578 : vector<1xf32> to vector<1x1xf32>
    %cst_308 = arith.constant 0.000000e+00 : f32
    %580 = vector.broadcast %cst_308 : f32 to vector<1x1xf32>
    %581 = arith.subf %580, %579 : vector<1x1xf32>
    %582 = tpu.concatenate %567, %581 in 0 : vector<1x1xf32>, vector<1x1xf32> -> vector<2x1xf32>
    %583 = arith.addf %471, %582 : vector<2x1xf32>
    %c3_i32 = arith.constant 3 : i32
    %cst_309 = arith.constant dense<0.000000e+00> : vector<2x128xf32>
    %584 = tpu.matmul %539, %242, %cst_309 {dimension_numbers = #tpu.dot_dimension_numbers<[1], [0], [0], [1], [0, 0, 1, 1], [], []>} : vector<2x32xf32>, vector<32x128xf32>, vector<2x128xf32> -> vector<2x128xf32>
    %585 = vector.broadcast %4 : vector<1x128xf32> to vector<2x128xf32>
    %586 = arith.addf %584, %585 : vector<2x128xf32>
    %587 = vector.extract_strided_slice %586 {offsets = [0, 0], sizes = [2, 32], strides = [1, 1]} : vector<2x128xf32> to vector<2x32xf32>
    %588 = vector.extract_strided_slice %586 {offsets = [0, 32], sizes = [2, 96], strides = [1, 1]} : vector<2x128xf32> to vector<2x96xf32>
    %589 = vector.shape_cast %587 : vector<2x32xf32> to vector<2x1x32xf32>
    %590 = vector.broadcast %589 : vector<2x1x32xf32> to vector<2x32x32xf32>
    %591 = arith.addf %241, %590 : vector<2x32x32xf32>
    %592 = math.tanh %591 : vector<2x32x32xf32>
    %593 = vector.shape_cast %5 : vector<1x32xf32> to vector<1x1x32xf32>
    %594 = vector.broadcast %593 : vector<1x1x32xf32> to vector<2x32x32xf32>
    %595 = arith.mulf %592, %594 : vector<2x32x32xf32>
    %cst_310 = arith.constant dense<0.000000e+00> : vector<2x32xf32>
    %596 = vector.multi_reduction <add>, %595, %cst_310 [2] : vector<2x32x32xf32> to vector<2x32xf32>
    %cst_311 = arith.constant dense<0xFF800000> : vector<2xf32>
    %597 = vector.multi_reduction <maximumf>, %596, %cst_311 [1] : vector<2x32xf32> to vector<2xf32>
    %598 = vector.shape_cast %597 : vector<2xf32> to vector<2x1xf32>
    %599 = vector.broadcast %598 : vector<2x1xf32> to vector<2x32xf32>
    %600 = arith.subf %596, %599 : vector<2x32xf32>
    %601 = math.exp %600 : vector<2x32xf32>
    %cst_312 = arith.constant dense<0.000000e+00> : vector<2xf32>
    %602 = vector.multi_reduction <add>, %601, %cst_312 [1] : vector<2x32xf32> to vector<2xf32>
    %603 = vector.shape_cast %602 : vector<2xf32> to vector<2x1xf32>
    %604 = vector.broadcast %603 : vector<2x1xf32> to vector<2x32xf32>
    %605 = arith.divf %601, %604 : vector<2x32xf32>
    %606 = vector.extract_strided_slice %605 {offsets = [0, 0], sizes = [1, 32], strides = [1, 1]} : vector<2x32xf32> to vector<1x32xf32>
    %cst_313 = arith.constant dense<0.000000e+00> : vector<1x44xf32>
    %607 = tpu.matmul %606, %122, %cst_313 {dimension_numbers = #tpu.dot_dimension_numbers<[1], [0], [0], [1], [0, 0, 1, 1], [], []>} : vector<1x32xf32>, vector<32x44xf32>, vector<1x44xf32> -> vector<1x44xf32>
    %608 = vector.extract_strided_slice %605 {offsets = [1, 0], sizes = [1, 32], strides = [1, 1]} : vector<2x32xf32> to vector<1x32xf32>
    %cst_314 = arith.constant dense<0.000000e+00> : vector<1x44xf32>
    %609 = tpu.matmul %608, %237, %cst_314 {dimension_numbers = #tpu.dot_dimension_numbers<[1], [0], [0], [1], [0, 0, 1, 1], [], []>} : vector<1x32xf32>, vector<32x44xf32>, vector<1x44xf32> -> vector<1x44xf32>
    %610 = tpu.concatenate %607, %609 in 0 : vector<1x44xf32>, vector<1x44xf32> -> vector<2x44xf32>
    %611 = arith.index_cast %c3_i32 : i32 to index
    %c0_315 = arith.constant 0 : index
    %612 = memref.load %arg3[%611, %c0_315] : memref<8x2xi32, #tpu.memory_space<smem>>
    %613 = arith.index_cast %612 : i32 to index
    %c0_316 = arith.constant 0 : index
    %c0_317 = arith.constant 0 : index
    %614 = vector.load %arg2[%613, %c0_316, %c0_317] : memref<40x1x96xf32, #tpu.memory_space<vmem>>, vector<1x1x96xf32>
    %615 = vector.shape_cast %614 : vector<1x1x96xf32> to vector<1x96xf32>
    %616 = arith.index_cast %c3_i32 : i32 to index
    %c1_318 = arith.constant 1 : index
    %617 = memref.load %arg3[%616, %c1_318] : memref<8x2xi32, #tpu.memory_space<smem>>
    %618 = arith.index_cast %617 : i32 to index
    %c0_319 = arith.constant 0 : index
    %c0_320 = arith.constant 0 : index
    %619 = vector.load %arg2[%618, %c0_319, %c0_320] : memref<40x1x96xf32, #tpu.memory_space<vmem>>, vector<1x1x96xf32>
    %620 = vector.shape_cast %619 : vector<1x1x96xf32> to vector<1x96xf32>
    %621 = tpu.concatenate %615, %620 in 0 : vector<1x96xf32>, vector<1x96xf32> -> vector<2x96xf32>
    %622 = vector.broadcast %3 : vector<1x96xf32> to vector<2x96xf32>
    %623 = arith.addf %621, %622 : vector<2x96xf32>
    %cst_321 = arith.constant dense<0.000000e+00> : vector<2x96xf32>
    %624 = tpu.matmul %610, %243, %cst_321 {dimension_numbers = #tpu.dot_dimension_numbers<[1], [0], [0], [1], [0, 0, 1, 1], [], []>} : vector<2x44xf32>, vector<44x96xf32>, vector<2x96xf32> -> vector<2x96xf32>
    %625 = arith.addf %623, %624 : vector<2x96xf32>
    %626 = vector.extract_strided_slice %625 {offsets = [0, 0], sizes = [2, 32], strides = [1, 1]} : vector<2x96xf32> to vector<2x32xf32>
    %627 = vector.extract_strided_slice %588 {offsets = [0, 0], sizes = [2, 32], strides = [1, 1]} : vector<2x96xf32> to vector<2x32xf32>
    %628 = arith.addf %626, %627 : vector<2x32xf32>
    %629 = arith.negf %628 : vector<2x32xf32>
    %630 = math.exp %629 : vector<2x32xf32>
    %cst_322 = arith.constant 1.000000e+00 : f32
    %631 = vector.broadcast %cst_322 : f32 to vector<2x32xf32>
    %632 = arith.addf %631, %630 : vector<2x32xf32>
    %633 = arith.divf %631, %632 : vector<2x32xf32>
    %634 = vector.extract_strided_slice %625 {offsets = [0, 32], sizes = [2, 32], strides = [1, 1]} : vector<2x96xf32> to vector<2x32xf32>
    %635 = vector.extract_strided_slice %588 {offsets = [0, 32], sizes = [2, 32], strides = [1, 1]} : vector<2x96xf32> to vector<2x32xf32>
    %636 = arith.addf %634, %635 : vector<2x32xf32>
    %637 = arith.negf %636 : vector<2x32xf32>
    %638 = math.exp %637 : vector<2x32xf32>
    %cst_323 = arith.constant 1.000000e+00 : f32
    %639 = vector.broadcast %cst_323 : f32 to vector<2x32xf32>
    %640 = arith.addf %639, %638 : vector<2x32xf32>
    %641 = arith.divf %639, %640 : vector<2x32xf32>
    %642 = vector.extract_strided_slice %625 {offsets = [0, 64], sizes = [2, 32], strides = [1, 1]} : vector<2x96xf32> to vector<2x32xf32>
    %643 = vector.extract_strided_slice %588 {offsets = [0, 64], sizes = [2, 32], strides = [1, 1]} : vector<2x96xf32> to vector<2x32xf32>
    %644 = arith.mulf %633, %643 : vector<2x32xf32>
    %645 = arith.addf %642, %644 : vector<2x32xf32>
    %646 = math.tanh %645 : vector<2x32xf32>
    %cst_324 = arith.constant 1.000000e+00 : f32
    %647 = vector.broadcast %cst_324 : f32 to vector<2x32xf32>
    %648 = arith.subf %647, %641 : vector<2x32xf32>
    %649 = arith.mulf %648, %646 : vector<2x32xf32>
    %650 = arith.mulf %641, %539 : vector<2x32xf32>
    %651 = arith.addf %649, %650 : vector<2x32xf32>
    %cst_325 = arith.constant dense<0.000000e+00> : vector<2x40xf32>
    %652 = tpu.matmul %651, %244, %cst_325 {dimension_numbers = #tpu.dot_dimension_numbers<[1], [0], [0], [1], [0, 0, 1, 1], [], []>} : vector<2x32xf32>, vector<32x40xf32>, vector<2x40xf32> -> vector<2x40xf32>
    %653 = vector.broadcast %6 : vector<1x40xf32> to vector<2x40xf32>
    %654 = arith.addf %652, %653 : vector<2x40xf32>
    %cst_326 = arith.constant dense<0xFF800000> : vector<2xf32>
    %655 = vector.multi_reduction <maximumf>, %654, %cst_326 [1] : vector<2x40xf32> to vector<2xf32>
    %656 = vector.shape_cast %655 : vector<2xf32> to vector<2x1xf32>
    %657 = vector.broadcast %656 : vector<2x1xf32> to vector<2x40xf32>
    %658 = arith.subf %654, %657 : vector<2x40xf32>
    %659 = math.exp %658 : vector<2x40xf32>
    %cst_327 = arith.constant dense<0.000000e+00> : vector<2xf32>
    %660 = vector.multi_reduction <add>, %659, %cst_327 [1] : vector<2x40xf32> to vector<2xf32>
    %661 = vector.shape_cast %660 : vector<2xf32> to vector<2x1xf32>
    %662 = math.log %661 : vector<2x1xf32>
    %663 = arith.addf %662, %656 : vector<2x1xf32>
    %664 = vector.broadcast %663 : vector<2x1xf32> to vector<2x40xf32>
    %665 = arith.subf %654, %664 : vector<2x40xf32>
    %666 = arith.index_cast %c3_i32 : i32 to index
    %c0_328 = arith.constant 0 : index
    %667 = memref.load %arg4[%666, %c0_328] : memref<8x2xi32, #tpu.memory_space<smem>>
    %668 = vector.broadcast %667 : i32 to vector<1x40xi32>
    %669 = arith.cmpi eq, %245, %668 : vector<1x40xi32>
    %c0_i32_329 = arith.constant 0 : i32
    %670 = arith.cmpi sge, %667, %c0_i32_329 : i32
    %671 = vector.broadcast %670 : i1 to vector<1x40xi1>
    %672 = arith.andi %669, %671 : vector<1x40xi1>
    %673 = vector.extract_strided_slice %665 {offsets = [0, 0], sizes = [1, 40], strides = [1, 1]} : vector<2x40xf32> to vector<1x40xf32>
    %cst_330 = arith.constant 0.000000e+00 : f32
    %674 = vector.broadcast %cst_330 : f32 to vector<1x40xf32>
    %675 = arith.select %672, %673, %674 : vector<1x40xi1>, vector<1x40xf32>
    %cst_331 = arith.constant dense<0.000000e+00> : vector<1xf32>
    %676 = vector.multi_reduction <add>, %675, %cst_331 [1] : vector<1x40xf32> to vector<1xf32>
    %677 = vector.shape_cast %676 : vector<1xf32> to vector<1x1xf32>
    %cst_332 = arith.constant 0.000000e+00 : f32
    %678 = vector.broadcast %cst_332 : f32 to vector<1x1xf32>
    %679 = arith.subf %678, %677 : vector<1x1xf32>
    %680 = arith.index_cast %c3_i32 : i32 to index
    %c1_333 = arith.constant 1 : index
    %681 = memref.load %arg4[%680, %c1_333] : memref<8x2xi32, #tpu.memory_space<smem>>
    %682 = vector.broadcast %681 : i32 to vector<1x40xi32>
    %683 = arith.cmpi eq, %245, %682 : vector<1x40xi32>
    %c0_i32_334 = arith.constant 0 : i32
    %684 = arith.cmpi sge, %681, %c0_i32_334 : i32
    %685 = vector.broadcast %684 : i1 to vector<1x40xi1>
    %686 = arith.andi %683, %685 : vector<1x40xi1>
    %687 = vector.extract_strided_slice %665 {offsets = [1, 0], sizes = [1, 40], strides = [1, 1]} : vector<2x40xf32> to vector<1x40xf32>
    %cst_335 = arith.constant 0.000000e+00 : f32
    %688 = vector.broadcast %cst_335 : f32 to vector<1x40xf32>
    %689 = arith.select %686, %687, %688 : vector<1x40xi1>, vector<1x40xf32>
    %cst_336 = arith.constant dense<0.000000e+00> : vector<1xf32>
    %690 = vector.multi_reduction <add>, %689, %cst_336 [1] : vector<1x40xf32> to vector<1xf32>
    %691 = vector.shape_cast %690 : vector<1xf32> to vector<1x1xf32>
    %cst_337 = arith.constant 0.000000e+00 : f32
    %692 = vector.broadcast %cst_337 : f32 to vector<1x1xf32>
    %693 = arith.subf %692, %691 : vector<1x1xf32>
    %694 = tpu.concatenate %679, %693 in 0 : vector<1x1xf32>, vector<1x1xf32> -> vector<2x1xf32>
    %695 = arith.addf %583, %694 : vector<2x1xf32>
    %c4_i32 = arith.constant 4 : i32
    %cst_338 = arith.constant dense<0.000000e+00> : vector<2x128xf32>
    %696 = tpu.matmul %651, %242, %cst_338 {dimension_numbers = #tpu.dot_dimension_numbers<[1], [0], [0], [1], [0, 0, 1, 1], [], []>} : vector<2x32xf32>, vector<32x128xf32>, vector<2x128xf32> -> vector<2x128xf32>
    %697 = vector.broadcast %4 : vector<1x128xf32> to vector<2x128xf32>
    %698 = arith.addf %696, %697 : vector<2x128xf32>
    %699 = vector.extract_strided_slice %698 {offsets = [0, 0], sizes = [2, 32], strides = [1, 1]} : vector<2x128xf32> to vector<2x32xf32>
    %700 = vector.extract_strided_slice %698 {offsets = [0, 32], sizes = [2, 96], strides = [1, 1]} : vector<2x128xf32> to vector<2x96xf32>
    %701 = vector.shape_cast %699 : vector<2x32xf32> to vector<2x1x32xf32>
    %702 = vector.broadcast %701 : vector<2x1x32xf32> to vector<2x32x32xf32>
    %703 = arith.addf %241, %702 : vector<2x32x32xf32>
    %704 = math.tanh %703 : vector<2x32x32xf32>
    %705 = vector.shape_cast %5 : vector<1x32xf32> to vector<1x1x32xf32>
    %706 = vector.broadcast %705 : vector<1x1x32xf32> to vector<2x32x32xf32>
    %707 = arith.mulf %704, %706 : vector<2x32x32xf32>
    %cst_339 = arith.constant dense<0.000000e+00> : vector<2x32xf32>
    %708 = vector.multi_reduction <add>, %707, %cst_339 [2] : vector<2x32x32xf32> to vector<2x32xf32>
    %cst_340 = arith.constant dense<0xFF800000> : vector<2xf32>
    %709 = vector.multi_reduction <maximumf>, %708, %cst_340 [1] : vector<2x32xf32> to vector<2xf32>
    %710 = vector.shape_cast %709 : vector<2xf32> to vector<2x1xf32>
    %711 = vector.broadcast %710 : vector<2x1xf32> to vector<2x32xf32>
    %712 = arith.subf %708, %711 : vector<2x32xf32>
    %713 = math.exp %712 : vector<2x32xf32>
    %cst_341 = arith.constant dense<0.000000e+00> : vector<2xf32>
    %714 = vector.multi_reduction <add>, %713, %cst_341 [1] : vector<2x32xf32> to vector<2xf32>
    %715 = vector.shape_cast %714 : vector<2xf32> to vector<2x1xf32>
    %716 = vector.broadcast %715 : vector<2x1xf32> to vector<2x32xf32>
    %717 = arith.divf %713, %716 : vector<2x32xf32>
    %718 = vector.extract_strided_slice %717 {offsets = [0, 0], sizes = [1, 32], strides = [1, 1]} : vector<2x32xf32> to vector<1x32xf32>
    %cst_342 = arith.constant dense<0.000000e+00> : vector<1x44xf32>
    %719 = tpu.matmul %718, %122, %cst_342 {dimension_numbers = #tpu.dot_dimension_numbers<[1], [0], [0], [1], [0, 0, 1, 1], [], []>} : vector<1x32xf32>, vector<32x44xf32>, vector<1x44xf32> -> vector<1x44xf32>
    %720 = vector.extract_strided_slice %717 {offsets = [1, 0], sizes = [1, 32], strides = [1, 1]} : vector<2x32xf32> to vector<1x32xf32>
    %cst_343 = arith.constant dense<0.000000e+00> : vector<1x44xf32>
    %721 = tpu.matmul %720, %237, %cst_343 {dimension_numbers = #tpu.dot_dimension_numbers<[1], [0], [0], [1], [0, 0, 1, 1], [], []>} : vector<1x32xf32>, vector<32x44xf32>, vector<1x44xf32> -> vector<1x44xf32>
    %722 = tpu.concatenate %719, %721 in 0 : vector<1x44xf32>, vector<1x44xf32> -> vector<2x44xf32>
    %723 = arith.index_cast %c4_i32 : i32 to index
    %c0_344 = arith.constant 0 : index
    %724 = memref.load %arg3[%723, %c0_344] : memref<8x2xi32, #tpu.memory_space<smem>>
    %725 = arith.index_cast %724 : i32 to index
    %c0_345 = arith.constant 0 : index
    %c0_346 = arith.constant 0 : index
    %726 = vector.load %arg2[%725, %c0_345, %c0_346] : memref<40x1x96xf32, #tpu.memory_space<vmem>>, vector<1x1x96xf32>
    %727 = vector.shape_cast %726 : vector<1x1x96xf32> to vector<1x96xf32>
    %728 = arith.index_cast %c4_i32 : i32 to index
    %c1_347 = arith.constant 1 : index
    %729 = memref.load %arg3[%728, %c1_347] : memref<8x2xi32, #tpu.memory_space<smem>>
    %730 = arith.index_cast %729 : i32 to index
    %c0_348 = arith.constant 0 : index
    %c0_349 = arith.constant 0 : index
    %731 = vector.load %arg2[%730, %c0_348, %c0_349] : memref<40x1x96xf32, #tpu.memory_space<vmem>>, vector<1x1x96xf32>
    %732 = vector.shape_cast %731 : vector<1x1x96xf32> to vector<1x96xf32>
    %733 = tpu.concatenate %727, %732 in 0 : vector<1x96xf32>, vector<1x96xf32> -> vector<2x96xf32>
    %734 = vector.broadcast %3 : vector<1x96xf32> to vector<2x96xf32>
    %735 = arith.addf %733, %734 : vector<2x96xf32>
    %cst_350 = arith.constant dense<0.000000e+00> : vector<2x96xf32>
    %736 = tpu.matmul %722, %243, %cst_350 {dimension_numbers = #tpu.dot_dimension_numbers<[1], [0], [0], [1], [0, 0, 1, 1], [], []>} : vector<2x44xf32>, vector<44x96xf32>, vector<2x96xf32> -> vector<2x96xf32>
    %737 = arith.addf %735, %736 : vector<2x96xf32>
    %738 = vector.extract_strided_slice %737 {offsets = [0, 0], sizes = [2, 32], strides = [1, 1]} : vector<2x96xf32> to vector<2x32xf32>
    %739 = vector.extract_strided_slice %700 {offsets = [0, 0], sizes = [2, 32], strides = [1, 1]} : vector<2x96xf32> to vector<2x32xf32>
    %740 = arith.addf %738, %739 : vector<2x32xf32>
    %741 = arith.negf %740 : vector<2x32xf32>
    %742 = math.exp %741 : vector<2x32xf32>
    %cst_351 = arith.constant 1.000000e+00 : f32
    %743 = vector.broadcast %cst_351 : f32 to vector<2x32xf32>
    %744 = arith.addf %743, %742 : vector<2x32xf32>
    %745 = arith.divf %743, %744 : vector<2x32xf32>
    %746 = vector.extract_strided_slice %737 {offsets = [0, 32], sizes = [2, 32], strides = [1, 1]} : vector<2x96xf32> to vector<2x32xf32>
    %747 = vector.extract_strided_slice %700 {offsets = [0, 32], sizes = [2, 32], strides = [1, 1]} : vector<2x96xf32> to vector<2x32xf32>
    %748 = arith.addf %746, %747 : vector<2x32xf32>
    %749 = arith.negf %748 : vector<2x32xf32>
    %750 = math.exp %749 : vector<2x32xf32>
    %cst_352 = arith.constant 1.000000e+00 : f32
    %751 = vector.broadcast %cst_352 : f32 to vector<2x32xf32>
    %752 = arith.addf %751, %750 : vector<2x32xf32>
    %753 = arith.divf %751, %752 : vector<2x32xf32>
    %754 = vector.extract_strided_slice %737 {offsets = [0, 64], sizes = [2, 32], strides = [1, 1]} : vector<2x96xf32> to vector<2x32xf32>
    %755 = vector.extract_strided_slice %700 {offsets = [0, 64], sizes = [2, 32], strides = [1, 1]} : vector<2x96xf32> to vector<2x32xf32>
    %756 = arith.mulf %745, %755 : vector<2x32xf32>
    %757 = arith.addf %754, %756 : vector<2x32xf32>
    %758 = math.tanh %757 : vector<2x32xf32>
    %cst_353 = arith.constant 1.000000e+00 : f32
    %759 = vector.broadcast %cst_353 : f32 to vector<2x32xf32>
    %760 = arith.subf %759, %753 : vector<2x32xf32>
    %761 = arith.mulf %760, %758 : vector<2x32xf32>
    %762 = arith.mulf %753, %651 : vector<2x32xf32>
    %763 = arith.addf %761, %762 : vector<2x32xf32>
    %cst_354 = arith.constant dense<0.000000e+00> : vector<2x40xf32>
    %764 = tpu.matmul %763, %244, %cst_354 {dimension_numbers = #tpu.dot_dimension_numbers<[1], [0], [0], [1], [0, 0, 1, 1], [], []>} : vector<2x32xf32>, vector<32x40xf32>, vector<2x40xf32> -> vector<2x40xf32>
    %765 = vector.broadcast %6 : vector<1x40xf32> to vector<2x40xf32>
    %766 = arith.addf %764, %765 : vector<2x40xf32>
    %cst_355 = arith.constant dense<0xFF800000> : vector<2xf32>
    %767 = vector.multi_reduction <maximumf>, %766, %cst_355 [1] : vector<2x40xf32> to vector<2xf32>
    %768 = vector.shape_cast %767 : vector<2xf32> to vector<2x1xf32>
    %769 = vector.broadcast %768 : vector<2x1xf32> to vector<2x40xf32>
    %770 = arith.subf %766, %769 : vector<2x40xf32>
    %771 = math.exp %770 : vector<2x40xf32>
    %cst_356 = arith.constant dense<0.000000e+00> : vector<2xf32>
    %772 = vector.multi_reduction <add>, %771, %cst_356 [1] : vector<2x40xf32> to vector<2xf32>
    %773 = vector.shape_cast %772 : vector<2xf32> to vector<2x1xf32>
    %774 = math.log %773 : vector<2x1xf32>
    %775 = arith.addf %774, %768 : vector<2x1xf32>
    %776 = vector.broadcast %775 : vector<2x1xf32> to vector<2x40xf32>
    %777 = arith.subf %766, %776 : vector<2x40xf32>
    %778 = arith.index_cast %c4_i32 : i32 to index
    %c0_357 = arith.constant 0 : index
    %779 = memref.load %arg4[%778, %c0_357] : memref<8x2xi32, #tpu.memory_space<smem>>
    %780 = vector.broadcast %779 : i32 to vector<1x40xi32>
    %781 = arith.cmpi eq, %245, %780 : vector<1x40xi32>
    %c0_i32_358 = arith.constant 0 : i32
    %782 = arith.cmpi sge, %779, %c0_i32_358 : i32
    %783 = vector.broadcast %782 : i1 to vector<1x40xi1>
    %784 = arith.andi %781, %783 : vector<1x40xi1>
    %785 = vector.extract_strided_slice %777 {offsets = [0, 0], sizes = [1, 40], strides = [1, 1]} : vector<2x40xf32> to vector<1x40xf32>
    %cst_359 = arith.constant 0.000000e+00 : f32
    %786 = vector.broadcast %cst_359 : f32 to vector<1x40xf32>
    %787 = arith.select %784, %785, %786 : vector<1x40xi1>, vector<1x40xf32>
    %cst_360 = arith.constant dense<0.000000e+00> : vector<1xf32>
    %788 = vector.multi_reduction <add>, %787, %cst_360 [1] : vector<1x40xf32> to vector<1xf32>
    %789 = vector.shape_cast %788 : vector<1xf32> to vector<1x1xf32>
    %cst_361 = arith.constant 0.000000e+00 : f32
    %790 = vector.broadcast %cst_361 : f32 to vector<1x1xf32>
    %791 = arith.subf %790, %789 : vector<1x1xf32>
    %792 = arith.index_cast %c4_i32 : i32 to index
    %c1_362 = arith.constant 1 : index
    %793 = memref.load %arg4[%792, %c1_362] : memref<8x2xi32, #tpu.memory_space<smem>>
    %794 = vector.broadcast %793 : i32 to vector<1x40xi32>
    %795 = arith.cmpi eq, %245, %794 : vector<1x40xi32>
    %c0_i32_363 = arith.constant 0 : i32
    %796 = arith.cmpi sge, %793, %c0_i32_363 : i32
    %797 = vector.broadcast %796 : i1 to vector<1x40xi1>
    %798 = arith.andi %795, %797 : vector<1x40xi1>
    %799 = vector.extract_strided_slice %777 {offsets = [1, 0], sizes = [1, 40], strides = [1, 1]} : vector<2x40xf32> to vector<1x40xf32>
    %cst_364 = arith.constant 0.000000e+00 : f32
    %800 = vector.broadcast %cst_364 : f32 to vector<1x40xf32>
    %801 = arith.select %798, %799, %800 : vector<1x40xi1>, vector<1x40xf32>
    %cst_365 = arith.constant dense<0.000000e+00> : vector<1xf32>
    %802 = vector.multi_reduction <add>, %801, %cst_365 [1] : vector<1x40xf32> to vector<1xf32>
    %803 = vector.shape_cast %802 : vector<1xf32> to vector<1x1xf32>
    %cst_366 = arith.constant 0.000000e+00 : f32
    %804 = vector.broadcast %cst_366 : f32 to vector<1x1xf32>
    %805 = arith.subf %804, %803 : vector<1x1xf32>
    %806 = tpu.concatenate %791, %805 in 0 : vector<1x1xf32>, vector<1x1xf32> -> vector<2x1xf32>
    %807 = arith.addf %695, %806 : vector<2x1xf32>
    %c5_i32 = arith.constant 5 : i32
    %cst_367 = arith.constant dense<0.000000e+00> : vector<2x128xf32>
    %808 = tpu.matmul %763, %242, %cst_367 {dimension_numbers = #tpu.dot_dimension_numbers<[1], [0], [0], [1], [0, 0, 1, 1], [], []>} : vector<2x32xf32>, vector<32x128xf32>, vector<2x128xf32> -> vector<2x128xf32>
    %809 = vector.broadcast %4 : vector<1x128xf32> to vector<2x128xf32>
    %810 = arith.addf %808, %809 : vector<2x128xf32>
    %811 = vector.extract_strided_slice %810 {offsets = [0, 0], sizes = [2, 32], strides = [1, 1]} : vector<2x128xf32> to vector<2x32xf32>
    %812 = vector.extract_strided_slice %810 {offsets = [0, 32], sizes = [2, 96], strides = [1, 1]} : vector<2x128xf32> to vector<2x96xf32>
    %813 = vector.shape_cast %811 : vector<2x32xf32> to vector<2x1x32xf32>
    %814 = vector.broadcast %813 : vector<2x1x32xf32> to vector<2x32x32xf32>
    %815 = arith.addf %241, %814 : vector<2x32x32xf32>
    %816 = math.tanh %815 : vector<2x32x32xf32>
    %817 = vector.shape_cast %5 : vector<1x32xf32> to vector<1x1x32xf32>
    %818 = vector.broadcast %817 : vector<1x1x32xf32> to vector<2x32x32xf32>
    %819 = arith.mulf %816, %818 : vector<2x32x32xf32>
    %cst_368 = arith.constant dense<0.000000e+00> : vector<2x32xf32>
    %820 = vector.multi_reduction <add>, %819, %cst_368 [2] : vector<2x32x32xf32> to vector<2x32xf32>
    %cst_369 = arith.constant dense<0xFF800000> : vector<2xf32>
    %821 = vector.multi_reduction <maximumf>, %820, %cst_369 [1] : vector<2x32xf32> to vector<2xf32>
    %822 = vector.shape_cast %821 : vector<2xf32> to vector<2x1xf32>
    %823 = vector.broadcast %822 : vector<2x1xf32> to vector<2x32xf32>
    %824 = arith.subf %820, %823 : vector<2x32xf32>
    %825 = math.exp %824 : vector<2x32xf32>
    %cst_370 = arith.constant dense<0.000000e+00> : vector<2xf32>
    %826 = vector.multi_reduction <add>, %825, %cst_370 [1] : vector<2x32xf32> to vector<2xf32>
    %827 = vector.shape_cast %826 : vector<2xf32> to vector<2x1xf32>
    %828 = vector.broadcast %827 : vector<2x1xf32> to vector<2x32xf32>
    %829 = arith.divf %825, %828 : vector<2x32xf32>
    %830 = vector.extract_strided_slice %829 {offsets = [0, 0], sizes = [1, 32], strides = [1, 1]} : vector<2x32xf32> to vector<1x32xf32>
    %cst_371 = arith.constant dense<0.000000e+00> : vector<1x44xf32>
    %831 = tpu.matmul %830, %122, %cst_371 {dimension_numbers = #tpu.dot_dimension_numbers<[1], [0], [0], [1], [0, 0, 1, 1], [], []>} : vector<1x32xf32>, vector<32x44xf32>, vector<1x44xf32> -> vector<1x44xf32>
    %832 = vector.extract_strided_slice %829 {offsets = [1, 0], sizes = [1, 32], strides = [1, 1]} : vector<2x32xf32> to vector<1x32xf32>
    %cst_372 = arith.constant dense<0.000000e+00> : vector<1x44xf32>
    %833 = tpu.matmul %832, %237, %cst_372 {dimension_numbers = #tpu.dot_dimension_numbers<[1], [0], [0], [1], [0, 0, 1, 1], [], []>} : vector<1x32xf32>, vector<32x44xf32>, vector<1x44xf32> -> vector<1x44xf32>
    %834 = tpu.concatenate %831, %833 in 0 : vector<1x44xf32>, vector<1x44xf32> -> vector<2x44xf32>
    %835 = arith.index_cast %c5_i32 : i32 to index
    %c0_373 = arith.constant 0 : index
    %836 = memref.load %arg3[%835, %c0_373] : memref<8x2xi32, #tpu.memory_space<smem>>
    %837 = arith.index_cast %836 : i32 to index
    %c0_374 = arith.constant 0 : index
    %c0_375 = arith.constant 0 : index
    %838 = vector.load %arg2[%837, %c0_374, %c0_375] : memref<40x1x96xf32, #tpu.memory_space<vmem>>, vector<1x1x96xf32>
    %839 = vector.shape_cast %838 : vector<1x1x96xf32> to vector<1x96xf32>
    %840 = arith.index_cast %c5_i32 : i32 to index
    %c1_376 = arith.constant 1 : index
    %841 = memref.load %arg3[%840, %c1_376] : memref<8x2xi32, #tpu.memory_space<smem>>
    %842 = arith.index_cast %841 : i32 to index
    %c0_377 = arith.constant 0 : index
    %c0_378 = arith.constant 0 : index
    %843 = vector.load %arg2[%842, %c0_377, %c0_378] : memref<40x1x96xf32, #tpu.memory_space<vmem>>, vector<1x1x96xf32>
    %844 = vector.shape_cast %843 : vector<1x1x96xf32> to vector<1x96xf32>
    %845 = tpu.concatenate %839, %844 in 0 : vector<1x96xf32>, vector<1x96xf32> -> vector<2x96xf32>
    %846 = vector.broadcast %3 : vector<1x96xf32> to vector<2x96xf32>
    %847 = arith.addf %845, %846 : vector<2x96xf32>
    %cst_379 = arith.constant dense<0.000000e+00> : vector<2x96xf32>
    %848 = tpu.matmul %834, %243, %cst_379 {dimension_numbers = #tpu.dot_dimension_numbers<[1], [0], [0], [1], [0, 0, 1, 1], [], []>} : vector<2x44xf32>, vector<44x96xf32>, vector<2x96xf32> -> vector<2x96xf32>
    %849 = arith.addf %847, %848 : vector<2x96xf32>
    %850 = vector.extract_strided_slice %849 {offsets = [0, 0], sizes = [2, 32], strides = [1, 1]} : vector<2x96xf32> to vector<2x32xf32>
    %851 = vector.extract_strided_slice %812 {offsets = [0, 0], sizes = [2, 32], strides = [1, 1]} : vector<2x96xf32> to vector<2x32xf32>
    %852 = arith.addf %850, %851 : vector<2x32xf32>
    %853 = arith.negf %852 : vector<2x32xf32>
    %854 = math.exp %853 : vector<2x32xf32>
    %cst_380 = arith.constant 1.000000e+00 : f32
    %855 = vector.broadcast %cst_380 : f32 to vector<2x32xf32>
    %856 = arith.addf %855, %854 : vector<2x32xf32>
    %857 = arith.divf %855, %856 : vector<2x32xf32>
    %858 = vector.extract_strided_slice %849 {offsets = [0, 32], sizes = [2, 32], strides = [1, 1]} : vector<2x96xf32> to vector<2x32xf32>
    %859 = vector.extract_strided_slice %812 {offsets = [0, 32], sizes = [2, 32], strides = [1, 1]} : vector<2x96xf32> to vector<2x32xf32>
    %860 = arith.addf %858, %859 : vector<2x32xf32>
    %861 = arith.negf %860 : vector<2x32xf32>
    %862 = math.exp %861 : vector<2x32xf32>
    %cst_381 = arith.constant 1.000000e+00 : f32
    %863 = vector.broadcast %cst_381 : f32 to vector<2x32xf32>
    %864 = arith.addf %863, %862 : vector<2x32xf32>
    %865 = arith.divf %863, %864 : vector<2x32xf32>
    %866 = vector.extract_strided_slice %849 {offsets = [0, 64], sizes = [2, 32], strides = [1, 1]} : vector<2x96xf32> to vector<2x32xf32>
    %867 = vector.extract_strided_slice %812 {offsets = [0, 64], sizes = [2, 32], strides = [1, 1]} : vector<2x96xf32> to vector<2x32xf32>
    %868 = arith.mulf %857, %867 : vector<2x32xf32>
    %869 = arith.addf %866, %868 : vector<2x32xf32>
    %870 = math.tanh %869 : vector<2x32xf32>
    %cst_382 = arith.constant 1.000000e+00 : f32
    %871 = vector.broadcast %cst_382 : f32 to vector<2x32xf32>
    %872 = arith.subf %871, %865 : vector<2x32xf32>
    %873 = arith.mulf %872, %870 : vector<2x32xf32>
    %874 = arith.mulf %865, %763 : vector<2x32xf32>
    %875 = arith.addf %873, %874 : vector<2x32xf32>
    %cst_383 = arith.constant dense<0.000000e+00> : vector<2x40xf32>
    %876 = tpu.matmul %875, %244, %cst_383 {dimension_numbers = #tpu.dot_dimension_numbers<[1], [0], [0], [1], [0, 0, 1, 1], [], []>} : vector<2x32xf32>, vector<32x40xf32>, vector<2x40xf32> -> vector<2x40xf32>
    %877 = vector.broadcast %6 : vector<1x40xf32> to vector<2x40xf32>
    %878 = arith.addf %876, %877 : vector<2x40xf32>
    %cst_384 = arith.constant dense<0xFF800000> : vector<2xf32>
    %879 = vector.multi_reduction <maximumf>, %878, %cst_384 [1] : vector<2x40xf32> to vector<2xf32>
    %880 = vector.shape_cast %879 : vector<2xf32> to vector<2x1xf32>
    %881 = vector.broadcast %880 : vector<2x1xf32> to vector<2x40xf32>
    %882 = arith.subf %878, %881 : vector<2x40xf32>
    %883 = math.exp %882 : vector<2x40xf32>
    %cst_385 = arith.constant dense<0.000000e+00> : vector<2xf32>
    %884 = vector.multi_reduction <add>, %883, %cst_385 [1] : vector<2x40xf32> to vector<2xf32>
    %885 = vector.shape_cast %884 : vector<2xf32> to vector<2x1xf32>
    %886 = math.log %885 : vector<2x1xf32>
    %887 = arith.addf %886, %880 : vector<2x1xf32>
    %888 = vector.broadcast %887 : vector<2x1xf32> to vector<2x40xf32>
    %889 = arith.subf %878, %888 : vector<2x40xf32>
    %890 = arith.index_cast %c5_i32 : i32 to index
    %c0_386 = arith.constant 0 : index
    %891 = memref.load %arg4[%890, %c0_386] : memref<8x2xi32, #tpu.memory_space<smem>>
    %892 = vector.broadcast %891 : i32 to vector<1x40xi32>
    %893 = arith.cmpi eq, %245, %892 : vector<1x40xi32>
    %c0_i32_387 = arith.constant 0 : i32
    %894 = arith.cmpi sge, %891, %c0_i32_387 : i32
    %895 = vector.broadcast %894 : i1 to vector<1x40xi1>
    %896 = arith.andi %893, %895 : vector<1x40xi1>
    %897 = vector.extract_strided_slice %889 {offsets = [0, 0], sizes = [1, 40], strides = [1, 1]} : vector<2x40xf32> to vector<1x40xf32>
    %cst_388 = arith.constant 0.000000e+00 : f32
    %898 = vector.broadcast %cst_388 : f32 to vector<1x40xf32>
    %899 = arith.select %896, %897, %898 : vector<1x40xi1>, vector<1x40xf32>
    %cst_389 = arith.constant dense<0.000000e+00> : vector<1xf32>
    %900 = vector.multi_reduction <add>, %899, %cst_389 [1] : vector<1x40xf32> to vector<1xf32>
    %901 = vector.shape_cast %900 : vector<1xf32> to vector<1x1xf32>
    %cst_390 = arith.constant 0.000000e+00 : f32
    %902 = vector.broadcast %cst_390 : f32 to vector<1x1xf32>
    %903 = arith.subf %902, %901 : vector<1x1xf32>
    %904 = arith.index_cast %c5_i32 : i32 to index
    %c1_391 = arith.constant 1 : index
    %905 = memref.load %arg4[%904, %c1_391] : memref<8x2xi32, #tpu.memory_space<smem>>
    %906 = vector.broadcast %905 : i32 to vector<1x40xi32>
    %907 = arith.cmpi eq, %245, %906 : vector<1x40xi32>
    %c0_i32_392 = arith.constant 0 : i32
    %908 = arith.cmpi sge, %905, %c0_i32_392 : i32
    %909 = vector.broadcast %908 : i1 to vector<1x40xi1>
    %910 = arith.andi %907, %909 : vector<1x40xi1>
    %911 = vector.extract_strided_slice %889 {offsets = [1, 0], sizes = [1, 40], strides = [1, 1]} : vector<2x40xf32> to vector<1x40xf32>
    %cst_393 = arith.constant 0.000000e+00 : f32
    %912 = vector.broadcast %cst_393 : f32 to vector<1x40xf32>
    %913 = arith.select %910, %911, %912 : vector<1x40xi1>, vector<1x40xf32>
    %cst_394 = arith.constant dense<0.000000e+00> : vector<1xf32>
    %914 = vector.multi_reduction <add>, %913, %cst_394 [1] : vector<1x40xf32> to vector<1xf32>
    %915 = vector.shape_cast %914 : vector<1xf32> to vector<1x1xf32>
    %cst_395 = arith.constant 0.000000e+00 : f32
    %916 = vector.broadcast %cst_395 : f32 to vector<1x1xf32>
    %917 = arith.subf %916, %915 : vector<1x1xf32>
    %918 = tpu.concatenate %903, %917 in 0 : vector<1x1xf32>, vector<1x1xf32> -> vector<2x1xf32>
    %919 = arith.addf %807, %918 : vector<2x1xf32>
    %c6_i32 = arith.constant 6 : i32
    %cst_396 = arith.constant dense<0.000000e+00> : vector<2x128xf32>
    %920 = tpu.matmul %875, %242, %cst_396 {dimension_numbers = #tpu.dot_dimension_numbers<[1], [0], [0], [1], [0, 0, 1, 1], [], []>} : vector<2x32xf32>, vector<32x128xf32>, vector<2x128xf32> -> vector<2x128xf32>
    %921 = vector.broadcast %4 : vector<1x128xf32> to vector<2x128xf32>
    %922 = arith.addf %920, %921 : vector<2x128xf32>
    %923 = vector.extract_strided_slice %922 {offsets = [0, 0], sizes = [2, 32], strides = [1, 1]} : vector<2x128xf32> to vector<2x32xf32>
    %924 = vector.extract_strided_slice %922 {offsets = [0, 32], sizes = [2, 96], strides = [1, 1]} : vector<2x128xf32> to vector<2x96xf32>
    %925 = vector.shape_cast %923 : vector<2x32xf32> to vector<2x1x32xf32>
    %926 = vector.broadcast %925 : vector<2x1x32xf32> to vector<2x32x32xf32>
    %927 = arith.addf %241, %926 : vector<2x32x32xf32>
    %928 = math.tanh %927 : vector<2x32x32xf32>
    %929 = vector.shape_cast %5 : vector<1x32xf32> to vector<1x1x32xf32>
    %930 = vector.broadcast %929 : vector<1x1x32xf32> to vector<2x32x32xf32>
    %931 = arith.mulf %928, %930 : vector<2x32x32xf32>
    %cst_397 = arith.constant dense<0.000000e+00> : vector<2x32xf32>
    %932 = vector.multi_reduction <add>, %931, %cst_397 [2] : vector<2x32x32xf32> to vector<2x32xf32>
    %cst_398 = arith.constant dense<0xFF800000> : vector<2xf32>
    %933 = vector.multi_reduction <maximumf>, %932, %cst_398 [1] : vector<2x32xf32> to vector<2xf32>
    %934 = vector.shape_cast %933 : vector<2xf32> to vector<2x1xf32>
    %935 = vector.broadcast %934 : vector<2x1xf32> to vector<2x32xf32>
    %936 = arith.subf %932, %935 : vector<2x32xf32>
    %937 = math.exp %936 : vector<2x32xf32>
    %cst_399 = arith.constant dense<0.000000e+00> : vector<2xf32>
    %938 = vector.multi_reduction <add>, %937, %cst_399 [1] : vector<2x32xf32> to vector<2xf32>
    %939 = vector.shape_cast %938 : vector<2xf32> to vector<2x1xf32>
    %940 = vector.broadcast %939 : vector<2x1xf32> to vector<2x32xf32>
    %941 = arith.divf %937, %940 : vector<2x32xf32>
    %942 = vector.extract_strided_slice %941 {offsets = [0, 0], sizes = [1, 32], strides = [1, 1]} : vector<2x32xf32> to vector<1x32xf32>
    %cst_400 = arith.constant dense<0.000000e+00> : vector<1x44xf32>
    %943 = tpu.matmul %942, %122, %cst_400 {dimension_numbers = #tpu.dot_dimension_numbers<[1], [0], [0], [1], [0, 0, 1, 1], [], []>} : vector<1x32xf32>, vector<32x44xf32>, vector<1x44xf32> -> vector<1x44xf32>
    %944 = vector.extract_strided_slice %941 {offsets = [1, 0], sizes = [1, 32], strides = [1, 1]} : vector<2x32xf32> to vector<1x32xf32>
    %cst_401 = arith.constant dense<0.000000e+00> : vector<1x44xf32>
    %945 = tpu.matmul %944, %237, %cst_401 {dimension_numbers = #tpu.dot_dimension_numbers<[1], [0], [0], [1], [0, 0, 1, 1], [], []>} : vector<1x32xf32>, vector<32x44xf32>, vector<1x44xf32> -> vector<1x44xf32>
    %946 = tpu.concatenate %943, %945 in 0 : vector<1x44xf32>, vector<1x44xf32> -> vector<2x44xf32>
    %947 = arith.index_cast %c6_i32 : i32 to index
    %c0_402 = arith.constant 0 : index
    %948 = memref.load %arg3[%947, %c0_402] : memref<8x2xi32, #tpu.memory_space<smem>>
    %949 = arith.index_cast %948 : i32 to index
    %c0_403 = arith.constant 0 : index
    %c0_404 = arith.constant 0 : index
    %950 = vector.load %arg2[%949, %c0_403, %c0_404] : memref<40x1x96xf32, #tpu.memory_space<vmem>>, vector<1x1x96xf32>
    %951 = vector.shape_cast %950 : vector<1x1x96xf32> to vector<1x96xf32>
    %952 = arith.index_cast %c6_i32 : i32 to index
    %c1_405 = arith.constant 1 : index
    %953 = memref.load %arg3[%952, %c1_405] : memref<8x2xi32, #tpu.memory_space<smem>>
    %954 = arith.index_cast %953 : i32 to index
    %c0_406 = arith.constant 0 : index
    %c0_407 = arith.constant 0 : index
    %955 = vector.load %arg2[%954, %c0_406, %c0_407] : memref<40x1x96xf32, #tpu.memory_space<vmem>>, vector<1x1x96xf32>
    %956 = vector.shape_cast %955 : vector<1x1x96xf32> to vector<1x96xf32>
    %957 = tpu.concatenate %951, %956 in 0 : vector<1x96xf32>, vector<1x96xf32> -> vector<2x96xf32>
    %958 = vector.broadcast %3 : vector<1x96xf32> to vector<2x96xf32>
    %959 = arith.addf %957, %958 : vector<2x96xf32>
    %cst_408 = arith.constant dense<0.000000e+00> : vector<2x96xf32>
    %960 = tpu.matmul %946, %243, %cst_408 {dimension_numbers = #tpu.dot_dimension_numbers<[1], [0], [0], [1], [0, 0, 1, 1], [], []>} : vector<2x44xf32>, vector<44x96xf32>, vector<2x96xf32> -> vector<2x96xf32>
    %961 = arith.addf %959, %960 : vector<2x96xf32>
    %962 = vector.extract_strided_slice %961 {offsets = [0, 0], sizes = [2, 32], strides = [1, 1]} : vector<2x96xf32> to vector<2x32xf32>
    %963 = vector.extract_strided_slice %924 {offsets = [0, 0], sizes = [2, 32], strides = [1, 1]} : vector<2x96xf32> to vector<2x32xf32>
    %964 = arith.addf %962, %963 : vector<2x32xf32>
    %965 = arith.negf %964 : vector<2x32xf32>
    %966 = math.exp %965 : vector<2x32xf32>
    %cst_409 = arith.constant 1.000000e+00 : f32
    %967 = vector.broadcast %cst_409 : f32 to vector<2x32xf32>
    %968 = arith.addf %967, %966 : vector<2x32xf32>
    %969 = arith.divf %967, %968 : vector<2x32xf32>
    %970 = vector.extract_strided_slice %961 {offsets = [0, 32], sizes = [2, 32], strides = [1, 1]} : vector<2x96xf32> to vector<2x32xf32>
    %971 = vector.extract_strided_slice %924 {offsets = [0, 32], sizes = [2, 32], strides = [1, 1]} : vector<2x96xf32> to vector<2x32xf32>
    %972 = arith.addf %970, %971 : vector<2x32xf32>
    %973 = arith.negf %972 : vector<2x32xf32>
    %974 = math.exp %973 : vector<2x32xf32>
    %cst_410 = arith.constant 1.000000e+00 : f32
    %975 = vector.broadcast %cst_410 : f32 to vector<2x32xf32>
    %976 = arith.addf %975, %974 : vector<2x32xf32>
    %977 = arith.divf %975, %976 : vector<2x32xf32>
    %978 = vector.extract_strided_slice %961 {offsets = [0, 64], sizes = [2, 32], strides = [1, 1]} : vector<2x96xf32> to vector<2x32xf32>
    %979 = vector.extract_strided_slice %924 {offsets = [0, 64], sizes = [2, 32], strides = [1, 1]} : vector<2x96xf32> to vector<2x32xf32>
    %980 = arith.mulf %969, %979 : vector<2x32xf32>
    %981 = arith.addf %978, %980 : vector<2x32xf32>
    %982 = math.tanh %981 : vector<2x32xf32>
    %cst_411 = arith.constant 1.000000e+00 : f32
    %983 = vector.broadcast %cst_411 : f32 to vector<2x32xf32>
    %984 = arith.subf %983, %977 : vector<2x32xf32>
    %985 = arith.mulf %984, %982 : vector<2x32xf32>
    %986 = arith.mulf %977, %875 : vector<2x32xf32>
    %987 = arith.addf %985, %986 : vector<2x32xf32>
    %cst_412 = arith.constant dense<0.000000e+00> : vector<2x40xf32>
    %988 = tpu.matmul %987, %244, %cst_412 {dimension_numbers = #tpu.dot_dimension_numbers<[1], [0], [0], [1], [0, 0, 1, 1], [], []>} : vector<2x32xf32>, vector<32x40xf32>, vector<2x40xf32> -> vector<2x40xf32>
    %989 = vector.broadcast %6 : vector<1x40xf32> to vector<2x40xf32>
    %990 = arith.addf %988, %989 : vector<2x40xf32>
    %cst_413 = arith.constant dense<0xFF800000> : vector<2xf32>
    %991 = vector.multi_reduction <maximumf>, %990, %cst_413 [1] : vector<2x40xf32> to vector<2xf32>
    %992 = vector.shape_cast %991 : vector<2xf32> to vector<2x1xf32>
    %993 = vector.broadcast %992 : vector<2x1xf32> to vector<2x40xf32>
    %994 = arith.subf %990, %993 : vector<2x40xf32>
    %995 = math.exp %994 : vector<2x40xf32>
    %cst_414 = arith.constant dense<0.000000e+00> : vector<2xf32>
    %996 = vector.multi_reduction <add>, %995, %cst_414 [1] : vector<2x40xf32> to vector<2xf32>
    %997 = vector.shape_cast %996 : vector<2xf32> to vector<2x1xf32>
    %998 = math.log %997 : vector<2x1xf32>
    %999 = arith.addf %998, %992 : vector<2x1xf32>
    %1000 = vector.broadcast %999 : vector<2x1xf32> to vector<2x40xf32>
    %1001 = arith.subf %990, %1000 : vector<2x40xf32>
    %1002 = arith.index_cast %c6_i32 : i32 to index
    %c0_415 = arith.constant 0 : index
    %1003 = memref.load %arg4[%1002, %c0_415] : memref<8x2xi32, #tpu.memory_space<smem>>
    %1004 = vector.broadcast %1003 : i32 to vector<1x40xi32>
    %1005 = arith.cmpi eq, %245, %1004 : vector<1x40xi32>
    %c0_i32_416 = arith.constant 0 : i32
    %1006 = arith.cmpi sge, %1003, %c0_i32_416 : i32
    %1007 = vector.broadcast %1006 : i1 to vector<1x40xi1>
    %1008 = arith.andi %1005, %1007 : vector<1x40xi1>
    %1009 = vector.extract_strided_slice %1001 {offsets = [0, 0], sizes = [1, 40], strides = [1, 1]} : vector<2x40xf32> to vector<1x40xf32>
    %cst_417 = arith.constant 0.000000e+00 : f32
    %1010 = vector.broadcast %cst_417 : f32 to vector<1x40xf32>
    %1011 = arith.select %1008, %1009, %1010 : vector<1x40xi1>, vector<1x40xf32>
    %cst_418 = arith.constant dense<0.000000e+00> : vector<1xf32>
    %1012 = vector.multi_reduction <add>, %1011, %cst_418 [1] : vector<1x40xf32> to vector<1xf32>
    %1013 = vector.shape_cast %1012 : vector<1xf32> to vector<1x1xf32>
    %cst_419 = arith.constant 0.000000e+00 : f32
    %1014 = vector.broadcast %cst_419 : f32 to vector<1x1xf32>
    %1015 = arith.subf %1014, %1013 : vector<1x1xf32>
    %1016 = arith.index_cast %c6_i32 : i32 to index
    %c1_420 = arith.constant 1 : index
    %1017 = memref.load %arg4[%1016, %c1_420] : memref<8x2xi32, #tpu.memory_space<smem>>
    %1018 = vector.broadcast %1017 : i32 to vector<1x40xi32>
    %1019 = arith.cmpi eq, %245, %1018 : vector<1x40xi32>
    %c0_i32_421 = arith.constant 0 : i32
    %1020 = arith.cmpi sge, %1017, %c0_i32_421 : i32
    %1021 = vector.broadcast %1020 : i1 to vector<1x40xi1>
    %1022 = arith.andi %1019, %1021 : vector<1x40xi1>
    %1023 = vector.extract_strided_slice %1001 {offsets = [1, 0], sizes = [1, 40], strides = [1, 1]} : vector<2x40xf32> to vector<1x40xf32>
    %cst_422 = arith.constant 0.000000e+00 : f32
    %1024 = vector.broadcast %cst_422 : f32 to vector<1x40xf32>
    %1025 = arith.select %1022, %1023, %1024 : vector<1x40xi1>, vector<1x40xf32>
    %cst_423 = arith.constant dense<0.000000e+00> : vector<1xf32>
    %1026 = vector.multi_reduction <add>, %1025, %cst_423 [1] : vector<1x40xf32> to vector<1xf32>
    %1027 = vector.shape_cast %1026 : vector<1xf32> to vector<1x1xf32>
    %cst_424 = arith.constant 0.000000e+00 : f32
    %1028 = vector.broadcast %cst_424 : f32 to vector<1x1xf32>
    %1029 = arith.subf %1028, %1027 : vector<1x1xf32>
    %1030 = tpu.concatenate %1015, %1029 in 0 : vector<1x1xf32>, vector<1x1xf32> -> vector<2x1xf32>
    %1031 = arith.addf %919, %1030 : vector<2x1xf32>
    %c7_i32 = arith.constant 7 : i32
    %cst_425 = arith.constant dense<0.000000e+00> : vector<2x128xf32>
    %1032 = tpu.matmul %987, %242, %cst_425 {dimension_numbers = #tpu.dot_dimension_numbers<[1], [0], [0], [1], [0, 0, 1, 1], [], []>} : vector<2x32xf32>, vector<32x128xf32>, vector<2x128xf32> -> vector<2x128xf32>
    %1033 = vector.broadcast %4 : vector<1x128xf32> to vector<2x128xf32>
    %1034 = arith.addf %1032, %1033 : vector<2x128xf32>
    %1035 = vector.extract_strided_slice %1034 {offsets = [0, 0], sizes = [2, 32], strides = [1, 1]} : vector<2x128xf32> to vector<2x32xf32>
    %1036 = vector.extract_strided_slice %1034 {offsets = [0, 32], sizes = [2, 96], strides = [1, 1]} : vector<2x128xf32> to vector<2x96xf32>
    %1037 = vector.shape_cast %1035 : vector<2x32xf32> to vector<2x1x32xf32>
    %1038 = vector.broadcast %1037 : vector<2x1x32xf32> to vector<2x32x32xf32>
    %1039 = arith.addf %241, %1038 : vector<2x32x32xf32>
    %1040 = math.tanh %1039 : vector<2x32x32xf32>
    %1041 = vector.shape_cast %5 : vector<1x32xf32> to vector<1x1x32xf32>
    %1042 = vector.broadcast %1041 : vector<1x1x32xf32> to vector<2x32x32xf32>
    %1043 = arith.mulf %1040, %1042 : vector<2x32x32xf32>
    %cst_426 = arith.constant dense<0.000000e+00> : vector<2x32xf32>
    %1044 = vector.multi_reduction <add>, %1043, %cst_426 [2] : vector<2x32x32xf32> to vector<2x32xf32>
    %cst_427 = arith.constant dense<0xFF800000> : vector<2xf32>
    %1045 = vector.multi_reduction <maximumf>, %1044, %cst_427 [1] : vector<2x32xf32> to vector<2xf32>
    %1046 = vector.shape_cast %1045 : vector<2xf32> to vector<2x1xf32>
    %1047 = vector.broadcast %1046 : vector<2x1xf32> to vector<2x32xf32>
    %1048 = arith.subf %1044, %1047 : vector<2x32xf32>
    %1049 = math.exp %1048 : vector<2x32xf32>
    %cst_428 = arith.constant dense<0.000000e+00> : vector<2xf32>
    %1050 = vector.multi_reduction <add>, %1049, %cst_428 [1] : vector<2x32xf32> to vector<2xf32>
    %1051 = vector.shape_cast %1050 : vector<2xf32> to vector<2x1xf32>
    %1052 = vector.broadcast %1051 : vector<2x1xf32> to vector<2x32xf32>
    %1053 = arith.divf %1049, %1052 : vector<2x32xf32>
    %1054 = vector.extract_strided_slice %1053 {offsets = [0, 0], sizes = [1, 32], strides = [1, 1]} : vector<2x32xf32> to vector<1x32xf32>
    %cst_429 = arith.constant dense<0.000000e+00> : vector<1x44xf32>
    %1055 = tpu.matmul %1054, %122, %cst_429 {dimension_numbers = #tpu.dot_dimension_numbers<[1], [0], [0], [1], [0, 0, 1, 1], [], []>} : vector<1x32xf32>, vector<32x44xf32>, vector<1x44xf32> -> vector<1x44xf32>
    %1056 = vector.extract_strided_slice %1053 {offsets = [1, 0], sizes = [1, 32], strides = [1, 1]} : vector<2x32xf32> to vector<1x32xf32>
    %cst_430 = arith.constant dense<0.000000e+00> : vector<1x44xf32>
    %1057 = tpu.matmul %1056, %237, %cst_430 {dimension_numbers = #tpu.dot_dimension_numbers<[1], [0], [0], [1], [0, 0, 1, 1], [], []>} : vector<1x32xf32>, vector<32x44xf32>, vector<1x44xf32> -> vector<1x44xf32>
    %1058 = tpu.concatenate %1055, %1057 in 0 : vector<1x44xf32>, vector<1x44xf32> -> vector<2x44xf32>
    %1059 = arith.index_cast %c7_i32 : i32 to index
    %c0_431 = arith.constant 0 : index
    %1060 = memref.load %arg3[%1059, %c0_431] : memref<8x2xi32, #tpu.memory_space<smem>>
    %1061 = arith.index_cast %1060 : i32 to index
    %c0_432 = arith.constant 0 : index
    %c0_433 = arith.constant 0 : index
    %1062 = vector.load %arg2[%1061, %c0_432, %c0_433] : memref<40x1x96xf32, #tpu.memory_space<vmem>>, vector<1x1x96xf32>
    %1063 = vector.shape_cast %1062 : vector<1x1x96xf32> to vector<1x96xf32>
    %1064 = arith.index_cast %c7_i32 : i32 to index
    %c1_434 = arith.constant 1 : index
    %1065 = memref.load %arg3[%1064, %c1_434] : memref<8x2xi32, #tpu.memory_space<smem>>
    %1066 = arith.index_cast %1065 : i32 to index
    %c0_435 = arith.constant 0 : index
    %c0_436 = arith.constant 0 : index
    %1067 = vector.load %arg2[%1066, %c0_435, %c0_436] : memref<40x1x96xf32, #tpu.memory_space<vmem>>, vector<1x1x96xf32>
    %1068 = vector.shape_cast %1067 : vector<1x1x96xf32> to vector<1x96xf32>
    %1069 = tpu.concatenate %1063, %1068 in 0 : vector<1x96xf32>, vector<1x96xf32> -> vector<2x96xf32>
    %1070 = vector.broadcast %3 : vector<1x96xf32> to vector<2x96xf32>
    %1071 = arith.addf %1069, %1070 : vector<2x96xf32>
    %cst_437 = arith.constant dense<0.000000e+00> : vector<2x96xf32>
    %1072 = tpu.matmul %1058, %243, %cst_437 {dimension_numbers = #tpu.dot_dimension_numbers<[1], [0], [0], [1], [0, 0, 1, 1], [], []>} : vector<2x44xf32>, vector<44x96xf32>, vector<2x96xf32> -> vector<2x96xf32>
    %1073 = arith.addf %1071, %1072 : vector<2x96xf32>
    %1074 = vector.extract_strided_slice %1073 {offsets = [0, 0], sizes = [2, 32], strides = [1, 1]} : vector<2x96xf32> to vector<2x32xf32>
    %1075 = vector.extract_strided_slice %1036 {offsets = [0, 0], sizes = [2, 32], strides = [1, 1]} : vector<2x96xf32> to vector<2x32xf32>
    %1076 = arith.addf %1074, %1075 : vector<2x32xf32>
    %1077 = arith.negf %1076 : vector<2x32xf32>
    %1078 = math.exp %1077 : vector<2x32xf32>
    %cst_438 = arith.constant 1.000000e+00 : f32
    %1079 = vector.broadcast %cst_438 : f32 to vector<2x32xf32>
    %1080 = arith.addf %1079, %1078 : vector<2x32xf32>
    %1081 = arith.divf %1079, %1080 : vector<2x32xf32>
    %1082 = vector.extract_strided_slice %1073 {offsets = [0, 32], sizes = [2, 32], strides = [1, 1]} : vector<2x96xf32> to vector<2x32xf32>
    %1083 = vector.extract_strided_slice %1036 {offsets = [0, 32], sizes = [2, 32], strides = [1, 1]} : vector<2x96xf32> to vector<2x32xf32>
    %1084 = arith.addf %1082, %1083 : vector<2x32xf32>
    %1085 = arith.negf %1084 : vector<2x32xf32>
    %1086 = math.exp %1085 : vector<2x32xf32>
    %cst_439 = arith.constant 1.000000e+00 : f32
    %1087 = vector.broadcast %cst_439 : f32 to vector<2x32xf32>
    %1088 = arith.addf %1087, %1086 : vector<2x32xf32>
    %1089 = arith.divf %1087, %1088 : vector<2x32xf32>
    %1090 = vector.extract_strided_slice %1073 {offsets = [0, 64], sizes = [2, 32], strides = [1, 1]} : vector<2x96xf32> to vector<2x32xf32>
    %1091 = vector.extract_strided_slice %1036 {offsets = [0, 64], sizes = [2, 32], strides = [1, 1]} : vector<2x96xf32> to vector<2x32xf32>
    %1092 = arith.mulf %1081, %1091 : vector<2x32xf32>
    %1093 = arith.addf %1090, %1092 : vector<2x32xf32>
    %1094 = math.tanh %1093 : vector<2x32xf32>
    %cst_440 = arith.constant 1.000000e+00 : f32
    %1095 = vector.broadcast %cst_440 : f32 to vector<2x32xf32>
    %1096 = arith.subf %1095, %1089 : vector<2x32xf32>
    %1097 = arith.mulf %1096, %1094 : vector<2x32xf32>
    %1098 = arith.mulf %1089, %987 : vector<2x32xf32>
    %1099 = arith.addf %1097, %1098 : vector<2x32xf32>
    %cst_441 = arith.constant dense<0.000000e+00> : vector<2x40xf32>
    %1100 = tpu.matmul %1099, %244, %cst_441 {dimension_numbers = #tpu.dot_dimension_numbers<[1], [0], [0], [1], [0, 0, 1, 1], [], []>} : vector<2x32xf32>, vector<32x40xf32>, vector<2x40xf32> -> vector<2x40xf32>
    %1101 = vector.broadcast %6 : vector<1x40xf32> to vector<2x40xf32>
    %1102 = arith.addf %1100, %1101 : vector<2x40xf32>
    %cst_442 = arith.constant dense<0xFF800000> : vector<2xf32>
    %1103 = vector.multi_reduction <maximumf>, %1102, %cst_442 [1] : vector<2x40xf32> to vector<2xf32>
    %1104 = vector.shape_cast %1103 : vector<2xf32> to vector<2x1xf32>
    %1105 = vector.broadcast %1104 : vector<2x1xf32> to vector<2x40xf32>
    %1106 = arith.subf %1102, %1105 : vector<2x40xf32>
    %1107 = math.exp %1106 : vector<2x40xf32>
    %cst_443 = arith.constant dense<0.000000e+00> : vector<2xf32>
    %1108 = vector.multi_reduction <add>, %1107, %cst_443 [1] : vector<2x40xf32> to vector<2xf32>
    %1109 = vector.shape_cast %1108 : vector<2xf32> to vector<2x1xf32>
    %1110 = math.log %1109 : vector<2x1xf32>
    %1111 = arith.addf %1110, %1104 : vector<2x1xf32>
    %1112 = vector.broadcast %1111 : vector<2x1xf32> to vector<2x40xf32>
    %1113 = arith.subf %1102, %1112 : vector<2x40xf32>
    %1114 = arith.index_cast %c7_i32 : i32 to index
    %c0_444 = arith.constant 0 : index
    %1115 = memref.load %arg4[%1114, %c0_444] : memref<8x2xi32, #tpu.memory_space<smem>>
    %1116 = vector.broadcast %1115 : i32 to vector<1x40xi32>
    %1117 = arith.cmpi eq, %245, %1116 : vector<1x40xi32>
    %c0_i32_445 = arith.constant 0 : i32
    %1118 = arith.cmpi sge, %1115, %c0_i32_445 : i32
    %1119 = vector.broadcast %1118 : i1 to vector<1x40xi1>
    %1120 = arith.andi %1117, %1119 : vector<1x40xi1>
    %1121 = vector.extract_strided_slice %1113 {offsets = [0, 0], sizes = [1, 40], strides = [1, 1]} : vector<2x40xf32> to vector<1x40xf32>
    %cst_446 = arith.constant 0.000000e+00 : f32
    %1122 = vector.broadcast %cst_446 : f32 to vector<1x40xf32>
    %1123 = arith.select %1120, %1121, %1122 : vector<1x40xi1>, vector<1x40xf32>
    %cst_447 = arith.constant dense<0.000000e+00> : vector<1xf32>
    %1124 = vector.multi_reduction <add>, %1123, %cst_447 [1] : vector<1x40xf32> to vector<1xf32>
    %1125 = vector.shape_cast %1124 : vector<1xf32> to vector<1x1xf32>
    %cst_448 = arith.constant 0.000000e+00 : f32
    %1126 = vector.broadcast %cst_448 : f32 to vector<1x1xf32>
    %1127 = arith.subf %1126, %1125 : vector<1x1xf32>
    %1128 = arith.index_cast %c7_i32 : i32 to index
    %c1_449 = arith.constant 1 : index
    %1129 = memref.load %arg4[%1128, %c1_449] : memref<8x2xi32, #tpu.memory_space<smem>>
    %1130 = vector.broadcast %1129 : i32 to vector<1x40xi32>
    %1131 = arith.cmpi eq, %245, %1130 : vector<1x40xi32>
    %c0_i32_450 = arith.constant 0 : i32
    %1132 = arith.cmpi sge, %1129, %c0_i32_450 : i32
    %1133 = vector.broadcast %1132 : i1 to vector<1x40xi1>
    %1134 = arith.andi %1131, %1133 : vector<1x40xi1>
    %1135 = vector.extract_strided_slice %1113 {offsets = [1, 0], sizes = [1, 40], strides = [1, 1]} : vector<2x40xf32> to vector<1x40xf32>
    %cst_451 = arith.constant 0.000000e+00 : f32
    %1136 = vector.broadcast %cst_451 : f32 to vector<1x40xf32>
    %1137 = arith.select %1134, %1135, %1136 : vector<1x40xi1>, vector<1x40xf32>
    %cst_452 = arith.constant dense<0.000000e+00> : vector<1xf32>
    %1138 = vector.multi_reduction <add>, %1137, %cst_452 [1] : vector<1x40xf32> to vector<1xf32>
    %1139 = vector.shape_cast %1138 : vector<1xf32> to vector<1x1xf32>
    %cst_453 = arith.constant 0.000000e+00 : f32
    %1140 = vector.broadcast %cst_453 : f32 to vector<1x1xf32>
    %1141 = arith.subf %1140, %1139 : vector<1x1xf32>
    %1142 = tpu.concatenate %1127, %1141 in 0 : vector<1x1xf32>, vector<1x1xf32> -> vector<2x1xf32>
    %1143 = arith.addf %1031, %1142 : vector<2x1xf32>
    %c8_i32 = arith.constant 8 : i32
    %1144 = vector.shape_cast %1143 : vector<2x1xf32> to vector<1x2x1xf32>
    %cst_454 = arith.constant dense<0.000000e+00> : vector<1xf32>
    %1145 = vector.multi_reduction <add>, %1144, %cst_454 [1, 2] : vector<1x2x1xf32> to vector<1xf32>
    %1146 = vector.shape_cast %1145 : vector<1xf32> to vector<1x1x1xf32>
    %1147 = vector.extract %1146[0, 0, 0] : f32 from vector<1x1x1xf32>
    %cst_455 = arith.constant 2.000000e-02 : f32
    %1148 = arith.mulf %cst_455, %1147 : f32
    %cst_456 = arith.constant 2.000000e+00 : f32
    %1149 = arith.divf %1148, %cst_456 : f32
    %1150 = vector.broadcast %1149 : f32 to vector<1x1xf32>
    %c0_457 = arith.constant 0 : index
    %c0_458 = arith.constant 0 : index
    %1151 = vector.load %arg5[%c0_457, %c0_458] : memref<1x1xf32, #tpu.memory_space<vmem>>, vector<1x1xf32>
    tpu.vector_store %arg5[%c0_457, %c0_458], %1150 {strides = array<i32>} : memref<1x1xf32, #tpu.memory_space<vmem>>, vector<1x1xf32>,
    return
  }
}

</mosaic_0001>

<bundles_post_ra>
// kernel: spatial_att_seq_head_train_forward.1
= control target key start
LH: loop header
LB: loop body
LE: loop exit
PB: predicated region body
PF: predicated region fallthrough
CT: control target
= control target key end

     0   :  { %10 = vsyncpa [#allocation4], 0  ;;  %s27305_s0 = inlined_call_operand.vmem [shape: f32[2,60,16], index: 0, kind: input, shape index: {}]   ;;  %s27306_s1 = inlined_call_operand.vmem [shape: f32[2056,128], index: 1, kind: input, shape index: {}]   ;;  %s27307_s2 = inlined_call_operand.vmem [shape: f32[40,1,96], index: 2, kind: input, shape index: {}]   ;;  %s27308_s3 = inlined_call_operand.vmem [shape: s32[8,2], index: 3, kind: input, shape index: {}]   ;;  %s27309_s4 = inlined_call_operand.vmem [shape: s32[8,2], index: 4, kind: input, shape index: {}]   ;;  %s27310_s5 = inlined_call_operand.hbm [shape: f32[1,1], index: 5, kind: output, shape index: {}]  }
   0x1   :  { %11 = vsyncpa [#allocation6], 0 }
   0x2   :  { %12 = vsyncpa [#allocation3], 0  ;;  %s25_s20 = sshll.u32 %s27308_s3, 4  ;;  %s35_s23 = sshll.u32 %s27309_s4, 4  ;;  %s26_s20 = int_to_ptr.vmem [resolvable:$true] %s25_s20  ;;  %s36_s23 = int_to_ptr.vmem [resolvable:$true] %s35_s23 }
   0x3   :  { %s22481_s24 = scalar_lea.vmem %s26_s20, 128  ;;  %p22486_p1 = scmp.lt.s32.totalorder %s26_s20, %s26_s20 }
   0x4   :  { %p22482_p0 = scmp.ne.s32.totalorder %s26_s20, %s22481_s24  ;;  %p22487_p2 = scmp.lt.s32.totalorder %s22481_s24, %s22481_s24 }
   0x6   :  { %p22488_p3 = por %p22487_p2, %p22486_p1 }
   0x8   :  { %p22489_p4 = pnand %p22488_p3, %p22482_p0 }
   0xa   :  { %22492 = shalt.err (!%p22489_p4)
}
   0xb   :  { %s22533_s25 = smov [#allocation2]   ;;  %s22493_s26 = scalar_lea.vmem %s36_s23, 128 }
   0xc   :  { %28 = dma.vmem_to_smem %s26_s20, 128, %s22533_s25, [#allocation4]  }
   0xd   :  { %p22494_p5 = scmp.ne.s32.totalorder %s36_s23, %s22493_s26  ;;  %p22498_p6 = scmp.lt.s32.totalorder %s36_s23, %s36_s23 }
   0xe   :  { %p22499_p7 = scmp.lt.s32.totalorder %s22493_s26, %s22493_s26 }
  0x10   :  { %p22500_p8 = por %p22499_p7, %p22498_p6 }
  0x12   :  { %p22501_p9 = pnand %p22500_p8, %p22494_p5 }
  0x14   :  { %22504 = shalt.err (!%p22501_p9)
}
  0x15   :  { %s22534_s3 = smov [#allocation5]  }
  0x16   :  { %38 = dma.vmem_to_smem %s36_s23, 128, %s22534_s3, [#allocation6]  }
  0x17   :  { %22527 = dma.done.wait [#allocation4], 128  }
  0x18   :  { %22528 = vsyncadd [#allocation4], 4294967168 }
  0x19   :  { %22529 = dma.done.wait [#allocation6], 128  }
  0x1a   :  { %22530 = vsyncadd [#allocation6], 4294967168 }
  0x1b   :  { %45 = sfence }
  0x1c   :  { %v229_v0 = vld [vmem:[%s27306_s1 + $0x630] sm:$0xff]  ;;  %v230_v1 = vld [vmem:[%s27306_s1 + $0x638] sm:$0xff]  ;;  %v22590_v2 = vld [vmem:[%s27305_s0] sm:$0xff]  ;;  %vm83_vm0 = vcmask 130048   ;;  %vm336_vm1 = vcmask 490496   ;;  %vm385_vm2 = vcmask 1043456  }
  0x1d   :  { %v22592_v3 = vpack.c.bf16 %v230_v1, %v229_v0  ;;  %18179 = vmatprep.mubr.msk.f32.mxu1 %vm83_vm0, %v22590_v2  ;;  %18163 = vmatprep.mubr.msk.f32.mxu0 %vm83_vm0, %v22590_v2  ;;  %v81_v4 = vld [vmem:[%s27306_s1 + $0x620] sm:$0xff]  ;;  %v22605_v5 = vld [vmem:[%s27305_s0 + $0x8] sm:$0xff]  ;;  %v1081_v10 = vld [vmem:[%s27306_s1 + $0x650] sm:$0xff]  ;;  %vm22535_vm3 = vmmov 1   ;;  %vm3673_vm5 = vcmask 261120   ;;  %s22536_s9 = smov 32  }
  0x1e   :  { %v82_v6 = vld [vmem:[%s27306_s1 + $0x628] sm:$0xff]  ;;  %v746_v8 = vld [vmem:[%s27306_s1 + $0x640] sm:$0xff]  ;;  %v22625_v11 = vld [vmem:[%s27305_s0 + $0x10] sm:$0xff]  ;;  %vm5244_vm6 = vcmask 359424   ;;  %vm22538_vm7 = vmmov 0   ;;  %vm10025_vm8 = vcmask 130112  }
  0x1f   :  { %20416 = vmatprep.subr.bf16.mxu1 %v22592_v3  ;;  %v22611_v7 = vpack.c.bf16 %v82_v6, %v81_v4  ;;  %v747_v9 = vld [vmem:[%s27306_s1 + $0x648] sm:$0xff]  ;;  %v1082_v13 = vld [vmem:[%s27306_s1 + $0x658] sm:$0xff]  ;;  %v22649_v16 = vld [vmem:[%s27305_s0 + $0x20] sm:$0xff]  ;;  %vm10032_vm9 = vcmask 195712   ;;  %vm10039_vm10 = vcmask 261312   ;;  %vm10060_vm11 = vcmask 1041409  }
  0x20   :  { %20418 = vmatpush3.bf16.msra.mxu1 %v22592_v3  ;;  %v22627_v12 = vpack.c.bf16 %v747_v9, %v746_v8  ;;  %v22633_v14 = vpack.c.bf16 %v1082_v13, %v1081_v10  ;;  %v22643_v15 = vld [vmem:[%s27305_s0 + $0x18] sm:$0xff]  ;;  %v22664_v17 = vld [vmem:[%s27305_s0 + $0x28] sm:$0xff]  ;;  %v22669_v18 = vld [vmem:[%s27305_s0 + $0x30] sm:$0xff]  ;;  %vm10063_vm12 = vcmask 254976   ;;  %s22542_s6 = smov 96   ;;  %vm27317_vm13 = vcmask 1040384  }
  0x21   :  { %20412 = vmatprep.subr.bf16.mxu0 %v22611_v7  ;;  %v22682_v19 = vld [vmem:[%s27305_s0 + $0x38] sm:$0xf]  ;;  %v1416_v20 = vld [vmem:[%s27306_s1 + $0x660] sm:$0xff]  ;;  %v1417_v21 = vld [vmem:[%s27306_s1 + $0x668] sm:$0xff]  ;;  %s10417_s19 = sld [smem:[#allocation2]]  ;;  %s16808_s20 = sld [smem:[#allocation2 + $0x1]] }
  0x22   :  { %20414 = vmatpush3.bf16.msra.mxu0 %v22611_v7  ;;  %20456 = vmatprep.subr.bf16.mxu1 %v22627_v12  ;;  %v22698_v22 = vpack.c.bf16 %v1417_v21, %v1416_v20  ;;  %v1751_v23 = vld [vmem:[%s27306_s1 + $0x670] sm:$0xff]  ;;  %v1752_v24 = vld [vmem:[%s27306_s1 + $0x678] sm:$0xff]  ;;  %v2086_v26 = vld [vmem:[%s27306_s1 + $0x680] sm:$0xff]  ;;  %s22543_s3 = smov 64   ;;  %s16818_s11 = sld [smem:[#allocation2 + $0x80]]  ;;  %vm10619_vm14 = vcmask 320512  }
  0x23   :  { %18180 = vmatmul.mubr.msk.f32.vlgmr.msra.gmra.mrb[0].mxu1 %vm83_vm0, %v22605_v5  ;;  %v22726_v25 = vpack.c.bf16 %v1752_v24, %v1751_v23  ;;  %v2087_v27 = vld [vmem:[%s27306_s1 + $0x688] sm:$0xff]  ;;  %v2421_v29 = vld [vmem:[%s27306_s1 + $0x690] sm:$0xff]  ;;  %v2422_v30 = vld [vmem:[%s27306_s1 + $0x698] sm:$0xff]  ;;  %s16830_s18 = sld [smem:[#allocation2 + $0x100]]  ;;  %s16843_s4 = sld [smem:[#allocation2 + $0x181]] }
  0x24   :  { %18182 = vmatprep.mubr.msk.f32.mxu1 %vm83_vm0, %v22625_v11  ;;  %20458 = vmatpush3.bf16.msra.mxu1 %v22627_v12  ;;  %v22752_v28 = vpack.c.bf16 %v2087_v27, %v2086_v26  ;;  %v22778_v31 = vpack.c.bf16 %v2422_v30, %v2421_v29  ;;  %v213_v32 = vld [vmem:[%s27306_s1 + $0x80] sm:$0xff]  ;;  %v2757_v34 = vld [vmem:[%s27306_s1 + $0x6a8] sm:$0xff]  ;;  %vm22859_vm4 = vmpackc.low %vm385_vm2, %vm22535_vm3  ;;  %s16854_s10 = sld [smem:[#allocation2 + $0x200]]  ;;  %vm10642_vm2 = vcmask 319488  }
  0x25   :  { %18164 = vmatmul.mubr.msk.f32.vlgmr.msra.gmra.mrb[0].mxu0 %vm83_vm0, %v22605_v5  ;;  %20478 = vmatprep.subr.bf16.mxu1 %v22633_v14  ;;  %v2756_v33 = vld [vmem:[%s27306_s1 + $0x6a0] sm:$0xff]  ;;  %v214_v61 = vld [vmem:[%s27306_s1 + $0x88] sm:$0xff]  ;;  %v215_v0 = vld [vmem:[%s27306_s1 + $0x90] sm:$0xff]  ;;  %s27001_s30 = sld [smem:[#allocation5 + $0x300]] }
  0x26   :  { %18166 = vmatprep.mubr.msk.f32.mxu0 %vm83_vm0, %v22625_v11  ;;  %v22839_v35 = vpack.c.bf16 %v2757_v34, %v2756_v33  ;;  %v216_v4 = vld [vmem:[%s27306_s1 + $0x98] sm:$0xff]  ;;  %v217_v6 = vld [vmem:[%s27306_s1 + $0xa0] sm:$0xff]  ;;  %v218_v10 = vld [vmem:[%s27306_s1 + $0xa8] sm:$0xff] }
  0x27   :  { %18183 = vmatmul.mubr.msk.f32.gmra.mrb[2].mxu1 %vm83_vm0, %v22643_v15  ;;  %v219_v13 = vld [vmem:[%s27306_s1 + $0xb0] sm:$0xff]  ;;  %v222_v23 = vld [vmem:[%s27306_s1 + $0xc8] sm:$0xff]  ;;  %v224_v30 = vld [vmem:[%s27306_s1 + $0xd8] sm:$0xff]  ;;  %s10418_s23 = scalar_lea.vmem %s27307_s2, %s10417_s19  ;;  %s10421_s26 = scalar_lea.vmem %s27307_s2, %s16808_s20 }
  0x28   :  { %18185 = vmatprep.mubr.msk.f32.mxu1 %vm83_vm0, %v22649_v16  ;;  %v223_v26 = vld [vmem:[%s27306_s1 + $0xd0] sm:$0xff]  ;;  %v225_v33 = vld [vmem:[%s27306_s1 + $0xe0] sm:$0xff]  ;;  %s11215_s14 = scalar_lea.vmem %s27307_s2, %s16818_s11  ;;  %s16831_s19 = sld [smem:[#allocation2 + $0x101]] }
  0x29   :  { %18167 = vmatmul.mubr.msk.f32.gmra.mrb[2].mxu0 %vm83_vm0, %v22643_v15  ;;  %s11998_s22 = scalar_lea.vmem %s27307_s2, %s16830_s18  ;;  %s12784_s8 = scalar_lea.vmem %s27307_s2, %s16843_s4 }
  0x2a   :  { %18169 = vmatprep.mubr.msk.f32.mxu0 %vm83_vm0, %v22649_v16  ;;  %s16855_s11 = sld [smem:[#allocation2 + $0x201]]  ;;  %s13564_s13 = scalar_lea.vmem %s27307_s2, %s16854_s10 }
  0x2b   :  { %18186 = vmatmul.mubr.msk.f32.gmra.mrb[4].mxu1 %vm83_vm0, %v22664_v17  ;;  %s16867_s18 = sld [smem:[#allocation2 + $0x281]]  ;;  %p15336_p8 = scmp.ge.s32.totalorder %s27001_s30, 0 }
  0x2c   :  { %18188 = vmatprep.mubr.msk.f32.mxu1 %vm83_vm0, %v22669_v18 }
  0x2d   :  { %18170 = vmatmul.mubr.msk.f32.gmra.mrb[4].mxu0 %vm83_vm0, %v22664_v17 }
  0x2e   :  { %18172 = vmatprep.mubr.msk.f32.mxu0 %vm83_vm0, %v22669_v18  ;;  %s12001_s25 = scalar_lea.vmem %s27307_s2, %s16831_s19  ;;  %s26948_s19 = sld [smem:[#allocation5 + $0x81]] }
  0x2f   :  { %18189 = vmatmul.mubr.msk.f32.gmra.mrb[6].mxu1 %vm83_vm0, %v22682_v19 }
  0x30   :  { %18275 = vmatprep.mubr.msk.f32.mxu1 %vm83_vm0, %v22590_v2  ;;  %s13567_s16 = scalar_lea.vmem %s27307_s2, %s16855_s11 }
  0x31   :  { %18173 = vmatmul.mubr.msk.f32.gmra.mrb[6].mxu0 %vm83_vm0, %v22682_v19  ;;  %s14350_s24 = scalar_lea.vmem %s27307_s2, %s16867_s18  ;;  %s26945_s18 = sld [smem:[#allocation5 + $0x80]] }
  0x32   :  { %18207 = vmatprep.mubr.msk.f32.mxu0 %vm336_vm1, %v213_v32 }
  0x33   :  { %18276 = vmatmul.mubr.msk.f32.vlgmr.msra.gmra.mrb[8].mxu1 %vm83_vm0, %v22605_v5 }
  0x34   :  { %18278 = vmatprep.mubr.msk.f32.mxu1 %vm83_vm0, %v22625_v11  ;;  %20480 = vmatpush3.bf16.msra.mxu1 %v22633_v14  ;;  %p11434_p1 = scmp.ge.s32.totalorder %s26948_s19, 0 }
  0x35   :  { %20500 = vmatprep.subr.bf16.mxu1 %v22698_v22 }
  0x36   :  { %s26986_s27 = scalar_select %p11434_p1, 1, 0 }
  0x37   :  { %18279 = vmatmul.mubr.msk.f32.gmra.mrb[10].mxu1 %vm83_vm0, %v22643_v15  ;;  %p11421_p0 = scmp.ge.s32.totalorder %s26945_s18, 0 }
  0x38   :  { %18281 = vmatprep.mubr.msk.f32.mxu1 %vm83_vm0, %v22649_v16 }
  0x39   :  { %s26975_s4 = scalar_select %p11421_p0, 1, 0 }
  0x3b   :  { %18282 = vmatmul.mubr.msk.f32.gmra.mrb[12].mxu1 %vm83_vm0, %v22664_v17 }
  0x3c   :  { %18284 = vmatprep.mubr.msk.f32.mxu1 %vm83_vm0, %v22669_v18 }
  0x3f   :  { %18285 = vmatmul.mubr.msk.f32.gmra.mrb[14].mxu1 %vm83_vm0, %v22682_v19 }
  0x40   :  { %18331 = vmatprep.mubr.msk.f32.mxu1 %vm83_vm0, %v22590_v2 }
  0x43   :  { %18332 = vmatmul.mubr.msk.f32.vlgmr.msra.gmra.mrb[16].mxu1 %vm83_vm0, %v22605_v5 }
  0x44   :  { %18334 = vmatprep.mubr.msk.f32.mxu1 %vm83_vm0, %v22625_v11  ;;  %20502 = vmatpush3.bf16.msra.mxu1 %v22698_v22 }
  0x45   :  { %20522 = vmatprep.subr.bf16.mxu1 %v22726_v25 }
  0x47   :  { %18335 = vmatmul.mubr.msk.f32.gmra.mrb[18].mxu1 %vm83_vm0, %v22643_v15 }
  0x48   :  { %18337 = vmatprep.mubr.msk.f32.mxu1 %vm83_vm0, %v22649_v16 }
  0x4b   :  { %18338 = vmatmul.mubr.msk.f32.gmra.mrb[20].mxu1 %vm83_vm0, %v22664_v17 }
  0x4c   :  { %18340 = vmatprep.mubr.msk.f32.mxu1 %vm83_vm0, %v22669_v18 }
  0x4f   :  { %18341 = vmatmul.mubr.msk.f32.gmra.mrb[22].mxu1 %vm83_vm0, %v22682_v19 }
  0x50   :  { %18387 = vmatprep.mubr.msk.f32.mxu1 %vm83_vm0, %v22590_v2 }
  0x53   :  { %18388 = vmatmul.mubr.msk.f32.vlgmr.msra.gmra.mrb[24].mxu1 %vm83_vm0, %v22605_v5 }
  0x54   :  { %18390 = vmatprep.mubr.msk.f32.mxu1 %vm83_vm0, %v22625_v11  ;;  %20524 = vmatpush3.bf16.msra.mxu1 %v22726_v25 }
  0x55   :  { %20544 = vmatprep.subr.bf16.mxu1 %v22752_v28 }
  0x57   :  { %18391 = vmatmul.mubr.msk.f32.gmra.mrb[26].mxu1 %vm83_vm0, %v22643_v15 }
  0x58   :  { %18393 = vmatprep.mubr.msk.f32.mxu1 %vm83_vm0, %v22649_v16 }
  0x5b   :  { %18394 = vmatmul.mubr.msk.f32.gmra.mrb[28].mxu1 %vm83_vm0, %v22664_v17 }
  0x5c   :  { %18396 = vmatprep.mubr.msk.f32.mxu1 %vm83_vm0, %v22669_v18 }
  0x5f   :  { %18397 = vmatmul.mubr.msk.f32.gmra.mrb[30].mxu1 %vm83_vm0, %v22682_v19 }
  0x60   :  { %18443 = vmatprep.mubr.msk.f32.mxu1 %vm83_vm0, %v22590_v2 }
  0x63   :  { %18444 = vmatmul.mubr.msk.f32.vlgmr.msra.gmra.mrb[32].mxu1 %vm83_vm0, %v22605_v5 }
  0x64   :  { %18446 = vmatprep.mubr.msk.f32.mxu1 %vm83_vm0, %v22625_v11  ;;  %20546 = vmatpush3.bf16.msra.mxu1 %v22752_v28 }
  0x65   :  { %20566 = vmatprep.subr.bf16.mxu1 %v22778_v31 }
  0x67   :  { %18447 = vmatmul.mubr.msk.f32.gmra.mrb[34].mxu1 %vm83_vm0, %v22643_v15 }
  0x68   :  { %18449 = vmatprep.mubr.msk.f32.mxu1 %vm83_vm0, %v22649_v16 }
  0x6b   :  { %18450 = vmatmul.mubr.msk.f32.gmra.mrb[36].mxu1 %vm83_vm0, %v22664_v17 }
  0x6c   :  { %18452 = vmatprep.mubr.msk.f32.mxu1 %vm83_vm0, %v22669_v18 }
  0x6f   :  { %18453 = vmatmul.mubr.msk.f32.gmra.mrb[38].mxu1 %vm83_vm0, %v22682_v19 }
  0x70   :  { %18499 = vmatprep.mubr.msk.f32.mxu1 %vm83_vm0, %v22590_v2 }
  0x73   :  { %18500 = vmatmul.mubr.msk.f32.vlgmr.msra.gmra.mrb[40].mxu1 %vm83_vm0, %v22605_v5 }
  0x74   :  { %18502 = vmatprep.mubr.msk.f32.mxu1 %vm83_vm0, %v22625_v11  ;;  %20568 = vmatpush3.bf16.msra.mxu1 %v22778_v31 }
  0x75   :  { %20588 = vmatprep.subr.bf16.mxu1 %v22839_v35 }
  0x77   :  { %18503 = vmatmul.mubr.msk.f32.gmra.mrb[42].mxu1 %vm83_vm0, %v22643_v15 }
  0x78   :  { %18505 = vmatprep.mubr.msk.f32.mxu1 %vm83_vm0, %v22649_v16 }
  0x7b   :  { %18506 = vmatmul.mubr.msk.f32.gmra.mrb[44].mxu1 %vm83_vm0, %v22664_v17 }
  0x7c   :  { %18508 = vmatprep.mubr.msk.f32.mxu1 %vm83_vm0, %v22669_v18 }
  0x7f   :  { %18509 = vmatmul.mubr.msk.f32.gmra.mrb[46].mxu1 %vm83_vm0, %v22682_v19 }
  0x80   :  { %18555 = vmatprep.mubr.msk.f32.mxu1 %vm83_vm0, %v22590_v2 }
  0x83   :  { %18556 = vmatmul.mubr.msk.f32.vlgmr.msra.gmra.mrb[48].mxu1 %vm83_vm0, %v22605_v5 }
  0x84   :  { %18558 = vmatprep.mubr.msk.f32.mxu1 %vm83_vm0, %v22625_v11  ;;  %20590 = vmatpush3.bf16.msra.mxu1 %v22839_v35 }
  0x87   :  { %18559 = vmatmul.mubr.msk.f32.gmra.mrb[50].mxu1 %vm83_vm0, %v22643_v15 }
  0x88   :  { %18561 = vmatprep.mubr.msk.f32.mxu1 %vm83_vm0, %v22649_v16 }
  0x8b   :  { %18562 = vmatmul.mubr.msk.f32.gmra.mrb[52].mxu1 %vm83_vm0, %v22664_v17 }
  0x8c   :  { %18564 = vmatprep.mubr.msk.f32.mxu1 %vm83_vm0, %v22669_v18 }
  0x8f   :  { %18565 = vmatmul.mubr.msk.f32.gmra.mrb[54].mxu1 %vm83_vm0, %v22682_v19 }
  0x90   :  { %18611 = vmatprep.mubr.msk.f32.mxu1 %vm83_vm0, %v22590_v2 }
  0x93   :  { %18612 = vmatmul.mubr.msk.f32.vlgmr.msra.gmra.mrb[56].mxu1 %vm83_vm0, %v22605_v5 }
  0x94   :  { %18614 = vmatprep.mubr.msk.f32.mxu1 %vm83_vm0, %v22625_v11 }
  0x97   :  { %18615 = vmatmul.mubr.msk.f32.gmra.mrb[58].mxu1 %vm83_vm0, %v22643_v15 }
  0x98   :  { %18617 = vmatprep.mubr.msk.f32.mxu1 %vm83_vm0, %v22649_v16 }
  0x9b   :  { %18618 = vmatmul.mubr.msk.f32.gmra.mrb[60].mxu1 %vm83_vm0, %v22664_v17  ;;  %v220_v17 = vld [vmem:[%s27306_s1 + $0xb8] sm:$0xff] }
  0x9c   :  { %18620 = vmatprep.mubr.msk.f32.mxu1 %vm83_vm0, %v22669_v18 }
  0x9f   :  { %18621 = vmatmul.mubr.msk.f32.gmra.mrb[62].mxu1 %vm83_vm0, %v22682_v19  ;;  %v221_v19 = vld [vmem:[%s27306_s1 + $0xc0] sm:$0xff] }
  0xf6   :  { %v18181_v36 = vpop.f32.mrb[0].mxu1 }
  0xf7   :  { %v297_v37 = vpop.f32.mrb[1].mxu1 }
  0xf8   :  { %v20419_v38 = vpack.c.bf16 %v18181_v36, %v297_v37  ;;  %v18165_v39 = vpop.f32.mrb[0].mxu0  ;;  %v226_v37 = vld [vmem:[%s27306_s1 + $0xe8] sm:$0xff] }
  0xf9   :  { %v174_v41 = vpop.f32.mrb[1].mxu0 }
  0xfa   :  { %v18184_v40 = vpop.f32.mrb[2].mxu1  ;;  %20420 = vmatprep.subr.bf16.mxu0 %v20419_v38  ;;  %v20437_v43 = vpack.c.bf16 %v18165_v39, %v174_v41  ;;  %v227_v39 = vld [vmem:[%s27306_s1 + $0xf0] sm:$0xff] }
  0xfb   :  { %v307_v42 = vpop.f32.mrb[3].mxu1  ;;  %20422 = vmatpush3.bf16.msra.mxu0 %v20419_v38 }
  0xfc   :  { %v20423_v44 = vpack.c.bf16 %v18184_v40, %v307_v42  ;;  %v18168_v45 = vpop.f32.mrb[2].mxu0  ;;  %v228_v42 = vld [vmem:[%s27306_s1 + $0xf8] sm:$0xff] }
  0xfd   :  { %v184_v47 = vpop.f32.mrb[3].mxu0 }
  0xfe   :  { %v18187_v46 = vpop.f32.mrb[4].mxu1  ;;  %20424 = vmatprep.subr.bf16.mxu0 %v20423_v44  ;;  %v20441_v49 = vpack.c.bf16 %v18168_v45, %v184_v47  ;;  %v66_v47 = vld [vmem:[%s27306_s1 + $0x8] sm:$0xff] }
  0xff   :  { %v317_v48 = vpop.f32.mrb[5].mxu1  ;;  %20426 = vmatpush3.bf16.msra.mxu0 %v20423_v44  ;;  %v65_v44 = vld [vmem:[%s27306_s1] sm:$0xff] }
 0x100   :  { %v20427_v50 = vpack.c.bf16 %v18187_v46, %v317_v48  ;;  %v18171_v51 = vpop.f32.mrb[4].mxu0 }
 0x101   :  { %v194_v53 = vpop.f32.mrb[5].mxu0 }
 0x102   :  { %v18190_v52 = vpop.f32.mrb[6].mxu1  ;;  %20428 = vmatprep.subr.bf16.mxu0 %v20427_v50  ;;  %v20445_v56 = vpack.c.bf16 %v18171_v51, %v194_v53 }
 0x103   :  { %v327_v54 = vpop.f32.mrb[7].mxu1  ;;  %20430 = vmatpush3.bf16.msra.mxu0 %v20427_v50 }
 0x104   :  { %v20431_v57 = vpack.c.bf16 %v18190_v52, %v327_v54  ;;  %v18174_v58 = vpop.f32.mrb[6].mxu0  ;;  %v68_v52 = vld [vmem:[%s27306_s1 + $0x18] sm:$0xff]  ;;  %v69_v54 = vld [vmem:[%s27306_s1 + $0x20] sm:$0xff] }
 0x105   :  { %v204_v59 = vpop.f32.mrb[7].mxu0 }
 0x106   :  { %20433 = vmatprep.subr.msk.bf16.mxu0 %vm22859_vm4, %v20431_v57  ;;  %v18277_v60 = vpop.f32.mrb[8].mxu1  ;;  %v20449_v62 = vpack.c.bf16 %v18174_v58, %v204_v59  ;;  %v70_v58 = vld [vmem:[%s27306_s1 + $0x28] sm:$0xff] }
 0x107   :  { %20436 = vmatpush3.bf16.msk.msra.mxu0 %vm22859_vm4, %v20431_v57  ;;  %v814_v63 = vpop.f32.mrb[9].mxu1 }
 0x108   :  { %20438 = vmatprep.subr.bf16.mxu0 %v20437_v43  ;;  %v22873_v1 = vpack.c.bf16 %v18277_v60, %v814_v63  ;;  %v71_v60 = vld [vmem:[%s27306_s1 + $0x30] sm:$0xff]  ;;  %v72_v63 = vld [vmem:[%s27306_s1 + $0x38] sm:$0xff] }
 0x10a   :  { %18208 = vmatmul.mubr.msk.f32.vlgmr.msra.gmra.mrb[8].mxu0 %vm336_vm1, %v214_v61  ;;  %v18280_v2 = vpop.f32.mrb[10].mxu1 }
 0x10b   :  { %20440 = vmatpush3.bf16.msra.mxu0 %v20437_v43  ;;  %18210 = vmatprep.mubr.msk.f32.mxu0 %vm336_vm1, %v215_v0  ;;  %v824_v5 = vpop.f32.mrb[11].mxu1 }
 0x10c   :  { %20442 = vmatprep.subr.bf16.mxu0 %v20441_v49  ;;  %v22883_v8 = vpack.c.bf16 %v18280_v2, %v824_v5  ;;  %v74_v5 = vld [vmem:[%s27306_s1 + $0x48] sm:$0xff] }
 0x10e   :  { %18211 = vmatmul.mubr.msk.f32.gmra.mrb[10].mxu0 %vm336_vm1, %v216_v4  ;;  %v18283_v9 = vpop.f32.mrb[12].mxu1 }
 0x10f   :  { %18213 = vmatprep.mubr.msk.f32.mxu0 %vm336_vm1, %v217_v6  ;;  %20444 = vmatpush3.bf16.msra.mxu0 %v20441_v49  ;;  %v834_v11 = vpop.f32.mrb[13].mxu1  ;;  %v67_v49 = vld [vmem:[%s27306_s1 + $0x10] sm:$0xff] }
 0x110   :  { %20446 = vmatprep.subr.bf16.mxu0 %v20445_v56  ;;  %v22893_v15 = vpack.c.bf16 %v18283_v9, %v834_v11  ;;  %v76_v11 = vld [vmem:[%s27306_s1 + $0x58] sm:$0xff] }
 0x112   :  { %18214 = vmatmul.mubr.msk.f32.gmra.mrb[12].mxu0 %vm336_vm1, %v218_v10  ;;  %v18286_v16 = vpop.f32.mrb[14].mxu1 }
 0x113   :  { %18216 = vmatprep.mubr.msk.f32.mxu0 %vm336_vm1, %v219_v13  ;;  %20448 = vmatpush3.bf16.msra.mxu0 %v20445_v56  ;;  %v844_v18 = vpop.f32.mrb[15].mxu1 }
 0x114   :  { %20451 = vmatprep.subr.msk.bf16.mxu0 %vm22859_vm4, %v20449_v62  ;;  %v22905_v20 = vpack.c.bf16 %v18286_v16, %v844_v18  ;;  %v78_v18 = vld [vmem:[%s27306_s1 + $0x68] sm:$0xff] }
 0x116   :  { %18217 = vmatmul.mubr.msk.f32.gmra.mrb[14].mxu0 %vm336_vm1, %v220_v17  ;;  %v18333_v21 = vpop.f32.mrb[16].mxu1 }
 0x117   :  { %18219 = vmatprep.mubr.msk.f32.mxu0 %vm336_vm1, %v221_v19  ;;  %20454 = vmatpush3.bf16.msk.msra.mxu0 %vm22859_vm4, %v20449_v62  ;;  %v1149_v24 = vpop.f32.mrb[17].mxu1 }
 0x118   :  { %20460 = vmatprep.subr.bf16.mxu0 %v22873_v1  ;;  %v22918_v27 = vpack.c.bf16 %v18333_v21, %v1149_v24  ;;  %v80_v24 = vld [vmem:[%s27306_s1 + $0x78] sm:$0xff] }
 0x11a   :  { %18220 = vmatmul.mubr.msk.f32.gmra.mrb[16].mxu0 %vm336_vm1, %v222_v23  ;;  %v18336_v29 = vpop.f32.mrb[18].mxu1 }
 0x11b   :  { %18222 = vmatprep.mubr.msk.f32.mxu0 %vm336_vm1, %v223_v26  ;;  %v1159_v32 = vpop.f32.mrb[19].mxu1 }
 0x11c   :  { %v22928_v34 = vpack.c.bf16 %v18336_v29, %v1159_v32  ;;  %v730_v29 = vld [vmem:[%s27306_s1 + $0x100] sm:$0xff] }
 0x11e   :  { %18223 = vmatmul.mubr.msk.f32.gmra.mrb[18].mxu0 %vm336_vm1, %v224_v30  ;;  %v18339_v36 = vpop.f32.mrb[20].mxu1 }
 0x11f   :  { %18225 = vmatprep.mubr.msk.f32.mxu0 %vm336_vm1, %v225_v33  ;;  %v1169_v38 = vpop.f32.mrb[21].mxu1  ;;  %v731_v33 = vld [vmem:[%s27306_s1 + $0x108] sm:$0xff] }
 0x120   :  { %v22938_v40 = vpack.c.bf16 %v18339_v36, %v1169_v38 }
 0x122   :  { %18226 = vmatmul.mubr.msk.f32.gmra.mrb[20].mxu0 %vm336_vm1, %v226_v37  ;;  %v18342_v41 = vpop.f32.mrb[22].mxu1  ;;  %v732_v37 = vld [vmem:[%s27306_s1 + $0x110] sm:$0xff] }
 0x123   :  { %18228 = vmatprep.mubr.msk.f32.mxu0 %vm336_vm1, %v227_v39  ;;  %v1179_v43 = vpop.f32.mrb[23].mxu1 }
 0x124   :  { %v22948_v45 = vpack.c.bf16 %v18342_v41, %v1179_v43  ;;  %v733_v41 = vld [vmem:[%s27306_s1 + $0x118] sm:$0xff]  ;;  %v734_v43 = vld [vmem:[%s27306_s1 + $0x120] sm:$0xff] }
 0x126   :  { %18229 = vmatmul.mubr.msk.f32.gmra.mrb[22].mxu0 %vm336_vm1, %v228_v42  ;;  %v18389_v46 = vpop.f32.mrb[24].mxu1 }
 0x127   :  { %18247 = vmatprep.mubr.msk.f32.mxu0 %vm336_vm1, %v65_v44  ;;  %v1484_v48 = vpop.f32.mrb[25].mxu1 }
 0x128   :  { %v22958_v50 = vpack.c.bf16 %v18389_v46, %v1484_v48  ;;  %v736_v48 = vld [vmem:[%s27306_s1 + $0x130] sm:$0xff] }
 0x12a   :  { %18248 = vmatmul.mubr.msk.f32.vlgmr.msra.gmra.mrb[8].mxu0 %vm336_vm1, %v66_v47  ;;  %v18392_v51 = vpop.f32.mrb[26].mxu1 }
 0x12b   :  { %20462 = vmatpush3.bf16.msra.mxu0 %v22873_v1  ;;  %18250 = vmatprep.mubr.msk.f32.mxu0 %vm336_vm1, %v67_v49  ;;  %v1494_v53 = vpop.f32.mrb[27].mxu1  ;;  %v73_v1 = vld [vmem:[%s27306_s1 + $0x40] sm:$0xff] }
 0x12c   :  { %20464 = vmatprep.subr.bf16.mxu0 %v22883_v8  ;;  %v22970_v56 = vpack.c.bf16 %v18392_v51, %v1494_v53  ;;  %v738_v53 = vld [vmem:[%s27306_s1 + $0x140] sm:$0xff] }
 0x12e   :  { %18251 = vmatmul.mubr.msk.f32.gmra.mrb[10].mxu0 %vm336_vm1, %v68_v52  ;;  %v18395_v57 = vpop.f32.mrb[28].mxu1 }
 0x12f   :  { %18253 = vmatprep.mubr.msk.f32.mxu0 %vm336_vm1, %v69_v54  ;;  %20466 = vmatpush3.bf16.msra.mxu0 %v22883_v8  ;;  %v1504_v59 = vpop.f32.mrb[29].mxu1  ;;  %v75_v8 = vld [vmem:[%s27306_s1 + $0x50] sm:$0xff] }
 0x130   :  { %20468 = vmatprep.subr.bf16.mxu0 %v22893_v15  ;;  %v22982_v61 = vpack.c.bf16 %v18395_v57, %v1504_v59  ;;  %v740_v59 = vld [vmem:[%s27306_s1 + $0x150] sm:$0xff] }
 0x132   :  { %18254 = vmatmul.mubr.msk.f32.gmra.mrb[12].mxu0 %vm336_vm1, %v70_v58  ;;  %v18398_v62 = vpop.f32.mrb[30].mxu1 }
 0x133   :  { %18256 = vmatprep.mubr.msk.f32.mxu0 %vm336_vm1, %v71_v60  ;;  %20470 = vmatpush3.bf16.msra.mxu0 %v22893_v15  ;;  %v1514_v0 = vpop.f32.mrb[31].mxu1  ;;  %v77_v15 = vld [vmem:[%s27306_s1 + $0x60] sm:$0xff] }
 0x134   :  { %20473 = vmatprep.subr.msk.bf16.mxu0 %vm22859_vm4, %v22905_v20  ;;  %v22996_v2 = vpack.c.bf16 %v18398_v62, %v1514_v0 }
 0x136   :  { %18257 = vmatmul.mubr.msk.f32.gmra.mrb[14].mxu0 %vm336_vm1, %v72_v63  ;;  %v18445_v4 = vpop.f32.mrb[32].mxu1  ;;  %v741_v63 = vld [vmem:[%s27306_s1 + $0x158] sm:$0xff] }
 0x137   :  { %18259 = vmatprep.mubr.msk.f32.mxu0 %vm336_vm1, %v73_v1  ;;  %20476 = vmatpush3.bf16.msk.msra.mxu0 %vm22859_vm4, %v22905_v20  ;;  %v1819_v6 = vpop.f32.mrb[33].mxu1  ;;  %v79_v20 = vld [vmem:[%s27306_s1 + $0x70] sm:$0xff] }
 0x138   :  { %20482 = vmatprep.subr.bf16.mxu0 %v22918_v27  ;;  %v23010_v9 = vpack.c.bf16 %v18445_v4, %v1819_v6 }
 0x13a   :  { %18260 = vmatmul.mubr.msk.f32.gmra.mrb[16].mxu0 %vm336_vm1, %v74_v5  ;;  %v18448_v10 = vpop.f32.mrb[34].mxu1  ;;  %v743_v5 = vld [vmem:[%s27306_s1 + $0x168] sm:$0xff] }
 0x13b   :  { %18262 = vmatprep.mubr.msk.f32.mxu0 %vm336_vm1, %v75_v8  ;;  %v1829_v13 = vpop.f32.mrb[35].mxu1  ;;  %v744_v8 = vld [vmem:[%s27306_s1 + $0x170] sm:$0xff] }
 0x13c   :  { %v23020_v16 = vpack.c.bf16 %v18448_v10, %v1829_v13  ;;  %v745_v13 = vld [vmem:[%s27306_s1 + $0x178] sm:$0xff] }
 0x13e   :  { %18263 = vmatmul.mubr.msk.f32.gmra.mrb[18].mxu0 %vm336_vm1, %v76_v11  ;;  %v18451_v17 = vpop.f32.mrb[36].mxu1 }
 0x13f   :  { %18265 = vmatprep.mubr.msk.f32.mxu0 %vm336_vm1, %v77_v15  ;;  %v1839_v19 = vpop.f32.mrb[37].mxu1 }
 0x140   :  { %v23030_v21 = vpack.c.bf16 %v18451_v17, %v1839_v19  ;;  %v1065_v17 = vld [vmem:[%s27306_s1 + $0x180] sm:$0xff]  ;;  %v1066_v19 = vld [vmem:[%s27306_s1 + $0x188] sm:$0xff] }
 0x142   :  { %18266 = vmatmul.mubr.msk.f32.gmra.mrb[20].mxu0 %vm336_vm1, %v78_v18  ;;  %v18454_v23 = vpop.f32.mrb[38].mxu1 }
 0x143   :  { %18268 = vmatprep.mubr.msk.f32.mxu0 %vm336_vm1, %v79_v20  ;;  %v1849_v26 = vpop.f32.mrb[39].mxu1  ;;  %v1067_v20 = vld [vmem:[%s27306_s1 + $0x190] sm:$0xff] }
 0x144   :  { %v23040_v30 = vpack.c.bf16 %v18454_v23, %v1849_v26 }
 0x146   :  { %18269 = vmatmul.mubr.msk.f32.gmra.mrb[22].mxu0 %vm336_vm1, %v80_v24  ;;  %v18501_v32 = vpop.f32.mrb[40].mxu1 }
 0x147   :  { %18303 = vmatprep.mubr.msk.f32.mxu0 %vm336_vm1, %v730_v29  ;;  %v2154_v36 = vpop.f32.mrb[41].mxu1  ;;  %v1068_v29 = vld [vmem:[%s27306_s1 + $0x198] sm:$0xff] }
 0x148   :  { %v23050_v38 = vpack.c.bf16 %v18501_v32, %v2154_v36  ;;  %v1069_v32 = vld [vmem:[%s27306_s1 + $0x1a0] sm:$0xff] }
 0x14a   :  { %18304 = vmatmul.mubr.msk.f32.vlgmr.msra.gmra.mrb[8].mxu0 %vm336_vm1, %v731_v33  ;;  %v18504_v39 = vpop.f32.mrb[42].mxu1 }
 0x14b   :  { %20484 = vmatpush3.bf16.msra.mxu0 %v22918_v27  ;;  %18306 = vmatprep.mubr.msk.f32.mxu0 %vm336_vm1, %v732_v37  ;;  %v2164_v42 = vpop.f32.mrb[43].mxu1  ;;  %v735_v27 = vld [vmem:[%s27306_s1 + $0x128] sm:$0xff] }
 0x14c   :  { %20486 = vmatprep.subr.bf16.mxu0 %v22928_v34  ;;  %v23062_v44 = vpack.c.bf16 %v18504_v39, %v2164_v42  ;;  %v1071_v39 = vld [vmem:[%s27306_s1 + $0x1b0] sm:$0xff]  ;;  %v1072_v42 = vld [vmem:[%s27306_s1 + $0x1b8] sm:$0xff] }
 0x14e   :  { %18307 = vmatmul.mubr.msk.f32.gmra.mrb[10].mxu0 %vm336_vm1, %v733_v41  ;;  %v18507_v46 = vpop.f32.mrb[44].mxu1 }
 0x14f   :  { %18309 = vmatprep.mubr.msk.f32.mxu0 %vm336_vm1, %v734_v43  ;;  %20488 = vmatpush3.bf16.msra.mxu0 %v22928_v34  ;;  %v2174_v47 = vpop.f32.mrb[45].mxu1  ;;  %v737_v34 = vld [vmem:[%s27306_s1 + $0x138] sm:$0xff]  ;;  %v1073_v43 = vld [vmem:[%s27306_s1 + $0x1c0] sm:$0xff] }
 0x150   :  { %20490 = vmatprep.subr.bf16.mxu0 %v22938_v40  ;;  %v23074_v49 = vpack.c.bf16 %v18507_v46, %v2174_v47 }
 0x152   :  { %18310 = vmatmul.mubr.msk.f32.gmra.mrb[12].mxu0 %vm336_vm1, %v735_v27  ;;  %v18510_v51 = vpop.f32.mrb[46].mxu1  ;;  %v1074_v27 = vld [vmem:[%s27306_s1 + $0x1c8] sm:$0xff] }
 0x153   :  { %18312 = vmatprep.mubr.msk.f32.mxu0 %vm336_vm1, %v736_v48  ;;  %20492 = vmatpush3.bf16.msra.mxu0 %v22938_v40  ;;  %v2184_v52 = vpop.f32.mrb[47].mxu1  ;;  %v739_v40 = vld [vmem:[%s27306_s1 + $0x148] sm:$0xff]  ;;  %v1076_v48 = vld [vmem:[%s27306_s1 + $0x1d8] sm:$0xff] }
 0x154   :  { %20495 = vmatprep.subr.msk.bf16.mxu0 %vm22859_vm4, %v22948_v45  ;;  %v23088_v54 = vpack.c.bf16 %v18510_v51, %v2184_v52  ;;  %v1078_v52 = vld [vmem:[%s27306_s1 + $0x1e8] sm:$0xff] }
 0x156   :  { %18313 = vmatmul.mubr.msk.f32.gmra.mrb[14].mxu0 %vm336_vm1, %v737_v34  ;;  %v18557_v57 = vpop.f32.mrb[48].mxu1 }
 0x157   :  { %18315 = vmatprep.mubr.msk.f32.mxu0 %vm336_vm1, %v738_v53  ;;  %20498 = vmatpush3.bf16.msk.msra.mxu0 %vm22859_vm4, %v22948_v45  ;;  %v2489_v58 = vpop.f32.mrb[49].mxu1  ;;  %v742_v45 = vld [vmem:[%s27306_s1 + $0x160] sm:$0xff]  ;;  %v1079_v53 = vld [vmem:[%s27306_s1 + $0x1f0] sm:$0xff] }
 0x158   :  { %20504 = vmatprep.subr.bf16.mxu0 %v22958_v50  ;;  %v23102_v60 = vpack.c.bf16 %v18557_v57, %v2489_v58  ;;  %v1080_v57 = vld [vmem:[%s27306_s1 + $0x1f8] sm:$0xff]  ;;  %v1401_v58 = vld [vmem:[%s27306_s1 + $0x208] sm:$0xff] }
 0x15a   :  { %18316 = vmatmul.mubr.msk.f32.gmra.mrb[16].mxu0 %vm336_vm1, %v739_v40  ;;  %v18560_v62 = vpop.f32.mrb[50].mxu1  ;;  %v1400_v40 = vld [vmem:[%s27306_s1 + $0x200] sm:$0xff] }
 0x15b   :  { %18318 = vmatprep.mubr.msk.f32.mxu0 %vm336_vm1, %v740_v59  ;;  %v2499_v0 = vpop.f32.mrb[51].mxu1  ;;  %v1402_v59 = vld [vmem:[%s27306_s1 + $0x210] sm:$0xff] }
 0x15c   :  { %v23112_v1 = vpack.c.bf16 %v18560_v62, %v2499_v0  ;;  %v1403_v62 = vld [vmem:[%s27306_s1 + $0x218] sm:$0xff]  ;;  %v1406_v0 = vld [vmem:[%s27306_s1 + $0x230] sm:$0xff] }
 0x15e   :  { %18319 = vmatmul.mubr.msk.f32.gmra.mrb[18].mxu0 %vm336_vm1, %v741_v63  ;;  %v18563_v4 = vpop.f32.mrb[52].mxu1  ;;  %v1404_v63 = vld [vmem:[%s27306_s1 + $0x220] sm:$0xff] }
 0x15f   :  { %18321 = vmatprep.mubr.msk.f32.mxu0 %vm336_vm1, %v742_v45  ;;  %v2509_v6 = vpop.f32.mrb[53].mxu1  ;;  %v1407_v45 = vld [vmem:[%s27306_s1 + $0x238] sm:$0xff] }
 0x160   :  { %v23122_v10 = vpack.c.bf16 %v18563_v4, %v2509_v6  ;;  %v1409_v4 = vld [vmem:[%s27306_s1 + $0x248] sm:$0xff]  ;;  %v1412_v6 = vld [vmem:[%s27306_s1 + $0x260] sm:$0xff] }
 0x162   :  { %18322 = vmatmul.mubr.msk.f32.gmra.mrb[20].mxu0 %vm336_vm1, %v743_v5  ;;  %v18566_v11 = vpop.f32.mrb[54].mxu1  ;;  %v1411_v5 = vld [vmem:[%s27306_s1 + $0x258] sm:$0xff] }
 0x163   :  { %18324 = vmatprep.mubr.msk.f32.mxu0 %vm336_vm1, %v744_v8  ;;  %v2519_v15 = vpop.f32.mrb[55].mxu1  ;;  %v1414_v8 = vld [vmem:[%s27306_s1 + $0x270] sm:$0xff] }
 0x164   :  { %v23132_v18 = vpack.c.bf16 %v18566_v11, %v2519_v15  ;;  %v1415_v11 = vld [vmem:[%s27306_s1 + $0x278] sm:$0xff]  ;;  %v1736_v15 = vld [vmem:[%s27306_s1 + $0x288] sm:$0xff] }
 0x166   :  { %18325 = vmatmul.mubr.msk.f32.gmra.mrb[22].mxu0 %vm336_vm1, %v745_v13  ;;  %v18613_v23 = vpop.f32.mrb[56].mxu1  ;;  %v1735_v13 = vld [vmem:[%s27306_s1 + $0x280] sm:$0xff] }
 0x167   :  { %18359 = vmatprep.mubr.msk.f32.mxu0 %vm336_vm1, %v1065_v17  ;;  %v2824_v24 = vpop.f32.mrb[57].mxu1  ;;  %v1737_v17 = vld [vmem:[%s27306_s1 + $0x290] sm:$0xff] }
 0x168   :  { %v23143_v26 = vpack.c.bf16 %v18613_v23, %v2824_v24  ;;  %v1741_v23 = vld [vmem:[%s27306_s1 + $0x2b0] sm:$0xff]  ;;  %v1742_v24 = vld [vmem:[%s27306_s1 + $0x2b8] sm:$0xff] }
 0x16a   :  { %18360 = vmatmul.mubr.msk.f32.vlgmr.msra.gmra.mrb[8].mxu0 %vm336_vm1, %v1066_v19  ;;  %v18616_v33 = vpop.f32.mrb[58].mxu1  ;;  %v1738_v19 = vld [vmem:[%s27306_s1 + $0x298] sm:$0xff] }
 0x16b   :  { %20506 = vmatpush3.bf16.msra.mxu0 %v22958_v50  ;;  %18362 = vmatprep.mubr.msk.f32.mxu0 %vm336_vm1, %v1067_v20  ;;  %v2834_v36 = vpop.f32.mrb[59].mxu1  ;;  %v1070_v50 = vld [vmem:[%s27306_s1 + $0x1a8] sm:$0xff]  ;;  %v1739_v20 = vld [vmem:[%s27306_s1 + $0x2a0] sm:$0xff] }
 0x16c   :  { %20508 = vmatprep.subr.bf16.mxu0 %v22970_v56  ;;  %v23155_v37 = vpack.c.bf16 %v18616_v33, %v2834_v36  ;;  %v1747_v33 = vld [vmem:[%s27306_s1 + $0x2e0] sm:$0xff]  ;;  %v1749_v36 = vld [vmem:[%s27306_s1 + $0x2f0] sm:$0xff] }
 0x16e   :  { %18363 = vmatmul.mubr.msk.f32.gmra.mrb[10].mxu0 %vm336_vm1, %v1068_v29  ;;  %v18619_v41 = vpop.f32.mrb[60].mxu1  ;;  %v1744_v29 = vld [vmem:[%s27306_s1 + $0x2c8] sm:$0xff] }
 0x16f   :  { %18365 = vmatprep.mubr.msk.f32.mxu0 %vm336_vm1, %v1069_v32  ;;  %20510 = vmatpush3.bf16.msra.mxu0 %v22970_v56  ;;  %v2844_v56 = vpop.f32.mrb[61].mxu1  ;;  %v1746_v32 = vld [vmem:[%s27306_s1 + $0x2d8] sm:$0xff] }
 0x170   :  { %20512 = vmatprep.subr.bf16.mxu0 %v22982_v61  ;;  %v23178_v46 = vpack.c.bf16 %v18619_v41, %v2844_v56  ;;  %v2071_v41 = vld [vmem:[%s27306_s1 + $0x308] sm:$0xff]  ;;  %v2073_v56 = vld [vmem:[%s27306_s1 + $0x318] sm:$0xff] }
 0x172   :  { %18366 = vmatmul.mubr.msk.f32.gmra.mrb[12].mxu0 %vm336_vm1, %v1070_v50  ;;  %v18622_v47 = vpop.f32.mrb[62].mxu1  ;;  %v1750_v50 = vld [vmem:[%s27306_s1 + $0x2f8] sm:$0xff] }
 0x173   :  { %18368 = vmatprep.mubr.msk.f32.mxu0 %vm336_vm1, %v1071_v39  ;;  %20514 = vmatpush3.bf16.msra.mxu0 %v22982_v61  ;;  %v1075_v61 = vld [vmem:[%s27306_s1 + $0x1d0] sm:$0xff]  ;;  %v2854_v51 = vpop.f32.mrb[63].mxu1  ;;  %v2070_v39 = vld [vmem:[%s27306_s1 + $0x300] sm:$0xff] }
 0x174   :  { %20517 = vmatprep.subr.msk.bf16.mxu0 %vm22859_vm4, %v22996_v2  ;;  %v23200_v34 = vpack.c.bf16 %v18622_v47, %v2854_v51  ;;  %v2079_v47 = vld [vmem:[%s27306_s1 + $0x348] sm:$0xff]  ;;  %v2082_v51 = vld [vmem:[%s27306_s1 + $0x360] sm:$0xff] }
 0x176   :  { %18369 = vmatmul.mubr.msk.f32.gmra.mrb[14].mxu0 %vm336_vm1, %v1072_v42  ;;  %v2072_v42 = vld [vmem:[%s27306_s1 + $0x310] sm:$0xff] }
 0x177   :  { %18371 = vmatprep.mubr.msk.f32.mxu0 %vm336_vm1, %v1073_v43  ;;  %20520 = vmatpush3.bf16.msk.msra.mxu0 %vm22859_vm4, %v22996_v2  ;;  %v1077_v2 = vld [vmem:[%s27306_s1 + $0x1e0] sm:$0xff] }
 0x178   :  { %20526 = vmatprep.subr.bf16.mxu0 %v23010_v9  ;;  %v2074_v43 = vld [vmem:[%s27306_s1 + $0x320] sm:$0xff] }
 0x17a   :  { %18372 = vmatmul.mubr.msk.f32.gmra.mrb[16].mxu0 %vm336_vm1, %v1074_v27  ;;  %v2076_v27 = vld [vmem:[%s27306_s1 + $0x330] sm:$0xff] }
 0x17b   :  { %18374 = vmatprep.mubr.msk.f32.mxu0 %vm336_vm1, %v1075_v61  ;;  %v2077_v61 = vld [vmem:[%s27306_s1 + $0x338] sm:$0xff] }
 0x17e   :  { %18375 = vmatmul.mubr.msk.f32.gmra.mrb[18].mxu0 %vm336_vm1, %v1076_v48  ;;  %v2081_v48 = vld [vmem:[%s27306_s1 + $0x358] sm:$0xff] }
 0x17f   :  { %18377 = vmatprep.mubr.msk.f32.mxu0 %vm336_vm1, %v1077_v2  ;;  %v2084_v2 = vld [vmem:[%s27306_s1 + $0x370] sm:$0xff] }
 0x182   :  { %18378 = vmatmul.mubr.msk.f32.gmra.mrb[20].mxu0 %vm336_vm1, %v1078_v52  ;;  %v2085_v52 = vld [vmem:[%s27306_s1 + $0x378] sm:$0xff] }
 0x183   :  { %18380 = vmatprep.mubr.msk.f32.mxu0 %vm336_vm1, %v1079_v53  ;;  %v2405_v53 = vld [vmem:[%s27306_s1 + $0x380] sm:$0xff] }
 0x186   :  { %18381 = vmatmul.mubr.msk.f32.gmra.mrb[22].mxu0 %vm336_vm1, %v1080_v57  ;;  %v2406_v57 = vld [vmem:[%s27306_s1 + $0x388] sm:$0xff] }
 0x187   :  { %18415 = vmatprep.mubr.msk.f32.mxu0 %vm336_vm1, %v1400_v40  ;;  %v2407_v40 = vld [vmem:[%s27306_s1 + $0x390] sm:$0xff] }
 0x18a   :  { %18416 = vmatmul.mubr.msk.f32.vlgmr.msra.gmra.mrb[8].mxu0 %vm336_vm1, %v1401_v58  ;;  %v2408_v58 = vld [vmem:[%s27306_s1 + $0x398] sm:$0xff] }
 0x18b   :  { %20528 = vmatpush3.bf16.msra.mxu0 %v23010_v9  ;;  %18418 = vmatprep.mubr.msk.f32.mxu0 %vm336_vm1, %v1402_v59  ;;  %v1405_v9 = vld [vmem:[%s27306_s1 + $0x228] sm:$0xff]  ;;  %v2409_v59 = vld [vmem:[%s27306_s1 + $0x3a0] sm:$0xff] }
 0x18c   :  { %20530 = vmatprep.subr.bf16.mxu0 %v23020_v16 }
 0x18e   :  { %18419 = vmatmul.mubr.msk.f32.gmra.mrb[10].mxu0 %vm336_vm1, %v1403_v62  ;;  %v2411_v62 = vld [vmem:[%s27306_s1 + $0x3b0] sm:$0xff] }
 0x18f   :  { %18421 = vmatprep.mubr.msk.f32.mxu0 %vm336_vm1, %v1404_v63  ;;  %20532 = vmatpush3.bf16.msra.mxu0 %v23020_v16  ;;  %v1408_v16 = vld [vmem:[%s27306_s1 + $0x240] sm:$0xff]  ;;  %v2412_v63 = vld [vmem:[%s27306_s1 + $0x3b8] sm:$0xff] }
 0x190   :  { %20534 = vmatprep.subr.bf16.mxu0 %v23030_v21 }
 0x192   :  { %18422 = vmatmul.mubr.msk.f32.gmra.mrb[12].mxu0 %vm336_vm1, %v1405_v9  ;;  %v2414_v9 = vld [vmem:[%s27306_s1 + $0x3c8] sm:$0xff] }
 0x193   :  { %18424 = vmatprep.mubr.msk.f32.mxu0 %vm336_vm1, %v1406_v0  ;;  %20536 = vmatpush3.bf16.msra.mxu0 %v23030_v21  ;;  %v1410_v21 = vld [vmem:[%s27306_s1 + $0x250] sm:$0xff]  ;;  %v2416_v0 = vld [vmem:[%s27306_s1 + $0x3d8] sm:$0xff] }
 0x194   :  { %20539 = vmatprep.subr.msk.bf16.mxu0 %vm22859_vm4, %v23040_v30 }
 0x196   :  { %18425 = vmatmul.mubr.msk.f32.gmra.mrb[14].mxu0 %vm336_vm1, %v1407_v45  ;;  %v2417_v45 = vld [vmem:[%s27306_s1 + $0x3e0] sm:$0xff] }
 0x197   :  { %18427 = vmatprep.mubr.msk.f32.mxu0 %vm336_vm1, %v1408_v16  ;;  %20542 = vmatpush3.bf16.msk.msra.mxu0 %vm22859_vm4, %v23040_v30  ;;  %v1413_v30 = vld [vmem:[%s27306_s1 + $0x268] sm:$0xff]  ;;  %v2419_v16 = vld [vmem:[%s27306_s1 + $0x3f0] sm:$0xff] }
 0x198   :  { %20548 = vmatprep.subr.bf16.mxu0 %v23050_v38 }
 0x19a   :  { %18428 = vmatmul.mubr.msk.f32.gmra.mrb[16].mxu0 %vm336_vm1, %v1409_v4  ;;  %v2420_v4 = vld [vmem:[%s27306_s1 + $0x3f8] sm:$0xff] }
 0x19b   :  { %18430 = vmatprep.mubr.msk.f32.mxu0 %vm336_vm1, %v1410_v21  ;;  %v2740_v21 = vld [vmem:[%s27306_s1 + $0x400] sm:$0xff] }
 0x19e   :  { %18431 = vmatmul.mubr.msk.f32.gmra.mrb[18].mxu0 %vm336_vm1, %v1411_v5  ;;  %v2741_v5 = vld [vmem:[%s27306_s1 + $0x408] sm:$0xff] }
 0x19f   :  { %18433 = vmatprep.mubr.msk.f32.mxu0 %vm336_vm1, %v1412_v6  ;;  %v2742_v6 = vld [vmem:[%s27306_s1 + $0x410] sm:$0xff] }
 0x1a2   :  { %18434 = vmatmul.mubr.msk.f32.gmra.mrb[20].mxu0 %vm336_vm1, %v1413_v30  ;;  %v2743_v30 = vld [vmem:[%s27306_s1 + $0x418] sm:$0xff] }
 0x1a3   :  { %18436 = vmatprep.mubr.msk.f32.mxu0 %vm336_vm1, %v1414_v8  ;;  %v2744_v8 = vld [vmem:[%s27306_s1 + $0x420] sm:$0xff] }
 0x1a6   :  { %18437 = vmatmul.mubr.msk.f32.gmra.mrb[22].mxu0 %vm336_vm1, %v1415_v11  ;;  %v2745_v11 = vld [vmem:[%s27306_s1 + $0x428] sm:$0xff] }
 0x1a7   :  { %18471 = vmatprep.mubr.msk.f32.mxu0 %vm336_vm1, %v1735_v13  ;;  %v2746_v13 = vld [vmem:[%s27306_s1 + $0x430] sm:$0xff] }
 0x1aa   :  { %18472 = vmatmul.mubr.msk.f32.vlgmr.msra.gmra.mrb[8].mxu0 %vm336_vm1, %v1736_v15  ;;  %v2747_v15 = vld [vmem:[%s27306_s1 + $0x438] sm:$0xff] }
 0x1ab   :  { %20550 = vmatpush3.bf16.msra.mxu0 %v23050_v38  ;;  %18474 = vmatprep.mubr.msk.f32.mxu0 %vm336_vm1, %v1737_v17  ;;  %v1740_v38 = vld [vmem:[%s27306_s1 + $0x2a8] sm:$0xff]  ;;  %v2748_v17 = vld [vmem:[%s27306_s1 + $0x440] sm:$0xff] }
 0x1ac   :  { %20552 = vmatprep.subr.bf16.mxu0 %v23062_v44 }
 0x1ae   :  { %18475 = vmatmul.mubr.msk.f32.gmra.mrb[10].mxu0 %vm336_vm1, %v1738_v19  ;;  %v2749_v19 = vld [vmem:[%s27306_s1 + $0x448] sm:$0xff] }
 0x1af   :  { %18477 = vmatprep.mubr.msk.f32.mxu0 %vm336_vm1, %v1739_v20  ;;  %20554 = vmatpush3.bf16.msra.mxu0 %v23062_v44  ;;  %v1743_v44 = vld [vmem:[%s27306_s1 + $0x2c0] sm:$0xff]  ;;  %v2750_v20 = vld [vmem:[%s27306_s1 + $0x450] sm:$0xff] }
 0x1b0   :  { %20556 = vmatprep.subr.bf16.mxu0 %v23074_v49 }
 0x1b2   :  { %18478 = vmatmul.mubr.msk.f32.gmra.mrb[12].mxu0 %vm336_vm1, %v1740_v38  ;;  %v2751_v38 = vld [vmem:[%s27306_s1 + $0x458] sm:$0xff] }
 0x1b3   :  { %18480 = vmatprep.mubr.msk.f32.mxu0 %vm336_vm1, %v1741_v23  ;;  %20558 = vmatpush3.bf16.msra.mxu0 %v23074_v49  ;;  %v1745_v49 = vld [vmem:[%s27306_s1 + $0x2d0] sm:$0xff]  ;;  %v2752_v23 = vld [vmem:[%s27306_s1 + $0x460] sm:$0xff] }
 0x1b4   :  { %20561 = vmatprep.subr.msk.bf16.mxu0 %vm22859_vm4, %v23088_v54 }
 0x1b6   :  { %18481 = vmatmul.mubr.msk.f32.gmra.mrb[14].mxu0 %vm336_vm1, %v1742_v24  ;;  %v2753_v24 = vld [vmem:[%s27306_s1 + $0x468] sm:$0xff] }
 0x1b7   :  { %18483 = vmatprep.mubr.msk.f32.mxu0 %vm336_vm1, %v1743_v44  ;;  %20564 = vmatpush3.bf16.msk.msra.mxu0 %vm22859_vm4, %v23088_v54  ;;  %v1748_v54 = vld [vmem:[%s27306_s1 + $0x2e8] sm:$0xff]  ;;  %v2754_v44 = vld [vmem:[%s27306_s1 + $0x470] sm:$0xff] }
 0x1b8   :  { %20570 = vmatprep.subr.bf16.mxu0 %v23102_v60 }
 0x1ba   :  { %18484 = vmatmul.mubr.msk.f32.gmra.mrb[16].mxu0 %vm336_vm1, %v1744_v29  ;;  %v2755_v29 = vld [vmem:[%s27306_s1 + $0x478] sm:$0xff] }
 0x1bb   :  { %18486 = vmatprep.mubr.msk.f32.mxu0 %vm336_vm1, %v1745_v49  ;;  %v3111_v49 = vld [vmem:[%s27306_s1 + $0x480] sm:$0xff] }
 0x1bc   :  { %18695 = vmatprep.mubr.f32.mxu1 %v3111_v49 }
 0x1be   :  { %18487 = vmatmul.mubr.msk.f32.gmra.mrb[18].mxu0 %vm336_vm1, %v1746_v32  ;;  %v3075_v32 = vlaneseq }
 0x1bf   :  { %18489 = vmatprep.mubr.msk.f32.mxu0 %vm336_vm1, %v1747_v33 }
 0x1c0   :  { %v23587_v33 = vshrl.u32 %v3075_v32, 7 }
 0x1c2   :  { %18490 = vmatmul.mubr.msk.f32.gmra.mrb[20].mxu0 %vm336_vm1, %v1748_v54  ;;  %v23590_v54 = vsub.s32 0, %v23587_v33 }
 0x1c3   :  { %18492 = vmatprep.mubr.msk.f32.mxu0 %vm336_vm1, %v1749_v36  ;;  %v23595_v36 = vld [vmem:[%s27306_s1 + $0x800] sm:$0xff] }
 0x1c6   :  { %18493 = vmatmul.mubr.msk.f32.gmra.mrb[22].mxu0 %vm336_vm1, %v1750_v50  ;;  %v23599_v50 = vrot.slane %v23595_v36, %v23590_v54 }
 0x1c7   :  { %18527 = vmatprep.mubr.msk.f32.mxu0 %vm336_vm1, %v2070_v39 }
 0x1ca   :  { %18528 = vmatmul.mubr.msk.f32.vlgmr.msra.gmra.mrb[8].mxu0 %vm336_vm1, %v2071_v41 }
 0x1cb   :  { %20572 = vmatpush3.bf16.msra.mxu0 %v23102_v60  ;;  %18530 = vmatprep.mubr.msk.f32.mxu0 %vm336_vm1, %v2072_v42  ;;  %v2075_v60 = vld [vmem:[%s27306_s1 + $0x328] sm:$0xff] }
 0x1cc   :  { %20574 = vmatprep.subr.bf16.mxu0 %v23112_v1 }
 0x1ce   :  { %18531 = vmatmul.mubr.msk.f32.gmra.mrb[10].mxu0 %vm336_vm1, %v2073_v56 }
 0x1cf   :  { %18533 = vmatprep.mubr.msk.f32.mxu0 %vm336_vm1, %v2074_v43  ;;  %20576 = vmatpush3.bf16.msra.mxu0 %v23112_v1  ;;  %v2078_v1 = vld [vmem:[%s27306_s1 + $0x340] sm:$0xff] }
 0x1d0   :  { %20578 = vmatprep.subr.bf16.mxu0 %v23122_v10 }
 0x1d2   :  { %18534 = vmatmul.mubr.msk.f32.gmra.mrb[12].mxu0 %vm336_vm1, %v2075_v60 }
 0x1d3   :  { %18536 = vmatprep.mubr.msk.f32.mxu0 %vm336_vm1, %v2076_v27  ;;  %20580 = vmatpush3.bf16.msra.mxu0 %v23122_v10  ;;  %v2080_v10 = vld [vmem:[%s27306_s1 + $0x350] sm:$0xff] }
 0x1d4   :  { %20583 = vmatprep.subr.msk.bf16.mxu0 %vm22859_vm4, %v23132_v18 }
 0x1d6   :  { %18537 = vmatmul.mubr.msk.f32.gmra.mrb[14].mxu0 %vm336_vm1, %v2077_v61 }
 0x1d7   :  { %18539 = vmatprep.mubr.msk.f32.mxu0 %vm336_vm1, %v2078_v1  ;;  %20586 = vmatpush3.bf16.msk.msra.mxu0 %vm22859_vm4, %v23132_v18  ;;  %v2083_v18 = vld [vmem:[%s27306_s1 + $0x368] sm:$0xff] }
 0x1d8   :  { %20592 = vmatprep.subr.bf16.mxu0 %v23143_v26 }
 0x1da   :  { %18540 = vmatmul.mubr.msk.f32.gmra.mrb[16].mxu0 %vm336_vm1, %v2079_v47 }
 0x1db   :  { %18542 = vmatprep.mubr.msk.f32.mxu0 %vm336_vm1, %v2080_v10 }
 0x1de   :  { %18543 = vmatmul.mubr.msk.f32.gmra.mrb[18].mxu0 %vm336_vm1, %v2081_v48 }
 0x1df   :  { %18545 = vmatprep.mubr.msk.f32.mxu0 %vm336_vm1, %v2082_v51 }
 0x1e2   :  { %18546 = vmatmul.mubr.msk.f32.gmra.mrb[20].mxu0 %vm336_vm1, %v2083_v18 }
 0x1e3   :  { %18548 = vmatprep.mubr.msk.f32.mxu0 %vm336_vm1, %v2084_v2 }
 0x1e6   :  { %18549 = vmatmul.mubr.msk.f32.gmra.mrb[22].mxu0 %vm336_vm1, %v2085_v52 }
 0x1e7   :  { %18583 = vmatprep.mubr.msk.f32.mxu0 %vm336_vm1, %v2405_v53 }
 0x1ea   :  { %18584 = vmatmul.mubr.msk.f32.vlgmr.msra.gmra.mrb[8].mxu0 %vm336_vm1, %v2406_v57 }
 0x1eb   :  { %20594 = vmatpush3.bf16.msra.mxu0 %v23143_v26  ;;  %18586 = vmatprep.mubr.msk.f32.mxu0 %vm336_vm1, %v2407_v40  ;;  %v2410_v26 = vld [vmem:[%s27306_s1 + $0x3a8] sm:$0xff] }
 0x1ec   :  { %20596 = vmatprep.subr.bf16.mxu0 %v23155_v37 }
 0x1ee   :  { %18587 = vmatmul.mubr.msk.f32.gmra.mrb[10].mxu0 %vm336_vm1, %v2408_v58 }
 0x1ef   :  { %18589 = vmatprep.mubr.msk.f32.mxu0 %vm336_vm1, %v2409_v59  ;;  %20598 = vmatpush3.bf16.msra.mxu0 %v23155_v37  ;;  %v2413_v37 = vld [vmem:[%s27306_s1 + $0x3c0] sm:$0xff] }
 0x1f0   :  { %20600 = vmatprep.subr.bf16.mxu0 %v23178_v46 }
 0x1f2   :  { %18590 = vmatmul.mubr.msk.f32.gmra.mrb[12].mxu0 %vm336_vm1, %v2410_v26 }
 0x1f3   :  { %18592 = vmatprep.mubr.msk.f32.mxu0 %vm336_vm1, %v2411_v62  ;;  %20602 = vmatpush3.bf16.msra.mxu0 %v23178_v46  ;;  %v2415_v46 = vld [vmem:[%s27306_s1 + $0x3d0] sm:$0xff] }
 0x1f4   :  { %20605 = vmatprep.subr.msk.bf16.mxu0 %vm22859_vm4, %v23200_v34 }
 0x1f6   :  { %18593 = vmatmul.mubr.msk.f32.gmra.mrb[14].mxu0 %vm336_vm1, %v2412_v63 }
 0x1f7   :  { %18595 = vmatprep.mubr.msk.f32.mxu0 %vm336_vm1, %v2413_v37  ;;  %20608 = vmatpush3.bf16.msk.msra.mxu0 %vm22859_vm4, %v23200_v34  ;;  %v2418_v34 = vld [vmem:[%s27306_s1 + $0x3e8] sm:$0xff] }
 0x1fa   :  { %18596 = vmatmul.mubr.msk.f32.gmra.mrb[16].mxu0 %vm336_vm1, %v2414_v9 }
 0x1fb   :  { %18598 = vmatprep.mubr.msk.f32.mxu0 %vm336_vm1, %v2415_v46 }
 0x1fe   :  { %18599 = vmatmul.mubr.msk.f32.gmra.mrb[18].mxu0 %vm336_vm1, %v2416_v0 }
 0x1ff   :  { %18601 = vmatprep.mubr.msk.f32.mxu0 %vm336_vm1, %v2417_v45 }
 0x202   :  { %18602 = vmatmul.mubr.msk.f32.gmra.mrb[20].mxu0 %vm336_vm1, %v2418_v34 }
 0x203   :  { %18604 = vmatprep.mubr.msk.f32.mxu0 %vm336_vm1, %v2419_v16 }
 0x206   :  { %18605 = vmatmul.mubr.msk.f32.gmra.mrb[22].mxu0 %vm336_vm1, %v2420_v4 }
 0x207   :  { %18639 = vmatprep.mubr.msk.f32.mxu0 %vm336_vm1, %v2740_v21 }
 0x20a   :  { %18640 = vmatmul.mubr.msk.f32.vlgmr.msra.gmra.mrb[8].mxu0 %vm336_vm1, %v2741_v5 }
 0x20b   :  { %18642 = vmatprep.mubr.msk.f32.mxu0 %vm336_vm1, %v2742_v6 }
 0x20e   :  { %18643 = vmatmul.mubr.msk.f32.gmra.mrb[10].mxu0 %vm336_vm1, %v2743_v30 }
 0x20f   :  { %18645 = vmatprep.mubr.msk.f32.mxu0 %vm336_vm1, %v2744_v8 }
 0x212   :  { %18646 = vmatmul.mubr.msk.f32.gmra.mrb[12].mxu0 %vm336_vm1, %v2745_v11 }
 0x213   :  { %18648 = vmatprep.mubr.msk.f32.mxu0 %vm336_vm1, %v2746_v13 }
 0x216   :  { %18649 = vmatmul.mubr.msk.f32.gmra.mrb[14].mxu0 %vm336_vm1, %v2747_v15 }
 0x217   :  { %18651 = vmatprep.mubr.msk.f32.mxu0 %vm336_vm1, %v2748_v17 }
 0x21a   :  { %18652 = vmatmul.mubr.msk.f32.gmra.mrb[16].mxu0 %vm336_vm1, %v2749_v19 }
 0x21b   :  { %18654 = vmatprep.mubr.msk.f32.mxu0 %vm336_vm1, %v2750_v20 }
 0x21e   :  { %18655 = vmatmul.mubr.msk.f32.gmra.mrb[18].mxu0 %vm336_vm1, %v2751_v38 }
 0x21f   :  { %18657 = vmatprep.mubr.msk.f32.mxu0 %vm336_vm1, %v2752_v23 }
 0x222   :  { %18658 = vmatmul.mubr.msk.f32.gmra.mrb[20].mxu0 %vm336_vm1, %v2753_v24 }
 0x223   :  { %18660 = vmatprep.mubr.msk.f32.mxu0 %vm336_vm1, %v2754_v44 }
 0x226   :  { %18661 = vmatmul.mubr.msk.f32.gmra.mrb[22].mxu0 %vm336_vm1, %v2755_v29 }
 0x2dd   :  { %v18641_v39 = vpop.f32.mrb[8].mxu0 }
 0x2de   :  { %v3080_v41 = vadd.f32 %v18641_v39, %v23599_v50  ;;  %v2980_v42 = vpop.f32.mrb[9].mxu0 }
 0x2df   :  { %v3079_v56 = vadd.f32 %v23599_v50, %v2980_v42 }
 0x2e0   :  { %v3096_v43 = vmax.f32 %v3080_v41, 0.0 }
 0x2e1   :  { %v3095_v60 = vmax.f32 %v3079_v56, 0.0  ;;  %v18644_v27 = vpop.f32.mrb[10].mxu0 }
 0x2e2   :  { %v3082_v61 = vadd.f32 %v18644_v27, %v23599_v50  ;;  %v2990_v1 = vpop.f32.mrb[11].mxu0 }
 0x2e3   :  { %v23604_v47 = vpack.c.bf16 %v3096_v43, %v3095_v60  ;;  %v3081_v10 = vadd.f32 %v23599_v50, %v2990_v1  ;;  %v3113_v1 = vld [vmem:[%s27306_s1 + $0x490] sm:$0xff] }
 0x2e4   :  { %v3098_v48 = vmax.f32 %v3082_v61, 0.0  ;;  %v3112_v61 = vld [vmem:[%s27306_s1 + $0x488] sm:$0xff] }
 0x2e5   :  { %v3097_v51 = vmax.f32 %v3081_v10, 0.0  ;;  %v18647_v18 = vpop.f32.mrb[12].mxu0  ;;  %20610 = vmatprep.subr.bf16.mxu1 %v23604_v47  ;;  %v3114_v10 = vld [vmem:[%s27306_s1 + $0x498] sm:$0xff] }
 0x2e6   :  { %v3084_v2 = vadd.f32 %v18647_v18, %v23599_v50  ;;  %v3000_v52 = vpop.f32.mrb[13].mxu0  ;;  %20612 = vmatpush3.bf16.msra.mxu1 %v23604_v47  ;;  %v3202_v18 = vld [vmem:[%s27306_s1 + $0x4b0] sm:$0xff] }
 0x2e7   :  { %v23610_v53 = vpack.c.bf16 %v3098_v48, %v3097_v51  ;;  %v3083_v57 = vadd.f32 %v23599_v50, %v3000_v52  ;;  %v3200_v48 = vld [vmem:[%s27306_s1 + $0x4a0] sm:$0xff]  ;;  %v3201_v51 = vld [vmem:[%s27306_s1 + $0x4a8] sm:$0xff] }
 0x2e8   :  { %v3100_v40 = vmax.f32 %v3084_v2, 0.0  ;;  %v3203_v2 = vld [vmem:[%s27306_s1 + $0x4b8] sm:$0xff]  ;;  %v3293_v52 = vld [vmem:[%s27306_s1 + $0x4c0] sm:$0xff] }
 0x2e9   :  { %v3099_v58 = vmax.f32 %v3083_v57, 0.0  ;;  %v18650_v59 = vpop.f32.mrb[14].mxu0  ;;  %20614 = vmatprep.subr.bf16.mxu1 %v23610_v53  ;;  %v3294_v57 = vld [vmem:[%s27306_s1 + $0x4c8] sm:$0xff] }
 0x2ea   :  { %v3086_v26 = vadd.f32 %v18650_v59, %v23599_v50  ;;  %v3010_v62 = vpop.f32.mrb[15].mxu0  ;;  %20616 = vmatpush3.bf16.msra.mxu1 %v23610_v53  ;;  %v3386_v59 = vld [vmem:[%s27306_s1 + $0x4e0] sm:$0xff] }
 0x2eb   :  { %v23616_v63 = vpack.c.bf16 %v3100_v40, %v3099_v58  ;;  %v3085_v37 = vadd.f32 %v23599_v50, %v3010_v62  ;;  %v3295_v40 = vld [vmem:[%s27306_s1 + $0x4d0] sm:$0xff]  ;;  %v3296_v58 = vld [vmem:[%s27306_s1 + $0x4d8] sm:$0xff] }
 0x2ec   :  { %v3102_v9 = vmax.f32 %v3086_v26, 0.0  ;;  %v3389_v26 = vld [vmem:[%s27306_s1 + $0x4f8] sm:$0xff]  ;;  %v3483_v62 = vld [vmem:[%s27306_s1 + $0x6b0] sm:$0xff] }
 0x2ed   :  { %v3101_v46 = vmax.f32 %v3085_v37, 0.0  ;;  %v18653_v0 = vpop.f32.mrb[16].mxu0  ;;  %20618 = vmatprep.subr.bf16.mxu1 %v23616_v63 }
 0x2ee   :  { %v3088_v45 = vadd.f32 %v18653_v0, %v23599_v50  ;;  %v3020_v34 = vpop.f32.mrb[17].mxu0  ;;  %20620 = vmatpush3.bf16.msra.mxu1 %v23616_v63 }
 0x2ef   :  { %v23622_v16 = vpack.c.bf16 %v3102_v9, %v3101_v46  ;;  %v3087_v4 = vadd.f32 %v23599_v50, %v3020_v34  ;;  %v4256_v9 = vld [vmem:[%s27306_s1 + $0x6f0] sm:$0xff]  ;;  %v4257_v46 = vld [vmem:[%s27306_s1 + $0x6f8] sm:$0xff]  ;;  %v3587_v34 = vld [vmem:[%s27306_s1 + $0x6c8] sm:$0xff] }
 0x2f0   :  { %v3104_v21 = vmax.f32 %v3088_v45, 0.0  ;;  %v23758_v0 = vpack.c.bf16 %v4257_v46, %v4256_v9  ;;  %v3586_v45 = vld [vmem:[%s27306_s1 + $0x6c0] sm:$0xff] }
 0x2f1   :  { %v3103_v5 = vmax.f32 %v3087_v4, 0.0  ;;  %v18656_v6 = vpop.f32.mrb[18].mxu0  ;;  %20622 = vmatprep.subr.bf16.mxu1 %v23622_v16  ;;  %v23771_v4 = vpack.c.bf16 %v3587_v34, %v3586_v45 }
 0x2f2   :  { %v3090_v30 = vadd.f32 %v18656_v6, %v23599_v50  ;;  %v3030_v8 = vpop.f32.mrb[19].mxu0  ;;  %20624 = vmatpush3.bf16.msra.mxu1 %v23622_v16  ;;  %20786 = vmatprep.subr.bf16.mxu0 %v23758_v0 }
 0x2f3   :  { %v23628_v11 = vpack.c.bf16 %v3104_v21, %v3103_v5  ;;  %v3089_v13 = vadd.f32 %v23599_v50, %v3030_v8  ;;  %20788 = vmatpush3.bf16.msra.mxu0 %v23758_v0  ;;  %v4449_v21 = vld [vmem:[%s27306_s1 + $0x708] sm:$0xff] }
 0x2f4   :  { %v3106_v15 = vmax.f32 %v3090_v30, 0.0 }
 0x2f5   :  { %v3105_v17 = vmax.f32 %v3089_v13, 0.0  ;;  %v18659_v19 = vpop.f32.mrb[20].mxu0  ;;  %20626 = vmatprep.subr.bf16.mxu1 %v23628_v11 }
 0x2f6   :  { %v3092_v20 = vadd.f32 %v18659_v19, %v23599_v50  ;;  %v3040_v38 = vpop.f32.mrb[21].mxu0  ;;  %20628 = vmatpush3.bf16.msra.mxu1 %v23628_v11 }
 0x2f7   :  { %v23634_v23 = vpack.c.bf16 %v3106_v15, %v3105_v17  ;;  %v3091_v24 = vadd.f32 %v23599_v50, %v3040_v38 }
 0x2f8   :  { %v3108_v44 = vmax.f32 %v3092_v20, 0.0 }
 0x2f9   :  { %v3107_v29 = vmax.f32 %v3091_v24, 0.0  ;;  %v18662_v49 = vpop.f32.mrb[22].mxu0  ;;  %20630 = vmatprep.subr.bf16.mxu1 %v23634_v23 }
 0x2fa   :  { %v3094_v39 = vadd.f32 %v18662_v49, %v23599_v50  ;;  %v3050_v41 = vpop.f32.mrb[23].mxu0  ;;  %20632 = vmatpush3.bf16.msra.mxu1 %v23634_v23 }
 0x2fb   :  { %v23640_v42 = vpack.c.bf16 %v3108_v44, %v3107_v29  ;;  %v3093_v56 = vadd.f32 %v23599_v50, %v3050_v41 }
 0x2fc   :  { %v3110_v43 = vmax.f32 %v3094_v39, 0.0 }
 0x2fd   :  { %v3109_v60 = vmax.f32 %v3093_v56, 0.0  ;;  %20634 = vmatprep.subr.bf16.mxu1 %v23640_v42 }
 0x2fe   :  { %20636 = vmatpush3.bf16.msra.mxu1 %v23640_v42 }
 0x2ff   :  { %v23645_v27 = vpack.c.bf16 %v3110_v43, %v3109_v60 }
 0x301   :  { %20638 = vmatprep.subr.bf16.mxu1 %v23645_v27 }
 0x302   :  { %20640 = vmatpush3.bf16.msra.mxu1 %v23645_v27 }
 0x303   :  { %20642 = vmatprep.subr.bf16.mxu1 %v23604_v47 }
 0x305   :  { %18696 = vmatmul.mubr.f32.vlgmr.msra.gmra.mrb[64].mxu1 %v3112_v61  ;;  %v4641_v61 = vld [vmem:[%s27306_s1 + $0x718] sm:$0xff] }
 0x306   :  { %20644 = vmatpush3.bf16.msra.mxu1 %v23604_v47  ;;  %18698 = vmatprep.mubr.f32.mxu1 %v3113_v1 }
 0x307   :  { %20646 = vmatprep.subr.bf16.mxu1 %v23610_v53 }
 0x309   :  { %18699 = vmatmul.mubr.f32.gmra.mrb[66].mxu1 %v3114_v10 }
 0x30a   :  { %20648 = vmatpush3.bf16.msra.mxu1 %v23610_v53  ;;  %18733 = vmatprep.mubr.f32.mxu1 %v3200_v48 }
 0x30b   :  { %20650 = vmatprep.subr.bf16.mxu1 %v23616_v63 }
 0x30e   :  { %20652 = vmatpush3.bf16.msra.mxu1 %v23616_v63 }
 0x30f   :  { %20654 = vmatprep.subr.bf16.mxu1 %v23622_v16 }
 0x312   :  { %20656 = vmatpush3.bf16.msra.mxu1 %v23622_v16 }
 0x313   :  { %20658 = vmatprep.subr.bf16.mxu1 %v23628_v11 }
 0x316   :  { %20660 = vmatpush3.bf16.msra.mxu1 %v23628_v11 }
 0x317   :  { %20662 = vmatprep.subr.bf16.mxu1 %v23634_v23 }
 0x31a   :  { %20664 = vmatpush3.bf16.msra.mxu1 %v23634_v23 }
 0x31b   :  { %20666 = vmatprep.subr.bf16.mxu1 %v23640_v42 }
 0x31e   :  { %20668 = vmatpush3.bf16.msra.mxu1 %v23640_v42 }
 0x31f   :  { %20670 = vmatprep.subr.bf16.mxu1 %v23645_v27 }
 0x322   :  { %20672 = vmatpush3.bf16.msra.mxu1 %v23645_v27 }
 0x323   :  { %20674 = vmatprep.subr.bf16.mxu1 %v23604_v47 }
 0x325   :  { %18734 = vmatmul.mubr.f32.vlgmr.msra.gmra.mrb[68].mxu1 %v3201_v51 }
 0x326   :  { %20676 = vmatpush3.bf16.msra.mxu1 %v23604_v47  ;;  %18736 = vmatprep.mubr.f32.mxu1 %v3202_v18 }
 0x327   :  { %20678 = vmatprep.subr.bf16.mxu1 %v23610_v53 }
 0x329   :  { %18737 = vmatmul.mubr.f32.gmra.mrb[70].mxu1 %v3203_v2 }
 0x32a   :  { %20680 = vmatpush3.bf16.msra.mxu1 %v23610_v53  ;;  %18771 = vmatprep.mubr.f32.mxu1 %v3293_v52 }
 0x32b   :  { %20682 = vmatprep.subr.bf16.mxu1 %v23616_v63 }
 0x32e   :  { %20684 = vmatpush3.bf16.msra.mxu1 %v23616_v63 }
 0x32f   :  { %20686 = vmatprep.subr.bf16.mxu1 %v23622_v16 }
 0x332   :  { %20688 = vmatpush3.bf16.msra.mxu1 %v23622_v16 }
 0x333   :  { %20690 = vmatprep.subr.bf16.mxu1 %v23628_v11 }
 0x336   :  { %20692 = vmatpush3.bf16.msra.mxu1 %v23628_v11 }
 0x337   :  { %20694 = vmatprep.subr.bf16.mxu1 %v23634_v23 }
 0x33a   :  { %20696 = vmatpush3.bf16.msra.mxu1 %v23634_v23 }
 0x33b   :  { %20698 = vmatprep.subr.bf16.mxu1 %v23640_v42 }
 0x33e   :  { %20700 = vmatpush3.bf16.msra.mxu1 %v23640_v42 }
 0x33f   :  { %20702 = vmatprep.subr.bf16.mxu1 %v23645_v27 }
 0x342   :  { %20704 = vmatpush3.bf16.msra.mxu1 %v23645_v27 }
 0x343   :  { %20706 = vmatprep.subr.bf16.mxu1 %v23604_v47 }
 0x345   :  { %18772 = vmatmul.mubr.f32.vlgmr.msra.gmra.mrb[72].mxu1 %v3294_v57 }
 0x346   :  { %20708 = vmatpush3.bf16.msra.mxu1 %v23604_v47  ;;  %18774 = vmatprep.mubr.f32.mxu1 %v3295_v40  ;;  %v3387_v47 = vld [vmem:[%s27306_s1 + $0x4e8] sm:$0xff]  ;;  %v4832_v40 = vld [vmem:[%s27306_s1 + $0x720] sm:$0xff] }
 0x347   :  { %20710 = vmatprep.subr.bf16.mxu1 %v23610_v53 }
 0x349   :  { %18775 = vmatmul.mubr.f32.gmra.mrb[74].mxu1 %v3296_v58  ;;  %v4833_v58 = vld [vmem:[%s27306_s1 + $0x728] sm:$0xff] }
 0x34a   :  { %20712 = vmatpush3.bf16.msra.mxu1 %v23610_v53  ;;  %18809 = vmatprep.mubr.f32.mxu1 %v3386_v59  ;;  %v3388_v53 = vld [vmem:[%s27306_s1 + $0x4f0] sm:$0xff]  ;;  %v23825_v59 = vpack.c.bf16 %v4833_v58, %v4832_v40  ;;  %v3585_v40 = vld [vmem:[%s27306_s1 + $0x538] sm:$0xff] }
 0x34b   :  { %20714 = vmatprep.subr.bf16.mxu1 %v23616_v63 }
 0x34e   :  { %20716 = vmatpush3.bf16.msra.mxu1 %v23616_v63  ;;  %v3484_v63 = vld [vmem:[%s27306_s1 + $0x6b8] sm:$0xff] }
 0x34f   :  { %20718 = vmatprep.subr.bf16.mxu1 %v23622_v16  ;;  %v23748_v37 = vpack.c.bf16 %v3484_v63, %v3483_v62  ;;  %v3582_v62 = vld [vmem:[%s27306_s1 + $0x520] sm:$0xff] }
 0x352   :  { %20720 = vmatpush3.bf16.msra.mxu1 %v23622_v16  ;;  %v4448_v16 = vld [vmem:[%s27306_s1 + $0x700] sm:$0xff] }
 0x353   :  { %20722 = vmatprep.subr.bf16.mxu1 %v23628_v11  ;;  %v23776_v5 = vpack.c.bf16 %v4449_v21, %v4448_v16 }
 0x355   :  { %20798 = vmatprep.subr.bf16.mxu0 %v23776_v5 }
 0x356   :  { %20724 = vmatpush3.bf16.msra.mxu1 %v23628_v11 }
 0x357   :  { %20726 = vmatprep.subr.bf16.mxu1 %v23634_v23 }
 0x35a   :  { %20728 = vmatpush3.bf16.msra.mxu1 %v23634_v23 }
 0x35b   :  { %20730 = vmatprep.subr.bf16.mxu1 %v23640_v42 }
 0x35e   :  { %20732 = vmatpush3.bf16.msra.mxu1 %v23640_v42 }
 0x35f   :  { %20734 = vmatprep.subr.bf16.mxu1 %v23645_v27 }
 0x362   :  { %20736 = vmatpush3.bf16.msra.mxu1 %v23645_v27  ;;  %v4640_v27 = vld [vmem:[%s27306_s1 + $0x710] sm:$0xff] }
 0x363   :  { %20738 = vmatprep.subr.bf16.mxu1 %v23748_v37  ;;  %v23790_v51 = vpack.c.bf16 %v4641_v61, %v4640_v27  ;;  %v3584_v27 = vld [vmem:[%s27306_s1 + $0x530] sm:$0xff] }
 0x364   :  { %v3872_v61 = vld [vmem:[%s27306_s1 + $0x6d0] sm:$0xff] }
 0x365   :  { %18810 = vmatmul.mubr.f32.vlgmr.msra.gmra.mrb[76].mxu1 %v3387_v47  ;;  %v5024_v47 = vld [vmem:[%s27306_s1 + $0x730] sm:$0xff] }
 0x366   :  { %18812 = vmatprep.mubr.f32.mxu1 %v3388_v53  ;;  %20740 = vmatpush3.bf16.msra.mxu1 %v23748_v37  ;;  %v5025_v53 = vld [vmem:[%s27306_s1 + $0x738] sm:$0xff] }
 0x367   :  { %20742 = vmatprep.subr.bf16.mxu1 %v23771_v4 }
 0x369   :  { %18813 = vmatmul.mubr.f32.gmra.mrb[78].mxu1 %v3389_v26  ;;  %v23849_v26 = vpack.c.bf16 %v5025_v53, %v5024_v47  ;;  %v3479_v47 = vld [vmem:[%s27306_s1 + $0x500] sm:$0xff] }
 0x3d8   :  { %v18697_v6 = vpop.f32.mrb[64].mxu1 }
 0x3d9   :  { %v3181_v30 = vpop.f32.mrb[65].mxu1 }
 0x3dc   :  { %v18700_v8 = vpop.f32.mrb[66].mxu1 }
 0x3dd   :  { %v3191_v11 = vpop.f32.mrb[67].mxu1 }
 0x3f8   :  { %v18735_v13 = vpop.f32.mrb[68].mxu1 }
 0x3f9   :  { %v3290_v15 = vmax.f32 %v18697_v6, %v18735_v13  ;;  %v3270_v17 = vpop.f32.mrb[69].mxu1 }
 0x3fa   :  { %v3289_v19 = vmax.f32 %v3181_v30, %v3270_v17 }
 0x3fc   :  { %v18738_v20 = vpop.f32.mrb[70].mxu1 }
 0x3fd   :  { %v3292_v38 = vmax.f32 %v18700_v8, %v18738_v20  ;;  %v3280_v23 = vpop.f32.mrb[71].mxu1 }
 0x3fe   :  { %v3291_v24 = vmax.f32 %v3191_v11, %v3280_v23 }
 0x418   :  { %v18773_v44 = vpop.f32.mrb[72].mxu1 }
 0x419   :  { %v3383_v29 = vmax.f32 %v3290_v15, %v18773_v44  ;;  %v3363_v49 = vpop.f32.mrb[73].mxu1 }
 0x41a   :  { %v3382_v39 = vmax.f32 %v3289_v19, %v3363_v49 }
 0x41c   :  { %v18776_v41 = vpop.f32.mrb[74].mxu1 }
 0x41d   :  { %v3385_v42 = vmax.f32 %v3292_v38, %v18776_v41  ;;  %v3373_v56 = vpop.f32.mrb[75].mxu1 }
 0x41e   :  { %v3384_v43 = vmax.f32 %v3291_v24, %v3373_v56 }
 0x438   :  { %v18811_v60 = vpop.f32.mrb[76].mxu1 }
 0x439   :  { %v23786_v1 = vmax.f32 %v3383_v29, %v18811_v60  ;;  %v3456_v10 = vpop.f32.mrb[77].mxu1 }
 0x43a   :  { %v23788_v48 = vmax.f32 %v3382_v39, %v3456_v10  ;;  %v3873_v10 = vld [vmem:[%s27306_s1 + $0x6d8] sm:$0xff] }
 0x43b   :  { %v23912_v53 = vpack.c.bf16 %v3873_v10, %v3872_v61  ;;  %v3869_v61 = vld [vmem:[%s27306_s1 + $0x548] sm:$0xff]  ;;  %v3870_v10 = vld [vmem:[%s27306_s1 + $0x550] sm:$0xff] }
 0x43c   :  { %v18814_v18 = vpop.f32.mrb[78].mxu1  ;;  %18819 = vmatprep.mubr.msk.f32.mxu1 %vm83_vm0, %v23788_v48  ;;  %18915 = vmatprep.mubr.msk.f32.mxu0 %vm83_vm0, %v23788_v48 }
 0x43d   :  { %v23796_v2 = vmax.f32 %v3385_v42, %v18814_v18  ;;  %v3466_v52 = vpop.f32.mrb[79].mxu1  ;;  %18820 = vmatmul.mubr.msk.f32.vlgmr.msra.gmra.mrb[80].mxu1 %vm83_vm0, %v23786_v1  ;;  %18916 = vmatmul.mubr.msk.f32.vlgmr.msra.gmra.mrb[24].mxu0 %vm83_vm0, %v23786_v1 }
 0x43e   :  { %v23802_v57 = vmax.f32 %v3384_v43, %v3466_v52  ;;  %20744 = vmatpush3.bf16.msra.mxu1 %v23771_v4  ;;  %20800 = vmatpush3.bf16.msra.mxu0 %v23776_v5  ;;  %v3583_v43 = vld [vmem:[%s27306_s1 + $0x528] sm:$0xff] }
 0x43f   :  { %20810 = vmatprep.subr.bf16.mxu0 %v23790_v51 }
 0x440   :  { %18822 = vmatprep.mubr.msk.f32.mxu1 %vm83_vm0, %v23802_v57  ;;  %18918 = vmatprep.mubr.msk.f32.mxu0 %vm83_vm0, %v23802_v57 }
 0x441   :  { %18823 = vmatmul.mubr.msk.f32.gmra.mrb[82].mxu1 %vm83_vm0, %v23796_v2  ;;  %18919 = vmatmul.mubr.msk.f32.gmra.mrb[26].mxu0 %vm83_vm0, %v23796_v2 }
 0x442   :  { %18829 = vmatprep.mubr.msk.f32.mxu1 %vm83_vm0, %v23788_v48  ;;  %18939 = vmatprep.mubr.msk.f32.mxu0 %vm83_vm0, %v23788_v48 }
 0x445   :  { %18830 = vmatmul.mubr.msk.f32.vlgmr.msra.gmra.mrb[84].mxu1 %vm83_vm0, %v23786_v1  ;;  %18940 = vmatmul.mubr.msk.f32.vlgmr.msra.gmra.mrb[28].mxu0 %vm83_vm0, %v23786_v1 }
 0x446   :  { %18832 = vmatprep.mubr.msk.f32.mxu1 %vm83_vm0, %v23802_v57  ;;  %18942 = vmatprep.mubr.msk.f32.mxu0 %vm83_vm0, %v23802_v57 }
 0x447   :  { %20812 = vmatpush3.bf16.msra.mxu0 %v23790_v51 }
 0x448   :  { %20822 = vmatprep.subr.bf16.mxu0 %v23825_v59 }
 0x449   :  { %18833 = vmatmul.mubr.msk.f32.gmra.mrb[86].mxu1 %vm83_vm0, %v23796_v2  ;;  %18943 = vmatmul.mubr.msk.f32.gmra.mrb[30].mxu0 %vm83_vm0, %v23796_v2 }
 0x44a   :  { %18963 = vmatprep.mubr.msk.f32.mxu0 %vm83_vm0, %v23788_v48  ;;  %18843 = vmatprep.mubr.msk.f32.mxu1 %vm3673_vm5, %v3582_v62 }
 0x44d   :  { %18964 = vmatmul.mubr.msk.f32.vlgmr.msra.gmra.mrb[32].mxu0 %vm83_vm0, %v23786_v1 }
 0x44e   :  { %18966 = vmatprep.mubr.msk.f32.mxu0 %vm83_vm0, %v23802_v57  ;;  %20824 = vmatpush3.bf16.msra.mxu0 %v23825_v59 }
 0x44f   :  { %20834 = vmatprep.subr.bf16.mxu0 %v23849_v26 }
 0x451   :  { %18967 = vmatmul.mubr.msk.f32.gmra.mrb[34].mxu0 %vm83_vm0, %v23796_v2 }
 0x452   :  { %18987 = vmatprep.mubr.msk.f32.mxu0 %vm83_vm0, %v23788_v48 }
 0x455   :  { %18988 = vmatmul.mubr.msk.f32.vlgmr.msra.gmra.mrb[36].mxu0 %vm83_vm0, %v23786_v1 }
 0x456   :  { %18990 = vmatprep.mubr.msk.f32.mxu0 %vm83_vm0, %v23802_v57  ;;  %20836 = vmatpush3.bf16.msra.mxu0 %v23849_v26 }
 0x459   :  { %18991 = vmatmul.mubr.msk.f32.gmra.mrb[38].mxu0 %vm83_vm0, %v23796_v2 }
 0x45a   :  { %19011 = vmatprep.mubr.msk.f32.mxu0 %vm83_vm0, %v23788_v48 }
 0x45d   :  { %19012 = vmatmul.mubr.msk.f32.vlgmr.msra.gmra.mrb[40].mxu0 %vm83_vm0, %v23786_v1 }
 0x45e   :  { %19014 = vmatprep.mubr.msk.f32.mxu0 %vm83_vm0, %v23802_v57 }
 0x461   :  { %19015 = vmatmul.mubr.msk.f32.gmra.mrb[42].mxu0 %vm83_vm0, %v23796_v2 }
 0x510   :  { %v18821_v63 = vpop.f32.mrb[80].mxu1  ;;  %v18917_v9 = vpop.f32.mrb[24].mxu0 }
 0x511   :  { %v3563_v46 = vpop.f32.mrb[81].mxu1  ;;  %v4324_v45 = vpop.f32.mrb[25].mxu0 }
 0x512   :  { %v20753_v34 = vpack.c.bf16 %v18821_v63, %v3563_v46  ;;  %v23880_v16 = vpack.c.bf16 %v18917_v9, %v4324_v45  ;;  %v3480_v9 = vld [vmem:[%s27306_s1 + $0x508] sm:$0xff]  ;;  %v3481_v45 = vld [vmem:[%s27306_s1 + $0x510] sm:$0xff] }
 0x514   :  { %v18824_v21 = vpop.f32.mrb[82].mxu1  ;;  %v18920_v6 = vpop.f32.mrb[26].mxu0 }
 0x515   :  { %v3573_v30 = vpop.f32.mrb[83].mxu1  ;;  %v4334_v8 = vpop.f32.mrb[27].mxu0 }
 0x516   :  { %v20757_v11 = vpack.c.bf16 %v18824_v21, %v3573_v30  ;;  %v23882_v13 = vpack.c.bf16 %v18920_v6, %v4334_v8  ;;  %v3482_v6 = vld [vmem:[%s27306_s1 + $0x518] sm:$0xff] }
 0x518   :  { %v18831_v15 = vpop.f32.mrb[84].mxu1  ;;  %v18941_v17 = vpop.f32.mrb[28].mxu0 }
 0x519   :  { %v3654_v19 = vpop.f32.mrb[85].mxu1  ;;  %v4516_v20 = vpop.f32.mrb[29].mxu0 }
 0x51a   :  { %v20745_v38 = vpack.c.bf16 %v18831_v15, %v3654_v19  ;;  %v23884_v23 = vpack.c.bf16 %v18941_v17, %v4516_v20 }
 0x51c   :  { %v18834_v24 = vpop.f32.mrb[86].mxu1  ;;  %20746 = vmatprep.subr.bf16.mxu1 %v20745_v38  ;;  %v18944_v44 = vpop.f32.mrb[30].mxu0 }
 0x51d   :  { %v3664_v29 = vpop.f32.mrb[87].mxu1  ;;  %20748 = vmatpush3.bf16.msra.mxu1 %v20745_v38  ;;  %v4526_v49 = vpop.f32.mrb[31].mxu0  ;;  %v3868_v38 = vld [vmem:[%s27306_s1 + $0x540] sm:$0xff] }
 0x51e   :  { %v20749_v39 = vpack.c.bf16 %v18834_v24, %v3664_v29  ;;  %v23886_v41 = vpack.c.bf16 %v18944_v44, %v4526_v49  ;;  %v4064_v49 = vld [vmem:[%s27306_s1 + $0x6e0] sm:$0xff] }
 0x520   :  { %20750 = vmatprep.subr.bf16.mxu1 %v20749_v39  ;;  %v18965_v42 = vpop.f32.mrb[32].mxu0 }
 0x521   :  { %20752 = vmatpush3.bf16.msra.mxu1 %v20749_v39  ;;  %v4708_v56 = vpop.f32.mrb[33].mxu0  ;;  %v4065_v39 = vld [vmem:[%s27306_s1 + $0x6e8] sm:$0xff] }
 0x522   :  { %v23891_v60 = vpack.c.bf16 %v18965_v42, %v4708_v56  ;;  %20754 = vmatprep.subr.bf16.mxu1 %v20753_v34 }
 0x524   :  { %18844 = vmatmul.mubr.msk.f32.vlgmr.msra.gmra.mrb[88].mxu1 %vm3673_vm5, %v3583_v43  ;;  %v18968_v18 = vpop.f32.mrb[34].mxu0 }
 0x525   :  { %20756 = vmatpush3.bf16.msra.mxu1 %v20753_v34  ;;  %v4718_v52 = vpop.f32.mrb[35].mxu0  ;;  %18846 = vmatprep.mubr.msk.f32.mxu1 %vm3673_vm5, %v3584_v27  ;;  %v23956_v27 = vpack.c.bf16 %v4065_v39, %v4064_v49  ;;  %v4638_v49 = vld [vmem:[%s27306_s1 + $0x5d0] sm:$0xff]  ;;  %v4828_v39 = vld [vmem:[%s27306_s1 + $0x5e0] sm:$0xff] }
 0x526   :  { %v23907_v58 = vpack.c.bf16 %v18968_v18, %v4718_v52  ;;  %20758 = vmatprep.subr.bf16.mxu1 %v20757_v11  ;;  %v3871_v18 = vld [vmem:[%s27306_s1 + $0x558] sm:$0xff]  ;;  %v4060_v52 = vld [vmem:[%s27306_s1 + $0x560] sm:$0xff] }
 0x528   :  { %18847 = vmatmul.mubr.msk.f32.gmra.mrb[90].mxu1 %vm3673_vm5, %v3585_v40  ;;  %v18989_v62 = vpop.f32.mrb[36].mxu0  ;;  %v47_v40 = vld [vmem:[%s27306_s1 + $0x740] sm:$0xff] }
 0x529   :  { %20760 = vmatpush3.bf16.msra.mxu1 %v20757_v11  ;;  %v4900_v63 = vpop.f32.mrb[37].mxu0  ;;  %18857 = vmatprep.mubr.msk.f32.mxu1 %vm3673_vm5, %v3479_v47  ;;  %v52_v47 = vld [vmem:[%s27306_s1 + $0x7b8] sm:$0xff] }
 0x52a   :  { %v23919_v46 = vpack.c.bf16 %v18989_v62, %v4900_v63  ;;  %20762 = vmatprep.subr.bf16.mxu1 %v23912_v53  ;;  %5228 = vrot.lane.b32.xlu0 %v47_v40, %s22536_s9 }
 0x52c   :  { %18858 = vmatmul.mubr.msk.f32.vlgmr.msra.gmra.mrb[88].mxu1 %vm3673_vm5, %v3480_v9  ;;  %v18992_v34 = vpop.f32.mrb[38].mxu0 }
 0x52d   :  { %20764 = vmatpush3.bf16.msra.mxu1 %v23912_v53  ;;  %v4910_v21 = vpop.f32.mrb[39].mxu0  ;;  %18860 = vmatprep.mubr.msk.f32.mxu1 %vm3673_vm5, %v3481_v45 }
 0x52e   :  { %v23931_v30 = vpack.c.bf16 %v18992_v34, %v4910_v21 }
 0x530   :  { %18861 = vmatmul.mubr.msk.f32.gmra.mrb[90].mxu1 %vm3673_vm5, %v3482_v6  ;;  %v19013_v8 = vpop.f32.mrb[40].mxu0 }
 0x531   :  { %18867 = vmatprep.mubr.msk.f32.mxu1 %vm83_vm0, %v23788_v48  ;;  %v5092_v11 = vpop.f32.mrb[41].mxu0 }
 0x532   :  { %v23936_v15 = vpack.c.bf16 %v19013_v8, %v5092_v11  ;;  %v4061_v8 = vld [vmem:[%s27306_s1 + $0x568] sm:$0xff]  ;;  %v4062_v11 = vld [vmem:[%s27306_s1 + $0x570] sm:$0xff] }
 0x534   :  { %18868 = vmatmul.mubr.msk.f32.vlgmr.msra.gmra.mrb[92].mxu1 %vm83_vm0, %v23786_v1  ;;  %v19016_v17 = vpop.f32.mrb[42].mxu0 }
 0x535   :  { %18870 = vmatprep.mubr.msk.f32.mxu1 %vm83_vm0, %v23802_v57  ;;  %v5102_v19 = vpop.f32.mrb[43].mxu0 }
 0x536   :  { %v23942_v20 = vpack.c.bf16 %v19016_v17, %v5102_v19  ;;  %v4063_v17 = vld [vmem:[%s27306_s1 + $0x578] sm:$0xff]  ;;  %v4252_v19 = vld [vmem:[%s27306_s1 + $0x580] sm:$0xff] }
 0x538   :  { %18871 = vmatmul.mubr.msk.f32.gmra.mrb[94].mxu1 %vm83_vm0, %v23796_v2 }
 0x539   :  { %18881 = vmatprep.mubr.msk.f32.mxu1 %vm3673_vm5, %v3868_v38  ;;  %v4254_v38 = vld [vmem:[%s27306_s1 + $0x590] sm:$0xff] }
 0x607   :  { %v18869_v24 = vpop.f32.mrb[92].mxu1 }
 0x608   :  { %v3940_v44 = vpop.f32.mrb[93].mxu1 }
 0x609   :  { %v20765_v29 = vpack.c.bf16 %v18869_v24, %v3940_v44  ;;  %v4444_v24 = vld [vmem:[%s27306_s1 + $0x5a0] sm:$0xff]  ;;  %v4446_v44 = vld [vmem:[%s27306_s1 + $0x5b0] sm:$0xff] }
 0x60b   :  { %v18872_v42 = vpop.f32.mrb[94].mxu1  ;;  %20766 = vmatprep.subr.bf16.mxu1 %v20765_v29 }
 0x60c   :  { %v3950_v56 = vpop.f32.mrb[95].mxu1  ;;  %20768 = vmatpush3.bf16.msra.mxu1 %v20765_v29  ;;  %v4636_v29 = vld [vmem:[%s27306_s1 + $0x5c0] sm:$0xff] }
 0x60d   :  { %v20769_v43 = vpack.c.bf16 %v18872_v42, %v3950_v56  ;;  %v4830_v42 = vld [vmem:[%s27306_s1 + $0x5f0] sm:$0xff]  ;;  %v5020_v56 = vld [vmem:[%s27306_s1 + $0x600] sm:$0xff] }
 0x60f   :  { %20770 = vmatprep.subr.bf16.mxu1 %v20769_v43 }
 0x610   :  { %20772 = vmatpush3.bf16.msra.mxu1 %v20769_v43  ;;  %v5022_v43 = vld [vmem:[%s27306_s1 + $0x610] sm:$0xff] }
 0x611   :  { %20774 = vmatprep.subr.bf16.mxu1 %v23956_v27 }
 0x613   :  { %18882 = vmatmul.mubr.msk.f32.vlgmr.msra.gmra.mrb[88].mxu1 %vm3673_vm5, %v3869_v61  ;;  %v53_v61 = vld [vmem:[%s27306_s1 + $0x7c0] sm:$0xff] }
 0x614   :  { %20776 = vmatpush3.bf16.msra.mxu1 %v23956_v27  ;;  %18884 = vmatprep.mubr.msk.f32.mxu1 %vm3673_vm5, %v3870_v10  ;;  %v54_v10 = vld [vmem:[%s27306_s1 + $0x7c8] sm:$0xff] }
 0x617   :  { %18885 = vmatmul.mubr.msk.f32.gmra.mrb[90].mxu1 %vm3673_vm5, %v3871_v18  ;;  %v24130_v18 = vpack.c.bf16 %v54_v10, %v53_v61 }
 0x618   :  { %18891 = vmatprep.mubr.msk.f32.mxu1 %vm83_vm0, %v23788_v48  ;;  %v51_v48 = vld [vmem:[%s27306_s1 + $0x7b0] sm:$0xff] }
 0x619   :  { %v24004_v62 = vpack.c.bf16 %v52_v47, %v51_v48  ;;  %v24157_v48 = vld [vmem:[%s27305_s0 + $0x48] sm:$0xff]  ;;  %v24180_v47 = vld [vmem:[%s27305_s0 + $0x60] sm:$0xff] }
 0x61b   :  { %18892 = vmatmul.mubr.msk.f32.vlgmr.msra.gmra.mrb[96].mxu1 %vm83_vm0, %v23786_v1  ;;  %v49_v1 = vld [vmem:[%s27306_s1 + $0x750] sm:$0xff]  ;;  %20846 = vmatprep.subr.bf16.mxu0 %v24004_v62 }
 0x61c   :  { %18894 = vmatprep.mubr.msk.f32.mxu1 %vm83_vm0, %v23802_v57  ;;  %5232 = vrot.lane.b32.xlu1 %v49_v1, %s22536_s9  ;;  %v50_v57 = vld [vmem:[%s27306_s1 + $0x758] sm:$0xff]  ;;  %v24152_v1 = vld [vmem:[%s27305_s0 + $0x40] sm:$0xff] }
 0x61d   :  { %20848 = vmatpush3.bf16.msra.mxu0 %v24004_v62 }
 0x61e   :  { %20850 = vmatprep.subr.bf16.mxu0 %v24130_v18 }
 0x61f   :  { %18895 = vmatmul.mubr.msk.f32.gmra.mrb[98].mxu1 %vm83_vm0, %v23796_v2  ;;  %v48_v2 = vld [vmem:[%s27306_s1 + $0x748] sm:$0xff] }
 0x620   :  { %18905 = vmatprep.mubr.msk.f32.mxu1 %vm3673_vm5, %v4060_v52  ;;  %5230 = vrot.lane.b32.xlu0 %v48_v2, %s22536_s9  ;;  %v56_v52 = vld [vmem:[%s27306_s1 + $0x7d8] sm:$0xf]  ;;  %v24166_v2 = vld [vmem:[%s27305_s0 + $0x50] sm:$0xff] }
 0x621   :  { %5234 = vrot.lane.b32.xlu1 %v50_v57, %s22536_s9  ;;  %20852 = vmatpush3.bf16.msra.mxu0 %v24130_v18  ;;  %v24171_v57 = vld [vmem:[%s27305_s0 + $0x58] sm:$0xff] }
 0x6ee   :  { %v18893_v63 = vpop.f32.mrb[96].mxu1 }
 0x6ef   :  { %v4132_v9 = vpop.f32.mrb[97].mxu1 }
 0x6f0   :  { %v20777_v45 = vpack.c.bf16 %v18893_v63, %v4132_v9  ;;  %v24185_v63 = vld [vmem:[%s27305_s0 + $0x68] sm:$0xff]  ;;  %v24194_v9 = vld [vmem:[%s27305_s0 + $0x70] sm:$0xff] }
 0x6f2   :  { %v18896_v34 = vpop.f32.mrb[98].mxu1  ;;  %20778 = vmatprep.subr.bf16.mxu1 %v20777_v45 }
 0x6f3   :  { %v4142_v21 = vpop.f32.mrb[99].mxu1  ;;  %20780 = vmatpush3.bf16.msra.mxu1 %v20777_v45  ;;  %v24199_v45 = vld [vmem:[%s27305_s0 + $0x78] sm:$0xf]  ;;  %s16819_s0 = sld [smem:[#allocation2 + $0x81]] }
 0x6f4   :  { %v20781_v6 = vpack.c.bf16 %v18896_v34, %v4142_v21  ;;  %v22283_v34 = vld [vmem:[%s27306_s1 + $0x80] sm:$0xff]  ;;  %v24210_v21 = vsub.s32 1, %v23587_v33 }
 0x6f6   :  { %20782 = vmatprep.subr.bf16.mxu1 %v20781_v6 }
 0x6f7   :  { %20784 = vmatpush3.bf16.msra.mxu1 %v20781_v6  ;;  %v24212_v6 = vpop.permute.xlu0 %5228 }
 0x6f8   :  { %20790 = vmatprep.subr.bf16.mxu1 %v23880_v16 }
 0x6f9   :  { %s11218_s17 = scalar_lea.vmem %s27307_s2, %s16819_s0 }
 0x6fa   :  { %18906 = vmatmul.mubr.msk.f32.vlgmr.msra.gmra.mrb[88].mxu1 %vm3673_vm5, %v4061_v8  ;;  %v24216_v8 = vrot.slane %v23595_v36, %v24210_v21 }
 0x6fb   :  { %20792 = vmatpush3.bf16.msra.mxu1 %v23880_v16  ;;  %18908 = vmatprep.mubr.msk.f32.mxu1 %vm3673_vm5, %v4062_v11  ;;  %v4253_v16 = vld [vmem:[%s27306_s1 + $0x588] sm:$0xff] }
 0x6fc   :  { %20794 = vmatprep.subr.bf16.mxu1 %v23882_v13 }
 0x6fe   :  { %18909 = vmatmul.mubr.msk.f32.gmra.mrb[90].mxu1 %vm3673_vm5, %v4063_v17  ;;  %v24218_v17 = vpop.permute.xlu1 %5232 }
 0x6ff   :  { %20796 = vmatpush3.bf16.msra.mxu1 %v23882_v13  ;;  %18929 = vmatprep.mubr.msk.f32.mxu1 %vm3673_vm5, %v4252_v19  ;;  %v4255_v13 = vld [vmem:[%s27306_s1 + $0x598] sm:$0xff] }
 0x700   :  { %20802 = vmatprep.subr.bf16.mxu1 %v23884_v23 }
 0x702   :  { %18930 = vmatmul.mubr.msk.f32.vlgmr.msra.gmra.mrb[88].mxu1 %vm3673_vm5, %v4253_v16 }
 0x703   :  { %20804 = vmatpush3.bf16.msra.mxu1 %v23884_v23  ;;  %18932 = vmatprep.mubr.msk.f32.mxu1 %vm3673_vm5, %v4254_v38  ;;  %v4445_v23 = vld [vmem:[%s27306_s1 + $0x5a8] sm:$0xff] }
 0x704   :  { %20806 = vmatprep.subr.bf16.mxu1 %v23886_v41 }
 0x706   :  { %18933 = vmatmul.mubr.msk.f32.gmra.mrb[90].mxu1 %vm3673_vm5, %v4255_v13  ;;  %v24222_v13 = vpop.permute.xlu0 %5230 }
 0x707   :  { %20808 = vmatpush3.bf16.msra.mxu1 %v23886_v41  ;;  %18953 = vmatprep.mubr.msk.f32.mxu1 %vm3673_vm5, %v4444_v24  ;;  %v4447_v41 = vld [vmem:[%s27306_s1 + $0x5b8] sm:$0xff] }
 0x708   :  { %20814 = vmatprep.subr.bf16.mxu1 %v23891_v60 }
 0x70a   :  { %18954 = vmatmul.mubr.msk.f32.vlgmr.msra.gmra.mrb[88].mxu1 %vm3673_vm5, %v4445_v23 }
 0x70b   :  { %20816 = vmatpush3.bf16.msra.mxu1 %v23891_v60  ;;  %18956 = vmatprep.mubr.msk.f32.mxu1 %vm3673_vm5, %v4446_v44  ;;  %v4637_v60 = vld [vmem:[%s27306_s1 + $0x5c8] sm:$0xff] }
 0x70c   :  { %20818 = vmatprep.subr.bf16.mxu1 %v23907_v58 }
 0x70e   :  { %18957 = vmatmul.mubr.msk.f32.gmra.mrb[90].mxu1 %vm3673_vm5, %v4447_v41 }
 0x70f   :  { %20820 = vmatpush3.bf16.msra.mxu1 %v23907_v58  ;;  %18977 = vmatprep.mubr.msk.f32.mxu1 %vm3673_vm5, %v4636_v29  ;;  %v4639_v58 = vld [vmem:[%s27306_s1 + $0x5d8] sm:$0xff] }
 0x710   :  { %20826 = vmatprep.subr.bf16.mxu1 %v23919_v46 }
 0x712   :  { %18978 = vmatmul.mubr.msk.f32.vlgmr.msra.gmra.mrb[88].mxu1 %vm3673_vm5, %v4637_v60 }
 0x713   :  { %20828 = vmatpush3.bf16.msra.mxu1 %v23919_v46  ;;  %18980 = vmatprep.mubr.msk.f32.mxu1 %vm3673_vm5, %v4638_v49  ;;  %v4829_v46 = vld [vmem:[%s27306_s1 + $0x5e8] sm:$0xff] }
 0x714   :  { %20830 = vmatprep.subr.bf16.mxu1 %v23931_v30 }
 0x716   :  { %18981 = vmatmul.mubr.msk.f32.gmra.mrb[90].mxu1 %vm3673_vm5, %v4639_v58  ;;  %v24230_v58 = vpop.permute.xlu1 %5234 }
 0x717   :  { %20832 = vmatpush3.bf16.msra.mxu1 %v23931_v30  ;;  %19001 = vmatprep.mubr.msk.f32.mxu1 %vm3673_vm5, %v4828_v39  ;;  %v4831_v30 = vld [vmem:[%s27306_s1 + $0x5f8] sm:$0xff] }
 0x718   :  { %20838 = vmatprep.subr.bf16.mxu1 %v23936_v15 }
 0x71a   :  { %19002 = vmatmul.mubr.msk.f32.vlgmr.msra.gmra.mrb[88].mxu1 %vm3673_vm5, %v4829_v46 }
 0x71b   :  { %20840 = vmatpush3.bf16.msra.mxu1 %v23936_v15  ;;  %19004 = vmatprep.mubr.msk.f32.mxu1 %vm3673_vm5, %v4830_v42  ;;  %v5021_v15 = vld [vmem:[%s27306_s1 + $0x608] sm:$0xff] }
 0x71c   :  { %20842 = vmatprep.subr.bf16.mxu1 %v23942_v20 }
 0x71e   :  { %19005 = vmatmul.mubr.msk.f32.gmra.mrb[90].mxu1 %vm3673_vm5, %v4831_v30 }
 0x71f   :  { %20844 = vmatpush3.bf16.msra.mxu1 %v23942_v20  ;;  %19025 = vmatprep.mubr.msk.f32.mxu1 %vm3673_vm5, %v5020_v56  ;;  %v5023_v20 = vld [vmem:[%s27306_s1 + $0x618] sm:$0xff] }
 0x720   :  { %20860 = vmatprep.subr.bf16.mxu1 %v22611_v7 }
 0x722   :  { %19026 = vmatmul.mubr.msk.f32.vlgmr.msra.gmra.mrb[88].mxu1 %vm3673_vm5, %v5021_v15 }
 0x723   :  { %19028 = vmatprep.mubr.msk.f32.mxu1 %vm3673_vm5, %v5022_v43  ;;  %20862 = vmatpush3.bf16.msra.mxu1 %v22611_v7  ;;  %v55_v7 = vld [vmem:[%s27306_s1 + $0x7d0] sm:$0xff] }
 0x724   :  { %v24140_v40 = vpack.c.bf16 %v56_v52, %v55_v7  ;;  %v22284_v7 = vld [vmem:[%s27306_s1 + $0x480] sm:$0xff] }
 0x726   :  { %19029 = vmatmul.mubr.msk.f32.gmra.mrb[90].mxu1 %vm3673_vm5, %v5023_v20  ;;  %20855 = vmatprep.subr.msk.bf16.mxu0 %vm22859_vm4, %v24140_v40 }
 0x727   :  { %20858 = vmatpush3.bf16.msk.msra.mxu0 %vm22859_vm4, %v24140_v40  ;;  %19053 = vmatprep.mubr.msk.f32.mxu1 %vm83_vm0, %v24152_v1 }
 0x728   :  { %20864 = vmatprep.subr.bf16.mxu0 %v22592_v3 }
 0x72a   :  { %19054 = vmatmul.mubr.msk.f32.vlgmr.msra.gmra.mrb[100].mxu1 %vm83_vm0, %v24157_v48 }
 0x72b   :  { %19056 = vmatprep.mubr.msk.f32.mxu1 %vm83_vm0, %v24166_v2 }
 0x72e   :  { %19057 = vmatmul.mubr.msk.f32.gmra.mrb[102].mxu1 %vm83_vm0, %v24171_v57 }
 0x72f   :  { %19059 = vmatprep.mubr.msk.f32.mxu1 %vm83_vm0, %v24180_v47 }
 0x732   :  { %19060 = vmatmul.mubr.msk.f32.gmra.mrb[104].mxu1 %vm83_vm0, %v24185_v63 }
 0x733   :  { %19062 = vmatprep.mubr.msk.f32.mxu1 %vm83_vm0, %v24194_v9 }
 0x736   :  { %19063 = vmatmul.mubr.msk.f32.gmra.mrb[106].mxu1 %vm83_vm0, %v24199_v45 }
 0x737   :  { %19097 = vmatprep.mubr.msk.f32.mxu1 %vm336_vm1, %v22283_v34 }
 0x7f5   :  { %v19027_v11 = vpop.f32.mrb[88].mxu1 }
 0x7f6   :  { %v5217_v19 = vadd.f32 %v19027_v11, %v24216_v8  ;;  %v5189_v16 = vpop.f32.mrb[89].mxu1 }
 0x7f7   :  { %v5216_v38 = vadd.f32 %v24216_v8, %v5189_v16 }
 0x7f8   :  { %v5221_v24 = vmax.f32 %v5217_v19, 0.0 }
 0x7f9   :  { %v5220_v23 = vmax.f32 %v5216_v38, 0.0  ;;  %v19030_v44 = vpop.f32.mrb[90].mxu1 }
 0x7fa   :  { %v5241_v41 = vsel %vm3673_vm5, %v5221_v24, %v24222_v13  ;;  %v5219_v36 = vadd.f32 %v19030_v44, %v24216_v8  ;;  %v5199_v29 = vpop.f32.mrb[91].mxu1 }
 0x7fb   :  { %v5218_v60 = vadd.f32 %v24216_v8, %v5199_v29  ;;  %v5240_v49 = vsel %vm3673_vm5, %v5220_v23, %v24212_v6  ;;  %v22285_v29 = vld [vmem:[%s27306_s1 + $0x88] sm:$0xff] }
 0x7fc   :  { %v5223_v39 = vmax.f32 %v5219_v36, 0.0  ;;  %19043 = vmatprep.mubr.msk.f32.mxu0 %vm5244_vm6, %v5240_v49  ;;  %v24233_v46 = vpack.c.bf16 %v5241_v41, %v5240_v49  ;;  %v22286_v49 = vld [vmem:[%s27306_s1 + $0x90] sm:$0xff] }
 0x7fd   :  { %v5222_v42 = vmax.f32 %v5218_v60, 0.0  ;;  %19044 = vmatmul.mubr.msk.f32.vlgmr.msra.gmra.mrb[44].mxu0 %vm5244_vm6, %v5241_v41 }
 0x7fe   :  { %20866 = vmatpush3.bf16.msra.mxu0 %v22592_v3  ;;  %v5243_v30 = vsel %vm3673_vm5, %v5223_v39, %v24230_v58  ;;  %v19055_v3 = vpop.f32.mrb[100].mxu1 }
 0x7ff   :  { %v5242_v56 = vsel %vm3673_vm5, %v5222_v42, %v24218_v17  ;;  %20904 = vmatprep.subr.bf16.mxu0 %v22627_v12 }
 0x800   :  { %19046 = vmatprep.mubr.msk.f32.mxu0 %vm5244_vm6, %v5242_v56  ;;  %v24243_v15 = vpack.c.bf16 %v5243_v30, %v5242_v56 }
 0x801   :  { %19047 = vmatmul.mubr.msk.f32.gmra.mrb[46].mxu0 %vm5244_vm6, %v5243_v30  ;;  %v22287_v30 = vld [vmem:[%s27306_s1 + $0x98] sm:$0xff] }
 0x802   :  { %19069 = vmatprep.mubr.msk.f32.mxu0 %vm83_vm0, %v24152_v1 }
 0x805   :  { %19070 = vmatmul.mubr.msk.f32.vlgmr.msra.gmra.mrb[48].mxu0 %vm83_vm0, %v24157_v48 }
 0x806   :  { %19072 = vmatprep.mubr.msk.f32.mxu0 %vm83_vm0, %v24166_v2  ;;  %20906 = vmatpush3.bf16.msra.mxu0 %v22627_v12  ;;  %v5444_v12 = vpop.f32.mrb[101].mxu1 }
 0x807   :  { %20926 = vmatprep.subr.bf16.mxu0 %v22633_v14 }
 0x809   :  { %19073 = vmatmul.mubr.msk.f32.gmra.mrb[50].mxu0 %vm83_vm0, %v24171_v57 }
 0x80a   :  { %19075 = vmatprep.mubr.msk.f32.mxu0 %vm83_vm0, %v24180_v47 }
 0x80d   :  { %19076 = vmatmul.mubr.msk.f32.gmra.mrb[52].mxu0 %vm83_vm0, %v24185_v63 }
 0x80e   :  { %19078 = vmatprep.mubr.msk.f32.mxu0 %vm83_vm0, %v24194_v9 }
 0x811   :  { %19079 = vmatmul.mubr.msk.f32.gmra.mrb[54].mxu0 %vm83_vm0, %v24199_v45 }
 0x812   :  { %19165 = vmatprep.mubr.msk.f32.mxu0 %vm83_vm0, %v24152_v1 }
 0x815   :  { %19166 = vmatmul.mubr.msk.f32.vlgmr.msra.gmra.mrb[56].mxu0 %vm83_vm0, %v24157_v48 }
 0x816   :  { %19168 = vmatprep.mubr.msk.f32.mxu0 %vm83_vm0, %v24166_v2  ;;  %20928 = vmatpush3.bf16.msra.mxu0 %v22633_v14  ;;  %v20885_v14 = vpack.c.bf16 %v19055_v3, %v5444_v12  ;;  %v22288_v3 = vld [vmem:[%s27306_s1 + $0xa0] sm:$0xff] }
 0x817   :  { %20948 = vmatprep.subr.bf16.mxu0 %v22698_v22 }
 0x819   :  { %19169 = vmatmul.mubr.msk.f32.gmra.mrb[58].mxu0 %vm83_vm0, %v24171_v57 }
 0x81a   :  { %19171 = vmatprep.mubr.msk.f32.mxu0 %vm83_vm0, %v24180_v47 }
 0x81d   :  { %19172 = vmatmul.mubr.msk.f32.gmra.mrb[60].mxu0 %vm83_vm0, %v24185_v63 }
 0x81e   :  { %19174 = vmatprep.mubr.msk.f32.mxu0 %vm83_vm0, %v24194_v9 }
 0x821   :  { %19175 = vmatmul.mubr.msk.f32.gmra.mrb[62].mxu0 %vm83_vm0, %v24199_v45 }
 0x822   :  { %19221 = vmatprep.mubr.msk.f32.mxu0 %vm83_vm0, %v24152_v1 }
 0x825   :  { %19222 = vmatmul.mubr.msk.f32.vlgmr.msra.gmra.mrb[64].mxu0 %vm83_vm0, %v24157_v48 }
 0x826   :  { %19224 = vmatprep.mubr.msk.f32.mxu0 %vm83_vm0, %v24166_v2  ;;  %20950 = vmatpush3.bf16.msra.mxu0 %v22698_v22  ;;  %v19058_v22 = vpop.f32.mrb[102].mxu1 }
 0x827   :  { %20970 = vmatprep.subr.bf16.mxu0 %v22726_v25 }
 0x829   :  { %19225 = vmatmul.mubr.msk.f32.gmra.mrb[66].mxu0 %vm83_vm0, %v24171_v57 }
 0x82a   :  { %19227 = vmatprep.mubr.msk.f32.mxu0 %vm83_vm0, %v24180_v47 }
 0x82d   :  { %19228 = vmatmul.mubr.msk.f32.gmra.mrb[68].mxu0 %vm83_vm0, %v24185_v63 }
 0x82e   :  { %19230 = vmatprep.mubr.msk.f32.mxu0 %vm83_vm0, %v24194_v9 }
 0x831   :  { %19231 = vmatmul.mubr.msk.f32.gmra.mrb[70].mxu0 %vm83_vm0, %v24199_v45 }
 0x832   :  { %19277 = vmatprep.mubr.msk.f32.mxu0 %vm83_vm0, %v24152_v1 }
 0x835   :  { %19278 = vmatmul.mubr.msk.f32.vlgmr.msra.gmra.mrb[72].mxu0 %vm83_vm0, %v24157_v48 }
 0x836   :  { %19280 = vmatprep.mubr.msk.f32.mxu0 %vm83_vm0, %v24166_v2  ;;  %20972 = vmatpush3.bf16.msra.mxu0 %v22726_v25  ;;  %v5454_v25 = vpop.f32.mrb[103].mxu1 }
 0x837   :  { %20992 = vmatprep.subr.bf16.mxu0 %v22752_v28 }
 0x839   :  { %19281 = vmatmul.mubr.msk.f32.gmra.mrb[74].mxu0 %vm83_vm0, %v24171_v57 }
 0x83a   :  { %19283 = vmatprep.mubr.msk.f32.mxu0 %vm83_vm0, %v24180_v47 }
 0x83d   :  { %19284 = vmatmul.mubr.msk.f32.gmra.mrb[76].mxu0 %vm83_vm0, %v24185_v63 }
 0x83e   :  { %19286 = vmatprep.mubr.msk.f32.mxu0 %vm83_vm0, %v24194_v9 }
 0x841   :  { %19287 = vmatmul.mubr.msk.f32.gmra.mrb[78].mxu0 %vm83_vm0, %v24199_v45 }
 0x842   :  { %19333 = vmatprep.mubr.msk.f32.mxu0 %vm83_vm0, %v24152_v1 }
 0x845   :  { %19334 = vmatmul.mubr.msk.f32.vlgmr.msra.gmra.mrb[80].mxu0 %vm83_vm0, %v24157_v48 }
 0x846   :  { %19336 = vmatprep.mubr.msk.f32.mxu0 %vm83_vm0, %v24166_v2  ;;  %20994 = vmatpush3.bf16.msra.mxu0 %v22752_v28  ;;  %v20889_v28 = vpack.c.bf16 %v19058_v22, %v5454_v25  ;;  %v22289_v22 = vld [vmem:[%s27306_s1 + $0xa8] sm:$0xff] }
 0x847   :  { %21014 = vmatprep.subr.bf16.mxu0 %v22778_v31 }
 0x849   :  { %19337 = vmatmul.mubr.msk.f32.gmra.mrb[82].mxu0 %vm83_vm0, %v24171_v57 }
 0x84a   :  { %19339 = vmatprep.mubr.msk.f32.mxu0 %vm83_vm0, %v24180_v47 }
 0x84d   :  { %19340 = vmatmul.mubr.msk.f32.gmra.mrb[84].mxu0 %vm83_vm0, %v24185_v63 }
 0x84e   :  { %19342 = vmatprep.mubr.msk.f32.mxu0 %vm83_vm0, %v24194_v9 }
 0x851   :  { %19343 = vmatmul.mubr.msk.f32.gmra.mrb[86].mxu0 %vm83_vm0, %v24199_v45 }
 0x852   :  { %19389 = vmatprep.mubr.msk.f32.mxu0 %vm83_vm0, %v24152_v1 }
 0x855   :  { %19390 = vmatmul.mubr.msk.f32.vlgmr.msra.gmra.mrb[88].mxu0 %vm83_vm0, %v24157_v48 }
 0x856   :  { %19392 = vmatprep.mubr.msk.f32.mxu0 %vm83_vm0, %v24166_v2  ;;  %21016 = vmatpush3.bf16.msra.mxu0 %v22778_v31  ;;  %v19061_v31 = vpop.f32.mrb[104].mxu1 }
 0x857   :  { %21036 = vmatprep.subr.bf16.mxu0 %v22839_v35 }
 0x859   :  { %19393 = vmatmul.mubr.msk.f32.gmra.mrb[90].mxu0 %vm83_vm0, %v24171_v57 }
 0x85a   :  { %19395 = vmatprep.mubr.msk.f32.mxu0 %vm83_vm0, %v24180_v47 }
 0x85d   :  { %19396 = vmatmul.mubr.msk.f32.gmra.mrb[92].mxu0 %vm83_vm0, %v24185_v63 }
 0x85e   :  { %19398 = vmatprep.mubr.msk.f32.mxu0 %vm83_vm0, %v24194_v9 }
 0x861   :  { %19399 = vmatmul.mubr.msk.f32.gmra.mrb[94].mxu0 %vm83_vm0, %v24199_v45 }
 0x862   :  { %19445 = vmatprep.mubr.msk.f32.mxu0 %vm83_vm0, %v24152_v1 }
 0x865   :  { %19446 = vmatmul.mubr.msk.f32.vlgmr.msra.gmra.mrb[96].mxu0 %vm83_vm0, %v24157_v48 }
 0x866   :  { %19448 = vmatprep.mubr.msk.f32.mxu0 %vm83_vm0, %v24166_v2  ;;  %21038 = vmatpush3.bf16.msra.mxu0 %v22839_v35  ;;  %v5464_v35 = vpop.f32.mrb[105].mxu1 }
 0x867   :  { %v24375_v43 = vpack.c.bf16 %v19061_v31, %v5464_v35  ;;  %v19064_v20 = vpop.f32.mrb[106].mxu1  ;;  %v22290_v31 = vld [vmem:[%s27306_s1 + $0xb0] sm:$0xff] }
 0x868   :  { %v5474_v61 = vpop.f32.mrb[107].mxu1 }
 0x869   :  { %19449 = vmatmul.mubr.msk.f32.gmra.mrb[98].mxu0 %vm83_vm0, %v24171_v57  ;;  %v24385_v10 = vpack.c.bf16 %v19064_v20, %v5474_v61  ;;  %v22291_v20 = vld [vmem:[%s27306_s1 + $0xb8] sm:$0xff] }
 0x86a   :  { %19451 = vmatprep.mubr.msk.f32.mxu0 %vm83_vm0, %v24180_v47 }
 0x86d   :  { %19452 = vmatmul.mubr.msk.f32.gmra.mrb[100].mxu0 %vm83_vm0, %v24185_v63 }
 0x86e   :  { %19454 = vmatprep.mubr.msk.f32.mxu0 %vm83_vm0, %v24194_v9 }
 0x871   :  { %19455 = vmatmul.mubr.msk.f32.gmra.mrb[102].mxu0 %vm83_vm0, %v24199_v45 }
 0x872   :  { %19501 = vmatprep.mubr.msk.f32.mxu0 %vm83_vm0, %v24152_v1 }
 0x875   :  { %19502 = vmatmul.mubr.msk.f32.vlgmr.msra.gmra.mrb[104].mxu0 %vm83_vm0, %v24157_v48 }
 0x876   :  { %19504 = vmatprep.mubr.msk.f32.mxu0 %vm83_vm0, %v24166_v2 }
 0x879   :  { %19505 = vmatmul.mubr.msk.f32.gmra.mrb[106].mxu0 %vm83_vm0, %v24171_v57 }
 0x87a   :  { %19507 = vmatprep.mubr.msk.f32.mxu0 %vm83_vm0, %v24180_v47 }
 0x87d   :  { %19508 = vmatmul.mubr.msk.f32.gmra.mrb[108].mxu0 %vm83_vm0, %v24185_v63 }
 0x87e   :  { %19510 = vmatprep.mubr.msk.f32.mxu0 %vm83_vm0, %v24194_v9 }
 0x881   :  { %19511 = vmatmul.mubr.msk.f32.gmra.mrb[110].mxu0 %vm83_vm0, %v24199_v45 }
 0x882   :  { %19585 = vmatprep.mubr.f32.mxu0 %v22284_v7  ;;  %v22292_v7 = vld [vmem:[%s27306_s1 + $0xc0] sm:$0xff] }
 0x8d0   :  { %v24394_v52 = vpop.f32.mrb[44].mxu0 }
 0x8d1   :  { %v24396_v1 = vpop.f32.mrb[45].mxu0 }
 0x8d4   :  { %v24398_v48 = vpop.f32.mrb[46].mxu0 }
 0x8d5   :  { %v24400_v2 = vpop.f32.mrb[47].mxu0 }
 0x8d8   :  { %v19071_v57 = vpop.f32.mrb[48].mxu0 }
 0x8d9   :  { %v5549_v47 = vpop.f32.mrb[49].mxu0 }
 0x8da   :  { %v20867_v63 = vpack.c.bf16 %v19071_v57, %v5549_v47  ;;  %v22293_v47 = vld [vmem:[%s27306_s1 + $0xc8] sm:$0xff] }
 0x8dc   :  { %v19074_v9 = vpop.f32.mrb[50].mxu0  ;;  %20868 = vmatprep.subr.bf16.mxu1 %v20867_v63 }
 0x8dd   :  { %v5559_v34 = vpop.f32.mrb[51].mxu0  ;;  %20870 = vmatpush3.bf16.msra.mxu1 %v20867_v63 }
 0x8de   :  { %v20871_v45 = vpack.c.bf16 %v19074_v9, %v5559_v34  ;;  %v22294_v9 = vld [vmem:[%s27306_s1 + $0xd0] sm:$0xff] }
 0x8e0   :  { %v19077_v11 = vpop.f32.mrb[52].mxu0  ;;  %20872 = vmatprep.subr.bf16.mxu1 %v20871_v45 }
 0x8e1   :  { %v5569_v19 = vpop.f32.mrb[53].mxu0  ;;  %20874 = vmatpush3.bf16.msra.mxu1 %v20871_v45  ;;  %v22295_v45 = vld [vmem:[%s27306_s1 + $0xd8] sm:$0xff] }
 0x8e2   :  { %v20875_v16 = vpack.c.bf16 %v19077_v11, %v5569_v19  ;;  %v22296_v19 = vld [vmem:[%s27306_s1 + $0xe0] sm:$0xff] }
 0x8e4   :  { %v19080_v38 = vpop.f32.mrb[54].mxu0  ;;  %20876 = vmatprep.subr.bf16.mxu1 %v20875_v16 }
 0x8e5   :  { %v5579_v24 = vpop.f32.mrb[55].mxu0  ;;  %20878 = vmatpush3.bf16.msra.mxu1 %v20875_v16 }
 0x8e6   :  { %v20879_v23 = vpack.c.bf16 %v19080_v38, %v5579_v24  ;;  %v22297_v24 = vld [vmem:[%s27306_s1 + $0xe8] sm:$0xff] }
 0x8e8   :  { %20881 = vmatprep.subr.msk.bf16.mxu1 %vm22859_vm4, %v20879_v23  ;;  %v19167_v44 = vpop.f32.mrb[56].mxu0 }
 0x8e9   :  { %20884 = vmatpush3.bf16.msk.msra.mxu1 %vm22859_vm4, %v20879_v23  ;;  %v5950_v41 = vpop.f32.mrb[57].mxu0 }
 0x8ea   :  { %20886 = vmatprep.subr.bf16.mxu1 %v20885_v14  ;;  %v24406_v36 = vpack.c.bf16 %v19167_v44, %v5950_v41  ;;  %v22298_v44 = vld [vmem:[%s27306_s1 + $0xf0] sm:$0xff] }
 0x8ec   :  { %19098 = vmatmul.mubr.msk.f32.vlgmr.msra.gmra.mrb[108].mxu1 %vm336_vm1, %v22285_v29  ;;  %v19170_v60 = vpop.f32.mrb[58].mxu0 }
 0x8ed   :  { %20888 = vmatpush3.bf16.msra.mxu1 %v20885_v14  ;;  %19100 = vmatprep.mubr.msk.f32.mxu1 %vm336_vm1, %v22286_v49  ;;  %v5960_v39 = vpop.f32.mrb[59].mxu0 }
 0x8ee   :  { %20890 = vmatprep.subr.bf16.mxu1 %v20889_v28  ;;  %v24416_v42 = vpack.c.bf16 %v19170_v60, %v5960_v39  ;;  %v22299_v60 = vld [vmem:[%s27306_s1 + $0xf8] sm:$0xff]  ;;  %v22300_v39 = vld [vmem:[%s27306_s1] sm:$0xff] }
 0x8f0   :  { %19101 = vmatmul.mubr.msk.f32.gmra.mrb[110].mxu1 %vm336_vm1, %v22287_v30  ;;  %v19173_v56 = vpop.f32.mrb[60].mxu0 }
 0x8f1   :  { %19103 = vmatprep.mubr.msk.f32.mxu1 %vm336_vm1, %v22288_v3  ;;  %20892 = vmatpush3.bf16.msra.mxu1 %v20889_v28  ;;  %v5970_v12 = vpop.f32.mrb[61].mxu0  ;;  %v22301_v3 = vld [vmem:[%s27306_s1 + $0x8] sm:$0xff] }
 0x8f2   :  { %20894 = vmatprep.subr.bf16.mxu1 %v24375_v43  ;;  %v24427_v14 = vpack.c.bf16 %v19173_v56, %v5970_v12 }
 0x8f4   :  { %19104 = vmatmul.mubr.msk.f32.gmra.mrb[112].mxu1 %vm336_vm1, %v22289_v22  ;;  %v19176_v25 = vpop.f32.mrb[62].mxu0  ;;  %v22302_v22 = vld [vmem:[%s27306_s1 + $0x10] sm:$0xff] }
 0x8f5   :  { %19106 = vmatprep.mubr.msk.f32.mxu1 %vm336_vm1, %v22290_v31  ;;  %20896 = vmatpush3.bf16.msra.mxu1 %v24375_v43  ;;  %v5980_v28 = vpop.f32.mrb[63].mxu0 }
 0x8f6   :  { %20899 = vmatprep.subr.msk.bf16.mxu1 %vm22859_vm4, %v24385_v10  ;;  %v24441_v35 = vpack.c.bf16 %v19176_v25, %v5980_v28  ;;  %v22303_v28 = vld [vmem:[%s27306_s1 + $0x18] sm:$0xff] }
 0x8f8   :  { %19107 = vmatmul.mubr.msk.f32.gmra.mrb[114].mxu1 %vm336_vm1, %v22291_v20  ;;  %v19223_v61 = vpop.f32.mrb[64].mxu0 }
 0x8f9   :  { %19109 = vmatprep.mubr.msk.f32.mxu1 %vm336_vm1, %v22292_v7  ;;  %20902 = vmatpush3.bf16.msk.msra.mxu1 %vm22859_vm4, %v24385_v10  ;;  %v6219_v43 = vpop.f32.mrb[65].mxu0 }
 0x8fa   :  { %20908 = vmatprep.subr.bf16.mxu1 %v24406_v36  ;;  %v24455_v57 = vpack.c.bf16 %v19223_v61, %v6219_v43  ;;  %v22305_v43 = vld [vmem:[%s27306_s1 + $0x28] sm:$0xff] }
 0x8fc   :  { %19110 = vmatmul.mubr.msk.f32.gmra.mrb[116].mxu1 %vm336_vm1, %v22293_v47  ;;  %v19226_v63 = vpop.f32.mrb[66].mxu0 }
 0x8fd   :  { %19112 = vmatprep.mubr.msk.f32.mxu1 %vm336_vm1, %v22294_v9  ;;  %v6229_v34 = vpop.f32.mrb[67].mxu0 }
 0x8fe   :  { %v24465_v10 = vpack.c.bf16 %v19226_v63, %v6229_v34  ;;  %v22306_v63 = vld [vmem:[%s27306_s1 + $0x30] sm:$0xff]  ;;  %v22307_v34 = vld [vmem:[%s27306_s1 + $0x38] sm:$0xff] }
 0x900   :  { %19113 = vmatmul.mubr.msk.f32.gmra.mrb[118].mxu1 %vm336_vm1, %v22295_v45  ;;  %v19229_v11 = vpop.f32.mrb[68].mxu0 }
 0x901   :  { %19115 = vmatprep.mubr.msk.f32.mxu1 %vm336_vm1, %v22296_v19  ;;  %v6239_v16 = vpop.f32.mrb[69].mxu0 }
 0x902   :  { %v24475_v38 = vpack.c.bf16 %v19229_v11, %v6239_v16  ;;  %v22308_v11 = vld [vmem:[%s27306_s1 + $0x40] sm:$0xff]  ;;  %v22309_v16 = vld [vmem:[%s27306_s1 + $0x48] sm:$0xff] }
 0x904   :  { %19116 = vmatmul.mubr.msk.f32.gmra.mrb[120].mxu1 %vm336_vm1, %v22297_v24  ;;  %v19232_v23 = vpop.f32.mrb[70].mxu0 }
 0x905   :  { %19118 = vmatprep.mubr.msk.f32.mxu1 %vm336_vm1, %v22298_v44  ;;  %v6249_v41 = vpop.f32.mrb[71].mxu0 }
 0x906   :  { %v24485_v29 = vpack.c.bf16 %v19232_v23, %v6249_v41  ;;  %v22310_v23 = vld [vmem:[%s27306_s1 + $0x50] sm:$0xff]  ;;  %v22311_v41 = vld [vmem:[%s27306_s1 + $0x58] sm:$0xff] }
 0x908   :  { %19119 = vmatmul.mubr.msk.f32.gmra.mrb[122].mxu1 %vm336_vm1, %v22299_v60  ;;  %v19279_v49 = vpop.f32.mrb[72].mxu0 }
 0x909   :  { %19137 = vmatprep.mubr.msk.f32.mxu1 %vm336_vm1, %v22300_v39  ;;  %v6488_v30 = vpop.f32.mrb[73].mxu0 }
 0x90a   :  { %v24495_v56 = vpack.c.bf16 %v19279_v49, %v6488_v30  ;;  %v22312_v49 = vld [vmem:[%s27306_s1 + $0x60] sm:$0xff] }
 0x90c   :  { %19138 = vmatmul.mubr.msk.f32.vlgmr.msra.gmra.mrb[108].mxu1 %vm336_vm1, %v22301_v3  ;;  %v19282_v12 = vpop.f32.mrb[74].mxu0  ;;  %v22313_v3 = vld [vmem:[%s27306_s1 + $0x68] sm:$0xff] }
 0x90d   :  { %20910 = vmatpush3.bf16.msra.mxu1 %v24406_v36  ;;  %19140 = vmatprep.mubr.msk.f32.mxu1 %vm336_vm1, %v22302_v22  ;;  %v6498_v25 = vpop.f32.mrb[75].mxu0  ;;  %v22304_v36 = vld [vmem:[%s27306_s1 + $0x20] sm:$0xff]  ;;  %v22314_v22 = vld [vmem:[%s27306_s1 + $0x70] sm:$0xff] }
 0x90e   :  { %20912 = vmatprep.subr.bf16.mxu1 %v24416_v42  ;;  %v24507_v31 = vpack.c.bf16 %v19282_v12, %v6498_v25 }
 0x910   :  { %19141 = vmatmul.mubr.msk.f32.gmra.mrb[110].mxu1 %vm336_vm1, %v22303_v28  ;;  %v19285_v20 = vpop.f32.mrb[76].mxu0 }
 0x911   :  { %19143 = vmatprep.mubr.msk.f32.mxu1 %vm336_vm1, %v22304_v36  ;;  %20914 = vmatpush3.bf16.msra.mxu1 %v24416_v42  ;;  %v6508_v61 = vpop.f32.mrb[77].mxu0 }
 0x912   :  { %20916 = vmatprep.subr.bf16.mxu1 %v24427_v14  ;;  %v24519_v7 = vpack.c.bf16 %v19285_v20, %v6508_v61  ;;  %v22315_v20 = vld [vmem:[%s27306_s1 + $0x78] sm:$0xff]  ;;  %v22316_v61 = vld [vmem:[%s27306_s1 + $0x100] sm:$0xff] }
 0x914   :  { %19144 = vmatmul.mubr.msk.f32.gmra.mrb[112].mxu1 %vm336_vm1, %v22305_v43  ;;  %v19288_v47 = vpop.f32.mrb[78].mxu0 }
 0x915   :  { %19146 = vmatprep.mubr.msk.f32.mxu1 %vm336_vm1, %v22306_v63  ;;  %20918 = vmatpush3.bf16.msra.mxu1 %v24427_v14  ;;  %v6518_v42 = vpop.f32.mrb[79].mxu0  ;;  %v22317_v63 = vld [vmem:[%s27306_s1 + $0x108] sm:$0xff] }
 0x916   :  { %20921 = vmatprep.subr.msk.bf16.mxu1 %vm22859_vm4, %v24441_v35  ;;  %v24533_v9 = vpack.c.bf16 %v19288_v47, %v6518_v42 }
 0x918   :  { %19147 = vmatmul.mubr.msk.f32.gmra.mrb[114].mxu1 %vm336_vm1, %v22307_v34  ;;  %v19335_v45 = vpop.f32.mrb[80].mxu0  ;;  %v22318_v34 = vld [vmem:[%s27306_s1 + $0x110] sm:$0xff] }
 0x919   :  { %19149 = vmatprep.mubr.msk.f32.mxu1 %vm336_vm1, %v22308_v11  ;;  %20924 = vmatpush3.bf16.msk.msra.mxu1 %vm22859_vm4, %v24441_v35  ;;  %v6757_v14 = vpop.f32.mrb[81].mxu0 }
 0x91a   :  { %20930 = vmatprep.subr.bf16.mxu1 %v24455_v57  ;;  %v24547_v19 = vpack.c.bf16 %v19335_v45, %v6757_v14  ;;  %v22319_v14 = vld [vmem:[%s27306_s1 + $0x118] sm:$0xff] }
 0x91c   :  { %19150 = vmatmul.mubr.msk.f32.gmra.mrb[116].mxu1 %vm336_vm1, %v22309_v16  ;;  %v19338_v24 = vpop.f32.mrb[82].mxu0 }
 0x91d   :  { %19152 = vmatprep.mubr.msk.f32.mxu1 %vm336_vm1, %v22310_v23  ;;  %v6767_v44 = vpop.f32.mrb[83].mxu0 }
 0x91e   :  { %v24557_v35 = vpack.c.bf16 %v19338_v24, %v6767_v44  ;;  %v22321_v44 = vld [vmem:[%s27306_s1 + $0x128] sm:$0xff] }
 0x920   :  { %19153 = vmatmul.mubr.msk.f32.gmra.mrb[118].mxu1 %vm336_vm1, %v22311_v41  ;;  %v19341_v60 = vpop.f32.mrb[84].mxu0 }
 0x921   :  { %19155 = vmatprep.mubr.msk.f32.mxu1 %vm336_vm1, %v22312_v49  ;;  %v6777_v39 = vpop.f32.mrb[85].mxu0 }
 0x922   :  { %v24567_v30 = vpack.c.bf16 %v19341_v60, %v6777_v39  ;;  %v22322_v60 = vld [vmem:[%s27306_s1 + $0x130] sm:$0xff]  ;;  %v22323_v39 = vld [vmem:[%s27306_s1 + $0x138] sm:$0xff] }
 0x924   :  { %19156 = vmatmul.mubr.msk.f32.gmra.mrb[120].mxu1 %vm336_vm1, %v22313_v3  ;;  %v19344_v12 = vpop.f32.mrb[86].mxu0 }
 0x925   :  { %19158 = vmatprep.mubr.msk.f32.mxu1 %vm336_vm1, %v22314_v22  ;;  %v6787_v25 = vpop.f32.mrb[87].mxu0 }
 0x926   :  { %v24577_v28 = vpack.c.bf16 %v19344_v12, %v6787_v25  ;;  %v22324_v12 = vld [vmem:[%s27306_s1 + $0x140] sm:$0xff]  ;;  %v22325_v25 = vld [vmem:[%s27306_s1 + $0x148] sm:$0xff] }
 0x928   :  { %19159 = vmatmul.mubr.msk.f32.gmra.mrb[122].mxu1 %vm336_vm1, %v22315_v20  ;;  %v19391_v36 = vpop.f32.mrb[88].mxu0 }
 0x929   :  { %19193 = vmatprep.mubr.msk.f32.mxu1 %vm336_vm1, %v22316_v61  ;;  %v7026_v43 = vpop.f32.mrb[89].mxu0 }
 0x92a   :  { %v24587_v47 = vpack.c.bf16 %v19391_v36, %v7026_v43  ;;  %v22326_v36 = vld [vmem:[%s27306_s1 + $0x150] sm:$0xff]  ;;  %v22327_v43 = vld [vmem:[%s27306_s1 + $0x158] sm:$0xff] }
 0x92c   :  { %19194 = vmatmul.mubr.msk.f32.vlgmr.msra.gmra.mrb[108].mxu1 %vm336_vm1, %v22317_v63  ;;  %v19394_v42 = vpop.f32.mrb[90].mxu0 }
 0x92d   :  { %20932 = vmatpush3.bf16.msra.mxu1 %v24455_v57  ;;  %19196 = vmatprep.mubr.msk.f32.mxu1 %vm336_vm1, %v22318_v34  ;;  %v7036_v45 = vpop.f32.mrb[91].mxu0  ;;  %v22320_v57 = vld [vmem:[%s27306_s1 + $0x120] sm:$0xff] }
 0x92e   :  { %20934 = vmatprep.subr.bf16.mxu1 %v24465_v10  ;;  %v24599_v11 = vpack.c.bf16 %v19394_v42, %v7036_v45  ;;  %v22328_v42 = vld [vmem:[%s27306_s1 + $0x160] sm:$0xff] }
 0x930   :  { %19197 = vmatmul.mubr.msk.f32.gmra.mrb[110].mxu1 %vm336_vm1, %v22319_v14  ;;  %v19397_v16 = vpop.f32.mrb[92].mxu0  ;;  %v22329_v14 = vld [vmem:[%s27306_s1 + $0x168] sm:$0xff] }
 0x931   :  { %19199 = vmatprep.mubr.msk.f32.mxu1 %vm336_vm1, %v22320_v57  ;;  %20936 = vmatpush3.bf16.msra.mxu1 %v24465_v10  ;;  %v7046_v24 = vpop.f32.mrb[93].mxu0  ;;  %v22330_v57 = vld [vmem:[%s27306_s1 + $0x170] sm:$0xff] }
 0x932   :  { %20938 = vmatprep.subr.bf16.mxu1 %v24475_v38  ;;  %v24611_v23 = vpack.c.bf16 %v19397_v16, %v7046_v24 }
 0x934   :  { %19200 = vmatmul.mubr.msk.f32.gmra.mrb[112].mxu1 %vm336_vm1, %v22321_v44  ;;  %v19400_v41 = vpop.f32.mrb[94].mxu0 }
 0x935   :  { %19202 = vmatprep.mubr.msk.f32.mxu1 %vm336_vm1, %v22322_v60  ;;  %20940 = vmatpush3.bf16.msra.mxu1 %v24475_v38  ;;  %v7056_v10 = vpop.f32.mrb[95].mxu0 }
 0x936   :  { %20943 = vmatprep.subr.msk.bf16.mxu1 %vm22859_vm4, %v24485_v29  ;;  %v24625_v49 = vpack.c.bf16 %v19400_v41, %v7056_v10  ;;  %v22331_v41 = vld [vmem:[%s27306_s1 + $0x178] sm:$0xff]  ;;  %v22332_v10 = vld [vmem:[%s27306_s1 + $0x180] sm:$0xff] }
 0x938   :  { %19203 = vmatmul.mubr.msk.f32.gmra.mrb[114].mxu1 %vm336_vm1, %v22323_v39  ;;  %v19447_v3 = vpop.f32.mrb[96].mxu0 }
 0x939   :  { %19205 = vmatprep.mubr.msk.f32.mxu1 %vm336_vm1, %v22324_v12  ;;  %20946 = vmatpush3.bf16.msk.msra.mxu1 %vm22859_vm4, %v24485_v29  ;;  %v7295_v38 = vpop.f32.mrb[97].mxu0  ;;  %v22333_v12 = vld [vmem:[%s27306_s1 + $0x188] sm:$0xff] }
 0x93a   :  { %20952 = vmatprep.subr.bf16.mxu1 %v24495_v56  ;;  %v24639_v22 = vpack.c.bf16 %v19447_v3, %v7295_v38  ;;  %v22334_v38 = vld [vmem:[%s27306_s1 + $0x190] sm:$0xff] }
 0x93c   :  { %19206 = vmatmul.mubr.msk.f32.gmra.mrb[116].mxu1 %vm336_vm1, %v22325_v25  ;;  %v19450_v20 = vpop.f32.mrb[98].mxu0 }
 0x93d   :  { %19208 = vmatprep.mubr.msk.f32.mxu1 %vm336_vm1, %v22326_v36  ;;  %v7305_v61 = vpop.f32.mrb[99].mxu0 }
 0x93e   :  { %v24649_v29 = vpack.c.bf16 %v19450_v20, %v7305_v61  ;;  %v22335_v61 = vld [vmem:[%s27306_s1 + $0x198] sm:$0xff] }
 0x940   :  { %19209 = vmatmul.mubr.msk.f32.gmra.mrb[118].mxu1 %vm336_vm1, %v22327_v43  ;;  %v19453_v63 = vpop.f32.mrb[100].mxu0  ;;  %v22337_v43 = vld [vmem:[%s27306_s1 + $0x1a8] sm:$0xff] }
 0x941   :  { %19211 = vmatprep.mubr.msk.f32.mxu1 %vm336_vm1, %v22328_v42  ;;  %v7315_v34 = vpop.f32.mrb[101].mxu0  ;;  %v22338_v42 = vld [vmem:[%s27306_s1 + $0x1b0] sm:$0xff] }
 0x942   :  { %v24659_v45 = vpack.c.bf16 %v19453_v63, %v7315_v34 }
 0x944   :  { %19212 = vmatmul.mubr.msk.f32.gmra.mrb[120].mxu1 %vm336_vm1, %v22329_v14  ;;  %v19456_v16 = vpop.f32.mrb[102].mxu0  ;;  %v22339_v14 = vld [vmem:[%s27306_s1 + $0x1b8] sm:$0xff] }
 0x945   :  { %19214 = vmatprep.mubr.msk.f32.mxu1 %vm336_vm1, %v22330_v57  ;;  %v7325_v24 = vpop.f32.mrb[103].mxu0 }
 0x946   :  { %v24669_v44 = vpack.c.bf16 %v19456_v16, %v7325_v24  ;;  %v22340_v16 = vld [vmem:[%s27306_s1 + $0x1c0] sm:$0xff]  ;;  %v22342_v24 = vld [vmem:[%s27306_s1 + $0x1d0] sm:$0xff] }
 0x948   :  { %19215 = vmatmul.mubr.msk.f32.gmra.mrb[122].mxu1 %vm336_vm1, %v22331_v41  ;;  %v19503_v60 = vpop.f32.mrb[104].mxu0 }
 0x949   :  { %19249 = vmatprep.mubr.msk.f32.mxu1 %vm336_vm1, %v22332_v10  ;;  %v7564_v39 = vpop.f32.mrb[105].mxu0  ;;  %v22344_v10 = vld [vmem:[%s27306_s1 + $0x1e0] sm:$0xff] }
 0x94a   :  { %v24679_v3 = vpack.c.bf16 %v19503_v60, %v7564_v39  ;;  %v22345_v39 = vld [vmem:[%s27306_s1 + $0x1e8] sm:$0xff] }
 0x94c   :  { %19250 = vmatmul.mubr.msk.f32.vlgmr.msra.gmra.mrb[108].mxu1 %vm336_vm1, %v22333_v12  ;;  %v19506_v25 = vpop.f32.mrb[106].mxu0  ;;  %v22346_v12 = vld [vmem:[%s27306_s1 + $0x1f0] sm:$0xff] }
 0x94d   :  { %20954 = vmatpush3.bf16.msra.mxu1 %v24495_v56  ;;  %19252 = vmatprep.mubr.msk.f32.mxu1 %vm336_vm1, %v22334_v38  ;;  %v7574_v20 = vpop.f32.mrb[107].mxu0  ;;  %v22336_v56 = vld [vmem:[%s27306_s1 + $0x1a0] sm:$0xff]  ;;  %v22347_v38 = vld [vmem:[%s27306_s1 + $0x1f8] sm:$0xff] }
 0x94e   :  { %20956 = vmatprep.subr.bf16.mxu1 %v24507_v31  ;;  %v24691_v36 = vpack.c.bf16 %v19506_v25, %v7574_v20  ;;  %v22348_v25 = vld [vmem:[%s27306_s1 + $0x200] sm:$0xff]  ;;  %v22349_v20 = vld [vmem:[%s27306_s1 + $0x208] sm:$0xff] }
 0x950   :  { %19253 = vmatmul.mubr.msk.f32.gmra.mrb[110].mxu1 %vm336_vm1, %v22335_v61  ;;  %v19509_v63 = vpop.f32.mrb[108].mxu0  ;;  %v22350_v61 = vld [vmem:[%s27306_s1 + $0x210] sm:$0xff] }
 0x951   :  { %19255 = vmatprep.mubr.msk.f32.mxu1 %vm336_vm1, %v22336_v56  ;;  %20958 = vmatpush3.bf16.msra.mxu1 %v24507_v31  ;;  %v7584_v34 = vpop.f32.mrb[109].mxu0  ;;  %v22351_v56 = vld [vmem:[%s27306_s1 + $0x218] sm:$0xff] }
 0x952   :  { %20960 = vmatprep.subr.bf16.mxu1 %v24519_v7  ;;  %v24715_v31 = vpack.c.bf16 %v19509_v63, %v7584_v34  ;;  %v22354_v63 = vld [vmem:[%s27306_s1 + $0x230] sm:$0xff] }
 0x953   :  { %v22358_v34 = vld [vmem:[%s27306_s1 + $0x250] sm:$0xff] }
 0x954   :  { %19256 = vmatmul.mubr.msk.f32.gmra.mrb[112].mxu1 %vm336_vm1, %v22337_v43  ;;  %v19512_v57 = vpop.f32.mrb[110].mxu0  ;;  %v22352_v43 = vld [vmem:[%s27306_s1 + $0x220] sm:$0xff] }
 0x955   :  { %19258 = vmatprep.mubr.msk.f32.mxu1 %vm336_vm1, %v22338_v42  ;;  %20962 = vmatpush3.bf16.msra.mxu1 %v24519_v7  ;;  %v22341_v7 = vld [vmem:[%s27306_s1 + $0x1c8] sm:$0xff]  ;;  %v7594_v41 = vpop.f32.mrb[111].mxu0  ;;  %v22356_v42 = vld [vmem:[%s27306_s1 + $0x240] sm:$0xff] }
 0x956   :  { %20965 = vmatprep.subr.msk.bf16.mxu1 %vm22859_vm4, %v24533_v9  ;;  %v24737_v60 = vpack.c.bf16 %v19512_v57, %v7594_v41  ;;  %v22363_v57 = vld [vmem:[%s27306_s1 + $0x278] sm:$0xff]  ;;  %v22365_v41 = vld [vmem:[%s27306_s1 + $0x288] sm:$0xff] }
 0x958   :  { %19259 = vmatmul.mubr.msk.f32.gmra.mrb[114].mxu1 %vm336_vm1, %v22339_v14  ;;  %v22359_v14 = vld [vmem:[%s27306_s1 + $0x258] sm:$0xff] }
 0x959   :  { %19261 = vmatprep.mubr.msk.f32.mxu1 %vm336_vm1, %v22340_v16  ;;  %20968 = vmatpush3.bf16.msk.msra.mxu1 %vm22859_vm4, %v24533_v9  ;;  %v22343_v9 = vld [vmem:[%s27306_s1 + $0x1d8] sm:$0xff]  ;;  %v22361_v16 = vld [vmem:[%s27306_s1 + $0x268] sm:$0xff] }
 0x95a   :  { %20974 = vmatprep.subr.bf16.mxu1 %v24547_v19 }
 0x95c   :  { %19262 = vmatmul.mubr.msk.f32.gmra.mrb[116].mxu1 %vm336_vm1, %v22341_v7  ;;  %v22362_v7 = vld [vmem:[%s27306_s1 + $0x270] sm:$0xff] }
 0x95d   :  { %19264 = vmatprep.mubr.msk.f32.mxu1 %vm336_vm1, %v22342_v24  ;;  %v22364_v24 = vld [vmem:[%s27306_s1 + $0x280] sm:$0xff] }
 0x960   :  { %19265 = vmatmul.mubr.msk.f32.gmra.mrb[118].mxu1 %vm336_vm1, %v22343_v9  ;;  %v22366_v9 = vld [vmem:[%s27306_s1 + $0x290] sm:$0xff] }
 0x961   :  { %19267 = vmatprep.mubr.msk.f32.mxu1 %vm336_vm1, %v22344_v10  ;;  %v22367_v10 = vld [vmem:[%s27306_s1 + $0x298] sm:$0xff] }
 0x964   :  { %19268 = vmatmul.mubr.msk.f32.gmra.mrb[120].mxu1 %vm336_vm1, %v22345_v39  ;;  %v22368_v39 = vld [vmem:[%s27306_s1 + $0x2a0] sm:$0xff] }
 0x965   :  { %19270 = vmatprep.mubr.msk.f32.mxu1 %vm336_vm1, %v22346_v12  ;;  %v22370_v12 = vld [vmem:[%s27306_s1 + $0x2b0] sm:$0xff] }
 0x968   :  { %19271 = vmatmul.mubr.msk.f32.gmra.mrb[122].mxu1 %vm336_vm1, %v22347_v38  ;;  %v22372_v38 = vld [vmem:[%s27306_s1 + $0x2c0] sm:$0xff] }
 0x969   :  { %19305 = vmatprep.mubr.msk.f32.mxu1 %vm336_vm1, %v22348_v25  ;;  %v22374_v25 = vld [vmem:[%s27306_s1 + $0x2d0] sm:$0xff] }
 0x96c   :  { %19306 = vmatmul.mubr.msk.f32.vlgmr.msra.gmra.mrb[108].mxu1 %vm336_vm1, %v22349_v20  ;;  %v22375_v20 = vld [vmem:[%s27306_s1 + $0x2d8] sm:$0xff] }
 0x96d   :  { %20976 = vmatpush3.bf16.msra.mxu1 %v24547_v19  ;;  %19308 = vmatprep.mubr.msk.f32.mxu1 %vm336_vm1, %v22350_v61  ;;  %v22353_v19 = vld [vmem:[%s27306_s1 + $0x228] sm:$0xff] }
 0x96e   :  { %20978 = vmatprep.subr.bf16.mxu1 %v24557_v35  ;;  %v22377_v61 = vld [vmem:[%s27306_s1 + $0x2e8] sm:$0xff] }
 0x970   :  { %19309 = vmatmul.mubr.msk.f32.gmra.mrb[110].mxu1 %vm336_vm1, %v22351_v56  ;;  %v22378_v56 = vld [vmem:[%s27306_s1 + $0x2f0] sm:$0xff] }
 0x971   :  { %19311 = vmatprep.mubr.msk.f32.mxu1 %vm336_vm1, %v22352_v43  ;;  %20980 = vmatpush3.bf16.msra.mxu1 %v24557_v35  ;;  %v22355_v35 = vld [vmem:[%s27306_s1 + $0x238] sm:$0xff] }
 0x972   :  { %20982 = vmatprep.subr.bf16.mxu1 %v24567_v30  ;;  %v22379_v43 = vld [vmem:[%s27306_s1 + $0x2f8] sm:$0xff] }
 0x974   :  { %19312 = vmatmul.mubr.msk.f32.gmra.mrb[112].mxu1 %vm336_vm1, %v22353_v19  ;;  %v22380_v19 = vld [vmem:[%s27306_s1 + $0x300] sm:$0xff] }
 0x975   :  { %19314 = vmatprep.mubr.msk.f32.mxu1 %vm336_vm1, %v22354_v63  ;;  %20984 = vmatpush3.bf16.msra.mxu1 %v24567_v30  ;;  %v22357_v30 = vld [vmem:[%s27306_s1 + $0x248] sm:$0xff] }
 0x976   :  { %20987 = vmatprep.subr.msk.bf16.mxu1 %vm22859_vm4, %v24577_v28  ;;  %v22381_v63 = vld [vmem:[%s27306_s1 + $0x308] sm:$0xff] }
 0x978   :  { %19315 = vmatmul.mubr.msk.f32.gmra.mrb[114].mxu1 %vm336_vm1, %v22355_v35  ;;  %v22382_v35 = vld [vmem:[%s27306_s1 + $0x310] sm:$0xff] }
 0x979   :  { %19317 = vmatprep.mubr.msk.f32.mxu1 %vm336_vm1, %v22356_v42  ;;  %20990 = vmatpush3.bf16.msk.msra.mxu1 %vm22859_vm4, %v24577_v28  ;;  %v22360_v28 = vld [vmem:[%s27306_s1 + $0x260] sm:$0xff]  ;;  %v22383_v42 = vld [vmem:[%s27306_s1 + $0x318] sm:$0xff] }
 0x97a   :  { %20996 = vmatprep.subr.bf16.mxu1 %v24587_v47 }
 0x97c   :  { %19318 = vmatmul.mubr.msk.f32.gmra.mrb[116].mxu1 %vm336_vm1, %v22357_v30  ;;  %v22384_v30 = vld [vmem:[%s27306_s1 + $0x320] sm:$0xff] }
 0x97d   :  { %19320 = vmatprep.mubr.msk.f32.mxu1 %vm336_vm1, %v22358_v34  ;;  %v22386_v34 = vld [vmem:[%s27306_s1 + $0x330] sm:$0xff] }
 0x980   :  { %19321 = vmatmul.mubr.msk.f32.gmra.mrb[118].mxu1 %vm336_vm1, %v22359_v14  ;;  %v22388_v14 = vld [vmem:[%s27306_s1 + $0x340] sm:$0xff] }
 0x981   :  { %19323 = vmatprep.mubr.msk.f32.mxu1 %vm336_vm1, %v22360_v28  ;;  %v22390_v28 = vld [vmem:[%s27306_s1 + $0x350] sm:$0xff] }
 0x984   :  { %19324 = vmatmul.mubr.msk.f32.gmra.mrb[120].mxu1 %vm336_vm1, %v22361_v16  ;;  %v22391_v16 = vld [vmem:[%s27306_s1 + $0x358] sm:$0xff] }
 0x985   :  { %19326 = vmatprep.mubr.msk.f32.mxu1 %vm336_vm1, %v22362_v7  ;;  %v22393_v7 = vld [vmem:[%s27306_s1 + $0x368] sm:$0xff] }
 0x988   :  { %19327 = vmatmul.mubr.msk.f32.gmra.mrb[122].mxu1 %vm336_vm1, %v22363_v57  ;;  %v22394_v57 = vld [vmem:[%s27306_s1 + $0x370] sm:$0xff] }
 0x989   :  { %19361 = vmatprep.mubr.msk.f32.mxu1 %vm336_vm1, %v22364_v24  ;;  %v22395_v24 = vld [vmem:[%s27306_s1 + $0x378] sm:$0xff] }
 0x98c   :  { %19362 = vmatmul.mubr.msk.f32.vlgmr.msra.gmra.mrb[108].mxu1 %vm336_vm1, %v22365_v41  ;;  %v22396_v41 = vld [vmem:[%s27306_s1 + $0x380] sm:$0xff] }
 0x98d   :  { %20998 = vmatpush3.bf16.msra.mxu1 %v24587_v47  ;;  %19364 = vmatprep.mubr.msk.f32.mxu1 %vm336_vm1, %v22366_v9  ;;  %v22369_v47 = vld [vmem:[%s27306_s1 + $0x2a8] sm:$0xff] }
 0x98e   :  { %21000 = vmatprep.subr.bf16.mxu1 %v24599_v11  ;;  %v22397_v9 = vld [vmem:[%s27306_s1 + $0x388] sm:$0xff] }
 0x990   :  { %19365 = vmatmul.mubr.msk.f32.gmra.mrb[110].mxu1 %vm336_vm1, %v22367_v10  ;;  %v22398_v10 = vld [vmem:[%s27306_s1 + $0x390] sm:$0xff] }
 0x991   :  { %19367 = vmatprep.mubr.msk.f32.mxu1 %vm336_vm1, %v22368_v39  ;;  %21002 = vmatpush3.bf16.msra.mxu1 %v24599_v11  ;;  %v22371_v11 = vld [vmem:[%s27306_s1 + $0x2b8] sm:$0xff] }
 0x992   :  { %21004 = vmatprep.subr.bf16.mxu1 %v24611_v23  ;;  %v22399_v39 = vld [vmem:[%s27306_s1 + $0x398] sm:$0xff] }
 0x994   :  { %19368 = vmatmul.mubr.msk.f32.gmra.mrb[112].mxu1 %vm336_vm1, %v22369_v47  ;;  %v22400_v47 = vld [vmem:[%s27306_s1 + $0x3a0] sm:$0xff] }
 0x995   :  { %19370 = vmatprep.mubr.msk.f32.mxu1 %vm336_vm1, %v22370_v12  ;;  %21006 = vmatpush3.bf16.msra.mxu1 %v24611_v23  ;;  %v22373_v23 = vld [vmem:[%s27306_s1 + $0x2c8] sm:$0xff]  ;;  %v22402_v12 = vld [vmem:[%s27306_s1 + $0x3b0] sm:$0xff] }
 0x996   :  { %21009 = vmatprep.subr.msk.bf16.mxu1 %vm22859_vm4, %v24625_v49 }
 0x998   :  { %19371 = vmatmul.mubr.msk.f32.gmra.mrb[114].mxu1 %vm336_vm1, %v22371_v11  ;;  %v22404_v11 = vld [vmem:[%s27306_s1 + $0x3c0] sm:$0xff] }
 0x999   :  { %19373 = vmatprep.mubr.msk.f32.mxu1 %vm336_vm1, %v22372_v38  ;;  %21012 = vmatpush3.bf16.msk.msra.mxu1 %vm22859_vm4, %v24625_v49  ;;  %v22376_v49 = vld [vmem:[%s27306_s1 + $0x2e0] sm:$0xff]  ;;  %v22406_v38 = vld [vmem:[%s27306_s1 + $0x3d0] sm:$0xff] }
 0x99a   :  { %21018 = vmatprep.subr.bf16.mxu1 %v24639_v22 }
 0x99c   :  { %19374 = vmatmul.mubr.msk.f32.gmra.mrb[116].mxu1 %vm336_vm1, %v22373_v23  ;;  %v22407_v23 = vld [vmem:[%s27306_s1 + $0x3d8] sm:$0xff] }
 0x99d   :  { %19376 = vmatprep.mubr.msk.f32.mxu1 %vm336_vm1, %v22374_v25  ;;  %v22409_v25 = vld [vmem:[%s27306_s1 + $0x3e8] sm:$0xff] }
 0x9a0   :  { %19377 = vmatmul.mubr.msk.f32.gmra.mrb[118].mxu1 %vm336_vm1, %v22375_v20  ;;  %v22410_v20 = vld [vmem:[%s27306_s1 + $0x3f0] sm:$0xff] }
 0x9a1   :  { %19379 = vmatprep.mubr.msk.f32.mxu1 %vm336_vm1, %v22376_v49  ;;  %v22411_v49 = vld [vmem:[%s27306_s1 + $0x3f8] sm:$0xff] }
 0x9a4   :  { %19380 = vmatmul.mubr.msk.f32.gmra.mrb[120].mxu1 %vm336_vm1, %v22377_v61  ;;  %v22412_v61 = vld [vmem:[%s27306_s1 + $0x400] sm:$0xff] }
 0x9a5   :  { %19382 = vmatprep.mubr.msk.f32.mxu1 %vm336_vm1, %v22378_v56  ;;  %v22413_v56 = vld [vmem:[%s27306_s1 + $0x408] sm:$0xff] }
 0x9a8   :  { %19383 = vmatmul.mubr.msk.f32.gmra.mrb[122].mxu1 %vm336_vm1, %v22379_v43  ;;  %v22414_v43 = vld [vmem:[%s27306_s1 + $0x410] sm:$0xff] }
 0x9a9   :  { %19417 = vmatprep.mubr.msk.f32.mxu1 %vm336_vm1, %v22380_v19  ;;  %v22415_v19 = vld [vmem:[%s27306_s1 + $0x418] sm:$0xff] }
 0x9ac   :  { %19418 = vmatmul.mubr.msk.f32.vlgmr.msra.gmra.mrb[108].mxu1 %vm336_vm1, %v22381_v63  ;;  %v22416_v63 = vld [vmem:[%s27306_s1 + $0x420] sm:$0xff] }
 0x9ad   :  { %21020 = vmatpush3.bf16.msra.mxu1 %v24639_v22  ;;  %19420 = vmatprep.mubr.msk.f32.mxu1 %vm336_vm1, %v22382_v35  ;;  %v22385_v22 = vld [vmem:[%s27306_s1 + $0x328] sm:$0xff] }
 0x9ae   :  { %21022 = vmatprep.subr.bf16.mxu1 %v24649_v29  ;;  %v22417_v35 = vld [vmem:[%s27306_s1 + $0x428] sm:$0xff] }
 0x9b0   :  { %19421 = vmatmul.mubr.msk.f32.gmra.mrb[110].mxu1 %vm336_vm1, %v22383_v42  ;;  %v22419_v42 = vld [vmem:[%s27306_s1 + $0x438] sm:$0xff] }
 0x9b1   :  { %19423 = vmatprep.mubr.msk.f32.mxu1 %vm336_vm1, %v22384_v30  ;;  %21024 = vmatpush3.bf16.msra.mxu1 %v24649_v29  ;;  %v22387_v29 = vld [vmem:[%s27306_s1 + $0x338] sm:$0xff]  ;;  %v22420_v30 = vld [vmem:[%s27306_s1 + $0x440] sm:$0xff] }
 0x9b2   :  { %21026 = vmatprep.subr.bf16.mxu1 %v24659_v45 }
 0x9b4   :  { %19424 = vmatmul.mubr.msk.f32.gmra.mrb[112].mxu1 %vm336_vm1, %v22385_v22  ;;  %v22421_v22 = vld [vmem:[%s27306_s1 + $0x448] sm:$0xff] }
 0x9b5   :  { %19426 = vmatprep.mubr.msk.f32.mxu1 %vm336_vm1, %v22386_v34  ;;  %21028 = vmatpush3.bf16.msra.mxu1 %v24659_v45  ;;  %v22389_v45 = vld [vmem:[%s27306_s1 + $0x348] sm:$0xff]  ;;  %v22422_v34 = vld [vmem:[%s27306_s1 + $0x450] sm:$0xff] }
 0x9b6   :  { %21031 = vmatprep.subr.msk.bf16.mxu1 %vm22859_vm4, %v24669_v44 }
 0x9b8   :  { %19427 = vmatmul.mubr.msk.f32.gmra.mrb[114].mxu1 %vm336_vm1, %v22387_v29  ;;  %v22423_v29 = vld [vmem:[%s27306_s1 + $0x458] sm:$0xff] }
 0x9b9   :  { %19429 = vmatprep.mubr.msk.f32.mxu1 %vm336_vm1, %v22388_v14  ;;  %21034 = vmatpush3.bf16.msk.msra.mxu1 %vm22859_vm4, %v24669_v44  ;;  %v22392_v44 = vld [vmem:[%s27306_s1 + $0x360] sm:$0xff] }
 0x9ba   :  { %21040 = vmatprep.subr.bf16.mxu1 %v24679_v3  ;;  %v22424_v14 = vld [vmem:[%s27306_s1 + $0x460] sm:$0xff] }
 0x9bc   :  { %19430 = vmatmul.mubr.msk.f32.gmra.mrb[116].mxu1 %vm336_vm1, %v22389_v45  ;;  %v22425_v45 = vld [vmem:[%s27306_s1 + $0x468] sm:$0xff] }
 0x9bd   :  { %19432 = vmatprep.mubr.msk.f32.mxu1 %vm336_vm1, %v22390_v28  ;;  %v22426_v28 = vld [vmem:[%s27306_s1 + $0x470] sm:$0xff] }
 0x9c0   :  { %19433 = vmatmul.mubr.msk.f32.gmra.mrb[118].mxu1 %vm336_vm1, %v22391_v16  ;;  %v22427_v16 = vld [vmem:[%s27306_s1 + $0x478] sm:$0xff] }
 0x9c1   :  { %19435 = vmatprep.mubr.msk.f32.mxu1 %vm336_vm1, %v22392_v44 }
 0x9c4   :  { %19436 = vmatmul.mubr.msk.f32.gmra.mrb[120].mxu1 %vm336_vm1, %v22393_v7 }
 0x9c5   :  { %19438 = vmatprep.mubr.msk.f32.mxu1 %vm336_vm1, %v22394_v57 }
 0x9c8   :  { %19439 = vmatmul.mubr.msk.f32.gmra.mrb[122].mxu1 %vm336_vm1, %v22395_v24 }
 0x9c9   :  { %19473 = vmatprep.mubr.msk.f32.mxu1 %vm336_vm1, %v22396_v41 }
 0x9cc   :  { %19474 = vmatmul.mubr.msk.f32.vlgmr.msra.gmra.mrb[108].mxu1 %vm336_vm1, %v22397_v9 }
 0x9cd   :  { %21042 = vmatpush3.bf16.msra.mxu1 %v24679_v3  ;;  %19476 = vmatprep.mubr.msk.f32.mxu1 %vm336_vm1, %v22398_v10  ;;  %v22401_v3 = vld [vmem:[%s27306_s1 + $0x3a8] sm:$0xff] }
 0x9ce   :  { %21044 = vmatprep.subr.bf16.mxu1 %v24691_v36 }
 0x9d0   :  { %19477 = vmatmul.mubr.msk.f32.gmra.mrb[110].mxu1 %vm336_vm1, %v22399_v39 }
 0x9d1   :  { %19479 = vmatprep.mubr.msk.f32.mxu1 %vm336_vm1, %v22400_v47  ;;  %21046 = vmatpush3.bf16.msra.mxu1 %v24691_v36  ;;  %v22403_v36 = vld [vmem:[%s27306_s1 + $0x3b8] sm:$0xff] }
 0x9d2   :  { %21048 = vmatprep.subr.bf16.mxu1 %v24715_v31 }
 0x9d4   :  { %19480 = vmatmul.mubr.msk.f32.gmra.mrb[112].mxu1 %vm336_vm1, %v22401_v3 }
 0x9d5   :  { %19482 = vmatprep.mubr.msk.f32.mxu1 %vm336_vm1, %v22402_v12  ;;  %21050 = vmatpush3.bf16.msra.mxu1 %v24715_v31  ;;  %v22405_v31 = vld [vmem:[%s27306_s1 + $0x3c8] sm:$0xff] }
 0x9d6   :  { %21053 = vmatprep.subr.msk.bf16.mxu1 %vm22859_vm4, %v24737_v60 }
 0x9d8   :  { %19483 = vmatmul.mubr.msk.f32.gmra.mrb[114].mxu1 %vm336_vm1, %v22403_v36 }
 0x9d9   :  { %19485 = vmatprep.mubr.msk.f32.mxu1 %vm336_vm1, %v22404_v11  ;;  %21056 = vmatpush3.bf16.msk.msra.mxu1 %vm22859_vm4, %v24737_v60  ;;  %v22408_v60 = vld [vmem:[%s27306_s1 + $0x3e0] sm:$0xff] }
 0x9da   :  { %21234 = vmatprep.subr.bf16.mxu1 %v23758_v0 }
 0x9dc   :  { %19486 = vmatmul.mubr.msk.f32.gmra.mrb[116].mxu1 %vm336_vm1, %v22405_v31 }
 0x9dd   :  { %19488 = vmatprep.mubr.msk.f32.mxu1 %vm336_vm1, %v22406_v38 }
 0x9e0   :  { %19489 = vmatmul.mubr.msk.f32.gmra.mrb[118].mxu1 %vm336_vm1, %v22407_v23 }
 0x9e1   :  { %19491 = vmatprep.mubr.msk.f32.mxu1 %vm336_vm1, %v22408_v60 }
 0x9e4   :  { %19492 = vmatmul.mubr.msk.f32.gmra.mrb[120].mxu1 %vm336_vm1, %v22409_v25 }
 0x9e5   :  { %19494 = vmatprep.mubr.msk.f32.mxu1 %vm336_vm1, %v22410_v20 }
 0x9e8   :  { %19495 = vmatmul.mubr.msk.f32.gmra.mrb[122].mxu1 %vm336_vm1, %v22411_v49 }
 0x9e9   :  { %19529 = vmatprep.mubr.msk.f32.mxu1 %vm336_vm1, %v22412_v61 }
 0x9ec   :  { %19530 = vmatmul.mubr.msk.f32.vlgmr.msra.gmra.mrb[108].mxu1 %vm336_vm1, %v22413_v56 }
 0x9ed   :  { %19532 = vmatprep.mubr.msk.f32.mxu1 %vm336_vm1, %v22414_v43  ;;  %21236 = vmatpush3.bf16.msra.mxu1 %v23758_v0  ;;  %v22418_v0 = vld [vmem:[%s27306_s1 + $0x430] sm:$0xff] }
 0x9ee   :  { %21246 = vmatprep.subr.bf16.mxu1 %v23776_v5 }
 0x9f0   :  { %19533 = vmatmul.mubr.msk.f32.gmra.mrb[110].mxu1 %vm336_vm1, %v22415_v19 }
 0x9f1   :  { %19535 = vmatprep.mubr.msk.f32.mxu1 %vm336_vm1, %v22416_v63 }
 0x9f4   :  { %19536 = vmatmul.mubr.msk.f32.gmra.mrb[112].mxu1 %vm336_vm1, %v22417_v35 }
 0x9f5   :  { %19538 = vmatprep.mubr.msk.f32.mxu1 %vm336_vm1, %v22418_v0 }
 0x9f8   :  { %19539 = vmatmul.mubr.msk.f32.gmra.mrb[114].mxu1 %vm336_vm1, %v22419_v42 }
 0x9f9   :  { %19541 = vmatprep.mubr.msk.f32.mxu1 %vm336_vm1, %v22420_v30 }
 0x9fc   :  { %19542 = vmatmul.mubr.msk.f32.gmra.mrb[116].mxu1 %vm336_vm1, %v22421_v22 }
 0x9fd   :  { %19544 = vmatprep.mubr.msk.f32.mxu1 %vm336_vm1, %v22422_v34 }
 0xa00   :  { %19545 = vmatmul.mubr.msk.f32.gmra.mrb[118].mxu1 %vm336_vm1, %v22423_v29 }
 0xa01   :  { %19547 = vmatprep.mubr.msk.f32.mxu1 %vm336_vm1, %v22424_v14 }
 0xa04   :  { %19548 = vmatmul.mubr.msk.f32.gmra.mrb[120].mxu1 %vm336_vm1, %v22425_v45 }
 0xa05   :  { %19550 = vmatprep.mubr.msk.f32.mxu1 %vm336_vm1, %v22426_v28 }
 0xa08   :  { %19551 = vmatmul.mubr.msk.f32.gmra.mrb[122].mxu1 %vm336_vm1, %v22427_v16 }
 0xabf   :  { %v19531_v44 = vpop.f32.mrb[108].mxu1 }
 0xac0   :  { %v7768_v7 = vadd.f32 %v19531_v44, %v23599_v50  ;;  %v7672_v57 = vpop.f32.mrb[109].mxu1 }
 0xac1   :  { %v7767_v24 = vadd.f32 %v7672_v57, %v23599_v50 }
 0xac2   :  { %v7784_v41 = vmax.f32 %v7768_v7, 0.0 }
 0xac3   :  { %v7783_v9 = vmax.f32 %v7767_v24, 0.0  ;;  %v19534_v10 = vpop.f32.mrb[110].mxu1 }
 0xac4   :  { %v7770_v39 = vadd.f32 %v19534_v10, %v23599_v50  ;;  %v7682_v47 = vpop.f32.mrb[111].mxu1 }
 0xac5   :  { %v25132_v3 = vpack.c.bf16 %v7784_v41, %v7783_v9  ;;  %v7769_v12 = vadd.f32 %v7682_v47, %v23599_v50 }
 0xac6   :  { %v7786_v36 = vmax.f32 %v7770_v39, 0.0 }
 0xac7   :  { %v7785_v11 = vmax.f32 %v7769_v12, 0.0  ;;  %v19537_v31 = vpop.f32.mrb[112].mxu1  ;;  %21058 = vmatprep.subr.bf16.mxu0 %v25132_v3 }
 0xac8   :  { %v7772_v38 = vadd.f32 %v19537_v31, %v23599_v50  ;;  %v7692_v23 = vpop.f32.mrb[113].mxu1  ;;  %21060 = vmatpush3.bf16.msra.mxu0 %v25132_v3 }
 0xac9   :  { %v25138_v60 = vpack.c.bf16 %v7786_v36, %v7785_v11  ;;  %v7771_v25 = vadd.f32 %v7692_v23, %v23599_v50 }
 0xaca   :  { %v7788_v20 = vmax.f32 %v7772_v38, 0.0 }
 0xacb   :  { %v7787_v49 = vmax.f32 %v7771_v25, 0.0  ;;  %v19540_v61 = vpop.f32.mrb[114].mxu1  ;;  %21062 = vmatprep.subr.bf16.mxu0 %v25138_v60 }
 0xacc   :  { %v7774_v56 = vadd.f32 %v19540_v61, %v23599_v50  ;;  %v7702_v43 = vpop.f32.mrb[115].mxu1  ;;  %21064 = vmatpush3.bf16.msra.mxu0 %v25138_v60 }
 0xacd   :  { %v25144_v19 = vpack.c.bf16 %v7788_v20, %v7787_v49  ;;  %v7773_v63 = vadd.f32 %v7702_v43, %v23599_v50  ;;  %v22428_v43 = vld [vmem:[%s27306_s1 + $0x488] sm:$0xff] }
 0xace   :  { %v7790_v35 = vmax.f32 %v7774_v56, 0.0 }
 0xacf   :  { %v7789_v0 = vmax.f32 %v7773_v63, 0.0  ;;  %v19543_v42 = vpop.f32.mrb[116].mxu1  ;;  %21066 = vmatprep.subr.bf16.mxu0 %v25144_v19  ;;  %v22430_v63 = vld [vmem:[%s27306_s1 + $0x498] sm:$0xff] }
 0xad0   :  { %v7776_v30 = vadd.f32 %v19543_v42, %v23599_v50  ;;  %v7712_v22 = vpop.f32.mrb[117].mxu1  ;;  %21068 = vmatpush3.bf16.msra.mxu0 %v25144_v19  ;;  %v22433_v42 = vld [vmem:[%s27306_s1 + $0x4b0] sm:$0xff] }
 0xad1   :  { %v25150_v34 = vpack.c.bf16 %v7790_v35, %v7789_v0  ;;  %v7775_v29 = vadd.f32 %v7712_v22, %v23599_v50  ;;  %v22431_v35 = vld [vmem:[%s27306_s1 + $0x4a0] sm:$0xff]  ;;  %v22432_v0 = vld [vmem:[%s27306_s1 + $0x4a8] sm:$0xff] }
 0xad2   :  { %v7792_v14 = vmax.f32 %v7776_v30, 0.0  ;;  %v22434_v30 = vld [vmem:[%s27306_s1 + $0x4b8] sm:$0xff]  ;;  %v22435_v22 = vld [vmem:[%s27306_s1 + $0x4c0] sm:$0xff] }
 0xad3   :  { %v7791_v45 = vmax.f32 %v7775_v29, 0.0  ;;  %v19546_v28 = vpop.f32.mrb[118].mxu1  ;;  %21070 = vmatprep.subr.bf16.mxu0 %v25150_v34  ;;  %v22436_v29 = vld [vmem:[%s27306_s1 + $0x4c8] sm:$0xff] }
 0xad4   :  { %v7778_v16 = vadd.f32 %v19546_v28, %v23599_v50  ;;  %v7722_v44 = vpop.f32.mrb[119].mxu1  ;;  %21072 = vmatpush3.bf16.msra.mxu0 %v25150_v34  ;;  %v22439_v28 = vld [vmem:[%s27306_s1 + $0x4e0] sm:$0xff] }
 0xad5   :  { %v25156_v7 = vpack.c.bf16 %v7792_v14, %v7791_v45  ;;  %v7777_v57 = vadd.f32 %v7722_v44, %v23599_v50  ;;  %v22437_v14 = vld [vmem:[%s27306_s1 + $0x4d0] sm:$0xff]  ;;  %v22438_v45 = vld [vmem:[%s27306_s1 + $0x4d8] sm:$0xff] }
 0xad6   :  { %v7794_v24 = vmax.f32 %v7778_v16, 0.0 }
 0xad7   :  { %v7793_v41 = vmax.f32 %v7777_v57, 0.0  ;;  %v19549_v9 = vpop.f32.mrb[120].mxu1  ;;  %21074 = vmatprep.subr.bf16.mxu0 %v25156_v7 }
 0xad8   :  { %v7780_v10 = vadd.f32 %v19549_v9, %v23599_v50  ;;  %v7732_v39 = vpop.f32.mrb[121].mxu1  ;;  %21076 = vmatpush3.bf16.msra.mxu0 %v25156_v7 }
 0xad9   :  { %v25162_v47 = vpack.c.bf16 %v7794_v24, %v7793_v41  ;;  %v7779_v12 = vadd.f32 %v7732_v39, %v23599_v50 }
 0xada   :  { %v7796_v36 = vmax.f32 %v7780_v10, 0.0 }
 0xadb   :  { %v7795_v11 = vmax.f32 %v7779_v12, 0.0  ;;  %v19552_v31 = vpop.f32.mrb[122].mxu1  ;;  %21078 = vmatprep.subr.bf16.mxu0 %v25162_v47 }
 0xadc   :  { %v7782_v38 = vadd.f32 %v19552_v31, %v23599_v50  ;;  %v7742_v23 = vpop.f32.mrb[123].mxu1  ;;  %21080 = vmatpush3.bf16.msra.mxu0 %v25162_v47 }
 0xadd   :  { %v25168_v25 = vpack.c.bf16 %v7796_v36, %v7795_v11  ;;  %v7781_v20 = vadd.f32 %v7742_v23, %v23599_v50  ;;  %v22429_v50 = vld [vmem:[%s27306_s1 + $0x490] sm:$0xff] }
 0xade   :  { %v7798_v49 = vmax.f32 %v7782_v38, 0.0 }
 0xadf   :  { %v7797_v61 = vmax.f32 %v7781_v20, 0.0  ;;  %21082 = vmatprep.subr.bf16.mxu0 %v25168_v25 }
 0xae0   :  { %21084 = vmatpush3.bf16.msra.mxu0 %v25168_v25 }
 0xae1   :  { %v25173_v56 = vpack.c.bf16 %v7798_v49, %v7797_v61 }
 0xae3   :  { %21086 = vmatprep.subr.bf16.mxu0 %v25173_v56 }
 0xae4   :  { %21088 = vmatpush3.bf16.msra.mxu0 %v25173_v56 }
 0xae5   :  { %21090 = vmatprep.subr.bf16.mxu0 %v25132_v3 }
 0xae7   :  { %19586 = vmatmul.mubr.f32.vlgmr.msra.gmra.mrb[112].mxu0 %v22428_v43 }
 0xae8   :  { %21092 = vmatpush3.bf16.msra.mxu0 %v25132_v3  ;;  %19588 = vmatprep.mubr.f32.mxu0 %v22429_v50 }
 0xae9   :  { %21094 = vmatprep.subr.bf16.mxu0 %v25138_v60 }
 0xaeb   :  { %19589 = vmatmul.mubr.f32.gmra.mrb[114].mxu0 %v22430_v63 }
 0xaec   :  { %21096 = vmatpush3.bf16.msra.mxu0 %v25138_v60  ;;  %19623 = vmatprep.mubr.f32.mxu0 %v22431_v35 }
 0xaed   :  { %21098 = vmatprep.subr.bf16.mxu0 %v25144_v19 }
 0xaf0   :  { %21100 = vmatpush3.bf16.msra.mxu0 %v25144_v19 }
 0xaf1   :  { %21102 = vmatprep.subr.bf16.mxu0 %v25150_v34 }
 0xaf4   :  { %21104 = vmatpush3.bf16.msra.mxu0 %v25150_v34 }
 0xaf5   :  { %21106 = vmatprep.subr.bf16.mxu0 %v25156_v7 }
 0xaf8   :  { %21108 = vmatpush3.bf16.msra.mxu0 %v25156_v7 }
 0xaf9   :  { %21110 = vmatprep.subr.bf16.mxu0 %v25162_v47 }
 0xafc   :  { %21112 = vmatpush3.bf16.msra.mxu0 %v25162_v47 }
 0xafd   :  { %21114 = vmatprep.subr.bf16.mxu0 %v25168_v25 }
 0xb00   :  { %21116 = vmatpush3.bf16.msra.mxu0 %v25168_v25 }
 0xb01   :  { %21118 = vmatprep.subr.bf16.mxu0 %v25173_v56 }
 0xb04   :  { %21120 = vmatpush3.bf16.msra.mxu0 %v25173_v56 }
 0xb05   :  { %21122 = vmatprep.subr.bf16.mxu0 %v25132_v3 }
 0xb07   :  { %19624 = vmatmul.mubr.f32.vlgmr.msra.gmra.mrb[116].mxu0 %v22432_v0 }
 0xb08   :  { %21124 = vmatpush3.bf16.msra.mxu0 %v25132_v3  ;;  %19626 = vmatprep.mubr.f32.mxu0 %v22433_v42 }
 0xb09   :  { %21126 = vmatprep.subr.bf16.mxu0 %v25138_v60 }
 0xb0b   :  { %19627 = vmatmul.mubr.f32.gmra.mrb[118].mxu0 %v22434_v30 }
 0xb0c   :  { %21128 = vmatpush3.bf16.msra.mxu0 %v25138_v60  ;;  %19661 = vmatprep.mubr.f32.mxu0 %v22435_v22 }
 0xb0d   :  { %21130 = vmatprep.subr.bf16.mxu0 %v25144_v19 }
 0xb10   :  { %21132 = vmatpush3.bf16.msra.mxu0 %v25144_v19 }
 0xb11   :  { %21134 = vmatprep.subr.bf16.mxu0 %v25150_v34 }
 0xb14   :  { %21136 = vmatpush3.bf16.msra.mxu0 %v25150_v34 }
 0xb15   :  { %21138 = vmatprep.subr.bf16.mxu0 %v25156_v7 }
 0xb18   :  { %21140 = vmatpush3.bf16.msra.mxu0 %v25156_v7 }
 0xb19   :  { %21142 = vmatprep.subr.bf16.mxu0 %v25162_v47 }
 0xb1c   :  { %21144 = vmatpush3.bf16.msra.mxu0 %v25162_v47 }
 0xb1d   :  { %21146 = vmatprep.subr.bf16.mxu0 %v25168_v25 }
 0xb20   :  { %21148 = vmatpush3.bf16.msra.mxu0 %v25168_v25 }
 0xb21   :  { %21150 = vmatprep.subr.bf16.mxu0 %v25173_v56 }
 0xb24   :  { %21152 = vmatpush3.bf16.msra.mxu0 %v25173_v56 }
 0xb25   :  { %21154 = vmatprep.subr.bf16.mxu0 %v25132_v3 }
 0xb27   :  { %19662 = vmatmul.mubr.f32.vlgmr.msra.gmra.mrb[120].mxu0 %v22436_v29 }
 0xb28   :  { %21156 = vmatpush3.bf16.msra.mxu0 %v25132_v3  ;;  %19664 = vmatprep.mubr.f32.mxu0 %v22437_v14  ;;  %v22440_v3 = vld [vmem:[%s27306_s1 + $0x4e8] sm:$0xff] }
 0xb29   :  { %21158 = vmatprep.subr.bf16.mxu0 %v25138_v60 }
 0xb2b   :  { %19665 = vmatmul.mubr.f32.gmra.mrb[122].mxu0 %v22438_v45 }
 0xb2c   :  { %21160 = vmatpush3.bf16.msra.mxu0 %v25138_v60  ;;  %19699 = vmatprep.mubr.f32.mxu0 %v22439_v28  ;;  %v22441_v60 = vld [vmem:[%s27306_s1 + $0x4f0] sm:$0xff] }
 0xb2d   :  { %21162 = vmatprep.subr.bf16.mxu0 %v25144_v19 }
 0xb30   :  { %21164 = vmatpush3.bf16.msra.mxu0 %v25144_v19  ;;  %v22442_v19 = vld [vmem:[%s27306_s1 + $0x4f8] sm:$0xff] }
 0xb31   :  { %21166 = vmatprep.subr.bf16.mxu0 %v25150_v34 }
 0xb34   :  { %21168 = vmatpush3.bf16.msra.mxu0 %v25150_v34 }
 0xb35   :  { %21170 = vmatprep.subr.bf16.mxu0 %v25156_v7 }
 0xb38   :  { %21172 = vmatpush3.bf16.msra.mxu0 %v25156_v7 }
 0xb39   :  { %21174 = vmatprep.subr.bf16.mxu0 %v25162_v47 }
 0xb3c   :  { %21176 = vmatpush3.bf16.msra.mxu0 %v25162_v47 }
 0xb3d   :  { %21178 = vmatprep.subr.bf16.mxu0 %v25168_v25 }
 0xb40   :  { %21180 = vmatpush3.bf16.msra.mxu0 %v25168_v25 }
 0xb41   :  { %21182 = vmatprep.subr.bf16.mxu0 %v25173_v56 }
 0xb44   :  { %21184 = vmatpush3.bf16.msra.mxu0 %v25173_v56 }
 0xb45   :  { %21186 = vmatprep.subr.bf16.mxu0 %v23748_v37 }
 0xb47   :  { %19700 = vmatmul.mubr.f32.vlgmr.msra.gmra.mrb[124].mxu0 %v22440_v3 }
 0xb48   :  { %19702 = vmatprep.mubr.f32.mxu0 %v22441_v60  ;;  %21188 = vmatpush3.bf16.msra.mxu0 %v23748_v37 }
 0xb49   :  { %21190 = vmatprep.subr.bf16.mxu0 %v23771_v4 }
 0xb4b   :  { %19703 = vmatmul.mubr.f32.gmra.mrb[126].mxu0 %v22442_v19 }
 0xbba   :  { %v19587_v34 = vpop.f32.mrb[112].mxu0 }
 0xbbb   :  { %v7865_v16 = vpop.f32.mrb[113].mxu0 }
 0xbbe   :  { %v19590_v44 = vpop.f32.mrb[114].mxu0 }
 0xbbf   :  { %v7875_v7 = vpop.f32.mrb[115].mxu0 }
 0xbda   :  { %v19625_v57 = vpop.f32.mrb[116].mxu0 }
 0xbdb   :  { %v7970_v24 = vmax.f32 %v19587_v34, %v19625_v57  ;;  %v7950_v41 = vpop.f32.mrb[117].mxu0 }
 0xbdc   :  { %v7969_v9 = vmax.f32 %v7865_v16, %v7950_v41 }
 0xbde   :  { %v19628_v10 = vpop.f32.mrb[118].mxu0 }
 0xbdf   :  { %v7972_v39 = vmax.f32 %v19590_v44, %v19628_v10  ;;  %v7960_v47 = vpop.f32.mrb[119].mxu0 }
 0xbe0   :  { %v7971_v12 = vmax.f32 %v7875_v7, %v7960_v47  ;;  %v22444_v47 = vld [vmem:[%s27306_s1 + $0x528] sm:$0xff] }
 0xbfa   :  { %v19663_v37 = vpop.f32.mrb[120].mxu0 }
 0xbfb   :  { %v8059_v36 = vmax.f32 %v7970_v24, %v19663_v37  ;;  %v8039_v11 = vpop.f32.mrb[121].mxu0 }
 0xbfc   :  { %v8058_v31 = vmax.f32 %v7969_v9, %v8039_v11 }
 0xbfe   :  { %v19666_v38 = vpop.f32.mrb[122].mxu0 }
 0xbff   :  { %v8061_v23 = vmax.f32 %v7972_v39, %v19666_v38  ;;  %v8049_v25 = vpop.f32.mrb[123].mxu0 }
 0xc00   :  { %v8060_v20 = vmax.f32 %v7971_v12, %v8049_v25  ;;  %v22447_v25 = vld [vmem:[%s27306_s1 + $0x500] sm:$0xff] }
 0xc1a   :  { %v19701_v49 = vpop.f32.mrb[124].mxu0 }
 0xc1b   :  { %v25273_v61 = vmax.f32 %v8059_v36, %v19701_v49  ;;  %v8128_v56 = vpop.f32.mrb[125].mxu0  ;;  %v22445_v36 = vld [vmem:[%s27306_s1 + $0x530] sm:$0xff]  ;;  %v22448_v49 = vld [vmem:[%s27306_s1 + $0x508] sm:$0xff] }
 0xc1c   :  { %v25275_v43 = vmax.f32 %v8058_v31, %v8128_v56  ;;  %v22446_v31 = vld [vmem:[%s27306_s1 + $0x538] sm:$0xff] }
 0xc1e   :  { %v19704_v50 = vpop.f32.mrb[126].mxu0  ;;  %19709 = vmatprep.mubr.msk.f32.mxu0 %vm83_vm0, %v25275_v43  ;;  %19805 = vmatprep.mubr.msk.f32.mxu1 %vm83_vm0, %v25275_v43 }
 0xc1f   :  { %v25281_v63 = vmax.f32 %v8061_v23, %v19704_v50  ;;  %v8138_v35 = vpop.f32.mrb[127].mxu0  ;;  %19710 = vmatmul.mubr.msk.f32.vlgmr.msra.gmra.mrb[128].mxu0 %vm83_vm0, %v25273_v61  ;;  %19806 = vmatmul.mubr.msk.f32.vlgmr.msra.gmra.mrb[124].mxu1 %vm83_vm0, %v25273_v61 }
 0xc20   :  { %v25287_v0 = vmax.f32 %v8060_v20, %v8138_v35  ;;  %21192 = vmatpush3.bf16.msra.mxu0 %v23771_v4  ;;  %21248 = vmatpush3.bf16.msra.mxu1 %v23776_v5  ;;  %v22443_v4 = vld [vmem:[%s27306_s1 + $0x520] sm:$0xff]  ;;  %v22449_v35 = vld [vmem:[%s27306_s1 + $0x510] sm:$0xff] }
 0xc21   :  { %21258 = vmatprep.subr.bf16.mxu1 %v23790_v51 }
 0xc22   :  { %19712 = vmatprep.mubr.msk.f32.mxu0 %vm83_vm0, %v25287_v0  ;;  %19808 = vmatprep.mubr.msk.f32.mxu1 %vm83_vm0, %v25287_v0 }
 0xc23   :  { %19713 = vmatmul.mubr.msk.f32.gmra.mrb[130].mxu0 %vm83_vm0, %v25281_v63  ;;  %19809 = vmatmul.mubr.msk.f32.gmra.mrb[126].mxu1 %vm83_vm0, %v25281_v63 }
 0xc24   :  { %19719 = vmatprep.mubr.msk.f32.mxu0 %vm83_vm0, %v25275_v43  ;;  %19829 = vmatprep.mubr.msk.f32.mxu1 %vm83_vm0, %v25275_v43 }
 0xc27   :  { %19720 = vmatmul.mubr.msk.f32.vlgmr.msra.gmra.mrb[132].mxu0 %vm83_vm0, %v25273_v61  ;;  %19830 = vmatmul.mubr.msk.f32.vlgmr.msra.gmra.mrb[128].mxu1 %vm83_vm0, %v25273_v61 }
 0xc28   :  { %19722 = vmatprep.mubr.msk.f32.mxu0 %vm83_vm0, %v25287_v0  ;;  %19832 = vmatprep.mubr.msk.f32.mxu1 %vm83_vm0, %v25287_v0 }
 0xc29   :  { %21260 = vmatpush3.bf16.msra.mxu1 %v23790_v51 }
 0xc2a   :  { %21270 = vmatprep.subr.bf16.mxu1 %v23825_v59 }
 0xc2b   :  { %19723 = vmatmul.mubr.msk.f32.gmra.mrb[134].mxu0 %vm83_vm0, %v25281_v63  ;;  %19833 = vmatmul.mubr.msk.f32.gmra.mrb[130].mxu1 %vm83_vm0, %v25281_v63 }
 0xc2c   :  { %19853 = vmatprep.mubr.msk.f32.mxu1 %vm83_vm0, %v25275_v43  ;;  %19733 = vmatprep.mubr.msk.f32.mxu0 %vm3673_vm5, %v22443_v4 }
 0xc2f   :  { %19854 = vmatmul.mubr.msk.f32.vlgmr.msra.gmra.mrb[132].mxu1 %vm83_vm0, %v25273_v61 }
 0xc30   :  { %19856 = vmatprep.mubr.msk.f32.mxu1 %vm83_vm0, %v25287_v0  ;;  %21272 = vmatpush3.bf16.msra.mxu1 %v23825_v59 }
 0xc31   :  { %21282 = vmatprep.subr.bf16.mxu1 %v23849_v26 }
 0xc33   :  { %19857 = vmatmul.mubr.msk.f32.gmra.mrb[134].mxu1 %vm83_vm0, %v25281_v63 }
 0xc34   :  { %19877 = vmatprep.mubr.msk.f32.mxu1 %vm83_vm0, %v25275_v43 }
 0xc37   :  { %19878 = vmatmul.mubr.msk.f32.vlgmr.msra.gmra.mrb[136].mxu1 %vm83_vm0, %v25273_v61 }
 0xc38   :  { %19880 = vmatprep.mubr.msk.f32.mxu1 %vm83_vm0, %v25287_v0  ;;  %21284 = vmatpush3.bf16.msra.mxu1 %v23849_v26 }
 0xc39   :  { %21294 = vmatprep.subr.bf16.mxu1 %v24004_v62 }
 0xc3b   :  { %19881 = vmatmul.mubr.msk.f32.gmra.mrb[138].mxu1 %vm83_vm0, %v25281_v63 }
 0xc3c   :  { %19901 = vmatprep.mubr.msk.f32.mxu1 %vm83_vm0, %v25275_v43 }
 0xc3f   :  { %19902 = vmatmul.mubr.msk.f32.vlgmr.msra.gmra.mrb[140].mxu1 %vm83_vm0, %v25273_v61 }
 0xc40   :  { %19904 = vmatprep.mubr.msk.f32.mxu1 %vm83_vm0, %v25287_v0  ;;  %21296 = vmatpush3.bf16.msra.mxu1 %v24004_v62 }
 0xc41   :  { %21298 = vmatprep.subr.bf16.mxu1 %v24130_v18 }
 0xc43   :  { %19905 = vmatmul.mubr.msk.f32.gmra.mrb[142].mxu1 %vm83_vm0, %v25281_v63 }
 0xc44   :  { %21300 = vmatpush3.bf16.msra.mxu1 %v24130_v18 }
 0xc45   :  { %21303 = vmatprep.subr.msk.bf16.mxu1 %vm22859_vm4, %v24140_v40 }
 0xc48   :  { %21306 = vmatpush3.bf16.msk.msra.mxu1 %vm22859_vm4, %v24140_v40 }
 0xcf2   :  { %v19711_v5 = vpop.f32.mrb[128].mxu0  ;;  %v19807_v51 = vpop.f32.mrb[124].mxu1 }
 0xcf3   :  { %v8229_v59 = vpop.f32.mrb[129].mxu0  ;;  %v8917_v26 = vpop.f32.mrb[125].mxu1 }
 0xcf4   :  { %v21201_v62 = vpack.c.bf16 %v19711_v5, %v8229_v59  ;;  %v25359_v42 = vpack.c.bf16 %v19807_v51, %v8917_v26  ;;  %v22450_v5 = vld [vmem:[%s27306_s1 + $0x518] sm:$0xff] }
 0xcf6   :  { %v19714_v30 = vpop.f32.mrb[130].mxu0  ;;  %v19810_v22 = vpop.f32.mrb[126].mxu1 }
 0xcf7   :  { %v8239_v29 = vpop.f32.mrb[131].mxu0  ;;  %v8927_v14 = vpop.f32.mrb[127].mxu1 }
 0xcf8   :  { %v21205_v18 = vpack.c.bf16 %v19714_v30, %v8239_v29  ;;  %v25361_v45 = vpack.c.bf16 %v19810_v22, %v8927_v14  ;;  %v22451_v22 = vld [vmem:[%s27306_s1 + $0x540] sm:$0xff] }
 0xcfa   :  { %v19721_v28 = vpop.f32.mrb[132].mxu0  ;;  %v19831_v3 = vpop.f32.mrb[128].mxu1 }
 0xcfb   :  { %v8314_v60 = vpop.f32.mrb[133].mxu0  ;;  %v9091_v19 = vpop.f32.mrb[129].mxu1 }
 0xcfc   :  { %v21193_v34 = vpack.c.bf16 %v19721_v28, %v8314_v60  ;;  %v25363_v40 = vpack.c.bf16 %v19831_v3, %v9091_v19  ;;  %v22452_v19 = vld [vmem:[%s27306_s1 + $0x548] sm:$0xff] }
 0xcfe   :  { %v19724_v16 = vpop.f32.mrb[134].mxu0  ;;  %21194 = vmatprep.subr.bf16.mxu0 %v21193_v34  ;;  %v19834_v44 = vpop.f32.mrb[130].mxu1 }
 0xcff   :  { %v8324_v7 = vpop.f32.mrb[135].mxu0  ;;  %21196 = vmatpush3.bf16.msra.mxu0 %v21193_v34  ;;  %v9101_v57 = vpop.f32.mrb[131].mxu1  ;;  %v22453_v34 = vld [vmem:[%s27306_s1 + $0x550] sm:$0xff] }
 0xd00   :  { %v21197_v24 = vpack.c.bf16 %v19724_v16, %v8324_v7  ;;  %v25365_v41 = vpack.c.bf16 %v19834_v44, %v9101_v57  ;;  %v22454_v16 = vld [vmem:[%s27306_s1 + $0x558] sm:$0xff]  ;;  %v27311_v44 = vmov 0.0|0.0  }
 0xd01   :  { %21313 = vmatprep.subr.bf16.mxu1 %v27311_v44 }
 0xd02   :  { %21198 = vmatprep.subr.bf16.mxu0 %v21197_v24  ;;  %v19855_v9 = vpop.f32.mrb[132].mxu1 }
 0xd03   :  { %21200 = vmatpush3.bf16.msra.mxu0 %v21197_v24  ;;  %v9265_v10 = vpop.f32.mrb[133].mxu1 }
 0xd04   :  { %v25367_v39 = vpack.c.bf16 %v19855_v9, %v9265_v10  ;;  %21202 = vmatprep.subr.bf16.mxu0 %v21201_v62  ;;  %v22457_v9 = vld [vmem:[%s27306_s1 + $0x570] sm:$0xff]  ;;  %v22458_v10 = vld [vmem:[%s27306_s1 + $0x578] sm:$0xff] }
 0xd06   :  { %19734 = vmatmul.mubr.msk.f32.vlgmr.msra.gmra.mrb[136].mxu0 %vm3673_vm5, %v22444_v47  ;;  %v19858_v12 = vpop.f32.mrb[134].mxu1  ;;  %v22460_v47 = vld [vmem:[%s27306_s1 + $0x588] sm:$0xff] }
 0xd07   :  { %21204 = vmatpush3.bf16.msra.mxu0 %v21201_v62  ;;  %v9275_v37 = vpop.f32.mrb[135].mxu1  ;;  %19736 = vmatprep.mubr.msk.f32.mxu0 %vm3673_vm5, %v22445_v36  ;;  %v22466_v36 = vld [vmem:[%s27306_s1 + $0x5b8] sm:$0xff] }
 0xd08   :  { %v25377_v11 = vpack.c.bf16 %v19858_v12, %v9275_v37  ;;  %21206 = vmatprep.subr.bf16.mxu0 %v21205_v18  ;;  %v22462_v12 = vld [vmem:[%s27306_s1 + $0x598] sm:$0xff]  ;;  %v22464_v37 = vld [vmem:[%s27306_s1 + $0x5a8] sm:$0xff] }
 0xd0a   :  { %19737 = vmatmul.mubr.msk.f32.gmra.mrb[138].mxu0 %vm3673_vm5, %v22446_v31  ;;  %v19879_v38 = vpop.f32.mrb[136].mxu1  ;;  %v22468_v31 = vld [vmem:[%s27306_s1 + $0x5c8] sm:$0xff] }
 0xd0b   :  { %21208 = vmatpush3.bf16.msra.mxu0 %v21205_v18  ;;  %v9439_v23 = vpop.f32.mrb[137].mxu1  ;;  %19747 = vmatprep.mubr.msk.f32.mxu0 %vm3673_vm5, %v22447_v25  ;;  %v22472_v25 = vld [vmem:[%s27306_s1 + $0x5e8] sm:$0xff] }
 0xd0c   :  { %v25387_v20 = vpack.c.bf16 %v19879_v38, %v9439_v23  ;;  %21210 = vmatprep.subr.bf16.mxu0 %v23912_v53  ;;  %v22470_v38 = vld [vmem:[%s27306_s1 + $0x5d8] sm:$0xff]  ;;  %v22471_v23 = vld [vmem:[%s27306_s1 + $0x5e0] sm:$0xff] }
 0xd0e   :  { %19748 = vmatmul.mubr.msk.f32.vlgmr.msra.gmra.mrb[136].mxu0 %vm3673_vm5, %v22448_v49  ;;  %v19882_v56 = vpop.f32.mrb[138].mxu1  ;;  %v9830_v49 = vld [vmem:[%s27306_s1 + $0x790] sm:$0xff] }
 0xd0f   :  { %21212 = vmatpush3.bf16.msra.mxu0 %v23912_v53  ;;  %v9449_v50 = vpop.f32.mrb[139].mxu1  ;;  %19750 = vmatprep.mubr.msk.f32.mxu0 %vm3673_vm5, %v22449_v35  ;;  %v22475_v35 = vld [vmem:[%s27306_s1 + $0x600] sm:$0xff] }
 0xd10   :  { %v25399_v4 = vpack.c.bf16 %v19882_v56, %v9449_v50  ;;  %v9831_v56 = vld [vmem:[%s27306_s1 + $0x798] sm:$0xff] }
 0xd11   :  { %v22474_v50 = vld [vmem:[%s27306_s1 + $0x5f8] sm:$0xff] }
 0xd12   :  { %19751 = vmatmul.mubr.msk.f32.gmra.mrb[138].mxu0 %vm3673_vm5, %v22450_v5  ;;  %v19903_v51 = vpop.f32.mrb[140].mxu1  ;;  %v9832_v5 = vld [vmem:[%s27306_s1 + $0x7a0] sm:$0xff] }
 0xd13   :  { %19757 = vmatprep.mubr.msk.f32.mxu0 %vm83_vm0, %v25275_v43  ;;  %v9613_v53 = vpop.f32.mrb[141].mxu1 }
 0xd14   :  { %v25407_v59 = vpack.c.bf16 %v19903_v51, %v9613_v53  ;;  %v9833_v51 = vld [vmem:[%s27306_s1 + $0x7a8] sm:$0xff] }
 0xd15   :  { %v22476_v53 = vld [vmem:[%s27306_s1 + $0x608] sm:$0xff] }
 0xd16   :  { %19758 = vmatmul.mubr.msk.f32.vlgmr.msra.gmra.mrb[140].mxu0 %vm83_vm0, %v25273_v61  ;;  %v19906_v26 = vpop.f32.mrb[142].mxu1 }
 0xd17   :  { %19760 = vmatprep.mubr.msk.f32.mxu0 %vm83_vm0, %v25287_v0  ;;  %v9623_v62 = vpop.f32.mrb[143].mxu1 }
 0xd18   :  { %v25413_v30 = vpack.c.bf16 %v19906_v26, %v9623_v62  ;;  %v25572_v26 = vpack.c.bf16 %v9833_v51, %v9832_v5  ;;  %v22478_v62 = vld [vmem:[%s27306_s1 + $0x618] sm:$0xff] }
 0xd1a   :  { %19761 = vmatmul.mubr.msk.f32.gmra.mrb[142].mxu0 %vm83_vm0, %v25281_v63 }
 0xd1b   :  { %19771 = vmatprep.mubr.msk.f32.mxu0 %vm3673_vm5, %v22451_v22  ;;  %v22540_v22 = vmov 1966171168  }
 0xde9   :  { %v19759_v29 = vpop.f32.mrb[140].mxu0 }
 0xdea   :  { %v8569_v14 = vpop.f32.mrb[141].mxu0 }
 0xdeb   :  { %v21213_v18 = vpack.c.bf16 %v19759_v29, %v8569_v14  ;;  %v9925_v29 = vunpack.c.l.s4 %v22540_v22 }
 0xded   :  { %v19762_v28 = vpop.f32.mrb[142].mxu0  ;;  %21214 = vmatprep.subr.bf16.mxu0 %v21213_v18 }
 0xdee   :  { %v8579_v3 = vpop.f32.mrb[143].mxu0  ;;  %21216 = vmatpush3.bf16.msra.mxu0 %v21213_v18 }
 0xdef   :  { %v21217_v60 = vpack.c.bf16 %v19762_v28, %v8579_v3  ;;  %v9848_v3 = vsub.s32 3, %v23587_v33 }
 0xdf1   :  { %21218 = vmatprep.subr.bf16.mxu0 %v21217_v60 }
 0xdf2   :  { %21220 = vmatpush3.bf16.msra.mxu0 %v21217_v60 }
 0xdf3   :  { %21222 = vmatprep.subr.bf16.mxu0 %v23956_v27 }
 0xdf5   :  { %19772 = vmatmul.mubr.msk.f32.vlgmr.msra.gmra.mrb[136].mxu0 %vm3673_vm5, %v22452_v19 }
 0xdf6   :  { %21224 = vmatpush3.bf16.msra.mxu0 %v23956_v27  ;;  %19774 = vmatprep.mubr.msk.f32.mxu0 %vm3673_vm5, %v22453_v34  ;;  %v22455_v27 = vld [vmem:[%s27306_s1 + $0x560] sm:$0xff]  ;;  %v9926_v34 = vunpack.c.0.s8 %v9925_v29 }
 0xdf9   :  { %19775 = vmatmul.mubr.msk.f32.gmra.mrb[138].mxu0 %vm3673_vm5, %v22454_v16 }
 0xdfa   :  { %19781 = vmatprep.mubr.msk.f32.mxu0 %vm83_vm0, %v25275_v43 }
 0xdfd   :  { %19782 = vmatmul.mubr.msk.f32.vlgmr.msra.gmra.mrb[144].mxu0 %vm83_vm0, %v25273_v61 }
 0xdfe   :  { %19784 = vmatprep.mubr.msk.f32.mxu0 %vm83_vm0, %v25287_v0 }
 0xe01   :  { %19785 = vmatmul.mubr.msk.f32.gmra.mrb[146].mxu0 %vm83_vm0, %v25281_v63  ;;  %v22456_v63 = vld [vmem:[%s27306_s1 + $0x568] sm:$0xff] }
 0xe02   :  { %19795 = vmatprep.mubr.msk.f32.mxu0 %vm3673_vm5, %v22455_v27 }
 0xed0   :  { %v19783_v7 = vpop.f32.mrb[144].mxu0 }
 0xed1   :  { %v8743_v43 = vpop.f32.mrb[145].mxu0 }
 0xed2   :  { %v21225_v57 = vpack.c.bf16 %v19783_v7, %v8743_v43 }
 0xed4   :  { %v19786_v24 = vpop.f32.mrb[146].mxu0  ;;  %21226 = vmatprep.subr.bf16.mxu0 %v21225_v57 }
 0xed5   :  { %v8753_v61 = vpop.f32.mrb[147].mxu0  ;;  %21228 = vmatpush3.bf16.msra.mxu0 %v21225_v57 }
 0xed6   :  { %v21229_v0 = vpack.c.bf16 %v19786_v24, %v8753_v61  ;;  %v25595_v24 = vld [vmem:[%s27306_s1 + $0x800] sm:$0xff] }
 0xed7   :  { %v25598_v61 = vrot.slane %v25595_v24, %v9848_v3 }
 0xed8   :  { %21230 = vmatprep.subr.bf16.mxu0 %v21229_v0 }
 0xed9   :  { %21232 = vmatpush3.bf16.msra.mxu0 %v21229_v0 }
 0xeda   :  { %21238 = vmatprep.subr.bf16.mxu0 %v25359_v42 }
 0xedc   :  { %19796 = vmatmul.mubr.msk.f32.vlgmr.msra.gmra.mrb[136].mxu0 %vm3673_vm5, %v22456_v63 }
 0xedd   :  { %21240 = vmatpush3.bf16.msra.mxu0 %v25359_v42  ;;  %19798 = vmatprep.mubr.msk.f32.mxu0 %vm3673_vm5, %v22457_v9  ;;  %v22459_v42 = vld [vmem:[%s27306_s1 + $0x580] sm:$0xff] }
 0xede   :  { %21242 = vmatprep.subr.bf16.mxu0 %v25361_v45 }
 0xee0   :  { %19799 = vmatmul.mubr.msk.f32.gmra.mrb[138].mxu0 %vm3673_vm5, %v22458_v10 }
 0xee1   :  { %21244 = vmatpush3.bf16.msra.mxu0 %v25361_v45  ;;  %19819 = vmatprep.mubr.msk.f32.mxu0 %vm3673_vm5, %v22459_v42  ;;  %v22461_v45 = vld [vmem:[%s27306_s1 + $0x590] sm:$0xff] }
 0xee2   :  { %21250 = vmatprep.subr.bf16.mxu0 %v25363_v40 }
 0xee4   :  { %19820 = vmatmul.mubr.msk.f32.vlgmr.msra.gmra.mrb[136].mxu0 %vm3673_vm5, %v22460_v47 }
 0xee5   :  { %21252 = vmatpush3.bf16.msra.mxu0 %v25363_v40  ;;  %19822 = vmatprep.mubr.msk.f32.mxu0 %vm3673_vm5, %v22461_v45  ;;  %v22463_v40 = vld [vmem:[%s27306_s1 + $0x5a0] sm:$0xff] }
 0xee6   :  { %21254 = vmatprep.subr.bf16.mxu0 %v25365_v41 }
 0xee8   :  { %19823 = vmatmul.mubr.msk.f32.gmra.mrb[138].mxu0 %vm3673_vm5, %v22462_v12 }
 0xee9   :  { %21256 = vmatpush3.bf16.msra.mxu0 %v25365_v41  ;;  %19843 = vmatprep.mubr.msk.f32.mxu0 %vm3673_vm5, %v22463_v40  ;;  %v22465_v41 = vld [vmem:[%s27306_s1 + $0x5b0] sm:$0xff] }
 0xeea   :  { %21262 = vmatprep.subr.bf16.mxu0 %v25367_v39 }
 0xeec   :  { %19844 = vmatmul.mubr.msk.f32.vlgmr.msra.gmra.mrb[136].mxu0 %vm3673_vm5, %v22464_v37 }
 0xeed   :  { %21264 = vmatpush3.bf16.msra.mxu0 %v25367_v39  ;;  %19846 = vmatprep.mubr.msk.f32.mxu0 %vm3673_vm5, %v22465_v41  ;;  %v22467_v39 = vld [vmem:[%s27306_s1 + $0x5c0] sm:$0xff] }
 0xeee   :  { %21266 = vmatprep.subr.bf16.mxu0 %v25377_v11 }
 0xef0   :  { %19847 = vmatmul.mubr.msk.f32.gmra.mrb[138].mxu0 %vm3673_vm5, %v22466_v36 }
 0xef1   :  { %21268 = vmatpush3.bf16.msra.mxu0 %v25377_v11  ;;  %19867 = vmatprep.mubr.msk.f32.mxu0 %vm3673_vm5, %v22467_v39  ;;  %v22469_v11 = vld [vmem:[%s27306_s1 + $0x5d0] sm:$0xff] }
 0xef2   :  { %21274 = vmatprep.subr.bf16.mxu0 %v25387_v20 }
 0xef4   :  { %19868 = vmatmul.mubr.msk.f32.vlgmr.msra.gmra.mrb[136].mxu0 %vm3673_vm5, %v22468_v31 }
 0xef5   :  { %21276 = vmatpush3.bf16.msra.mxu0 %v25387_v20  ;;  %19870 = vmatprep.mubr.msk.f32.mxu0 %vm3673_vm5, %v22469_v11  ;;  %v22473_v20 = vld [vmem:[%s27306_s1 + $0x5f0] sm:$0xff]  ;;  %v9974_v11 = vsub.s32 4, %v23587_v33 }
 0xef6   :  { %21278 = vmatprep.subr.bf16.mxu0 %v25399_v4 }
 0xef8   :  { %19871 = vmatmul.mubr.msk.f32.gmra.mrb[138].mxu0 %vm3673_vm5, %v22470_v38  ;;  %v25641_v38 = vrot.slane %v25595_v24, %v9974_v11 }
 0xef9   :  { %21280 = vmatpush3.bf16.msra.mxu0 %v25399_v4  ;;  %19891 = vmatprep.mubr.msk.f32.mxu0 %vm3673_vm5, %v22471_v23  ;;  %v25554_v4 = vpack.c.bf16 %v9831_v56, %v9830_v49 }
 0xefa   :  { %21286 = vmatprep.subr.bf16.mxu0 %v25407_v59 }
 0xefc   :  { %19892 = vmatmul.mubr.msk.f32.vlgmr.msra.gmra.mrb[136].mxu0 %vm3673_vm5, %v22472_v25 }
 0xefd   :  { %21288 = vmatpush3.bf16.msra.mxu0 %v25407_v59  ;;  %19894 = vmatprep.mubr.msk.f32.mxu0 %vm3673_vm5, %v22473_v20  ;;  %v22477_v59 = vld [vmem:[%s27306_s1 + $0x610] sm:$0xff] }
 0xefe   :  { %21290 = vmatprep.subr.bf16.mxu0 %v25413_v30 }
 0xf00   :  { %19895 = vmatmul.mubr.msk.f32.gmra.mrb[138].mxu0 %vm3673_vm5, %v22474_v50 }
 0xf01   :  { %21292 = vmatpush3.bf16.msra.mxu0 %v25413_v30  ;;  %19915 = vmatprep.mubr.msk.f32.mxu0 %vm3673_vm5, %v22475_v35  ;;  %v27313_v30 = vmov 0.0  }
 0xf02   :  { %21307 = vmatprep.subr.bf16.mxu0 %v27311_v44 }
 0xf04   :  { %19916 = vmatmul.mubr.msk.f32.vlgmr.msra.gmra.mrb[136].mxu0 %vm3673_vm5, %v22476_v53 }
 0xf05   :  { %21309 = vmatpush3.bf16.msra.mxu0 %v25554_v4  ;;  %19918 = vmatprep.mubr.msk.f32.mxu0 %vm3673_vm5, %v22477_v59 }
 0xf06   :  { %21310 = vmatprep.subr.bf16.mxu0 %v27311_v44 }
 0xf08   :  { %19919 = vmatmul.mubr.msk.f32.gmra.mrb[138].mxu0 %vm3673_vm5, %v22478_v62 }
 0xf09   :  { %21312 = vmatpush3.bf16.msra.mxu0 %v25572_v26  ;;  %19947 = vmatprep.mubr.msk.f32.mxu0 %vm22538_vm7, %v27313_v30 }
 0xf0a   :  { %21319 = vmatprep.subr.bf16.mxu0 %v27311_v44 }
 0xf0c   :  { %19948 = vmatmul.mubr.f32.vlgmr.msra.gmra.mrb[148].mxu0 %v27313_v30 }
 0xf0d   :  { %19969 = vmatprep.mubr.msk.f32.mxu0 %vm22538_vm7, %v27313_v30 }
 0xfd7   :  { %v19917_v14 = vpop.f32.mrb[136].mxu0 }
 0xfd8   :  { %v9722_v18 = vadd.f32 %v19917_v14, %v24216_v8  ;;  %v9698_v28 = vpop.f32.mrb[137].mxu0 }
 0xfd9   :  { %v9721_v60 = vadd.f32 %v9698_v28, %v24216_v8 }
 0xfda   :  { %v9726_v19 = vmax.f32 %v9722_v18, 0.0 }
 0xfdb   :  { %v9725_v16 = vmax.f32 %v9721_v60, 0.0  ;;  %v19920_v27 = vpop.f32.mrb[138].mxu0 }
 0xfdc   :  { %v9724_v7 = vadd.f32 %v19920_v27, %v24216_v8  ;;  %v9708_v43 = vpop.f32.mrb[139].mxu0  ;;  %v9730_v57 = vsel %vm3673_vm5, %v9726_v19, %v24222_v13  ;;  %v25607_v13 = vsub.s32 %v9926_v34, %v23587_v33 }
 0xfdd   :  { %v9723_v0 = vadd.f32 %v9708_v43, %v24216_v8  ;;  %v9729_v63 = vsel %vm3673_vm5, %v9725_v16, %v24212_v6 }
 0xfde   :  { %v9728_v9 = vmax.f32 %v9724_v7, 0.0  ;;  %19933 = vmatprep.mubr.msk.f32.mxu1 %vm5244_vm6, %v9729_v63  ;;  %v25604_v10 = vpack.c.bf16 %v9730_v57, %v9729_v63 }
 0xfdf   :  { %v9727_v42 = vmax.f32 %v9723_v0, 0.0  ;;  %19934 = vmatmul.mubr.msk.f32.vlgmr.msra.gmra.mrb[144].mxu1 %vm5244_vm6, %v9730_v57  ;;  %v9919_v47 = vpop.f32.mrb[148].mxu0 }
 0xfe0   :  { %v25611_v45 = vadd.f32 %v9919_v47, %v25598_v61  ;;  %21315 = vmatpush3.bf16.msra.mxu1 %v24233_v46  ;;  %21321 = vmatpush3.bf16.msra.mxu0 %v25604_v10  ;;  %v9732_v6 = vsel %vm3673_vm5, %v9728_v9, %v24230_v58  ;;  %v19949_v8 = vpop.f32.mrb[149].mxu0 }
 0xfe1   :  { %v9731_v12 = vsel %vm3673_vm5, %v9727_v42, %v24218_v17  ;;  %21316 = vmatprep.subr.bf16.mxu1 %v27311_v44  ;;  %21322 = vmatprep.subr.bf16.mxu0 %v27311_v44 }
 0xfe2   :  { %v9930_v40 = vrot.slane %v25611_v45, %v25607_v13  ;;  %19936 = vmatprep.mubr.msk.f32.mxu1 %vm5244_vm6, %v9731_v12  ;;  %v25624_v37 = vpack.c.bf16 %v9732_v6, %v9731_v12 }
 0xfe3   :  { %19937 = vmatmul.mubr.msk.f32.gmra.mrb[146].mxu1 %vm5244_vm6, %v9732_v6 }
 0xfe4   :  { %v9938_v41 = vrot.slane %v9930_v40, %v25607_v13  ;;  %21318 = vmatpush3.bf16.msra.mxu1 %v24243_v15  ;;  %21324 = vmatpush3.bf16.msra.mxu0 %v25624_v37  ;;  %v9931_v22 = vcombine.high %v9930_v40, %v9930_v40 }
 0xfe5   :  { %19958 = vmatprep.mubr.msk.f32.mxu1 %vm22538_vm7, %v27313_v30  ;;  %21325 = vmatprep.subr.bf16.mxu1 %v27311_v44 }
 0xfe6   :  { %v9949_v17 = vrot.slane %v9938_v41, %v23590_v54  ;;  %21335 = vmatprep.subr.bf16.mxu0 %v27311_v44  ;;  %v9945_v29 = vrot.slane %v9931_v22, %v25607_v13 }
 0xfe8   :  { %v9957_v58 = vadd.f32 %v24394_v52, %v9949_v17  ;;  %v9956_v36 = vadd.f32 %v9949_v17, %v24396_v1  ;;  %v9958_v39 = vadd.f32 %v9949_v17, %v24400_v2  ;;  %v9959_v31 = vadd.f32 %v24398_v48, %v9949_v17 }
 0xfe9   :  { %v9953_v14 = vrot.slane %v9945_v29, %v23590_v54 }
 0xfea   :  { %21915 = vtanh.f32 %v9957_v58  ;;  %v25674_v58 = vand.u32 127, %v3075_v32 }
 0xfeb   :  { %21917 = vtanh.f32 %v9956_v36 }
 0xfec   :  { %21919 = vtanh.f32 %v9958_v39  ;;  %27320 = vst [vmem:[#allocation11_spill] sm:$0xff] %v25674_v58  ;;  %v10020_v39 = vadd.s32 4294967288, %v25674_v58 }
 0xfed   :  { %21921 = vtanh.f32 %v9959_v31  ;;  %v10027_v31 = vadd.s32 4294967280, %v25674_v58 }
 0xff4   :  { %v21916_v23 = vpop.eup %21915 }
 0xff5   :  { %v21918_v25 = vpop.eup %21917  ;;  %v9977_v20 = vmul.f32 %v21916_v23, %v25641_v38  ;;  %v10034_v23 = vadd.s32 4294967272, %v25674_v58 }
 0xff6   :  { %v21920_v49 = vpop.eup %21919  ;;  %v9976_v56 = vmul.f32 %v21918_v25, %v25641_v38 }
 0xff7   :  { %v9987_v50 = vsel %vm3673_vm5, %v9977_v20, 0.0  ;;  %v9978_v35 = vmul.f32 %v21920_v49, %v25641_v38  ;;  %v21922_v5 = vpop.eup %21921  ;;  %v25680_v20 = vsub.s32 %v10020_v39, %v23587_v33  ;;  %v25684_v49 = vsub.s32 %v25674_v58, %v23587_v33 }
 0xff8   :  { %9988 = vadd.xlane.f32.xlu1 %v9987_v50  ;;  %v9984_v51 = vsel %vm3673_vm5, %v9976_v56, 0.0  ;;  %v9979_v59 = vmul.f32 %v21922_v5, %v25641_v38  ;;  %v25687_v56 = vsub.s32 %v10027_v31, %v23587_v33  ;;  %v25690_v32 = vsub.s32 %v10034_v23, %v23587_v33 }
 0xff9   :  { %9985 = vadd.xlane.f32.xlu0 %v9984_v51  ;;  %v9990_v53 = vsel %vm3673_vm5, %v9978_v35, 0.0 }
 0xffa   :  { %v9993_v62 = vsel %vm3673_vm5, %v9979_v59, 0.0 }
 0xffc   :  { %9991 = vadd.xlane.f32.xlu1 %v9990_v53 }
0x1000   :  { %9994 = vadd.xlane.f32.xlu1 %v9993_v62 }
0x1085   :  { %v9989_v41 = vpop.xlane.xlu1 %9988 }
0x1086   :  { %v9986_v17 = vpop.xlane.xlu0 %9985  ;;  %v10024_v5 = vrot.slane %v9989_v41, %v25680_v20 }
0x1087   :  { %v10019_v51 = vrot.slane %v9986_v17, %v25684_v49 }
0x1089   :  { %v9992_v11 = vpop.xlane.xlu1 %9991 }
0x108a   :  { %v10031_v59 = vrot.slane %v9992_v11, %v25687_v56 }
0x108d   :  { %v9995_v50 = vpop.xlane.xlu1 %9994 }
0x108e   :  { %v10038_v22 = vrot.slane %v9995_v50, %v25690_v32 }
0x10b2   :  { %v25653_v18 = vpop.f32.mrb[144].mxu1 }
0x10b3   :  { %v25655_v28 = vpop.f32.mrb[145].mxu1  ;;  %v9961_v3 = vadd.f32 %v25653_v18, %v9953_v14 }
0x10b4   :  { %v9960_v60 = vadd.f32 %v9953_v14, %v25655_v28 }
0x10b5   :  { %21923 = vtanh.f32 %v9961_v3  ;;  %v10026_v3 = vsel %vm10025_vm8, %v10024_v5, %v10019_v51 }
0x10b6   :  { %v25659_v19 = vpop.f32.mrb[146].mxu1  ;;  %21925 = vtanh.f32 %v9960_v60 }
0x10b7   :  { %v25661_v34 = vpop.f32.mrb[147].mxu1  ;;  %v9963_v16 = vadd.f32 %v25659_v19, %v9953_v14 }
0x10b8   :  { %v9962_v27 = vadd.f32 %v9953_v14, %v25661_v34 }
0x10ba   :  { %21927 = vtanh.f32 %v9962_v27  ;;  %v10033_v27 = vsel %vm10032_vm9, %v10031_v59, %v10026_v3 }
0x10bb   :  { %21929 = vtanh.f32 %v9963_v16 }
0x10bf   :  { %v21924_v7 = vpop.eup %21923 }
0x10c0   :  { %v21926_v43 = vpop.eup %21925  ;;  %v9981_v57 = vmul.f32 %v21924_v7, %v25641_v38 }
0x10c1   :  { %v9980_v63 = vmul.f32 %v21926_v43, %v25641_v38  ;;  %v10040_v43 = vsel %vm10039_vm10, %v10038_v22, %v10033_v27 }
0x10c2   :  { %v9999_v0 = vsel %vm3673_vm5, %v9981_v57, 0.0 }
0x10c3   :  { %10000 = vadd.xlane.f32.xlu0 %v9999_v0  ;;  %v9996_v42 = vsel %vm3673_vm5, %v9980_v63, 0.0 }
0x10c4   :  { %v21928_v9 = vpop.eup %21927 }
0x10c5   :  { %v9982_v47 = vmul.f32 %v21928_v9, %v25641_v38  ;;  %v21930_v6 = vpop.eup %21929  ;;  %v22541_v9 = vmov 0  }
0x10c6   :  { %v9983_v12 = vmul.f32 %v21930_v6, %v25641_v38  ;;  %21914 = vset.pattern.permute.xlu1 %v22541_v9  ;;  %21913 = vset.pattern.permute.xlu0 %v22541_v9 }
0x10c7   :  { %9997 = vadd.xlane.f32.xlu0 %v9996_v42  ;;  %v10002_v8 = vsel %vm3673_vm5, %v9982_v47, 0.0 }
0x10c8   :  { %v10005_v40 = vsel %vm3673_vm5, %v9983_v12, 0.0 }
0x10cb   :  { %10003 = vadd.xlane.f32.xlu0 %v10002_v8 }
0x10cf   :  { %10006 = vadd.xlane.f32.xlu0 %v10005_v40 }
0x1150   :  { %v10001_v36 = vpop.xlane.xlu0 %10000 }
0x1151   :  { %v10048_v29 = vrot.slane %v10001_v36, %v25680_v20 }
0x1154   :  { %v9998_v25 = vpop.xlane.xlu0 %9997 }
0x1155   :  { %v10044_v53 = vrot.slane %v9998_v25, %v25684_v49 }
0x1157   :  { %v10049_v60 = vsel %vm10025_vm8, %v10048_v29, %v10044_v53 }
0x1158   :  { %v10004_v35 = vpop.xlane.xlu0 %10003 }
0x1159   :  { %v10053_v62 = vrot.slane %v10004_v35, %v25687_v56 }
0x115b   :  { %v10054_v7 = vsel %vm10032_vm9, %v10053_v62, %v10049_v60 }
0x115c   :  { %v10007_v14 = vpop.xlane.xlu0 %10006 }
0x115d   :  { %v10058_v16 = vrot.slane %v10007_v14, %v25690_v32 }
0x115f   :  { %v10059_v57 = vsel %vm10039_vm10, %v10058_v16, %v10054_v7 }
0x1160   :  { %v10061_v0 = vsel %vm10060_vm11, %v10059_v57, %v10040_v43 }
0x1161   :  { %v10064_v63 = vsel %vm10063_vm12, %v10061_v0, -inf }
0x1162   :  { %10065 = vmax.xlane.f32.xlu1 %v10064_v63 }
0x11ef   :  { %v10066_v42 = vpop.xlane.xlu1 %10065 }
0x11f0   :  { %v10071_v47 = vrot.slane %v10066_v42, %v23590_v54  ;;  %v10075_v6 = vrot.slane %v10066_v42, %v24210_v21 }
0x11f2   :  { %v10078_v8 = vsub.f32 %v9986_v17, %v10071_v47  ;;  %v10079_v12 = vsub.f32 %v9989_v41, %v10071_v47  ;;  %v10082_v40 = vsub.f32 %v9998_v25, %v10075_v6  ;;  %v10083_v23 = vsub.f32 %v10001_v36, %v10075_v6 }
0x11f3   :  { %v10080_v51 = vsub.f32 %v9992_v11, %v10071_v47  ;;  %v10084_v59 = vsub.f32 %v10004_v35, %v10075_v6  ;;  %v10081_v41 = vsub.f32 %v9995_v50, %v10071_v47  ;;  %v10085_v25 = vsub.f32 %v10007_v14, %v10075_v6 }
0x11f4   :  { %v10086_v39 = vmul.f32 1.442695, %v10078_v8  ;;  %v10088_v31 = vmul.f32 1.442695, %v10079_v12  ;;  %v10094_v5 = vmul.f32 1.442695, %v10082_v40 }
0x11f5   :  { %v10096_v53 = vmul.f32 1.442695, %v10083_v23  ;;  %v10090_v62 = vmul.f32 1.442695, %v10080_v51  ;;  %v10098_v17 = vmul.f32 1.442695, %v10084_v59 }
0x11f6   :  { %21931 = vpow2.f32 %v10086_v39  ;;  %v10092_v11 = vmul.f32 1.442695, %v10081_v41  ;;  %v10100_v35 = vmul.f32 1.442695, %v10085_v25 }
0x11f7   :  { %21933 = vpow2.f32 %v10088_v31 }
0x11f8   :  { %21935 = vpow2.f32 %v10094_v5 }
0x11f9   :  { %21937 = vpow2.f32 %v10096_v53 }
0x11fa   :  { %21939 = vpow2.f32 %v10090_v62 }
0x11fb   :  { %21941 = vpow2.f32 %v10098_v17 }
0x11fc   :  { %21943 = vpow2.f32 %v10092_v11 }
0x11fd   :  { %21945 = vpow2.f32 %v10100_v35 }
0x1200   :  { %v25710_v22 = vpop.eup %21931 }
0x1201   :  { %v25712_v29 = vpop.eup %21933  ;;  %10111 = vperm.xlu0 %21913, %v25710_v22  }
0x1202   :  { %10114 = vperm.xlu1 %21914, %v25712_v29   ;;  %v21936_v36 = vpop.eup %21935 }
0x1203   :  { %v21938_v3 = vpop.eup %21937 }
0x1204   :  { %v21940_v60 = vpop.eup %21939 }
0x1205   :  { %v21942_v16 = vpop.eup %21941 }
0x1206   :  { %10123 = vperm.xlu1 %21914, %v21936_v36   ;;  %v21944_v27 = vpop.eup %21943 }
0x1207   :  { %v21946_v7 = vpop.eup %21945 }
0x120a   :  { %10126 = vperm.xlu1 %21914, %v21938_v3  }
0x120e   :  { %10117 = vperm.xlu1 %21914, %v21940_v60  }
0x1212   :  { %10129 = vperm.xlu1 %21914, %v21942_v16  }
0x1216   :  { %10120 = vperm.xlu1 %21914, %v21944_v27  }
0x121a   :  { %10132 = vperm.xlu1 %21914, %v21946_v7  }
0x1280   :  { %v10112_v63 = vpop.permute.xlu0 %10111 }
0x1281   :  { %v10115_v50 = vpop.permute.xlu1 %10114  ;;  %v10137_v47 = vrot.slane %v10112_v63, %v25684_v49 }
0x1282   :  { %v10141_v42 = vrot.slane %v10115_v50, %v25680_v20 }
0x1284   :  { %v10142_v23 = vsel %vm10025_vm8, %v10141_v42, %v10137_v47 }
0x1285   :  { %v10124_v43 = vpop.permute.xlu1 %10123 }
0x1286   :  { %v10156_v40 = vrot.slane %v10124_v43, %v25684_v49 }
0x1289   :  { %v10127_v57 = vpop.permute.xlu1 %10126 }
0x128a   :  { %v10160_v6 = vrot.slane %v10127_v57, %v25680_v20 }
0x128c   :  { %v10161_v5 = vsel %vm10025_vm8, %v10160_v6, %v10156_v40 }
0x128d   :  { %v10118_v0 = vpop.permute.xlu1 %10117 }
0x128e   :  { %v10146_v8 = vrot.slane %v10118_v0, %v25687_v56 }
0x1290   :  { %v10147_v53 = vsel %vm10032_vm9, %v10146_v8, %v10142_v23 }
0x1291   :  { %v10130_v14 = vpop.permute.xlu1 %10129 }
0x1292   :  { %v10165_v12 = vrot.slane %v10130_v14, %v25687_v56 }
0x1294   :  { %v10166_v59 = vsel %vm10032_vm9, %v10165_v12, %v10161_v5 }
0x1295   :  { %v10121_v9 = vpop.permute.xlu1 %10120 }
0x1296   :  { %v10151_v39 = vrot.slane %v10121_v9, %v25690_v32 }
0x1298   :  { %v10152_v62 = vsel %vm10039_vm10, %v10151_v39, %v10147_v53  ;;  %v9834_v53 = vld [vmem:[%s27306_s1 + $0x760] sm:$0xff] }
0x1299   :  { %v10133_v31 = vpop.permute.xlu1 %10132 }
0x129a   :  { %v10170_v51 = vrot.slane %v10133_v31, %v25690_v32 }
0x129c   :  { %v10171_v41 = vsel %vm10039_vm10, %v10170_v51, %v10166_v59  ;;  %v9835_v59 = vld [vmem:[%s27306_s1 + $0x768] sm:$0xff] }
0x129d   :  { %v10172_v17 = vsel %vm10060_vm11, %v10171_v41, %v10152_v62 }
0x129e   :  { %v10174_v25 = vsel %vm10063_vm12, %v10172_v17, 0.0 }
0x129f   :  { %10175 = vadd.xlane.f32.xlu1 %v10174_v25 }
0x12b0   :  { %10522 = vrot.lane.b32.xlu1 %v25611_v45, %s22536_s9 }
0x132c   :  { %v10176_v11 = vpop.xlane.xlu1 %10175 }
0x132d   :  { %v10185_v35 = vrot.slane %v10176_v11, %v24210_v21  ;;  %v10181_v50 = vrot.slane %v10176_v11, %v23590_v54  ;;  %v25761_v11 = vpack.c.bf16 %v9835_v59, %v9834_v53 }
0x132f   :  { %21947 = vrcp.f32 %v10185_v35 }
0x1330   :  { %21949 = vrcp.f32 %v10181_v50  ;;  %v10523_v59 = vpop.permute.xlu1 %10522 }
0x1339   :  { %v21948_v43 = vpop.eup %21947 }
0x133a   :  { %v10194_v57 = vmul.f32 %v21948_v43, %v21936_v36  ;;  %v10195_v0 = vmul.f32 %v21948_v43, %v21938_v3  ;;  %v10196_v14 = vmul.f32 %v21948_v43, %v21942_v16  ;;  %v21950_v63 = vpop.eup %21949  ;;  %v10197_v47 = vmul.f32 %v21948_v43, %v21946_v7  ;;  %v9836_v43 = vld [vmem:[%s27306_s1 + $0x770] sm:$0xff] }
0x133b   :  { %v10189_v9 = vmul.f32 %v21950_v63, %v25710_v22  ;;  %v10190_v42 = vmul.f32 %v21950_v63, %v25712_v29  ;;  %v10191_v6 = vmul.f32 %v21950_v63, %v21940_v60  ;;  %v10192_v8 = vmul.f32 %v21950_v63, %v21944_v27  ;;  %v9839_v63 = vld [vmem:[%s27306_s1 + $0x788] sm:$0xf] }
0x133c   :  { %10310 = vperm.xlu0 %21913, %v10194_v57   ;;  %v9837_v57 = vld [vmem:[%s27306_s1 + $0x778] sm:$0xff] }
0x1340   :  { %10313 = vperm.xlu0 %21913, %v10195_v0   ;;  %v9838_v0 = vld [vmem:[%s27306_s1 + $0x780] sm:$0xff] }
0x1344   :  { %10316 = vperm.xlu0 %21913, %v10196_v14   ;;  %v25779_v14 = vpack.c.bf16 %v9837_v57, %v9836_v43  ;;  %v9843_v43 = vld [vmem:[%s27306_s1 + $0x7f8] sm:$0xff] }
0x1348   :  { %10203 = vperm.xlu0 %21913, %v10189_v9   ;;  %v25785_v9 = vpack.c.bf16 %v9839_v63, %v9838_v0 }
0x134c   :  { %10206 = vperm.xlu0 %21913, %v10190_v42  }
0x1350   :  { %10319 = vperm.xlu0 %21913, %v10197_v47  }
0x1354   :  { %10209 = vperm.xlu0 %21913, %v10191_v6  }
0x1358   :  { %10212 = vperm.xlu0 %21913, %v10192_v8  }
0x135c   :  { %10512 = vrot.lane.b32.xlu0 %v25611_v45, %s22542_s6 }
0x13bb   :  { %v10311_v36 = vpop.permute.xlu0 %10310 }
0x13bc   :  { %v10324_v7 = vrot.slane %v10311_v36, %v25684_v49 }
0x13bf   :  { %v10314_v3 = vpop.permute.xlu0 %10313 }
0x13c0   :  { %v10328_v22 = vrot.slane %v10314_v3, %v25680_v20 }
0x13c2   :  { %v10329_v60 = vsel %vm10025_vm8, %v10328_v22, %v10324_v7 }
0x13c3   :  { %v10317_v16 = vpop.permute.xlu0 %10316 }
0x13c4   :  { %v10333_v29 = vrot.slane %v10317_v16, %v25687_v56  ;;  %v10432_v16 = vsub.s32 2, %v23587_v33 }
0x13c6   :  { %v10334_v31 = vsel %vm10032_vm9, %v10333_v29, %v10329_v60  ;;  %v25808_v22 = vrot.slane %v25595_v24, %v10432_v16 }
0x13c7   :  { %v10204_v12 = vpop.permute.xlu0 %10203 }
0x13c8   :  { %v10217_v62 = vrot.slane %v10204_v12, %v25684_v49  ;;  %v10419_v12 = vld [vmem:[%s10418_s23] sm:$0x1]  ;;  %s26961_s23 = sld [smem:[#allocation5 + $0x200]] }
0x13cb   :  { %v10207_v40 = vpop.permute.xlu0 %10206 }
0x13cc   :  { %v10221_v5 = vrot.slane %v10207_v40, %v25680_v20  ;;  %v16809_v40 = vld [vmem:[%s10421_s26] ss:$0 sm:$0xff]  ;;  %s16842_s26 = sld [smem:[#allocation2 + $0x180]] }
0x13cd   :  { %v10429_v29 = vsel %vm27317_vm13, %v10419_v12, %v16809_v40 }
0x13ce   :  { %v10222_v17 = vsel %vm10025_vm8, %v10221_v5, %v10217_v62  ;;  %v10434_v7 = vadd.f32 %v25808_v22, %v10429_v29  ;;  %p13770_p4 = scmp.ge.s32.totalorder %s26961_s23, 0 }
0x13cf   :  { %v10320_v39 = vpop.permute.xlu0 %10319 }
0x13d0   :  { %v10338_v27 = vrot.slane %v10320_v39, %v25690_v32 }
0x13d2   :  { %v10339_v45 = vsel %vm10039_vm10, %v10338_v27, %v10334_v31  ;;  %s12781_s29 = scalar_lea.vmem %s27307_s2, %s16842_s26  ;;  %s16879_s26 = sld [smem:[#allocation2 + $0x301]] }
0x13d3   :  { %19970 = vmatmul.mubr.msk.f32.vlgmr.msra.gmra.mrb[150].mxu0 %vm3673_vm5, %v10339_v45  ;;  %v10210_v23 = vpop.permute.xlu0 %10209 }
0x13d4   :  { %19995 = vmatprep.mubr.msk.f32.mxu0 %vm22538_vm7, %v27313_v30  ;;  %v10226_v51 = vrot.slane %v10210_v23, %v25687_v56 }
0x13d6   :  { %v10227_v35 = vsel %vm10032_vm9, %v10226_v51, %v10222_v17  ;;  %v9840_v17 = vld [vmem:[%s27306_s1 + $0x7e0] sm:$0xff] }
0x13d7   :  { %v10213_v41 = vpop.permute.xlu0 %10212 }
0x13d8   :  { %v10231_v25 = vrot.slane %v10213_v41, %v25690_v32  ;;  %s15133_s7 = scalar_lea.vmem %s27307_s2, %s16879_s26 }
0x13da   :  { %v10232_v50 = vsel %vm10039_vm10, %v10231_v25, %v10227_v35  ;;  %v9841_v25 = vld [vmem:[%s27306_s1 + $0x7e8] sm:$0xff]  ;;  %v9842_v35 = vld [vmem:[%s27306_s1 + $0x7f0] sm:$0xff] }
0x13db   :  { %19959 = vmatmul.mubr.msk.f32.vlgmr.msra.gmra.mrb[148].mxu1 %vm3673_vm5, %v10232_v50  ;;  %v10513_v31 = vpop.permute.xlu0 %10512  ;;  %v25822_v50 = vpack.c.bf16 %v9841_v25, %v9840_v17  ;;  %v25828_v57 = vpack.c.bf16 %v9843_v43, %v9842_v35 }
0x13dc   :  { %21327 = vmatpush3.bf16.msra.mxu1 %v25761_v11  ;;  %19984 = vmatprep.mubr.msk.f32.mxu1 %vm22538_vm7, %v27313_v30 }
0x13dd   :  { %21328 = vmatprep.subr.bf16.mxu1 %v27311_v44  ;;  %21337 = vmatpush3.bf16.msra.mxu0 %v25822_v50 }
0x13de   :  { %21338 = vmatprep.subr.bf16.mxu0 %v27311_v44 }
0x13e0   :  { %21330 = vmatpush3.bf16.msra.mxu1 %v25779_v14 }
0x13e1   :  { %21331 = vmatprep.subr.bf16.mxu1 %v27311_v44  ;;  %21340 = vmatpush3.bf16.msra.mxu0 %v25828_v57 }
0x13e2   :  { %21347 = vmatprep.subr.bf16.mxu0 %v27311_v44 }
0x13e4   :  { %21334 = vmatpush3.bf16.msk.msra.mxu1 %vm22859_vm4, %v25785_v9 }
0x13e5   :  { %21341 = vmatprep.subr.bf16.mxu1 %v27311_v44 }
0x14a6   :  { %v10408_v42 = vpop.f32.mrb[150].mxu0 }
0x14a7   :  { %v19971_v47 = vpop.f32.mrb[151].mxu0  ;;  %v10413_v6 = vrot.slane %v10408_v42, 7 }
0x14ae   :  { %v10301_v8 = vpop.f32.mrb[148].mxu1 }
0x14af   :  { %v10416_v36 = vsel %vm27317_vm13, %v10301_v8, %v10413_v6  ;;  %v19960_v3 = vpop.f32.mrb[149].mxu1 }
0x14b0   :  { %19985 = vmatmul.mubr.msk.f32.vlgmr.msra.gmra.mrb[150].mxu1 %vm5244_vm6, %v10416_v36 }
0x14b1   :  { %21343 = vmatpush3.bf16.msra.mxu1 %v25554_v4  ;;  %20006 = vmatprep.mubr.msk.f32.mxu1 %vm22538_vm7, %v27313_v30 }
0x14b2   :  { %21344 = vmatprep.subr.bf16.mxu1 %v27311_v44 }
0x14b5   :  { %21346 = vmatpush3.bf16.msra.mxu1 %v25572_v26 }
0x14b6   :  { %21353 = vmatprep.subr.bf16.mxu1 %v27311_v44 }
0x1583   :  { %v10507_v39 = vpop.f32.mrb[150].mxu1 }
0x1584   :  { %v10511_v60 = vadd.f32 %v10507_v39, %v10434_v7  ;;  %v19986_v27 = vpop.f32.mrb[151].mxu1 }
0x1586   :  { %v10515_v45 = vadd.f32 %v10513_v31, %v10511_v60 }
0x1588   :  { %v16812_v23 = vmul.f32 -1.442695, %v10515_v45 }
0x158a   :  { %21951 = vpow2.f32 %v16812_v23 }
0x1594   :  { %v21952_v5 = vpop.eup %21951 }
0x1595   :  { %v10519_v51 = vadd.f32 1.0, %v21952_v5 }
0x1597   :  { %21953 = vrcp.f32 %v10519_v51 }
0x15a1   :  { %v21954_v53 = vpop.eup %21953 }
0x15a2   :  { %v10525_v62 = vmul.f32 %v21954_v53, %v10523_v59  ;;  %v10532_v63 = vsub.f32 1.0, %v21954_v53  ;;  %v10538_v47 = vmul.f32 0.0, %v21954_v53 }
0x15a4   :  { %10527 = vrot.lane.b32.xlu0 %v10525_v62, %s22543_s3 }
0x1616   :  { %v10528_v24 = vpop.permute.xlu0 %10527 }
0x1617   :  { %v10530_v41 = vadd.f32 %v10528_v24, %v10511_v60 }
0x1619   :  { %21955 = vtanh.f32 %v10530_v41 }
0x1623   :  { %v21956_v0 = vpop.eup %21955 }
0x1624   :  { %10534 = vrot.lane.b32.xlu0 %v21956_v0, %s22542_s6 }
0x1696   :  { %v10535_v42 = vpop.permute.xlu0 %10534 }
0x1697   :  { %v10537_v6 = vmul.f32 %v10535_v42, %v10532_v63 }
0x1699   :  { %v25834_v8 = vadd.f32 %v10538_v47, %v10537_v6 }
0x169b   :  { %10545 = vrot.lane.b32.xlu0 %v25834_v8, %s22542_s6 }
0x170d   :  { %v10546_v36 = vpop.permute.xlu0 %10545 }
0x170e   :  { %19996 = vmatmul.mubr.msk.f32.vlgmr.msra.gmra.mrb[152].mxu0 %vm3673_vm5, %v10546_v36  ;;  %20007 = vmatmul.mubr.msk.f32.vlgmr.msra.gmra.mrb[152].mxu1 %vm3673_vm5, %v10546_v36 }
0x170f   :  { %21349 = vmatpush3.bf16.msra.mxu0 %v24233_v46  ;;  %21355 = vmatpush3.bf16.msra.mxu1 %v25604_v10 }
0x1710   :  { %21350 = vmatprep.subr.bf16.mxu0 %v27311_v44  ;;  %21356 = vmatprep.subr.bf16.mxu1 %v27311_v44 }
0x1711   :  { %20028 = vmatprep.mubr.msk.f32.mxu1 %vm22538_vm7, %v27313_v30  ;;  %20017 = vmatprep.mubr.msk.f32.mxu0 %vm22538_vm7, %v27313_v30 }
0x1713   :  { %21352 = vmatpush3.bf16.msra.mxu0 %v24243_v15  ;;  %21358 = vmatpush3.bf16.msra.mxu1 %v25624_v37 }
0x1714   :  { %21359 = vmatprep.subr.bf16.mxu0 %v27311_v44  ;;  %21369 = vmatprep.subr.bf16.mxu1 %v27311_v44 }
0x17e1   :  { %v25852_v3 = vpop.f32.mrb[152].mxu0  ;;  %v10729_v16 = vpop.f32.mrb[152].mxu1 }
0x17e2   :  { %v25855_v12 = vadd.f32 %v10729_v16, %v25598_v61  ;;  %v19997_v40 = vpop.f32.mrb[153].mxu0  ;;  %v20008_v29 = vpop.f32.mrb[153].mxu1 }
0x17e4   :  { %v10740_v7 = vrot.slane %v25855_v12, %v25607_v13 }
0x17e6   :  { %v10741_v39 = vcombine.high %v10740_v7, %v10740_v7  ;;  %v10748_v60 = vrot.slane %v10740_v7, %v25607_v13 }
0x17e8   :  { %v10755_v27 = vrot.slane %v10741_v39, %v25607_v13  ;;  %v10759_v31 = vrot.slane %v10748_v60, %v23590_v54 }
0x17ea   :  { %v10763_v45 = vrot.slane %v10755_v27, %v23590_v54  ;;  %v10767_v23 = vadd.f32 %v24394_v52, %v10759_v31  ;;  %v10766_v5 = vadd.f32 %v10759_v31, %v24396_v1  ;;  %v10768_v51 = vadd.f32 %v10759_v31, %v24400_v2 }
0x17eb   :  { %v10769_v41 = vadd.f32 %v24398_v48, %v10759_v31 }
0x17ec   :  { %21957 = vtanh.f32 %v10767_v23  ;;  %v10772_v53 = vadd.f32 %v10763_v45, %v25661_v34  ;;  %v10773_v59 = vadd.f32 %v25659_v19, %v10763_v45  ;;  %v10770_v62 = vadd.f32 %v10763_v45, %v25655_v28 }
0x17ed   :  { %21959 = vtanh.f32 %v10766_v5  ;;  %v10771_v24 = vadd.f32 %v25653_v18, %v10763_v45 }
0x17ee   :  { %21961 = vtanh.f32 %v10768_v51 }
0x17ef   :  { %21963 = vtanh.f32 %v10772_v53 }
0x17f0   :  { %21965 = vtanh.f32 %v10773_v59 }
0x17f1   :  { %21967 = vtanh.f32 %v10770_v62 }
0x17f2   :  { %21969 = vtanh.f32 %v10771_v24 }
0x17f3   :  { %21971 = vtanh.f32 %v10769_v41 }
0x17f6   :  { %v21958_v17 = vpop.eup %21957 }
0x17f7   :  { %v21960_v25 = vpop.eup %21959  ;;  %v10783_v35 = vmul.f32 %v21958_v17, %v25641_v38 }
0x17f8   :  { %v21962_v43 = vpop.eup %21961  ;;  %v10782_v0 = vmul.f32 %v21960_v25, %v25641_v38 }
0x17f9   :  { %v21964_v63 = vpop.eup %21963  ;;  %v10793_v42 = vsel %vm3673_vm5, %v10783_v35, 0.0  ;;  %v10784_v36 = vmul.f32 %v21962_v43, %v25641_v38 }
0x17fa   :  { %v21966_v47 = vpop.eup %21965  ;;  %10794 = vadd.xlane.f32.xlu1 %v10793_v42  ;;  %v10790_v6 = vsel %vm3673_vm5, %v10782_v0, 0.0  ;;  %v10788_v16 = vmul.f32 %v21964_v63, %v25641_v38 }
0x17fb   :  { %v21968_v40 = vpop.eup %21967  ;;  %10791 = vadd.xlane.f32.xlu0 %v10790_v6  ;;  %v10789_v7 = vmul.f32 %v21966_v47, %v25641_v38  ;;  %v10796_v39 = vsel %vm3673_vm5, %v10784_v36, 0.0 }
0x17fc   :  { %v10808_v29 = vsel %vm3673_vm5, %v10788_v16, 0.0  ;;  %v10786_v60 = vmul.f32 %v21968_v40, %v25641_v38  ;;  %v21970_v27 = vpop.eup %21969 }
0x17fd   :  { %v10811_v31 = vsel %vm3673_vm5, %v10789_v7, 0.0  ;;  %v10787_v23 = vmul.f32 %v21970_v27, %v25641_v38  ;;  %v21972_v5 = vpop.eup %21971 }
0x17fe   :  { %10809 = vadd.xlane.f32.xlu1 %v10808_v29  ;;  %v10802_v45 = vsel %vm3673_vm5, %v10786_v60, 0.0  ;;  %v10785_v53 = vmul.f32 %v21972_v5, %v25641_v38 }
0x17ff   :  { %10797 = vadd.xlane.f32.xlu0 %v10796_v39  ;;  %v10805_v51 = vsel %vm3673_vm5, %v10787_v23, 0.0 }
0x1800   :  { %v10799_v59 = vsel %vm3673_vm5, %v10785_v53, 0.0 }
0x1802   :  { %10812 = vadd.xlane.f32.xlu1 %v10811_v31 }
0x1803   :  { %10803 = vadd.xlane.f32.xlu0 %v10802_v45 }
0x1807   :  { %10806 = vadd.xlane.f32.xlu0 %v10805_v51 }
0x180b   :  { %10800 = vadd.xlane.f32.xlu0 %v10799_v59 }
0x1887   :  { %v10795_v24 = vpop.xlane.xlu1 %10794 }
0x1888   :  { %v10792_v62 = vpop.xlane.xlu0 %10791  ;;  %v10829_v43 = vrot.slane %v10795_v24, %v25680_v20 }
0x1889   :  { %v10825_v0 = vrot.slane %v10792_v62, %v25684_v49 }
0x188b   :  { %v10810_v17 = vpop.xlane.xlu1 %10809  ;;  %v10830_v7 = vsel %vm10025_vm8, %v10829_v43, %v10825_v0 }
0x188c   :  { %v10798_v41 = vpop.xlane.xlu0 %10797  ;;  %v10853_v6 = vrot.slane %v10810_v17, %v25687_v56 }
0x188d   :  { %v10834_v47 = vrot.slane %v10798_v41, %v25687_v56 }
0x188f   :  { %v10813_v36 = vpop.xlane.xlu1 %10812  ;;  %v10835_v27 = vsel %vm10032_vm9, %v10834_v47, %v10830_v7 }
0x1890   :  { %v10804_v25 = vpop.xlane.xlu0 %10803  ;;  %v10858_v39 = vrot.slane %v10813_v36, %v25690_v32 }
0x1891   :  { %v10844_v63 = vrot.slane %v10804_v25, %v25684_v49 }
0x1894   :  { %v10807_v35 = vpop.xlane.xlu0 %10806 }
0x1895   :  { %v10848_v42 = vrot.slane %v10807_v35, %v25680_v20 }
0x1897   :  { %v10849_v16 = vsel %vm10025_vm8, %v10848_v42, %v10844_v63 }
0x1898   :  { %v10801_v40 = vpop.xlane.xlu0 %10800  ;;  %v10854_v29 = vsel %vm10032_vm9, %v10853_v6, %v10849_v16 }
0x1899   :  { %v10839_v60 = vrot.slane %v10801_v40, %v25690_v32  ;;  %v10859_v45 = vsel %vm10039_vm10, %v10858_v39, %v10854_v29 }
0x189b   :  { %v10840_v31 = vsel %vm10039_vm10, %v10839_v60, %v10835_v27 }
0x189c   :  { %v10860_v23 = vsel %vm10060_vm11, %v10859_v45, %v10840_v31 }
0x189d   :  { %v10862_v5 = vsel %vm10063_vm12, %v10860_v23, -inf }
0x189e   :  { %10863 = vmax.xlane.f32.xlu0 %v10862_v5 }
0x192b   :  { %v10864_v51 = vpop.xlane.xlu0 %10863 }
0x192c   :  { %v10869_v53 = vrot.slane %v10864_v51, %v23590_v54  ;;  %v10873_v59 = vrot.slane %v10864_v51, %v24210_v21 }
0x192e   :  { %v10876_v43 = vsub.f32 %v10792_v62, %v10869_v53  ;;  %v10877_v0 = vsub.f32 %v10795_v24, %v10869_v53  ;;  %v10880_v63 = vsub.f32 %v10804_v25, %v10873_v59  ;;  %v10882_v42 = vsub.f32 %v10810_v17, %v10873_v59 }
0x192f   :  { %v10881_v16 = vsub.f32 %v10807_v35, %v10873_v59  ;;  %v10883_v29 = vsub.f32 %v10813_v36, %v10873_v59  ;;  %v10878_v60 = vsub.f32 %v10798_v41, %v10869_v53  ;;  %v10879_v45 = vsub.f32 %v10801_v40, %v10869_v53 }
0x1930   :  { %v10884_v6 = vmul.f32 1.442695, %v10876_v43  ;;  %v10886_v47 = vmul.f32 1.442695, %v10877_v0  ;;  %v10892_v7 = vmul.f32 1.442695, %v10880_v63 }
0x1931   :  { %v10896_v39 = vmul.f32 1.442695, %v10882_v42  ;;  %v10894_v27 = vmul.f32 1.442695, %v10881_v16  ;;  %v10898_v31 = vmul.f32 1.442695, %v10883_v29 }
0x1932   :  { %21973 = vpow2.f32 %v10884_v6  ;;  %v10888_v23 = vmul.f32 1.442695, %v10878_v60  ;;  %v10890_v17 = vmul.f32 1.442695, %v10879_v45 }
0x1933   :  { %21975 = vpow2.f32 %v10886_v47 }
0x1934   :  { %21977 = vpow2.f32 %v10892_v7 }
0x1935   :  { %21979 = vpow2.f32 %v10896_v39 }
0x1936   :  { %21981 = vpow2.f32 %v10894_v27 }
0x1937   :  { %21983 = vpow2.f32 %v10898_v31 }
0x1938   :  { %21985 = vpow2.f32 %v10888_v23 }
0x1939   :  { %21987 = vpow2.f32 %v10890_v17 }
0x193c   :  { %v21974_v62 = vpop.eup %21973 }
0x193d   :  { %v21976_v24 = vpop.eup %21975  ;;  %10909 = vperm.xlu1 %21914, %v21974_v62  }
0x193e   :  { %10912 = vperm.xlu0 %21913, %v21976_v24   ;;  %v21978_v25 = vpop.eup %21977 }
0x193f   :  { %v21980_v35 = vpop.eup %21979 }
0x1940   :  { %v21982_v41 = vpop.eup %21981 }
0x1941   :  { %10921 = vperm.xlu1 %21914, %v21978_v25   ;;  %v21984_v36 = vpop.eup %21983 }
0x1942   :  { %10927 = vperm.xlu0 %21913, %v21980_v35   ;;  %v21986_v5 = vpop.eup %21985 }
0x1943   :  { %v21988_v40 = vpop.eup %21987 }
0x1945   :  { %10924 = vperm.xlu1 %21914, %v21982_v41  }
0x1946   :  { %10930 = vperm.xlu0 %21913, %v21984_v36  }
0x1949   :  { %10915 = vperm.xlu1 %21914, %v21986_v5  }
0x194d   :  { %10918 = vperm.xlu1 %21914, %v21988_v40  }
0x19bc   :  { %v10910_v51 = vpop.permute.xlu1 %10909 }
0x19bd   :  { %v10913_v53 = vpop.permute.xlu0 %10912  ;;  %v10935_v16 = vrot.slane %v10910_v51, %v25684_v49 }
0x19be   :  { %v10939_v47 = vrot.slane %v10913_v53, %v25680_v20 }
0x19c0   :  { %v10922_v59 = vpop.permute.xlu1 %10921  ;;  %v10940_v45 = vsel %vm10025_vm8, %v10939_v47, %v10935_v16 }
0x19c1   :  { %v10928_v43 = vpop.permute.xlu0 %10927  ;;  %v10954_v42 = vrot.slane %v10922_v59, %v25684_v49 }
0x19c2   :  { %v10963_v29 = vrot.slane %v10928_v43, %v25687_v56 }
0x19c4   :  { %v10925_v0 = vpop.permute.xlu1 %10924 }
0x19c5   :  { %v10958_v63 = vrot.slane %v10925_v0, %v25680_v20  ;;  %v10931_v39 = vpop.permute.xlu0 %10930 }
0x19c6   :  { %v10968_v23 = vrot.slane %v10931_v39, %v25690_v32 }
0x19c7   :  { %v10959_v7 = vsel %vm10025_vm8, %v10958_v63, %v10954_v42 }
0x19c8   :  { %v10916_v6 = vpop.permute.xlu1 %10915  ;;  %v10964_v31 = vsel %vm10032_vm9, %v10963_v29, %v10959_v7 }
0x19c9   :  { %v10944_v60 = vrot.slane %v10916_v6, %v25687_v56  ;;  %v10969_v59 = vsel %vm10039_vm10, %v10968_v23, %v10964_v31 }
0x19cb   :  { %v10945_v53 = vsel %vm10032_vm9, %v10944_v60, %v10940_v45 }
0x19cc   :  { %v10919_v27 = vpop.permute.xlu1 %10918 }
0x19cd   :  { %v10949_v17 = vrot.slane %v10919_v27, %v25690_v32 }
0x19cf   :  { %v10950_v51 = vsel %vm10039_vm10, %v10949_v17, %v10945_v53 }
0x19d0   :  { %v10970_v43 = vsel %vm10060_vm11, %v10969_v59, %v10950_v51 }
0x19d1   :  { %v10972_v0 = vsel %vm10063_vm12, %v10970_v43, 0.0 }
0x19d2   :  { %10973 = vadd.xlane.f32.xlu1 %v10972_v0 }
0x19e3   :  { %11312 = vrot.lane.b32.xlu1 %v25855_v12, %s22536_s9 }
0x1a5f   :  { %v10974_v63 = vpop.xlane.xlu1 %10973 }
0x1a60   :  { %v10983_v42 = vrot.slane %v10974_v63, %v24210_v21  ;;  %v10979_v6 = vrot.slane %v10974_v63, %v23590_v54 }
0x1a62   :  { %21989 = vrcp.f32 %v10983_v42 }
0x1a63   :  { %21991 = vrcp.f32 %v10979_v6 }
0x1a6c   :  { %v21990_v47 = vpop.eup %21989 }
0x1a6d   :  { %v10992_v16 = vmul.f32 %v21990_v47, %v21978_v25  ;;  %v10993_v7 = vmul.f32 %v21990_v47, %v21982_v41  ;;  %v10994_v29 = vmul.f32 %v21990_v47, %v21980_v35  ;;  %v21992_v39 = vpop.eup %21991  ;;  %v10995_v31 = vmul.f32 %v21990_v47, %v21984_v36 }
0x1a6e   :  { %v10987_v60 = vmul.f32 %v21992_v39, %v21974_v62  ;;  %v10988_v27 = vmul.f32 %v21992_v39, %v21976_v24  ;;  %v10989_v45 = vmul.f32 %v21992_v39, %v21986_v5  ;;  %v10990_v23 = vmul.f32 %v21992_v39, %v21988_v40 }
0x1a6f   :  { %11108 = vperm.xlu0 %21913, %v10992_v16  }
0x1a73   :  { %11111 = vperm.xlu0 %21913, %v10993_v7  }
0x1a77   :  { %11114 = vperm.xlu0 %21913, %v10994_v29  }
0x1a7b   :  { %11001 = vperm.xlu0 %21913, %v10987_v60  }
0x1a7f   :  { %11004 = vperm.xlu0 %21913, %v10988_v27  }
0x1a83   :  { %11117 = vperm.xlu0 %21913, %v10995_v31  }
0x1a87   :  { %11007 = vperm.xlu0 %21913, %v10989_v45  }
0x1a8b   :  { %11010 = vperm.xlu0 %21913, %v10990_v23  }
0x1a8f   :  { %11302 = vrot.lane.b32.xlu0 %v25855_v12, %s22542_s6 }
0x1aee   :  { %v11109_v25 = vpop.permute.xlu0 %11108 }
0x1aef   :  { %v11122_v24 = vrot.slane %v11109_v25, %v25684_v49  ;;  %v11216_v25 = vld [vmem:[%s11215_s14] sm:$0x1]  ;;  %s16898_s14 = sld [smem:[#allocation5 + $0x381]] }
0x1af2   :  { %v11112_v17 = vpop.permute.xlu0 %11111 }
0x1af3   :  { %v11126_v51 = vrot.slane %v11112_v17, %v25680_v20  ;;  %v16820_v17 = vld [vmem:[%s11218_s17] ss:$0 sm:$0xff]  ;;  %s16866_s17 = sld [smem:[#allocation2 + $0x280]] }
0x1af5   :  { %v11127_v5 = vsel %vm10025_vm8, %v11126_v51, %v11122_v24 }
0x1af6   :  { %v11115_v41 = vpop.permute.xlu0 %11114 }
0x1af7   :  { %v11131_v62 = vrot.slane %v11115_v41, %v25687_v56  ;;  %v11226_v41 = vsel %vm27317_vm13, %v11216_v25, %v16820_v17 }
0x1af9   :  { %v11132_v59 = vsel %vm10032_vm9, %v11131_v62, %v11127_v5  ;;  %s14347_s21 = scalar_lea.vmem %s27307_s2, %s16866_s17  ;;  %s26943_s17 = sld [smem:[#allocation5 + $0x101]] }
0x1afa   :  { %v11002_v53 = vpop.permute.xlu0 %11001 }
0x1afb   :  { %v11015_v42 = vrot.slane %v11002_v53, %v25684_v49  ;;  %v11227_v53 = vadd.f32 %v11226_v41, %v25808_v22 }
0x1afe   :  { %v11005_v35 = vpop.permute.xlu0 %11004 }
0x1aff   :  { %v11019_v0 = vrot.slane %v11005_v35, %v25680_v20  ;;  %p12217_p13 = scmp.ge.s32.totalorder %s26943_s17, 0 }
0x1b01   :  { %v11020_v47 = vsel %vm10025_vm8, %v11019_v0, %v11015_v42  ;;  %s26973_s26 = scalar_select %p12217_p13, 1, 0 }
0x1b02   :  { %v11118_v36 = vpop.permute.xlu0 %11117 }
0x1b03   :  { %v11136_v40 = vrot.slane %v11118_v36, %v25690_v32 }
0x1b05   :  { %v11137_v12 = vsel %vm10039_vm10, %v11136_v40, %v11132_v59 }
0x1b06   :  { %20029 = vmatmul.mubr.msk.f32.vlgmr.msra.gmra.mrb[154].mxu1 %vm3673_vm5, %v11137_v12  ;;  %v11008_v43 = vpop.permute.xlu0 %11007 }
0x1b07   :  { %21371 = vmatpush3.bf16.msra.mxu1 %v25822_v50  ;;  %20054 = vmatprep.mubr.msk.f32.mxu1 %vm22538_vm7, %v27313_v30  ;;  %v11024_v63 = vrot.slane %v11008_v43, %v25687_v56  ;;  %v11313_v43 = vpop.permute.xlu1 %11312 }
0x1b08   :  { %21372 = vmatprep.subr.bf16.mxu1 %v27311_v44 }
0x1b09   :  { %v11025_v7 = vsel %vm10032_vm9, %v11024_v63, %v11020_v47 }
0x1b0a   :  { %v11011_v6 = vpop.permute.xlu0 %11010 }
0x1b0b   :  { %v11029_v16 = vrot.slane %v11011_v6, %v25690_v32  ;;  %21374 = vmatpush3.bf16.msra.mxu1 %v25828_v57 }
0x1b0c   :  { %21381 = vmatprep.subr.bf16.mxu1 %v27311_v44 }
0x1b0d   :  { %v11030_v29 = vsel %vm10039_vm10, %v11029_v16, %v11025_v7 }
0x1b0e   :  { %20018 = vmatmul.mubr.msk.f32.vlgmr.msra.gmra.mrb[154].mxu0 %vm3673_vm5, %v11030_v29  ;;  %v11303_v24 = vpop.permute.xlu0 %11302 }
0x1b0f   :  { %21361 = vmatpush3.bf16.msra.mxu0 %v25761_v11  ;;  %20043 = vmatprep.mubr.msk.f32.mxu0 %vm22538_vm7, %v27313_v30 }
0x1b10   :  { %21362 = vmatprep.subr.bf16.mxu0 %v27311_v44 }
0x1b13   :  { %21364 = vmatpush3.bf16.msra.mxu0 %v25779_v14 }
0x1b14   :  { %21365 = vmatprep.subr.bf16.mxu0 %v27311_v44 }
0x1b17   :  { %21368 = vmatpush3.bf16.msk.msra.mxu0 %vm22859_vm4, %v25785_v9 }
0x1b18   :  { %21375 = vmatprep.subr.bf16.mxu0 %v27311_v44 }
0x1bd9   :  { %v11206_v39 = vpop.f32.mrb[154].mxu1 }
0x1bda   :  { %v20030_v60 = vpop.f32.mrb[155].mxu1  ;;  %v11211_v27 = vrot.slane %v11206_v39, 7 }
0x1be1   :  { %v11099_v31 = vpop.f32.mrb[154].mxu0 }
0x1be2   :  { %v11213_v45 = vsel %vm27317_vm13, %v11099_v31, %v11211_v27  ;;  %v20019_v23 = vpop.f32.mrb[155].mxu0 }
0x1be3   :  { %20044 = vmatmul.mubr.msk.f32.vlgmr.msra.gmra.mrb[156].mxu0 %vm5244_vm6, %v11213_v45 }
0x1be4   :  { %21377 = vmatpush3.bf16.msra.mxu0 %v25554_v4  ;;  %20065 = vmatprep.mubr.msk.f32.mxu0 %vm22538_vm7, %v27313_v30 }
0x1be5   :  { %21378 = vmatprep.subr.bf16.mxu0 %v27311_v44 }
0x1be8   :  { %21380 = vmatpush3.bf16.msra.mxu0 %v25572_v26 }
0x1be9   :  { %21387 = vmatprep.subr.bf16.mxu0 %v27311_v44 }
0x1cb6   :  { %v11297_v35 = vpop.f32.mrb[156].mxu0 }
0x1cb7   :  { %v11301_v51 = vadd.f32 %v11297_v35, %v11227_v53  ;;  %v20045_v62 = vpop.f32.mrb[157].mxu0 }
0x1cb9   :  { %v11305_v36 = vadd.f32 %v11303_v24, %v11301_v51 }
0x1cbb   :  { %v16823_v5 = vmul.f32 -1.442695, %v11305_v36 }
0x1cbd   :  { %21993 = vpow2.f32 %v16823_v5 }
0x1cc7   :  { %v21994_v40 = vpop.eup %21993 }
0x1cc8   :  { %v11309_v59 = vadd.f32 1.0, %v21994_v40 }
0x1cca   :  { %21995 = vrcp.f32 %v11309_v59 }
0x1cd4   :  { %v21996_v12 = vpop.eup %21995 }
0x1cd5   :  { %v11315_v0 = vmul.f32 %v21996_v12, %v11313_v43  ;;  %v11322_v47 = vsub.f32 1.0, %v21996_v12  ;;  %v11328_v7 = vmul.f32 %v21996_v12, %v25834_v8 }
0x1cd7   :  { %11317 = vrot.lane.b32.xlu0 %v11315_v0, %s22543_s3 }
0x1d49   :  { %v11318_v63 = vpop.permute.xlu0 %11317 }
0x1d4a   :  { %v11320_v42 = vadd.f32 %v11318_v63, %v11301_v51 }
0x1d4c   :  { %21997 = vtanh.f32 %v11320_v42 }
0x1d56   :  { %v21998_v6 = vpop.eup %21997 }
0x1d57   :  { %11324 = vrot.lane.b32.xlu0 %v21998_v6, %s22542_s6 }
0x1dc9   :  { %v11325_v16 = vpop.permute.xlu0 %11324 }
0x1dca   :  { %v11327_v29 = vmul.f32 %v11325_v16, %v11322_v47 }
0x1dcc   :  { %v25978_v39 = vadd.f32 %v11328_v7, %v11327_v29 }
0x1dce   :  { %11331 = vrot.lane.b32.xlu0 %v25978_v39, %s22542_s6 }
0x1e40   :  { %v11332_v60 = vpop.permute.xlu0 %11331 }
0x1e41   :  { %20055 = vmatmul.mubr.msk.f32.vlgmr.msra.gmra.mrb[156].mxu1 %vm3673_vm5, %v11332_v60  ;;  %20066 = vmatmul.mubr.msk.f32.vlgmr.msra.gmra.mrb[158].mxu0 %vm3673_vm5, %v11332_v60 }
0x1e42   :  { %21383 = vmatpush3.bf16.msra.mxu1 %v24233_v46  ;;  %21389 = vmatpush3.bf16.msra.mxu0 %v25604_v10 }
0x1e43   :  { %21384 = vmatprep.subr.bf16.mxu1 %v27311_v44  ;;  %21390 = vmatprep.subr.bf16.mxu0 %v27311_v44 }
0x1e44   :  { %20087 = vmatprep.mubr.msk.f32.mxu0 %vm22538_vm7, %v27313_v30  ;;  %20076 = vmatprep.mubr.msk.f32.mxu1 %vm22538_vm7, %v27313_v30 }
0x1e46   :  { %21386 = vmatpush3.bf16.msra.mxu1 %v24243_v15  ;;  %21392 = vmatpush3.bf16.msra.mxu0 %v25624_v37 }
0x1e47   :  { %21393 = vmatprep.subr.bf16.mxu1 %v27311_v44  ;;  %21403 = vmatprep.subr.bf16.mxu0 %v27311_v44 }
0x1f14   :  { %v25996_v8 = vpop.f32.mrb[156].mxu1  ;;  %v11512_v27 = vpop.f32.mrb[158].mxu0 }
0x1f15   :  { %v25999_v31 = vadd.f32 %v11512_v27, %v25598_v61  ;;  %v20056_v45 = vpop.f32.mrb[157].mxu1  ;;  %v20067_v23 = vpop.f32.mrb[159].mxu0 }
0x1f17   :  { %v11523_v25 = vrot.slane %v25999_v31, %v25607_v13 }
0x1f19   :  { %v11524_v17 = vcombine.high %v11523_v25, %v11523_v25  ;;  %v11531_v41 = vrot.slane %v11523_v25, %v25607_v13 }
0x1f1b   :  { %v11538_v53 = vrot.slane %v11524_v17, %v25607_v13  ;;  %v11542_v35 = vrot.slane %v11531_v41, %v23590_v54 }
0x1f1d   :  { %v11546_v51 = vrot.slane %v11538_v53, %v23590_v54  ;;  %v11550_v62 = vadd.f32 %v24394_v52, %v11542_v35  ;;  %v11549_v24 = vadd.f32 %v11542_v35, %v24396_v1  ;;  %v11551_v36 = vadd.f32 %v11542_v35, %v24400_v2 }
0x1f1e   :  { %v11552_v43 = vadd.f32 %v24398_v48, %v11542_v35 }
0x1f1f   :  { %21999 = vtanh.f32 %v11550_v62  ;;  %v11555_v5 = vadd.f32 %v11546_v51, %v25661_v34  ;;  %v11556_v40 = vadd.f32 %v25659_v19, %v11546_v51  ;;  %v11553_v59 = vadd.f32 %v11546_v51, %v25655_v28 }
0x1f20   :  { %22001 = vtanh.f32 %v11549_v24  ;;  %v11554_v12 = vadd.f32 %v25653_v18, %v11546_v51 }
0x1f21   :  { %22003 = vtanh.f32 %v11551_v36 }
0x1f22   :  { %22005 = vtanh.f32 %v11555_v5 }
0x1f23   :  { %22007 = vtanh.f32 %v11556_v40 }
0x1f24   :  { %22009 = vtanh.f32 %v11553_v59 }
0x1f25   :  { %22011 = vtanh.f32 %v11554_v12 }
0x1f26   :  { %22013 = vtanh.f32 %v11552_v43 }
0x1f29   :  { %v22000_v0 = vpop.eup %21999 }
0x1f2a   :  { %v22002_v63 = vpop.eup %22001  ;;  %v11566_v42 = vmul.f32 %v22000_v0, %v25641_v38 }
0x1f2b   :  { %v22004_v6 = vpop.eup %22003  ;;  %v11565_v47 = vmul.f32 %v22002_v63, %v25641_v38 }
0x1f2c   :  { %v22006_v16 = vpop.eup %22005  ;;  %v11576_v7 = vsel %vm3673_vm5, %v11566_v42, 0.0  ;;  %v11567_v27 = vmul.f32 %v22004_v6, %v25641_v38 }
0x1f2d   :  { %v22008_v29 = vpop.eup %22007  ;;  %11577 = vadd.xlane.f32.xlu1 %v11576_v7  ;;  %v11573_v60 = vsel %vm3673_vm5, %v11565_v47, 0.0  ;;  %v11571_v45 = vmul.f32 %v22006_v16, %v25641_v38 }
0x1f2e   :  { %v22010_v23 = vpop.eup %22009  ;;  %11574 = vadd.xlane.f32.xlu0 %v11573_v60  ;;  %v11572_v17 = vmul.f32 %v22008_v29, %v25641_v38  ;;  %v11579_v41 = vsel %vm3673_vm5, %v11567_v27, 0.0 }
0x1f2f   :  { %v11591_v25 = vsel %vm3673_vm5, %v11571_v45, 0.0  ;;  %v11569_v53 = vmul.f32 %v22010_v23, %v25641_v38  ;;  %v22012_v35 = vpop.eup %22011 }
0x1f30   :  { %v11594_v51 = vsel %vm3673_vm5, %v11572_v17, 0.0  ;;  %v11570_v24 = vmul.f32 %v22012_v35, %v25641_v38  ;;  %v22014_v36 = vpop.eup %22013 }
0x1f31   :  { %11592 = vadd.xlane.f32.xlu1 %v11591_v25  ;;  %v11585_v62 = vsel %vm3673_vm5, %v11569_v53, 0.0  ;;  %v11568_v40 = vmul.f32 %v22014_v36, %v25641_v38 }
0x1f32   :  { %11580 = vadd.xlane.f32.xlu0 %v11579_v41  ;;  %v11588_v5 = vsel %vm3673_vm5, %v11570_v24, 0.0 }
0x1f33   :  { %v11582_v59 = vsel %vm3673_vm5, %v11568_v40, 0.0 }
0x1f35   :  { %11595 = vadd.xlane.f32.xlu1 %v11594_v51 }
0x1f36   :  { %11586 = vadd.xlane.f32.xlu0 %v11585_v62 }
0x1f3a   :  { %11589 = vadd.xlane.f32.xlu0 %v11588_v5 }
0x1f3e   :  { %11583 = vadd.xlane.f32.xlu0 %v11582_v59 }
0x1fba   :  { %v11578_v43 = vpop.xlane.xlu1 %11577 }
0x1fbb   :  { %v11575_v12 = vpop.xlane.xlu0 %11574  ;;  %v11612_v47 = vrot.slane %v11578_v43, %v25680_v20 }
0x1fbc   :  { %v11608_v16 = vrot.slane %v11575_v12, %v25684_v49 }
0x1fbe   :  { %v11593_v63 = vpop.xlane.xlu1 %11592  ;;  %v11613_v41 = vsel %vm10025_vm8, %v11612_v47, %v11608_v16 }
0x1fbf   :  { %v11581_v0 = vpop.xlane.xlu0 %11580  ;;  %v11636_v27 = vrot.slane %v11593_v63, %v25687_v56 }
0x1fc0   :  { %v11617_v60 = vrot.slane %v11581_v0, %v25687_v56 }
0x1fc2   :  { %v11596_v45 = vpop.xlane.xlu1 %11595  ;;  %v11618_v51 = vsel %vm10032_vm9, %v11617_v60, %v11613_v41 }
0x1fc3   :  { %v11587_v42 = vpop.xlane.xlu0 %11586  ;;  %v11641_v53 = vrot.slane %v11596_v45, %v25690_v32 }
0x1fc4   :  { %v11627_v7 = vrot.slane %v11587_v42, %v25684_v49 }
0x1fc7   :  { %v11590_v6 = vpop.xlane.xlu0 %11589 }
0x1fc8   :  { %v11631_v29 = vrot.slane %v11590_v6, %v25680_v20 }
0x1fca   :  { %v11632_v23 = vsel %vm10025_vm8, %v11631_v29, %v11627_v7 }
0x1fcb   :  { %v11584_v25 = vpop.xlane.xlu0 %11583  ;;  %v11637_v17 = vsel %vm10032_vm9, %v11636_v27, %v11632_v23 }
0x1fcc   :  { %v11622_v35 = vrot.slane %v11584_v25, %v25690_v32  ;;  %v11642_v24 = vsel %vm10039_vm10, %v11641_v53, %v11637_v17 }
0x1fce   :  { %v11623_v62 = vsel %vm10039_vm10, %v11622_v35, %v11618_v51 }
0x1fcf   :  { %v11643_v36 = vsel %vm10060_vm11, %v11642_v24, %v11623_v62 }
0x1fd0   :  { %v11645_v5 = vsel %vm10063_vm12, %v11643_v36, -inf }
0x1fd1   :  { %11646 = vmax.xlane.f32.xlu0 %v11645_v5 }
0x205e   :  { %v11647_v40 = vpop.xlane.xlu0 %11646 }
0x205f   :  { %v11652_v59 = vrot.slane %v11647_v40, %v23590_v54  ;;  %v11656_v47 = vrot.slane %v11647_v40, %v24210_v21 }
0x2061   :  { %v11659_v16 = vsub.f32 %v11575_v12, %v11652_v59  ;;  %v11660_v7 = vsub.f32 %v11578_v43, %v11652_v59  ;;  %v11661_v29 = vsub.f32 %v11581_v0, %v11652_v59  ;;  %v11663_v27 = vsub.f32 %v11587_v42, %v11656_v47 }
0x2062   :  { %v11664_v41 = vsub.f32 %v11590_v6, %v11656_v47  ;;  %v11662_v17 = vsub.f32 %v11584_v25, %v11652_v59  ;;  %v11665_v51 = vsub.f32 %v11593_v63, %v11656_v47  ;;  %v11666_v36 = vsub.f32 %v11596_v45, %v11656_v47 }
0x2063   :  { %v11667_v23 = vmul.f32 1.442695, %v11659_v16  ;;  %v11669_v60 = vmul.f32 1.442695, %v11660_v7  ;;  %v11675_v35 = vmul.f32 1.442695, %v11663_v27 }
0x2064   :  { %v11671_v53 = vmul.f32 1.442695, %v11661_v29  ;;  %v11677_v62 = vmul.f32 1.442695, %v11664_v41  ;;  %v11673_v24 = vmul.f32 1.442695, %v11662_v17 }
0x2065   :  { %22015 = vpow2.f32 %v11667_v23  ;;  %v11679_v5 = vmul.f32 1.442695, %v11665_v51  ;;  %v11681_v0 = vmul.f32 1.442695, %v11666_v36 }
0x2066   :  { %22017 = vpow2.f32 %v11669_v60 }
0x2067   :  { %22019 = vpow2.f32 %v11675_v35 }
0x2068   :  { %22021 = vpow2.f32 %v11671_v53 }
0x2069   :  { %22023 = vpow2.f32 %v11677_v62 }
0x206a   :  { %22025 = vpow2.f32 %v11673_v24 }
0x206b   :  { %22027 = vpow2.f32 %v11679_v5 }
0x206c   :  { %22029 = vpow2.f32 %v11681_v0 }
0x206f   :  { %v22016_v12 = vpop.eup %22015 }
0x2070   :  { %v22018_v43 = vpop.eup %22017  ;;  %11692 = vperm.xlu1 %21914, %v22016_v12  }
0x2071   :  { %11695 = vperm.xlu0 %21913, %v22018_v43   ;;  %v22020_v42 = vpop.eup %22019 }
0x2072   :  { %v22022_v6 = vpop.eup %22021 }
0x2073   :  { %v22024_v63 = vpop.eup %22023 }
0x2074   :  { %11704 = vperm.xlu1 %21914, %v22020_v42   ;;  %v22026_v25 = vpop.eup %22025 }
0x2075   :  { %11698 = vperm.xlu0 %21913, %v22022_v6   ;;  %v22028_v40 = vpop.eup %22027 }
0x2076   :  { %v22030_v45 = vpop.eup %22029 }
0x2078   :  { %11707 = vperm.xlu1 %21914, %v22024_v63  }
0x2079   :  { %11701 = vperm.xlu0 %21913, %v22026_v25  }
0x207c   :  { %11710 = vperm.xlu1 %21914, %v22028_v40  }
0x2080   :  { %11713 = vperm.xlu1 %21914, %v22030_v45  }
0x20ef   :  { %v11693_v59 = vpop.permute.xlu1 %11692 }
0x20f0   :  { %v11696_v47 = vpop.permute.xlu0 %11695  ;;  %v11718_v41 = vrot.slane %v11693_v59, %v25684_v49 }
0x20f1   :  { %v11722_v60 = vrot.slane %v11696_v47, %v25680_v20 }
0x20f3   :  { %v11705_v16 = vpop.permute.xlu1 %11704  ;;  %v11723_v36 = vsel %vm10025_vm8, %v11722_v60, %v11718_v41 }
0x20f4   :  { %v11699_v7 = vpop.permute.xlu0 %11698  ;;  %v11737_v51 = vrot.slane %v11705_v16, %v25684_v49 }
0x20f5   :  { %v11727_v17 = vrot.slane %v11699_v7, %v25687_v56 }
0x20f7   :  { %v11708_v29 = vpop.permute.xlu1 %11707  ;;  %v11728_v47 = vsel %vm10032_vm9, %v11727_v17, %v11723_v36 }
0x20f8   :  { %v11702_v27 = vpop.permute.xlu0 %11701  ;;  %v11741_v35 = vrot.slane %v11708_v29, %v25680_v20 }
0x20f9   :  { %v11732_v62 = vrot.slane %v11702_v27, %v25690_v32 }
0x20fa   :  { %v11742_v5 = vsel %vm10025_vm8, %v11741_v35, %v11737_v51 }
0x20fb   :  { %v11711_v23 = vpop.permute.xlu1 %11710  ;;  %v11733_v29 = vsel %vm10039_vm10, %v11732_v62, %v11728_v47 }
0x20fc   :  { %v11746_v53 = vrot.slane %v11711_v23, %v25687_v56 }
0x20fe   :  { %v11747_v59 = vsel %vm10032_vm9, %v11746_v53, %v11742_v5 }
0x20ff   :  { %v11714_v24 = vpop.permute.xlu1 %11713 }
0x2100   :  { %v11751_v0 = vrot.slane %v11714_v24, %v25690_v32 }
0x2102   :  { %v11752_v7 = vsel %vm10039_vm10, %v11751_v0, %v11747_v59 }
0x2103   :  { %v11753_v23 = vsel %vm10060_vm11, %v11752_v7, %v11733_v29 }
0x2104   :  { %v11755_v16 = vsel %vm10063_vm12, %v11753_v23, 0.0 }
0x2105   :  { %11756 = vadd.xlane.f32.xlu0 %v11755_v16 }
0x211b   :  { %12085 = vrot.lane.b32.xlu0 %v25999_v31, %s22542_s6 }
0x2192   :  { %v11757_v27 = vpop.xlane.xlu0 %11756 }
0x2193   :  { %v11766_v60 = vrot.slane %v11757_v27, %v24210_v21  ;;  %v11762_v41 = vrot.slane %v11757_v27, %v23590_v54 }
0x2195   :  { %22031 = vrcp.f32 %v11766_v60 }
0x2196   :  { %22033 = vrcp.f32 %v11762_v41 }
0x219f   :  { %v22032_v35 = vpop.eup %22031 }
0x21a0   :  { %v11775_v17 = vmul.f32 %v22032_v35, %v22020_v42  ;;  %v11776_v53 = vmul.f32 %v22032_v35, %v22024_v63  ;;  %v11777_v51 = vmul.f32 %v22032_v35, %v22028_v40  ;;  %v22034_v62 = vpop.eup %22033  ;;  %v11778_v5 = vmul.f32 %v22032_v35, %v22030_v45 }
0x21a1   :  { %v11770_v24 = vmul.f32 %v22034_v62, %v22016_v12  ;;  %v11771_v36 = vmul.f32 %v22034_v62, %v22018_v43  ;;  %v11772_v0 = vmul.f32 %v22034_v62, %v22022_v6  ;;  %v11773_v47 = vmul.f32 %v22034_v62, %v22026_v25 }
0x21a2   :  { %11891 = vperm.xlu1 %21914, %v11775_v17  }
0x21a6   :  { %11894 = vperm.xlu1 %21914, %v11776_v53  }
0x21aa   :  { %11897 = vperm.xlu1 %21914, %v11777_v51  }
0x21ae   :  { %11784 = vperm.xlu1 %21914, %v11770_v24  }
0x21b2   :  { %11787 = vperm.xlu1 %21914, %v11771_v36  }
0x21b6   :  { %11900 = vperm.xlu1 %21914, %v11778_v5  }
0x21ba   :  { %11790 = vperm.xlu1 %21914, %v11772_v0  }
0x21be   :  { %11793 = vperm.xlu1 %21914, %v11773_v47  }
0x21c2   :  { %12095 = vrot.lane.b32.xlu1 %v25999_v31, %s22536_s9 }
0x2221   :  { %v11892_v42 = vpop.permute.xlu1 %11891 }
0x2222   :  { %v11905_v43 = vrot.slane %v11892_v42, %v25684_v49 }
0x2225   :  { %v11895_v59 = vpop.permute.xlu1 %11894 }
0x2226   :  { %v11909_v7 = vrot.slane %v11895_v59, %v25680_v20  ;;  %v11999_v59 = vld [vmem:[%s11998_s22] sm:$0x1]  ;;  %s26958_s22 = sld [smem:[#allocation5 + $0x181]] }
0x2228   :  { %v11910_v6 = vsel %vm10025_vm8, %v11909_v7, %v11905_v43 }
0x2229   :  { %v11898_v63 = vpop.permute.xlu1 %11897 }
0x222a   :  { %v11914_v12 = vrot.slane %v11898_v63, %v25687_v56  ;;  %v16832_v63 = vld [vmem:[%s12001_s25] ss:$0 sm:$0xff]  ;;  %s16878_s25 = sld [smem:[#allocation2 + $0x300]] }
0x222c   :  { %v11915_v23 = vsel %vm10032_vm9, %v11914_v12, %v11910_v6  ;;  %p13000_p3 = scmp.ge.s32.totalorder %s26958_s22, 0 }
0x222d   :  { %v11785_v29 = vpop.permute.xlu1 %11784 }
0x222e   :  { %v11798_v41 = vrot.slane %v11785_v29, %v25684_v49  ;;  %v12009_v29 = vsel %vm27317_vm13, %v11999_v59, %v16832_v63  ;;  %s27035_s10 = scalar_select %p13000_p3, 1, 0 }
0x2230   :  { %s15130_s28 = scalar_lea.vmem %s27307_s2, %s16878_s25 }
0x2231   :  { %v11788_v40 = vpop.permute.xlu1 %11787 }
0x2232   :  { %v11802_v27 = vrot.slane %v11788_v40, %v25680_v20  ;;  %v12010_v40 = vadd.f32 %v12009_v29, %v25808_v22 }
0x2234   :  { %v11803_v17 = vsel %vm10025_vm8, %v11802_v27, %v11798_v41 }
0x2235   :  { %v11901_v45 = vpop.permute.xlu1 %11900 }
0x2236   :  { %v11919_v25 = vrot.slane %v11901_v45, %v25690_v32  ;;  %v12086_v45 = vpop.permute.xlu0 %12085 }
0x2238   :  { %v11920_v31 = vsel %vm10039_vm10, %v11919_v25, %v11915_v23 }
0x2239   :  { %20088 = vmatmul.mubr.msk.f32.vlgmr.msra.gmra.mrb[160].mxu0 %vm3673_vm5, %v11920_v31  ;;  %v11791_v16 = vpop.permute.xlu1 %11790 }
0x223a   :  { %21405 = vmatpush3.bf16.msra.mxu0 %v25822_v50  ;;  %20113 = vmatprep.mubr.msk.f32.mxu0 %vm22538_vm7, %v27313_v30  ;;  %v11807_v60 = vrot.slane %v11791_v16, %v25687_v56 }
0x223b   :  { %21406 = vmatprep.subr.bf16.mxu0 %v27311_v44 }
0x223c   :  { %v11808_v51 = vsel %vm10032_vm9, %v11807_v60, %v11803_v17 }
0x223d   :  { %v11794_v35 = vpop.permute.xlu1 %11793 }
0x223e   :  { %v11812_v53 = vrot.slane %v11794_v35, %v25690_v32  ;;  %21408 = vmatpush3.bf16.msra.mxu0 %v25828_v57 }
0x223f   :  { %21415 = vmatprep.subr.bf16.mxu0 %v27311_v44 }
0x2240   :  { %v11813_v62 = vsel %vm10039_vm10, %v11812_v53, %v11808_v51 }
0x2241   :  { %20077 = vmatmul.mubr.msk.f32.vlgmr.msra.gmra.mrb[158].mxu1 %vm3673_vm5, %v11813_v62  ;;  %v12096_v27 = vpop.permute.xlu1 %12095 }
0x2242   :  { %21395 = vmatpush3.bf16.msra.mxu1 %v25761_v11  ;;  %20102 = vmatprep.mubr.msk.f32.mxu1 %vm22538_vm7, %v27313_v30 }
0x2243   :  { %21396 = vmatprep.subr.bf16.mxu1 %v27311_v44 }
0x2246   :  { %21398 = vmatpush3.bf16.msra.mxu1 %v25779_v14 }
0x2247   :  { %21399 = vmatprep.subr.bf16.mxu1 %v27311_v44 }
0x224a   :  { %21402 = vmatpush3.bf16.msk.msra.mxu1 %vm22859_vm4, %v25785_v9 }
0x224b   :  { %21409 = vmatprep.subr.bf16.mxu1 %v27311_v44 }
0x230c   :  { %v11989_v24 = vpop.f32.mrb[160].mxu0 }
0x230d   :  { %v20089_v36 = vpop.f32.mrb[161].mxu0  ;;  %v11994_v5 = vrot.slane %v11989_v24, 7 }
0x2314   :  { %v11882_v0 = vpop.f32.mrb[158].mxu1 }
0x2315   :  { %v11996_v47 = vsel %vm27317_vm13, %v11882_v0, %v11994_v5  ;;  %v20078_v42 = vpop.f32.mrb[159].mxu1 }
0x2316   :  { %20103 = vmatmul.mubr.msk.f32.vlgmr.msra.gmra.mrb[160].mxu1 %vm5244_vm6, %v11996_v47 }
0x2317   :  { %21411 = vmatpush3.bf16.msra.mxu1 %v25554_v4  ;;  %20124 = vmatprep.mubr.msk.f32.mxu1 %vm22538_vm7, %v27313_v30 }
0x2318   :  { %21412 = vmatprep.subr.bf16.mxu1 %v27311_v44 }
0x231b   :  { %21414 = vmatpush3.bf16.msra.mxu1 %v25572_v26 }
0x231c   :  { %21421 = vmatprep.subr.bf16.mxu1 %v27311_v44 }
0x23e9   :  { %v12080_v7 = vpop.f32.mrb[160].mxu1 }
0x23ea   :  { %v12084_v12 = vadd.f32 %v12080_v7, %v12010_v40  ;;  %v20104_v43 = vpop.f32.mrb[161].mxu1 }
0x23ec   :  { %v12088_v6 = vadd.f32 %v12086_v45, %v12084_v12 }
0x23ee   :  { %v16835_v25 = vmul.f32 -1.442695, %v12088_v6 }
0x23f0   :  { %22035 = vpow2.f32 %v16835_v25 }
0x23fa   :  { %v22036_v23 = vpop.eup %22035 }
0x23fb   :  { %v12092_v31 = vadd.f32 1.0, %v22036_v23 }
0x23fd   :  { %22037 = vrcp.f32 %v12092_v31 }
0x2407   :  { %v22038_v16 = vpop.eup %22037 }
0x2408   :  { %v12098_v60 = vmul.f32 %v22038_v16, %v12096_v27  ;;  %v12105_v53 = vsub.f32 1.0, %v22038_v16  ;;  %v12111_v62 = vmul.f32 %v22038_v16, %v25978_v39 }
0x240a   :  { %12100 = vrot.lane.b32.xlu1 %v12098_v60, %s22543_s3 }
0x247c   :  { %v12101_v41 = vpop.permute.xlu1 %12100 }
0x247d   :  { %v12103_v35 = vadd.f32 %v12101_v41, %v12084_v12 }
0x247f   :  { %22039 = vtanh.f32 %v12103_v35 }
0x2489   :  { %v22040_v17 = vpop.eup %22039 }
0x248a   :  { %12107 = vrot.lane.b32.xlu1 %v22040_v17, %s22542_s6 }
0x24fc   :  { %v12108_v51 = vpop.permute.xlu1 %12107 }
0x24fd   :  { %v12110_v24 = vmul.f32 %v12108_v51, %v12105_v53 }
0x24ff   :  { %v26122_v36 = vadd.f32 %v12111_v62, %v12110_v24 }
0x2501   :  { %12114 = vrot.lane.b32.xlu1 %v26122_v36, %s22542_s6 }
0x2573   :  { %v12115_v5 = vpop.permute.xlu1 %12114 }
0x2574   :  { %20114 = vmatmul.mubr.msk.f32.vlgmr.msra.gmra.mrb[162].mxu0 %vm3673_vm5, %v12115_v5  ;;  %20125 = vmatmul.mubr.msk.f32.vlgmr.msra.gmra.mrb[162].mxu1 %vm3673_vm5, %v12115_v5 }
0x2575   :  { %21417 = vmatpush3.bf16.msra.mxu0 %v24233_v46  ;;  %21423 = vmatpush3.bf16.msra.mxu1 %v25604_v10 }
0x2576   :  { %21418 = vmatprep.subr.bf16.mxu0 %v27311_v44  ;;  %21424 = vmatprep.subr.bf16.mxu1 %v27311_v44 }
0x2577   :  { %20146 = vmatprep.mubr.msk.f32.mxu1 %vm22538_vm7, %v27313_v30  ;;  %20135 = vmatprep.mubr.msk.f32.mxu0 %vm22538_vm7, %v27313_v30 }
0x2579   :  { %21420 = vmatpush3.bf16.msra.mxu0 %v24243_v15  ;;  %21426 = vmatpush3.bf16.msra.mxu1 %v25624_v37 }
0x257a   :  { %21427 = vmatprep.subr.bf16.mxu0 %v27311_v44  ;;  %21437 = vmatprep.subr.bf16.mxu1 %v27311_v44 }
0x2647   :  { %v26140_v39 = vpop.f32.mrb[162].mxu0  ;;  %v12295_v0 = vpop.f32.mrb[162].mxu1 }
0x2648   :  { %27321 = vst [vmem:[#allocation12_spill] sm:$0xff] %v26140_v39  ;;  %v26143_v47 = vadd.f32 %v12295_v0, %v25598_v61  ;;  %v20115_v42 = vpop.f32.mrb[163].mxu0  ;;  %v20126_v59 = vpop.f32.mrb[163].mxu1 }
0x264a   :  { %v12306_v63 = vrot.slane %v26143_v47, %v25607_v13 }
0x264c   :  { %v12307_v29 = vcombine.high %v12306_v63, %v12306_v63  ;;  %v12314_v40 = vrot.slane %v12306_v63, %v25607_v13 }
0x264e   :  { %v12321_v7 = vrot.slane %v12307_v29, %v25607_v13  ;;  %v12325_v12 = vrot.slane %v12314_v40, %v23590_v54 }
0x2650   :  { %v12329_v43 = vrot.slane %v12321_v7, %v23590_v54  ;;  %v12333_v45 = vadd.f32 %v24394_v52, %v12325_v12  ;;  %v12332_v6 = vadd.f32 %v12325_v12, %v24396_v1  ;;  %v12334_v25 = vadd.f32 %v12325_v12, %v24400_v2 }
0x2651   :  { %v12335_v27 = vadd.f32 %v24398_v48, %v12325_v12 }
0x2652   :  { %22041 = vtanh.f32 %v12333_v45  ;;  %v12337_v23 = vadd.f32 %v25653_v18, %v12329_v43  ;;  %v12338_v31 = vadd.f32 %v12329_v43, %v25661_v34  ;;  %v12336_v16 = vadd.f32 %v12329_v43, %v25655_v28 }
0x2653   :  { %22043 = vtanh.f32 %v12332_v6  ;;  %v12339_v60 = vadd.f32 %v25659_v19, %v12329_v43 }
0x2654   :  { %22045 = vtanh.f32 %v12334_v25 }
0x2655   :  { %22047 = vtanh.f32 %v12337_v23 }
0x2656   :  { %22049 = vtanh.f32 %v12338_v31 }
0x2657   :  { %22051 = vtanh.f32 %v12336_v16 }
0x2658   :  { %22053 = vtanh.f32 %v12335_v27 }
0x2659   :  { %22055 = vtanh.f32 %v12339_v60 }
0x265c   :  { %v22042_v41 = vpop.eup %22041 }
0x265d   :  { %v22044_v35 = vpop.eup %22043  ;;  %v12349_v17 = vmul.f32 %v22042_v41, %v25641_v38 }
0x265e   :  { %v22046_v53 = vpop.eup %22045  ;;  %v12348_v51 = vmul.f32 %v22044_v35, %v25641_v38 }
0x265f   :  { %v22048_v62 = vpop.eup %22047  ;;  %v12359_v24 = vsel %vm3673_vm5, %v12349_v17, 0.0  ;;  %v12350_v5 = vmul.f32 %v22046_v53, %v25641_v38 }
0x2660   :  { %v22050_v0 = vpop.eup %22049  ;;  %12360 = vadd.xlane.f32.xlu0 %v12359_v24  ;;  %v12356_v42 = vsel %vm3673_vm5, %v12348_v51, 0.0  ;;  %v12353_v59 = vmul.f32 %v22048_v62, %v25641_v38 }
0x2661   :  { %v22052_v63 = vpop.eup %22051  ;;  %12357 = vadd.xlane.f32.xlu1 %v12356_v42  ;;  %v12362_v29 = vsel %vm3673_vm5, %v12350_v5, 0.0  ;;  %v12354_v43 = vmul.f32 %v22050_v0, %v25641_v38 }
0x2662   :  { %v12352_v40 = vmul.f32 %v22052_v63, %v25641_v38  ;;  %v22054_v7 = vpop.eup %22053  ;;  %v12371_v12 = vsel %vm3673_vm5, %v12353_v59, 0.0 }
0x2663   :  { %v22056_v45 = vpop.eup %22055  ;;  %v12351_v25 = vmul.f32 %v22054_v7, %v25641_v38  ;;  %v12374_v23 = vsel %vm3673_vm5, %v12354_v43, 0.0 }
0x2664   :  { %12363 = vadd.xlane.f32.xlu0 %v12362_v29  ;;  %v12368_v6 = vsel %vm3673_vm5, %v12352_v40, 0.0  ;;  %v12355_v31 = vmul.f32 %v22056_v45, %v25641_v38 }
0x2665   :  { %12372 = vadd.xlane.f32.xlu1 %v12371_v12  ;;  %v12365_v16 = vsel %vm3673_vm5, %v12351_v25, 0.0 }
0x2666   :  { %v12377_v27 = vsel %vm3673_vm5, %v12355_v31, 0.0 }
0x2668   :  { %12369 = vadd.xlane.f32.xlu0 %v12368_v6 }
0x2669   :  { %12375 = vadd.xlane.f32.xlu1 %v12374_v23 }
0x266c   :  { %12366 = vadd.xlane.f32.xlu0 %v12365_v16 }
0x266d   :  { %12378 = vadd.xlane.f32.xlu1 %v12377_v27 }
0x26ed   :  { %v12361_v60 = vpop.xlane.xlu0 %12360 }
0x26ee   :  { %v12358_v41 = vpop.xlane.xlu1 %12357  ;;  %v12395_v51 = vrot.slane %v12361_v60, %v25680_v20 }
0x26ef   :  { %v12391_v62 = vrot.slane %v12358_v41, %v25684_v49 }
0x26f1   :  { %v12364_v35 = vpop.xlane.xlu0 %12363  ;;  %v12396_v40 = vsel %vm10025_vm8, %v12395_v51, %v12391_v62 }
0x26f2   :  { %v12373_v17 = vpop.xlane.xlu1 %12372  ;;  %v12400_v0 = vrot.slane %v12364_v35, %v25687_v56 }
0x26f3   :  { %v12414_v42 = vrot.slane %v12373_v17, %v25680_v20 }
0x26f4   :  { %v12401_v45 = vsel %vm10032_vm9, %v12400_v0, %v12396_v40 }
0x26f5   :  { %v12370_v53 = vpop.xlane.xlu0 %12369 }
0x26f6   :  { %v12376_v24 = vpop.xlane.xlu1 %12375  ;;  %v12410_v5 = vrot.slane %v12370_v53, %v25684_v49 }
0x26f7   :  { %v12419_v59 = vrot.slane %v12376_v24, %v25687_v56 }
0x26f8   :  { %v12415_v63 = vsel %vm10025_vm8, %v12414_v42, %v12410_v5 }
0x26f9   :  { %v12367_v29 = vpop.xlane.xlu0 %12366  ;;  %v12420_v25 = vsel %vm10032_vm9, %v12419_v59, %v12415_v63 }
0x26fa   :  { %v12379_v7 = vpop.xlane.xlu1 %12378  ;;  %v12405_v12 = vrot.slane %v12367_v29, %v25690_v32 }
0x26fb   :  { %v12424_v43 = vrot.slane %v12379_v7, %v25690_v32 }
0x26fc   :  { %v12406_v6 = vsel %vm10039_vm10, %v12405_v12, %v12401_v45 }
0x26fd   :  { %v12425_v23 = vsel %vm10039_vm10, %v12424_v43, %v12420_v25 }
0x26fe   :  { %v12426_v31 = vsel %vm10060_vm11, %v12425_v23, %v12406_v6 }
0x26ff   :  { %v12428_v16 = vsel %vm10063_vm12, %v12426_v31, -inf }
0x2700   :  { %12429 = vmax.xlane.f32.xlu0 %v12428_v16 }
0x278d   :  { %v12430_v27 = vpop.xlane.xlu0 %12429 }
0x278e   :  { %v12435_v51 = vrot.slane %v12430_v27, %v23590_v54  ;;  %v12439_v62 = vrot.slane %v12430_v27, %v24210_v21 }
0x2790   :  { %v12442_v5 = vsub.f32 %v12358_v41, %v12435_v51  ;;  %v12443_v42 = vsub.f32 %v12361_v60, %v12435_v51  ;;  %v12446_v44 = vsub.f32 %v12370_v53, %v12439_v62  ;;  %v12448_v0 = vsub.f32 %v12376_v24, %v12439_v62 }
0x2791   :  { %v12447_v45 = vsub.f32 %v12373_v17, %v12439_v62  ;;  %v12449_v63 = vsub.f32 %v12379_v7, %v12439_v62  ;;  %v12444_v6 = vsub.f32 %v12364_v35, %v12435_v51  ;;  %v12445_v31 = vsub.f32 %v12367_v29, %v12435_v51 }
0x2792   :  { %v12450_v40 = vmul.f32 1.442695, %v12442_v5  ;;  %v12452_v12 = vmul.f32 1.442695, %v12443_v42  ;;  %v12458_v59 = vmul.f32 1.442695, %v12446_v44 }
0x2793   :  { %v12462_v43 = vmul.f32 1.442695, %v12448_v0  ;;  %v12460_v25 = vmul.f32 1.442695, %v12447_v45  ;;  %v12464_v23 = vmul.f32 1.442695, %v12449_v63 }
0x2794   :  { %22057 = vpow2.f32 %v12450_v40  ;;  %v12454_v16 = vmul.f32 1.442695, %v12444_v6  ;;  %v12456_v53 = vmul.f32 1.442695, %v12445_v31 }
0x2795   :  { %22059 = vpow2.f32 %v12452_v12 }
0x2796   :  { %22061 = vpow2.f32 %v12458_v59 }
0x2797   :  { %22063 = vpow2.f32 %v12462_v43 }
0x2798   :  { %22065 = vpow2.f32 %v12460_v25 }
0x2799   :  { %22067 = vpow2.f32 %v12464_v23 }
0x279a   :  { %22069 = vpow2.f32 %v12454_v16 }
0x279b   :  { %22071 = vpow2.f32 %v12456_v53 }
0x279e   :  { %v22058_v41 = vpop.eup %22057 }
0x279f   :  { %v22060_v60 = vpop.eup %22059  ;;  %12475 = vperm.xlu1 %21914, %v22058_v41  }
0x27a0   :  { %12478 = vperm.xlu0 %21913, %v22060_v60   ;;  %v22062_v17 = vpop.eup %22061 }
0x27a1   :  { %v22064_v44 = vpop.eup %22063 }
0x27a2   :  { %v22066_v35 = vpop.eup %22065 }
0x27a3   :  { %12487 = vperm.xlu1 %21914, %v22062_v17   ;;  %v22068_v24 = vpop.eup %22067 }
0x27a4   :  { %12493 = vperm.xlu0 %21913, %v22064_v44   ;;  %v22070_v7 = vpop.eup %22069 }
0x27a5   :  { %v22072_v29 = vpop.eup %22071 }
0x27a7   :  { %12490 = vperm.xlu1 %21914, %v22066_v35  }
0x27a8   :  { %12496 = vperm.xlu0 %21913, %v22068_v24  }
0x27ab   :  { %12481 = vperm.xlu1 %21914, %v22070_v7  }
0x27af   :  { %12484 = vperm.xlu1 %21914, %v22072_v29  }
0x281e   :  { %v12476_v27 = vpop.permute.xlu1 %12475 }
0x281f   :  { %v12479_v51 = vpop.permute.xlu0 %12478  ;;  %v12501_v59 = vrot.slane %v12476_v27, %v25684_v49 }
0x2820   :  { %v12505_v45 = vrot.slane %v12479_v51, %v25680_v20 }
0x2822   :  { %v12488_v62 = vpop.permute.xlu1 %12487  ;;  %v12506_v16 = vsel %vm10025_vm8, %v12505_v45, %v12501_v59 }
0x2823   :  { %v12494_v5 = vpop.permute.xlu0 %12493  ;;  %v12520_v40 = vrot.slane %v12488_v62, %v25684_v49 }
0x2824   :  { %v12529_v43 = vrot.slane %v12494_v5, %v25687_v56 }
0x2826   :  { %v12491_v42 = vpop.permute.xlu1 %12490 }
0x2827   :  { %v12524_v0 = vrot.slane %v12491_v42, %v25680_v20  ;;  %v12497_v6 = vpop.permute.xlu0 %12496 }
0x2828   :  { %v12534_v53 = vrot.slane %v12497_v6, %v25690_v32 }
0x2829   :  { %v12525_v63 = vsel %vm10025_vm8, %v12524_v0, %v12520_v40 }
0x282a   :  { %v12482_v12 = vpop.permute.xlu1 %12481  ;;  %v12530_v31 = vsel %vm10032_vm9, %v12529_v43, %v12525_v63 }
0x282b   :  { %v12510_v25 = vrot.slane %v12482_v12, %v25687_v56  ;;  %v12535_v42 = vsel %vm10039_vm10, %v12534_v53, %v12530_v31 }
0x282d   :  { %v12511_v51 = vsel %vm10032_vm9, %v12510_v25, %v12506_v16 }
0x282e   :  { %v12485_v23 = vpop.permute.xlu1 %12484 }
0x282f   :  { %v12515_v62 = vrot.slane %v12485_v23, %v25690_v32 }
0x2831   :  { %v12516_v27 = vsel %vm10039_vm10, %v12515_v62, %v12511_v51 }
0x2832   :  { %v12536_v5 = vsel %vm10060_vm11, %v12535_v42, %v12516_v27 }
0x2833   :  { %v12538_v0 = vsel %vm10063_vm12, %v12536_v5, 0.0 }
0x2834   :  { %12539 = vadd.xlane.f32.xlu1 %v12538_v0 }
0x2845   :  { %12878 = vrot.lane.b32.xlu1 %v26143_v47, %s22536_s9 }
0x28c1   :  { %v12540_v40 = vpop.xlane.xlu1 %12539 }
0x28c2   :  { %v12549_v12 = vrot.slane %v12540_v40, %v24210_v21  ;;  %v12545_v45 = vrot.slane %v12540_v40, %v23590_v54 }
0x28c4   :  { %22073 = vrcp.f32 %v12549_v12 }
0x28c5   :  { %22075 = vrcp.f32 %v12545_v45  ;;  %v27322_v45 = vmov 0.0|0.0  }
0x28ce   :  { %v22074_v59 = vpop.eup %22073 }
0x28cf   :  { %v12558_v63 = vmul.f32 %v22074_v59, %v22062_v17  ;;  %v12559_v43 = vmul.f32 %v22074_v59, %v22066_v35  ;;  %v12560_v6 = vmul.f32 %v22074_v59, %v22064_v44  ;;  %v22076_v25 = vpop.eup %22075  ;;  %v12561_v16 = vmul.f32 %v22074_v59, %v22068_v24 }
0x28d0   :  { %v12553_v23 = vmul.f32 %v22076_v25, %v22058_v41  ;;  %v12554_v31 = vmul.f32 %v22076_v25, %v22060_v60  ;;  %v12555_v53 = vmul.f32 %v22076_v25, %v22070_v7  ;;  %v12556_v62 = vmul.f32 %v22076_v25, %v22072_v29 }
0x28d1   :  { %12674 = vperm.xlu0 %21913, %v12558_v63  }
0x28d5   :  { %12677 = vperm.xlu0 %21913, %v12559_v43  }
0x28d9   :  { %12680 = vperm.xlu0 %21913, %v12560_v6  }
0x28dd   :  { %12567 = vperm.xlu0 %21913, %v12553_v23  }
0x28e1   :  { %12570 = vperm.xlu0 %21913, %v12554_v31  }
0x28e5   :  { %12683 = vperm.xlu0 %21913, %v12561_v16  }
0x28e9   :  { %12573 = vperm.xlu0 %21913, %v12555_v53  }
0x28ed   :  { %12576 = vperm.xlu0 %21913, %v12556_v62  }
0x28f1   :  { %12868 = vrot.lane.b32.xlu0 %v26143_v47, %s22542_s6 }
0x2950   :  { %v12675_v17 = vpop.permute.xlu0 %12674 }
0x2951   :  { %v12688_v60 = vrot.slane %v12675_v17, %v25684_v49 }
0x2954   :  { %v12678_v51 = vpop.permute.xlu0 %12677 }
0x2955   :  { %v12692_v42 = vrot.slane %v12678_v51, %v25680_v20 }
0x2957   :  { %v12693_v7 = vsel %vm10025_vm8, %v12692_v42, %v12688_v60 }
0x2958   :  { %v12681_v35 = vpop.permute.xlu0 %12680 }
0x2959   :  { %v12697_v41 = vrot.slane %v12681_v35, %v25687_v56  ;;  %v12782_v35 = vld [vmem:[%s12781_s29] sm:$0x1]  ;;  %s26992_s29 = sld [smem:[#allocation5 + $0x281]] }
0x295b   :  { %v12698_v5 = vsel %vm10032_vm9, %v12697_v41, %v12693_v7 }
0x295c   :  { %v12568_v27 = vpop.permute.xlu0 %12567 }
0x295d   :  { %v12581_v59 = vrot.slane %v12568_v27, %v25684_v49  ;;  %v16844_v27 = vld [vmem:[%s12784_s8] ss:$0 sm:$0xff] }
0x295f   :  { %p14566_p7 = scmp.ge.s32.totalorder %s26992_s29, 0 }
0x2960   :  { %v12571_v44 = vpop.permute.xlu0 %12570 }
0x2961   :  { %v12585_v40 = vrot.slane %v12571_v44, %v25680_v20  ;;  %v12792_v44 = vsel %vm27317_vm13, %v12782_v35, %v16844_v27  ;;  %s27146_s0 = scalar_select %p14566_p7, 1, 0 }
0x2962   :  { %v12793_v42 = vadd.f32 %v12792_v44, %v25808_v22 }
0x2963   :  { %v12586_v43 = vsel %vm10025_vm8, %v12585_v40, %v12581_v59 }
0x2964   :  { %v12684_v24 = vpop.permute.xlu0 %12683 }
0x2965   :  { %v12702_v29 = vrot.slane %v12684_v24, %v25690_v32 }
0x2967   :  { %v12703_v47 = vsel %vm10039_vm10, %v12702_v29, %v12698_v5 }
0x2968   :  { %20147 = vmatmul.mubr.msk.f32.vlgmr.msra.gmra.mrb[164].mxu1 %vm3673_vm5, %v12703_v47  ;;  %v12574_v0 = vpop.permute.xlu0 %12573 }
0x2969   :  { %21439 = vmatpush3.bf16.msra.mxu1 %v25822_v50  ;;  %20172 = vmatprep.mubr.msk.f32.mxu1 %vm22538_vm7, %v27313_v30  ;;  %v12590_v12 = vrot.slane %v12574_v0, %v25687_v56 }
0x296a   :  { %21440 = vmatprep.subr.bf16.mxu1 %v27322_v45 }
0x296b   :  { %v12591_v25 = vsel %vm10032_vm9, %v12590_v12, %v12586_v43  ;;  %v12879_v12 = vpop.permute.xlu1 %12878 }
0x296c   :  { %v12577_v63 = vpop.permute.xlu0 %12576 }
0x296d   :  { %v12595_v6 = vrot.slane %v12577_v63, %v25690_v32  ;;  %21442 = vmatpush3.bf16.msra.mxu1 %v25828_v57 }
0x296e   :  { %21449 = vmatprep.subr.bf16.mxu1 %v27322_v45 }
0x296f   :  { %v12596_v23 = vsel %vm10039_vm10, %v12595_v6, %v12591_v25 }
0x2970   :  { %20136 = vmatmul.mubr.msk.f32.vlgmr.msra.gmra.mrb[164].mxu0 %vm3673_vm5, %v12596_v23  ;;  %v12869_v7 = vpop.permute.xlu0 %12868 }
0x2971   :  { %21429 = vmatpush3.bf16.msra.mxu0 %v25761_v11  ;;  %20161 = vmatprep.mubr.msk.f32.mxu0 %vm22538_vm7, %v27313_v30 }
0x2972   :  { %21430 = vmatprep.subr.bf16.mxu0 %v27322_v45 }
0x2975   :  { %21432 = vmatpush3.bf16.msra.mxu0 %v25779_v14 }
0x2976   :  { %21433 = vmatprep.subr.bf16.mxu0 %v27322_v45 }
0x2979   :  { %21436 = vmatpush3.bf16.msk.msra.mxu0 %vm22859_vm4, %v25785_v9 }
0x297a   :  { %21443 = vmatprep.subr.bf16.mxu0 %v27322_v45 }
0x2a3b   :  { %v12772_v31 = vpop.f32.mrb[164].mxu1 }
0x2a3c   :  { %v20148_v16 = vpop.f32.mrb[165].mxu1  ;;  %v12777_v53 = vrot.slane %v12772_v31, 7 }
0x2a43   :  { %v12665_v62 = vpop.f32.mrb[164].mxu0 }
0x2a44   :  { %v12779_v17 = vsel %vm27317_vm13, %v12665_v62, %v12777_v53  ;;  %v20137_v51 = vpop.f32.mrb[165].mxu0 }
0x2a45   :  { %20162 = vmatmul.mubr.msk.f32.vlgmr.msra.gmra.mrb[166].mxu0 %vm5244_vm6, %v12779_v17 }
0x2a46   :  { %21445 = vmatpush3.bf16.msra.mxu0 %v25554_v4  ;;  %20183 = vmatprep.mubr.msk.f32.mxu0 %vm22538_vm7, %v27313_v30 }
0x2a47   :  { %21446 = vmatprep.subr.bf16.mxu0 %v27322_v45 }
0x2a4a   :  { %21448 = vmatpush3.bf16.msra.mxu0 %v25572_v26 }
0x2a4b   :  { %21455 = vmatprep.subr.bf16.mxu0 %v27322_v45 }
0x2b18   :  { %v12863_v41 = vpop.f32.mrb[166].mxu0 }
0x2b19   :  { %v12867_v60 = vadd.f32 %v12863_v41, %v12793_v42  ;;  %v20163_v24 = vpop.f32.mrb[167].mxu0 }
0x2b1b   :  { %v12871_v29 = vadd.f32 %v12869_v7, %v12867_v60 }
0x2b1d   :  { %v16847_v5 = vmul.f32 -1.442695, %v12871_v29 }
0x2b1f   :  { %22077 = vpow2.f32 %v16847_v5 }
0x2b29   :  { %v22078_v47 = vpop.eup %22077 }
0x2b2a   :  { %v12875_v0 = vadd.f32 1.0, %v22078_v47 }
0x2b2c   :  { %22079 = vrcp.f32 %v12875_v0 }
0x2b36   :  { %v22080_v40 = vpop.eup %22079 }
0x2b37   :  { %v12881_v59 = vmul.f32 %v22080_v40, %v12879_v12  ;;  %v12888_v25 = vsub.f32 1.0, %v22080_v40  ;;  %v12894_v31 = vmul.f32 %v22080_v40, %v26122_v36 }
0x2b39   :  { %12883 = vrot.lane.b32.xlu0 %v12881_v59, %s22543_s3 }
0x2bab   :  { %v12884_v63 = vpop.permute.xlu0 %12883 }
0x2bac   :  { %v12886_v43 = vadd.f32 %v12884_v63, %v12867_v60 }
0x2bae   :  { %22081 = vtanh.f32 %v12886_v43 }
0x2bb8   :  { %v22082_v6 = vpop.eup %22081 }
0x2bb9   :  { %12890 = vrot.lane.b32.xlu0 %v22082_v6, %s22542_s6 }
0x2c2b   :  { %v12891_v23 = vpop.permute.xlu0 %12890 }
0x2c2c   :  { %v12893_v16 = vmul.f32 %v12891_v23, %v12888_v25 }
0x2c2e   :  { %v26266_v53 = vadd.f32 %v12894_v31, %v12893_v16 }
0x2c30   :  { %12897 = vrot.lane.b32.xlu0 %v26266_v53, %s22542_s6 }
0x2ca2   :  { %v12898_v62 = vpop.permute.xlu0 %12897 }
0x2ca3   :  { %20173 = vmatmul.mubr.msk.f32.vlgmr.msra.gmra.mrb[166].mxu1 %vm3673_vm5, %v12898_v62  ;;  %20184 = vmatmul.mubr.msk.f32.vlgmr.msra.gmra.mrb[168].mxu0 %vm3673_vm5, %v12898_v62 }
0x2ca4   :  { %21451 = vmatpush3.bf16.msra.mxu1 %v24233_v46  ;;  %21457 = vmatpush3.bf16.msra.mxu0 %v25604_v10 }
0x2ca5   :  { %21452 = vmatprep.subr.bf16.mxu1 %v27322_v45  ;;  %21458 = vmatprep.subr.bf16.mxu0 %v27322_v45 }
0x2ca6   :  { %20205 = vmatprep.mubr.msk.f32.mxu0 %vm22538_vm7, %v27313_v30  ;;  %20194 = vmatprep.mubr.msk.f32.mxu1 %vm22538_vm7, %v27313_v30 }
0x2ca8   :  { %21454 = vmatpush3.bf16.msra.mxu1 %v24243_v15  ;;  %21460 = vmatpush3.bf16.msra.mxu0 %v25624_v37 }
0x2ca9   :  { %21461 = vmatprep.subr.bf16.mxu1 %v27322_v45  ;;  %21471 = vmatprep.subr.bf16.mxu0 %v27322_v45 }
0x2d76   :  { %v26284_v36 = vpop.f32.mrb[166].mxu1  ;;  %v13078_v17 = vpop.f32.mrb[168].mxu0 }
0x2d77   :  { %27323 = vst [vmem:[#allocation13_spill] sm:$0xff] %v26284_v36  ;;  %v26287_v51 = vadd.f32 %v13078_v17, %v25598_v61  ;;  %v20174_v35 = vpop.f32.mrb[167].mxu1  ;;  %v20185_v27 = vpop.f32.mrb[169].mxu0 }
0x2d79   :  { %v13089_v44 = vrot.slane %v26287_v51, %v25607_v13 }
0x2d7b   :  { %v13090_v42 = vcombine.high %v13089_v44, %v13089_v44  ;;  %v13097_v41 = vrot.slane %v13089_v44, %v25607_v13 }
0x2d7d   :  { %v13104_v60 = vrot.slane %v13090_v42, %v25607_v13  ;;  %v13108_v24 = vrot.slane %v13097_v41, %v23590_v54 }
0x2d7f   :  { %v13112_v7 = vrot.slane %v13104_v60, %v23590_v54  ;;  %v13116_v29 = vadd.f32 %v24394_v52, %v13108_v24  ;;  %v13115_v5 = vadd.f32 %v13108_v24, %v24396_v1  ;;  %v13117_v47 = vadd.f32 %v13108_v24, %v24400_v2 }
0x2d80   :  { %v13118_v63 = vadd.f32 %v24398_v48, %v13108_v24 }
0x2d81   :  { %22083 = vtanh.f32 %v13116_v29  ;;  %v13121_v0 = vadd.f32 %v13112_v7, %v25661_v34  ;;  %v13122_v40 = vadd.f32 %v25659_v19, %v13112_v7  ;;  %v13119_v12 = vadd.f32 %v13112_v7, %v25655_v28 }
0x2d82   :  { %22085 = vtanh.f32 %v13115_v5  ;;  %v13120_v59 = vadd.f32 %v25653_v18, %v13112_v7 }
0x2d83   :  { %22087 = vtanh.f32 %v13117_v47 }
0x2d84   :  { %22089 = vtanh.f32 %v13121_v0 }
0x2d85   :  { %22091 = vtanh.f32 %v13122_v40 }
0x2d86   :  { %22093 = vtanh.f32 %v13119_v12 }
0x2d87   :  { %22095 = vtanh.f32 %v13120_v59 }
0x2d88   :  { %22097 = vtanh.f32 %v13118_v63 }
0x2d8b   :  { %v22084_v43 = vpop.eup %22083 }
0x2d8c   :  { %v22086_v6 = vpop.eup %22085  ;;  %v13132_v25 = vmul.f32 %v22084_v43, %v25641_v38 }
0x2d8d   :  { %v22088_v23 = vpop.eup %22087  ;;  %v13131_v31 = vmul.f32 %v22086_v6, %v25641_v38 }
0x2d8e   :  { %v22090_v16 = vpop.eup %22089  ;;  %v13142_v62 = vsel %vm3673_vm5, %v13132_v25, 0.0  ;;  %v13133_v27 = vmul.f32 %v22088_v23, %v25641_v38 }
0x2d8f   :  { %v22092_v17 = vpop.eup %22091  ;;  %13143 = vadd.xlane.f32.xlu1 %v13142_v62  ;;  %v13139_v35 = vsel %vm3673_vm5, %v13131_v31, 0.0  ;;  %v13137_v44 = vmul.f32 %v22090_v16, %v25641_v38 }
0x2d90   :  { %v22094_v42 = vpop.eup %22093  ;;  %13140 = vadd.xlane.f32.xlu0 %v13139_v35  ;;  %v13138_v60 = vmul.f32 %v22092_v17, %v25641_v38  ;;  %v13145_v24 = vsel %vm3673_vm5, %v13133_v27, 0.0 }
0x2d91   :  { %v13157_v41 = vsel %vm3673_vm5, %v13137_v44, 0.0  ;;  %v13135_v7 = vmul.f32 %v22094_v42, %v25641_v38  ;;  %v22096_v29 = vpop.eup %22095 }
0x2d92   :  { %v13160_v5 = vsel %vm3673_vm5, %v13138_v60, 0.0  ;;  %v13136_v0 = vmul.f32 %v22096_v29, %v25641_v38  ;;  %v22098_v40 = vpop.eup %22097 }
0x2d93   :  { %13158 = vadd.xlane.f32.xlu1 %v13157_v41  ;;  %v13151_v47 = vsel %vm3673_vm5, %v13135_v7, 0.0  ;;  %v13134_v59 = vmul.f32 %v22098_v40, %v25641_v38 }
0x2d94   :  { %13146 = vadd.xlane.f32.xlu0 %v13145_v24  ;;  %v13154_v12 = vsel %vm3673_vm5, %v13136_v0, 0.0 }
0x2d95   :  { %v13148_v63 = vsel %vm3673_vm5, %v13134_v59, 0.0 }
0x2d97   :  { %13161 = vadd.xlane.f32.xlu1 %v13160_v5 }
0x2d98   :  { %13152 = vadd.xlane.f32.xlu0 %v13151_v47 }
0x2d9c   :  { %13155 = vadd.xlane.f32.xlu0 %v13154_v12 }
0x2da0   :  { %13149 = vadd.xlane.f32.xlu0 %v13148_v63 }
0x2e1c   :  { %v13144_v6 = vpop.xlane.xlu1 %13143 }
0x2e1d   :  { %v13141_v43 = vpop.xlane.xlu0 %13140  ;;  %v13178_v62 = vrot.slane %v13144_v6, %v25680_v20 }
0x2e1e   :  { %v13174_v17 = vrot.slane %v13141_v43, %v25684_v49 }
0x2e20   :  { %v13159_v23 = vpop.xlane.xlu1 %13158  ;;  %v13179_v29 = vsel %vm10025_vm8, %v13178_v62, %v13174_v17 }
0x2e21   :  { %v13147_v25 = vpop.xlane.xlu0 %13146  ;;  %v13202_v42 = vrot.slane %v13159_v23, %v25687_v56 }
0x2e22   :  { %v13183_v44 = vrot.slane %v13147_v25, %v25687_v56 }
0x2e24   :  { %v13162_v41 = vpop.xlane.xlu1 %13161  ;;  %v13184_v0 = vsel %vm10032_vm9, %v13183_v44, %v13179_v29 }
0x2e25   :  { %v13153_v31 = vpop.xlane.xlu0 %13152  ;;  %v13207_v5 = vrot.slane %v13162_v41, %v25690_v32 }
0x2e26   :  { %v13193_v35 = vrot.slane %v13153_v31, %v25684_v49 }
0x2e29   :  { %v13156_v16 = vpop.xlane.xlu0 %13155 }
0x2e2a   :  { %v13197_v27 = vrot.slane %v13156_v16, %v25680_v20 }
0x2e2c   :  { %v13198_v60 = vsel %vm10025_vm8, %v13197_v27, %v13193_v35 }
0x2e2d   :  { %v13150_v24 = vpop.xlane.xlu0 %13149  ;;  %v13203_v7 = vsel %vm10032_vm9, %v13202_v42, %v13198_v60 }
0x2e2e   :  { %v13188_v47 = vrot.slane %v13150_v24, %v25690_v32  ;;  %v13208_v12 = vsel %vm10039_vm10, %v13207_v5, %v13203_v7 }
0x2e30   :  { %v13189_v40 = vsel %vm10039_vm10, %v13188_v47, %v13184_v0 }
0x2e31   :  { %v13209_v59 = vsel %vm10060_vm11, %v13208_v12, %v13189_v40 }
0x2e32   :  { %v13211_v63 = vsel %vm10063_vm12, %v13209_v59, -inf }
0x2e33   :  { %13212 = vmax.xlane.f32.xlu0 %v13211_v63 }
0x2ec0   :  { %v13213_v35 = vpop.xlane.xlu0 %13212 }
0x2ec1   :  { %v13218_v27 = vrot.slane %v13213_v35, %v23590_v54  ;;  %v13222_v62 = vrot.slane %v13213_v35, %v24210_v21 }
0x2ec3   :  { %v13225_v17 = vsub.f32 %v13141_v43, %v13218_v27  ;;  %v13226_v42 = vsub.f32 %v13144_v6, %v13218_v27  ;;  %v13227_v60 = vsub.f32 %v13147_v25, %v13218_v27  ;;  %v13229_v30 = vsub.f32 %v13153_v31, %v13222_v62 }
0x2ec4   :  { %v13230_v29 = vsub.f32 %v13156_v16, %v13222_v62  ;;  %v13228_v7 = vsub.f32 %v13150_v24, %v13218_v27  ;;  %v13231_v0 = vsub.f32 %v13159_v23, %v13222_v62  ;;  %v13232_v59 = vsub.f32 %v13162_v41, %v13222_v62 }
0x2ec5   :  { %v13233_v58 = vmul.f32 1.442695, %v13225_v17  ;;  %v13235_v44 = vmul.f32 1.442695, %v13226_v42  ;;  %v13241_v47 = vmul.f32 1.442695, %v13229_v30 }
0x2ec6   :  { %v13237_v5 = vmul.f32 1.442695, %v13227_v60  ;;  %v13243_v40 = vmul.f32 1.442695, %v13230_v29  ;;  %v13239_v12 = vmul.f32 1.442695, %v13228_v7 }
0x2ec7   :  { %22099 = vpow2.f32 %v13233_v58  ;;  %v13245_v63 = vmul.f32 1.442695, %v13231_v0  ;;  %v13247_v25 = vmul.f32 1.442695, %v13232_v59 }
0x2ec8   :  { %22101 = vpow2.f32 %v13235_v44 }
0x2ec9   :  { %22103 = vpow2.f32 %v13241_v47 }
0x2eca   :  { %22105 = vpow2.f32 %v13237_v5 }
0x2ecb   :  { %22107 = vpow2.f32 %v13243_v40 }
0x2ecc   :  { %22109 = vpow2.f32 %v13239_v12 }
0x2ecd   :  { %22111 = vpow2.f32 %v13245_v63 }
0x2ece   :  { %22113 = vpow2.f32 %v13247_v25 }
0x2ed1   :  { %v22100_v43 = vpop.eup %22099 }
0x2ed2   :  { %v22102_v6 = vpop.eup %22101  ;;  %13258 = vperm.xlu1 %21914, %v22100_v43  }
0x2ed3   :  { %13261 = vperm.xlu0 %21913, %v22102_v6   ;;  %v22104_v58 = vpop.eup %22103 }
0x2ed4   :  { %v22106_v30 = vpop.eup %22105 }
0x2ed5   :  { %v22108_v23 = vpop.eup %22107 }
0x2ed6   :  { %13270 = vperm.xlu1 %21914, %v22104_v58   ;;  %v22110_v31 = vpop.eup %22109 }
0x2ed7   :  { %13264 = vperm.xlu0 %21913, %v22106_v30   ;;  %v22112_v16 = vpop.eup %22111 }
0x2ed8   :  { %v22114_v41 = vpop.eup %22113 }
0x2eda   :  { %13273 = vperm.xlu1 %21914, %v22108_v23  }
0x2edb   :  { %13267 = vperm.xlu0 %21913, %v22110_v31  }
0x2ede   :  { %13276 = vperm.xlu1 %21914, %v22112_v16  }
0x2ee2   :  { %13279 = vperm.xlu1 %21914, %v22114_v41  }
0x2f51   :  { %v13259_v24 = vpop.permute.xlu1 %13258 }
0x2f52   :  { %v13262_v35 = vpop.permute.xlu0 %13261  ;;  %v13284_v29 = vrot.slane %v13259_v24, %v25684_v49 }
0x2f53   :  { %v13288_v44 = vrot.slane %v13262_v35, %v25680_v20 }
0x2f55   :  { %v13271_v27 = vpop.permute.xlu1 %13270  ;;  %v13289_v59 = vsel %vm10025_vm8, %v13288_v44, %v13284_v29 }
0x2f56   :  { %v13265_v62 = vpop.permute.xlu0 %13264  ;;  %v13303_v0 = vrot.slane %v13271_v27, %v25684_v49 }
0x2f57   :  { %v13293_v7 = vrot.slane %v13265_v62, %v25687_v56 }
0x2f59   :  { %v13274_v17 = vpop.permute.xlu1 %13273  ;;  %v13294_v35 = vsel %vm10032_vm9, %v13293_v7, %v13289_v59 }
0x2f5a   :  { %v13268_v42 = vpop.permute.xlu0 %13267  ;;  %v13307_v47 = vrot.slane %v13274_v17, %v25680_v20 }
0x2f5b   :  { %v13298_v40 = vrot.slane %v13268_v42, %v25690_v32 }
0x2f5c   :  { %v13308_v63 = vsel %vm10025_vm8, %v13307_v47, %v13303_v0 }
0x2f5d   :  { %v13277_v60 = vpop.permute.xlu1 %13276  ;;  %v13299_v17 = vsel %vm10039_vm10, %v13298_v40, %v13294_v35 }
0x2f5e   :  { %v13312_v5 = vrot.slane %v13277_v60, %v25687_v56 }
0x2f60   :  { %v13313_v24 = vsel %vm10032_vm9, %v13312_v5, %v13308_v63 }
0x2f61   :  { %v13280_v12 = vpop.permute.xlu1 %13279 }
0x2f62   :  { %v13317_v25 = vrot.slane %v13280_v12, %v25690_v32 }
0x2f64   :  { %v13318_v62 = vsel %vm10039_vm10, %v13317_v25, %v13313_v24 }
0x2f65   :  { %v13319_v60 = vsel %vm10060_vm11, %v13318_v62, %v13299_v17 }
0x2f66   :  { %v13321_v27 = vsel %vm10063_vm12, %v13319_v60, 0.0 }
0x2f67   :  { %13322 = vadd.xlane.f32.xlu0 %v13321_v27 }
0x2f7d   :  { %13651 = vrot.lane.b32.xlu0 %v26287_v51, %s22542_s6 }
0x2ff4   :  { %v13323_v42 = vpop.xlane.xlu0 %13322 }
0x2ff5   :  { %v13332_v44 = vrot.slane %v13323_v42, %v24210_v21  ;;  %v13328_v29 = vrot.slane %v13323_v42, %v23590_v54 }
0x2ff7   :  { %22115 = vrcp.f32 %v13332_v44  ;;  %v27324_v44 = vmov 0.0  }
0x2ff8   :  { %22117 = vrcp.f32 %v13328_v29 }
0x3001   :  { %v22116_v47 = vpop.eup %22115 }
0x3002   :  { %v13341_v7 = vmul.f32 %v22116_v47, %v22104_v58  ;;  %v13342_v5 = vmul.f32 %v22116_v47, %v22108_v23  ;;  %v13343_v0 = vmul.f32 %v22116_v47, %v22112_v16  ;;  %v22118_v40 = vpop.eup %22117  ;;  %v13344_v63 = vmul.f32 %v22116_v47, %v22114_v41 }
0x3003   :  { %v13336_v12 = vmul.f32 %v22118_v40, %v22100_v43  ;;  %v13337_v59 = vmul.f32 %v22118_v40, %v22102_v6  ;;  %v13338_v25 = vmul.f32 %v22118_v40, %v22106_v30  ;;  %v13339_v35 = vmul.f32 %v22118_v40, %v22110_v31 }
0x3004   :  { %13457 = vperm.xlu1 %21914, %v13341_v7  }
0x3008   :  { %13460 = vperm.xlu1 %21914, %v13342_v5  }
0x300c   :  { %13463 = vperm.xlu1 %21914, %v13343_v0  }
0x3010   :  { %13350 = vperm.xlu1 %21914, %v13336_v12  }
0x3014   :  { %13353 = vperm.xlu1 %21914, %v13337_v59  }
0x3018   :  { %13466 = vperm.xlu1 %21914, %v13344_v63  }
0x301c   :  { %13356 = vperm.xlu1 %21914, %v13338_v25  }
0x3020   :  { %13359 = vperm.xlu1 %21914, %v13339_v35  }
0x3024   :  { %13661 = vrot.lane.b32.xlu1 %v26287_v51, %s22536_s9 }
0x3083   :  { %v13458_v58 = vpop.permute.xlu1 %13457 }
0x3084   :  { %v13471_v6 = vrot.slane %v13458_v58, %v25684_v49 }
0x3087   :  { %v13461_v24 = vpop.permute.xlu1 %13460 }
0x3088   :  { %v13475_v62 = vrot.slane %v13461_v24, %v25680_v20 }
0x308a   :  { %v13476_v30 = vsel %vm10025_vm8, %v13475_v62, %v13471_v6 }
0x308b   :  { %v13464_v23 = vpop.permute.xlu1 %13463 }
0x308c   :  { %v13480_v43 = vrot.slane %v13464_v23, %v25687_v56  ;;  %v13565_v23 = vld [vmem:[%s13564_s13] sm:$0x1] }
0x308e   :  { %v13481_v60 = vsel %vm10032_vm9, %v13480_v43, %v13476_v30  ;;  %v13652_v30 = vpop.permute.xlu0 %13651 }
0x308f   :  { %v13351_v17 = vpop.permute.xlu1 %13350 }
0x3090   :  { %v13364_v47 = vrot.slane %v13351_v17, %v25684_v49  ;;  %v16856_v17 = vld [vmem:[%s13567_s16] ss:$0 sm:$0xff]  ;;  %s26941_s16 = sld [smem:[#allocation5 + $0x100]] }
0x3093   :  { %v13354_v16 = vpop.permute.xlu1 %13353 }
0x3094   :  { %v13368_v42 = vrot.slane %v13354_v16, %v25680_v20  ;;  %v13575_v16 = vsel %vm27317_vm13, %v13565_v23, %v16856_v17 }
0x3095   :  { %v13576_v62 = vadd.f32 %v13575_v16, %v25808_v22 }
0x3096   :  { %v13369_v5 = vsel %vm10025_vm8, %v13368_v42, %v13364_v47  ;;  %p12204_p12 = scmp.ge.s32.totalorder %s26941_s16, 0 }
0x3097   :  { %v13467_v41 = vpop.permute.xlu1 %13466 }
0x3098   :  { %v13485_v31 = vrot.slane %v13467_v41, %v25690_v32  ;;  %s26969_s25 = scalar_select %p12204_p12, 1, 0 }
0x309a   :  { %v13486_v51 = vsel %vm10039_vm10, %v13485_v31, %v13481_v60 }
0x309b   :  { %20206 = vmatmul.mubr.msk.f32.vlgmr.msra.gmra.mrb[170].mxu0 %vm3673_vm5, %v13486_v51  ;;  %v13357_v27 = vpop.permute.xlu1 %13356 }
0x309c   :  { %21473 = vmatpush3.bf16.msra.mxu0 %v25822_v50  ;;  %20231 = vmatprep.mubr.msk.f32.mxu0 %vm22538_vm7, %v27324_v44  ;;  %v13373_v29 = vrot.slane %v13357_v27, %v25687_v56 }
0x309d   :  { %21474 = vmatprep.subr.bf16.mxu0 %v27322_v45 }
0x309e   :  { %v13374_v40 = vsel %vm10032_vm9, %v13373_v29, %v13369_v5 }
0x309f   :  { %v13360_v7 = vpop.permute.xlu1 %13359 }
0x30a0   :  { %v13378_v0 = vrot.slane %v13360_v7, %v25690_v32  ;;  %21476 = vmatpush3.bf16.msra.mxu0 %v25828_v57 }
0x30a1   :  { %21483 = vmatprep.subr.bf16.mxu0 %v27322_v45 }
0x30a2   :  { %v13379_v12 = vsel %vm10039_vm10, %v13378_v0, %v13374_v40 }
0x30a3   :  { %20195 = vmatmul.mubr.msk.f32.vlgmr.msra.gmra.mrb[168].mxu1 %vm3673_vm5, %v13379_v12  ;;  %v13662_v29 = vpop.permute.xlu1 %13661 }
0x30a4   :  { %21463 = vmatpush3.bf16.msra.mxu1 %v25761_v11  ;;  %20220 = vmatprep.mubr.msk.f32.mxu1 %vm22538_vm7, %v27324_v44 }
0x30a5   :  { %21464 = vmatprep.subr.bf16.mxu1 %v27322_v45 }
0x30a8   :  { %21466 = vmatpush3.bf16.msra.mxu1 %v25779_v14 }
0x30a9   :  { %21467 = vmatprep.subr.bf16.mxu1 %v27322_v45 }
0x30ac   :  { %21470 = vmatpush3.bf16.msk.msra.mxu1 %vm22859_vm4, %v25785_v9 }
0x30ad   :  { %21477 = vmatprep.subr.bf16.mxu1 %v27322_v45 }
0x316e   :  { %v13555_v59 = vpop.f32.mrb[170].mxu0 }
0x316f   :  { %v20207_v63 = vpop.f32.mrb[171].mxu0  ;;  %v13560_v25 = vrot.slane %v13555_v59, 7 }
0x3176   :  { %v13448_v35 = vpop.f32.mrb[168].mxu1 }
0x3177   :  { %v13562_v58 = vsel %vm27317_vm13, %v13448_v35, %v13560_v25  ;;  %v20196_v24 = vpop.f32.mrb[169].mxu1 }
0x3178   :  { %20221 = vmatmul.mubr.msk.f32.vlgmr.msra.gmra.mrb[170].mxu1 %vm5244_vm6, %v13562_v58 }
0x3179   :  { %21479 = vmatpush3.bf16.msra.mxu1 %v25554_v4  ;;  %20242 = vmatprep.mubr.msk.f32.mxu1 %vm22538_vm7, %v27324_v44 }
0x317a   :  { %21480 = vmatprep.subr.bf16.mxu1 %v27322_v45 }
0x317d   :  { %21482 = vmatpush3.bf16.msra.mxu1 %v25572_v26 }
0x317e   :  { %21489 = vmatprep.subr.bf16.mxu1 %v27322_v45 }
0x324b   :  { %v13646_v43 = vpop.f32.mrb[170].mxu1 }
0x324c   :  { %v13650_v6 = vadd.f32 %v13646_v43, %v13576_v62  ;;  %v20222_v41 = vpop.f32.mrb[171].mxu1 }
0x324e   :  { %v13654_v31 = vadd.f32 %v13652_v30, %v13650_v6 }
0x3250   :  { %v16859_v60 = vmul.f32 -1.442695, %v13654_v31 }
0x3252   :  { %22119 = vpow2.f32 %v16859_v60 }
0x325c   :  { %v22120_v51 = vpop.eup %22119 }
0x325d   :  { %v13658_v27 = vadd.f32 1.0, %v22120_v51 }
0x325f   :  { %22121 = vrcp.f32 %v13658_v27 }
0x3269   :  { %v22122_v42 = vpop.eup %22121 }
0x326a   :  { %v13664_v47 = vmul.f32 %v22122_v42, %v13662_v29  ;;  %v13671_v40 = vsub.f32 1.0, %v22122_v42  ;;  %v13677_v59 = vmul.f32 %v22122_v42, %v26266_v53 }
0x326c   :  { %13666 = vrot.lane.b32.xlu1 %v13664_v47, %s22543_s3 }
0x32de   :  { %v13667_v7 = vpop.permute.xlu1 %13666 }
0x32df   :  { %v13669_v5 = vadd.f32 %v13667_v7, %v13650_v6 }
0x32e1   :  { %22123 = vtanh.f32 %v13669_v5 }
0x32eb   :  { %v22124_v0 = vpop.eup %22123 }
0x32ec   :  { %13673 = vrot.lane.b32.xlu1 %v22124_v0, %s22542_s6 }
0x335e   :  { %v13674_v12 = vpop.permute.xlu1 %13673 }
0x335f   :  { %v13676_v63 = vmul.f32 %v13674_v12, %v13671_v40 }
0x3361   :  { %v26410_v25 = vadd.f32 %v13677_v59, %v13676_v63 }
0x3363   :  { %13680 = vrot.lane.b32.xlu1 %v26410_v25, %s22542_s6 }
0x33d5   :  { %v13681_v35 = vpop.permute.xlu1 %13680 }
0x33d6   :  { %20232 = vmatmul.mubr.msk.f32.vlgmr.msra.gmra.mrb[172].mxu0 %vm3673_vm5, %v13681_v35  ;;  %20243 = vmatmul.mubr.msk.f32.vlgmr.msra.gmra.mrb[172].mxu1 %vm3673_vm5, %v13681_v35 }
0x33d7   :  { %21485 = vmatpush3.bf16.msra.mxu0 %v24233_v46  ;;  %21491 = vmatpush3.bf16.msra.mxu1 %v25604_v10 }
0x33d8   :  { %21486 = vmatprep.subr.bf16.mxu0 %v27322_v45  ;;  %21492 = vmatprep.subr.bf16.mxu1 %v27322_v45 }
0x33d9   :  { %20264 = vmatprep.mubr.msk.f32.mxu1 %vm22538_vm7, %v27324_v44  ;;  %20253 = vmatprep.mubr.msk.f32.mxu0 %vm22538_vm7, %v27324_v44 }
0x33db   :  { %21488 = vmatpush3.bf16.msra.mxu0 %v24243_v15  ;;  %21494 = vmatpush3.bf16.msra.mxu1 %v25624_v37 }
0x33dc   :  { %21495 = vmatprep.subr.bf16.mxu0 %v27322_v45  ;;  %21505 = vmatprep.subr.bf16.mxu1 %v27322_v45 }
0x34a9   :  { %v26428_v53 = vpop.f32.mrb[172].mxu0  ;;  %v13861_v58 = vpop.f32.mrb[172].mxu1 }
0x34aa   :  { %27325 = vst [vmem:[#allocation14_spill] sm:$0xff] %v26428_v53  ;;  %v26431_v24 = vadd.f32 %v13861_v58, %v25598_v61  ;;  %v20233_v23 = vpop.f32.mrb[173].mxu0  ;;  %v20244_v17 = vpop.f32.mrb[173].mxu1 }
0x34ac   :  { %v13872_v16 = vrot.slane %v26431_v24, %v25607_v13 }
0x34ae   :  { %v13873_v62 = vcombine.high %v13872_v16, %v13872_v16  ;;  %v13880_v43 = vrot.slane %v13872_v16, %v25607_v13 }
0x34b0   :  { %v13887_v6 = vrot.slane %v13873_v62, %v25607_v13  ;;  %v13891_v41 = vrot.slane %v13880_v43, %v23590_v54 }
0x34b2   :  { %v13895_v30 = vrot.slane %v13887_v6, %v23590_v54  ;;  %v13899_v31 = vadd.f32 %v24394_v52, %v13891_v41  ;;  %v13898_v60 = vadd.f32 %v13891_v41, %v24396_v1  ;;  %v13900_v51 = vadd.f32 %v13891_v41, %v24400_v2 }
0x34b3   :  { %v13901_v47 = vadd.f32 %v24398_v48, %v13891_v41 }
0x34b4   :  { %22125 = vtanh.f32 %v13899_v31  ;;  %v13903_v27 = vadd.f32 %v25653_v18, %v13895_v30  ;;  %v13904_v42 = vadd.f32 %v13895_v30, %v25661_v34  ;;  %v13902_v29 = vadd.f32 %v13895_v30, %v25655_v28 }
0x34b5   :  { %22127 = vtanh.f32 %v13898_v60  ;;  %v13905_v7 = vadd.f32 %v25659_v19, %v13895_v30 }
0x34b6   :  { %22129 = vtanh.f32 %v13900_v51 }
0x34b7   :  { %22131 = vtanh.f32 %v13903_v27 }
0x34b8   :  { %22133 = vtanh.f32 %v13904_v42 }
0x34b9   :  { %22135 = vtanh.f32 %v13902_v29 }
0x34ba   :  { %22137 = vtanh.f32 %v13901_v47 }
0x34bb   :  { %22139 = vtanh.f32 %v13905_v7 }
0x34be   :  { %v22126_v5 = vpop.eup %22125 }
0x34bf   :  { %v22128_v0 = vpop.eup %22127  ;;  %v13915_v40 = vmul.f32 %v22126_v5, %v25641_v38 }
0x34c0   :  { %v22130_v12 = vpop.eup %22129  ;;  %v13914_v59 = vmul.f32 %v22128_v0, %v25641_v38 }
0x34c1   :  { %v22132_v63 = vpop.eup %22131  ;;  %v13925_v35 = vsel %vm3673_vm5, %v13915_v40, 0.0  ;;  %v13916_v58 = vmul.f32 %v22130_v12, %v25641_v38 }
0x34c2   :  { %v22134_v23 = vpop.eup %22133  ;;  %13926 = vadd.xlane.f32.xlu0 %v13925_v35  ;;  %v13922_v17 = vsel %vm3673_vm5, %v13914_v59, 0.0  ;;  %v13919_v16 = vmul.f32 %v22132_v63, %v25641_v38 }
0x34c3   :  { %v22136_v62 = vpop.eup %22135  ;;  %13923 = vadd.xlane.f32.xlu1 %v13922_v17  ;;  %v13928_v43 = vsel %vm3673_vm5, %v13916_v58, 0.0  ;;  %v13920_v31 = vmul.f32 %v22134_v23, %v25641_v38 }
0x34c4   :  { %v13918_v6 = vmul.f32 %v22136_v62, %v25641_v38  ;;  %v22138_v41 = vpop.eup %22137  ;;  %v13937_v30 = vsel %vm3673_vm5, %v13919_v16, 0.0 }
0x34c5   :  { %v22140_v60 = vpop.eup %22139  ;;  %v13917_v27 = vmul.f32 %v22138_v41, %v25641_v38  ;;  %v13940_v42 = vsel %vm3673_vm5, %v13920_v31, 0.0 }
0x34c6   :  { %13929 = vadd.xlane.f32.xlu0 %v13928_v43  ;;  %v13934_v51 = vsel %vm3673_vm5, %v13918_v6, 0.0  ;;  %v13921_v29 = vmul.f32 %v22140_v60, %v25641_v38 }
0x34c7   :  { %13938 = vadd.xlane.f32.xlu1 %v13937_v30  ;;  %v13931_v47 = vsel %vm3673_vm5, %v13917_v27, 0.0 }
0x34c8   :  { %v13943_v7 = vsel %vm3673_vm5, %v13921_v29, 0.0 }
0x34ca   :  { %13935 = vadd.xlane.f32.xlu0 %v13934_v51 }
0x34cb   :  { %13941 = vadd.xlane.f32.xlu1 %v13940_v42 }
0x34ce   :  { %13932 = vadd.xlane.f32.xlu0 %v13931_v47 }
0x34cf   :  { %13944 = vadd.xlane.f32.xlu1 %v13943_v7 }
0x354f   :  { %v13927_v5 = vpop.xlane.xlu0 %13926 }
0x3550   :  { %v13924_v0 = vpop.xlane.xlu1 %13923  ;;  %v13961_v63 = vrot.slane %v13927_v5, %v25680_v20 }
0x3551   :  { %v13957_v35 = vrot.slane %v13924_v0, %v25684_v49 }
0x3553   :  { %v13930_v40 = vpop.xlane.xlu0 %13929  ;;  %v13962_v41 = vsel %vm10025_vm8, %v13961_v63, %v13957_v35 }
0x3554   :  { %v13939_v12 = vpop.xlane.xlu1 %13938  ;;  %v13966_v17 = vrot.slane %v13930_v40, %v25687_v56 }
0x3555   :  { %v13980_v16 = vrot.slane %v13939_v12, %v25680_v20 }
0x3556   :  { %v13967_v51 = vsel %vm10032_vm9, %v13966_v17, %v13962_v41 }
0x3557   :  { %v13936_v59 = vpop.xlane.xlu0 %13935 }
0x3558   :  { %v13942_v58 = vpop.xlane.xlu1 %13941  ;;  %v13976_v23 = vrot.slane %v13936_v59, %v25684_v49 }
0x3559   :  { %v13985_v62 = vrot.slane %v13942_v58, %v25687_v56 }
0x355a   :  { %v13981_v43 = vsel %vm10025_vm8, %v13980_v16, %v13976_v23 }
0x355b   :  { %v13933_v6 = vpop.xlane.xlu0 %13932  ;;  %v13986_v42 = vsel %vm10032_vm9, %v13985_v62, %v13981_v43 }
0x355c   :  { %v13945_v30 = vpop.xlane.xlu1 %13944  ;;  %v13971_v31 = vrot.slane %v13933_v6, %v25690_v32 }
0x355d   :  { %v13990_v60 = vrot.slane %v13945_v30, %v25690_v32 }
0x355e   :  { %v13972_v27 = vsel %vm10039_vm10, %v13971_v31, %v13967_v51 }
0x355f   :  { %v13991_v29 = vsel %vm10039_vm10, %v13990_v60, %v13986_v42 }
0x3560   :  { %v13992_v47 = vsel %vm10060_vm11, %v13991_v29, %v13972_v27 }
0x3561   :  { %v13994_v7 = vsel %vm10063_vm12, %v13992_v47, -inf }
0x3562   :  { %13995 = vmax.xlane.f32.xlu0 %v13994_v7 }
0x35ef   :  { %v13996_v23 = vpop.xlane.xlu0 %13995 }
0x35f0   :  { %v14001_v63 = vrot.slane %v13996_v23, %v23590_v54  ;;  %v14005_v35 = vrot.slane %v13996_v23, %v24210_v21 }
0x35f2   :  { %v14008_v16 = vsub.f32 %v13924_v0, %v14001_v63  ;;  %v14009_v53 = vsub.f32 %v13927_v5, %v14001_v63  ;;  %v14012_v36 = vsub.f32 %v13936_v59, %v14005_v35  ;;  %v14014_v17 = vsub.f32 %v13942_v58, %v14005_v35 }
0x35f3   :  { %v14013_v51 = vsub.f32 %v13939_v12, %v14005_v35  ;;  %v14015_v43 = vsub.f32 %v13945_v30, %v14005_v35  ;;  %v14010_v27 = vsub.f32 %v13930_v40, %v14001_v63  ;;  %v14011_v47 = vsub.f32 %v13933_v6, %v14001_v63 }
0x35f4   :  { %v14016_v41 = vmul.f32 1.442695, %v14008_v16  ;;  %v14018_v31 = vmul.f32 1.442695, %v14009_v53  ;;  %v14024_v62 = vmul.f32 1.442695, %v14012_v36 }
0x35f5   :  { %v14028_v60 = vmul.f32 1.442695, %v14014_v17  ;;  %v14026_v42 = vmul.f32 1.442695, %v14013_v51  ;;  %v14030_v29 = vmul.f32 1.442695, %v14015_v43 }
0x35f6   :  { %22141 = vpow2.f32 %v14016_v41  ;;  %v14020_v7 = vmul.f32 1.442695, %v14010_v27  ;;  %v14022_v53 = vmul.f32 1.442695, %v14011_v47 }
0x35f7   :  { %22143 = vpow2.f32 %v14018_v31 }
0x35f8   :  { %22145 = vpow2.f32 %v14024_v62 }
0x35f9   :  { %22147 = vpow2.f32 %v14028_v60 }
0x35fa   :  { %22149 = vpow2.f32 %v14026_v42 }
0x35fb   :  { %22151 = vpow2.f32 %v14030_v29 }
0x35fc   :  { %22153 = vpow2.f32 %v14020_v7 }
0x35fd   :  { %22155 = vpow2.f32 %v14022_v53 }
0x3600   :  { %v22142_v0 = vpop.eup %22141 }
0x3601   :  { %v22144_v5 = vpop.eup %22143  ;;  %14041 = vperm.xlu1 %21914, %v22142_v0  }
0x3602   :  { %14044 = vperm.xlu0 %21913, %v22144_v5   ;;  %v22146_v12 = vpop.eup %22145 }
0x3603   :  { %v22148_v36 = vpop.eup %22147 }
0x3604   :  { %v22150_v40 = vpop.eup %22149 }
0x3605   :  { %14053 = vperm.xlu1 %21914, %v22146_v12   ;;  %v22152_v59 = vpop.eup %22151 }
0x3606   :  { %14059 = vperm.xlu0 %21913, %v22148_v36   ;;  %v22154_v58 = vpop.eup %22153 }
0x3607   :  { %v22156_v6 = vpop.eup %22155 }
0x3609   :  { %14056 = vperm.xlu1 %21914, %v22150_v40  }
0x360a   :  { %14062 = vperm.xlu0 %21913, %v22152_v59  }
0x360d   :  { %14047 = vperm.xlu1 %21914, %v22154_v58  }
0x3611   :  { %14050 = vperm.xlu1 %21914, %v22156_v6  }
0x3680   :  { %v14042_v30 = vpop.permute.xlu1 %14041 }
0x3681   :  { %v14045_v23 = vpop.permute.xlu0 %14044  ;;  %v14067_v62 = vrot.slane %v14042_v30, %v25684_v49 }
0x3682   :  { %v14071_v51 = vrot.slane %v14045_v23, %v25680_v20 }
0x3684   :  { %v14054_v63 = vpop.permute.xlu1 %14053  ;;  %v14072_v7 = vsel %vm10025_vm8, %v14071_v51, %v14067_v62 }
0x3685   :  { %v14060_v35 = vpop.permute.xlu0 %14059  ;;  %v14086_v41 = vrot.slane %v14054_v63, %v25684_v49 }
0x3686   :  { %v14095_v60 = vrot.slane %v14060_v35, %v25687_v56 }
0x3688   :  { %v14057_v16 = vpop.permute.xlu1 %14056 }
0x3689   :  { %v14090_v17 = vrot.slane %v14057_v16, %v25680_v20  ;;  %v14063_v27 = vpop.permute.xlu0 %14062 }
0x368a   :  { %v14100_v53 = vrot.slane %v14063_v27, %v25690_v32 }
0x368b   :  { %v14091_v43 = vsel %vm10025_vm8, %v14090_v17, %v14086_v41 }
0x368c   :  { %v14048_v31 = vpop.permute.xlu1 %14047  ;;  %v14096_v47 = vsel %vm10032_vm9, %v14095_v60, %v14091_v43 }
0x368d   :  { %v14076_v42 = vrot.slane %v14048_v31, %v25687_v56  ;;  %v14101_v16 = vsel %vm10039_vm10, %v14100_v53, %v14096_v47 }
0x368f   :  { %v14077_v23 = vsel %vm10032_vm9, %v14076_v42, %v14072_v7 }
0x3690   :  { %v14051_v29 = vpop.permute.xlu1 %14050 }
0x3691   :  { %v14081_v63 = vrot.slane %v14051_v29, %v25690_v32 }
0x3693   :  { %v14082_v30 = vsel %vm10039_vm10, %v14081_v63, %v14077_v23 }
0x3694   :  { %v14102_v35 = vsel %vm10060_vm11, %v14101_v16, %v14082_v30 }
0x3695   :  { %v14104_v17 = vsel %vm10063_vm12, %v14102_v35, 0.0 }
0x3696   :  { %14105 = vadd.xlane.f32.xlu1 %v14104_v17 }
0x36a7   :  { %14444 = vrot.lane.b32.xlu1 %v26431_v24, %s22536_s9 }
0x3723   :  { %v14106_v41 = vpop.xlane.xlu1 %14105 }
0x3724   :  { %v14115_v31 = vrot.slane %v14106_v41, %v24210_v21  ;;  %v14111_v51 = vrot.slane %v14106_v41, %v23590_v54 }
0x3726   :  { %22157 = vrcp.f32 %v14115_v31 }
0x3727   :  { %22159 = vrcp.f32 %v14111_v51 }
0x3730   :  { %v22158_v62 = vpop.eup %22157 }
0x3731   :  { %v14124_v43 = vmul.f32 %v22158_v62, %v22146_v12  ;;  %v14125_v60 = vmul.f32 %v22158_v62, %v22150_v40  ;;  %v14126_v27 = vmul.f32 %v22158_v62, %v22148_v36  ;;  %v22160_v42 = vpop.eup %22159  ;;  %v14127_v7 = vmul.f32 %v22158_v62, %v22152_v59 }
0x3732   :  { %v14119_v29 = vmul.f32 %v22160_v42, %v22142_v0  ;;  %v14120_v47 = vmul.f32 %v22160_v42, %v22144_v5  ;;  %v14121_v53 = vmul.f32 %v22160_v42, %v22154_v58  ;;  %v14122_v63 = vmul.f32 %v22160_v42, %v22156_v6 }
0x3733   :  { %14240 = vperm.xlu0 %21913, %v14124_v43  }
0x3737   :  { %14243 = vperm.xlu0 %21913, %v14125_v60  }
0x373b   :  { %14246 = vperm.xlu0 %21913, %v14126_v27  }
0x373f   :  { %14133 = vperm.xlu0 %21913, %v14119_v29  }
0x3743   :  { %14136 = vperm.xlu0 %21913, %v14120_v47  }
0x3747   :  { %14249 = vperm.xlu0 %21913, %v14127_v7  }
0x374b   :  { %14139 = vperm.xlu0 %21913, %v14121_v53  }
0x374f   :  { %14142 = vperm.xlu0 %21913, %v14122_v63  }
0x3753   :  { %14434 = vrot.lane.b32.xlu0 %v26431_v24, %s22542_s6 }
0x37b2   :  { %v14241_v12 = vpop.permute.xlu0 %14240 }
0x37b3   :  { %v14254_v5 = vrot.slane %v14241_v12, %v25684_v49 }
0x37b6   :  { %v14244_v23 = vpop.permute.xlu0 %14243 }
0x37b7   :  { %v14258_v16 = vrot.slane %v14244_v23, %v25680_v20  ;;  %v14348_v23 = vld [vmem:[%s14347_s21] sm:$0x1]  ;;  %s26955_s21 = sld [smem:[#allocation5 + $0x180]] }
0x37b9   :  { %v14259_v58 = vsel %vm10025_vm8, %v14258_v16, %v14254_v5 }
0x37ba   :  { %v14247_v40 = vpop.permute.xlu0 %14246 }
0x37bb   :  { %v14263_v0 = vrot.slane %v14247_v40, %v25687_v56  ;;  %v16868_v40 = vld [vmem:[%s14350_s24] ss:$0 sm:$0xff]  ;;  %s26964_s24 = sld [smem:[#allocation5 + $0x201]] }
0x37bd   :  { %v14264_v35 = vsel %vm10032_vm9, %v14263_v0, %v14259_v58  ;;  %p12987_p2 = scmp.ge.s32.totalorder %s26955_s21, 0 }
0x37be   :  { %v14134_v30 = vpop.permute.xlu0 %14133 }
0x37bf   :  { %v14147_v51 = vrot.slane %v14134_v30, %v25684_v49  ;;  %v14358_v30 = vsel %vm27317_vm13, %v14348_v23, %v16868_v40  ;;  %s27015_s8 = scalar_select %p12987_p2, 1, 0 }
0x37c1   :  { %p13783_p5 = scmp.ge.s32.totalorder %s26964_s24, 0 }
0x37c2   :  { %v14137_v36 = vpop.permute.xlu0 %14136 }
0x37c3   :  { %v14151_v41 = vrot.slane %v14137_v36, %v25680_v20  ;;  %v14359_v36 = vadd.f32 %v14358_v30, %v25808_v22 }
0x37c5   :  { %v14152_v43 = vsel %vm10025_vm8, %v14151_v41, %v14147_v51  ;;  %v14445_v41 = vpop.permute.xlu1 %14444 }
0x37c6   :  { %v14250_v59 = vpop.permute.xlu0 %14249 }
0x37c7   :  { %v14268_v6 = vrot.slane %v14250_v59, %v25690_v32 }
0x37c9   :  { %v14269_v24 = vsel %vm10039_vm10, %v14268_v6, %v14264_v35 }
0x37ca   :  { %20265 = vmatmul.mubr.msk.f32.vlgmr.msra.gmra.mrb[174].mxu1 %vm3673_vm5, %v14269_v24  ;;  %v14140_v17 = vpop.permute.xlu0 %14139 }
0x37cb   :  { %21507 = vmatpush3.bf16.msra.mxu1 %v25822_v50  ;;  %20290 = vmatprep.mubr.msk.f32.mxu1 %vm22538_vm7, %v27324_v44  ;;  %v14156_v31 = vrot.slane %v14140_v17, %v25687_v56 }
0x37cc   :  { %21508 = vmatprep.subr.bf16.mxu1 %v27322_v45 }
0x37cd   :  { %v14157_v27 = vsel %vm10032_vm9, %v14156_v31, %v14152_v43 }
0x37ce   :  { %v14143_v62 = vpop.permute.xlu0 %14142 }
0x37cf   :  { %v14161_v60 = vrot.slane %v14143_v62, %v25690_v32  ;;  %21510 = vmatpush3.bf16.msra.mxu1 %v25828_v57 }
0x37d0   :  { %21517 = vmatprep.subr.bf16.mxu1 %v27322_v45 }
0x37d1   :  { %v14162_v42 = vsel %vm10039_vm10, %v14161_v60, %v14157_v27 }
0x37d2   :  { %20254 = vmatmul.mubr.msk.f32.vlgmr.msra.gmra.mrb[174].mxu0 %vm3673_vm5, %v14162_v42  ;;  %v14435_v59 = vpop.permute.xlu0 %14434 }
0x37d3   :  { %21497 = vmatpush3.bf16.msra.mxu0 %v25761_v11  ;;  %20279 = vmatprep.mubr.msk.f32.mxu0 %vm22538_vm7, %v27324_v44 }
0x37d4   :  { %21498 = vmatprep.subr.bf16.mxu0 %v27322_v45 }
0x37d7   :  { %21500 = vmatpush3.bf16.msra.mxu0 %v25779_v14 }
0x37d8   :  { %21501 = vmatprep.subr.bf16.mxu0 %v27322_v45 }
0x37db   :  { %21504 = vmatpush3.bf16.msk.msra.mxu0 %vm22859_vm4, %v25785_v9 }
0x37dc   :  { %21511 = vmatprep.subr.bf16.mxu0 %v27322_v45 }
0x389d   :  { %v14338_v29 = vpop.f32.mrb[174].mxu1 }
0x389e   :  { %v20266_v47 = vpop.f32.mrb[175].mxu1  ;;  %v14343_v7 = vrot.slane %v14338_v29, 7 }
0x38a5   :  { %v14231_v53 = vpop.f32.mrb[174].mxu0 }
0x38a6   :  { %v14345_v63 = vsel %vm27317_vm13, %v14231_v53, %v14343_v7  ;;  %v20255_v12 = vpop.f32.mrb[175].mxu0 }
0x38a7   :  { %20280 = vmatmul.mubr.msk.f32.vlgmr.msra.gmra.mrb[176].mxu0 %vm5244_vm6, %v14345_v63 }
0x38a8   :  { %21513 = vmatpush3.bf16.msra.mxu0 %v25554_v4  ;;  %20301 = vmatprep.mubr.msk.f32.mxu0 %vm22538_vm7, %v27324_v44 }
0x38a9   :  { %21514 = vmatprep.subr.bf16.mxu0 %v27322_v45 }
0x38ac   :  { %21516 = vmatpush3.bf16.msra.mxu0 %v25572_v26 }
0x38ad   :  { %21523 = vmatprep.subr.bf16.mxu0 %v27322_v45 }
0x397a   :  { %v14429_v16 = vpop.f32.mrb[176].mxu0 }
0x397b   :  { %v14433_v0 = vadd.f32 %v14429_v16, %v14359_v36  ;;  %v20281_v5 = vpop.f32.mrb[177].mxu0 }
0x397d   :  { %v14437_v58 = vadd.f32 %v14435_v59, %v14433_v0 }
0x397f   :  { %v16871_v6 = vmul.f32 -1.442695, %v14437_v58 }
0x3981   :  { %22161 = vpow2.f32 %v16871_v6 }
0x398b   :  { %v22162_v35 = vpop.eup %22161 }
0x398c   :  { %v14441_v24 = vadd.f32 1.0, %v22162_v35 }
0x398e   :  { %22163 = vrcp.f32 %v14441_v24 }
0x3998   :  { %v22164_v17 = vpop.eup %22163 }
0x3999   :  { %v14447_v31 = vmul.f32 %v22164_v17, %v14445_v41  ;;  %v14454_v60 = vsub.f32 1.0, %v22164_v17  ;;  %v14460_v42 = vmul.f32 %v22164_v17, %v26410_v25 }
0x399b   :  { %14449 = vrot.lane.b32.xlu0 %v14447_v31, %s22543_s3 }
0x3a0d   :  { %v14450_v51 = vpop.permute.xlu0 %14449 }
0x3a0e   :  { %v14452_v62 = vadd.f32 %v14450_v51, %v14433_v0 }
0x3a10   :  { %22165 = vtanh.f32 %v14452_v62 }
0x3a1a   :  { %v22166_v43 = vpop.eup %22165 }
0x3a1b   :  { %14456 = vrot.lane.b32.xlu0 %v22166_v43, %s22542_s6 }
0x3a8d   :  { %v14457_v27 = vpop.permute.xlu0 %14456 }
0x3a8e   :  { %v14459_v29 = vmul.f32 %v14457_v27, %v14454_v60 }
0x3a90   :  { %v26554_v47 = vadd.f32 %v14460_v42, %v14459_v29 }
0x3a92   :  { %14463 = vrot.lane.b32.xlu0 %v26554_v47, %s22542_s6 }
0x3b04   :  { %v14464_v7 = vpop.permute.xlu0 %14463 }
0x3b05   :  { %20291 = vmatmul.mubr.msk.f32.vlgmr.msra.gmra.mrb[176].mxu1 %vm3673_vm5, %v14464_v7  ;;  %20302 = vmatmul.mubr.msk.f32.vlgmr.msra.gmra.mrb[178].mxu0 %vm3673_vm5, %v14464_v7 }
0x3b06   :  { %21519 = vmatpush3.bf16.msra.mxu1 %v24233_v46  ;;  %21525 = vmatpush3.bf16.msra.mxu0 %v25604_v10 }
0x3b07   :  { %21520 = vmatprep.subr.bf16.mxu1 %v27322_v45  ;;  %21526 = vmatprep.subr.bf16.mxu0 %v27322_v45 }
0x3b08   :  { %20323 = vmatprep.mubr.msk.f32.mxu0 %vm22538_vm7, %v27324_v44  ;;  %20312 = vmatprep.mubr.msk.f32.mxu1 %vm22538_vm7, %v27324_v44 }
0x3b0a   :  { %21522 = vmatpush3.bf16.msra.mxu1 %v24243_v15  ;;  %21528 = vmatpush3.bf16.msra.mxu0 %v25624_v37 }
0x3b0b   :  { %21529 = vmatprep.subr.bf16.mxu1 %v27322_v45  ;;  %21539 = vmatprep.subr.bf16.mxu0 %v27322_v45 }
0x3bd8   :  { %v26572_v25 = vpop.f32.mrb[176].mxu1  ;;  %v14644_v53 = vpop.f32.mrb[178].mxu0 }
0x3bd9   :  { %v26575_v63 = vadd.f32 %v14644_v53, %v25598_v61  ;;  %v20292_v12 = vpop.f32.mrb[177].mxu1  ;;  %v20303_v23 = vpop.f32.mrb[179].mxu0 }
0x3bdb   :  { %v14655_v40 = vrot.slane %v26575_v63, %v25607_v13 }
0x3bdd   :  { %v14656_v30 = vcombine.high %v14655_v40, %v14655_v40  ;;  %v14663_v36 = vrot.slane %v14655_v40, %v25607_v13 }
0x3bdf   :  { %v14670_v16 = vrot.slane %v14656_v30, %v25607_v13  ;;  %v14674_v0 = vrot.slane %v14663_v36, %v23590_v54 }
0x3be1   :  { %v14678_v5 = vrot.slane %v14670_v16, %v23590_v54  ;;  %v14682_v59 = vadd.f32 %v24394_v52, %v14674_v0  ;;  %v14681_v58 = vadd.f32 %v14674_v0, %v24396_v1  ;;  %v14683_v6 = vadd.f32 %v14674_v0, %v24400_v2 }
0x3be2   :  { %v14684_v31 = vadd.f32 %v24398_v48, %v14674_v0 }
0x3be3   :  { %22167 = vtanh.f32 %v14682_v59  ;;  %v14687_v35 = vadd.f32 %v14678_v5, %v25661_v34  ;;  %v14688_v24 = vadd.f32 %v25659_v19, %v14678_v5  ;;  %v14685_v17 = vadd.f32 %v14678_v5, %v25655_v28 }
0x3be4   :  { %22169 = vtanh.f32 %v14681_v58  ;;  %v14686_v41 = vadd.f32 %v25653_v18, %v14678_v5 }
0x3be5   :  { %22171 = vtanh.f32 %v14683_v6 }
0x3be6   :  { %22173 = vtanh.f32 %v14687_v35 }
0x3be7   :  { %22175 = vtanh.f32 %v14688_v24 }
0x3be8   :  { %22177 = vtanh.f32 %v14685_v17 }
0x3be9   :  { %22179 = vtanh.f32 %v14686_v41 }
0x3bea   :  { %22181 = vtanh.f32 %v14684_v31 }
0x3bed   :  { %v22168_v51 = vpop.eup %22167 }
0x3bee   :  { %v22170_v62 = vpop.eup %22169  ;;  %v14698_v43 = vmul.f32 %v22168_v51, %v25641_v38 }
0x3bef   :  { %v22172_v60 = vpop.eup %22171  ;;  %v14697_v27 = vmul.f32 %v22170_v62, %v25641_v38 }
0x3bf0   :  { %v22174_v42 = vpop.eup %22173  ;;  %v14708_v29 = vsel %vm3673_vm5, %v14698_v43, 0.0  ;;  %v14699_v12 = vmul.f32 %v22172_v60, %v25641_v38 }
0x3bf1   :  { %v22176_v7 = vpop.eup %22175  ;;  %14709 = vadd.xlane.f32.xlu1 %v14708_v29  ;;  %v14705_v53 = vsel %vm3673_vm5, %v14697_v27, 0.0  ;;  %v14703_v23 = vmul.f32 %v22174_v42, %v25641_v38 }
0x3bf2   :  { %v22178_v40 = vpop.eup %22177  ;;  %14706 = vadd.xlane.f32.xlu0 %v14705_v53  ;;  %v14704_v36 = vmul.f32 %v22176_v7, %v25641_v38  ;;  %v14711_v16 = vsel %vm3673_vm5, %v14699_v12, 0.0 }
0x3bf3   :  { %v14723_v30 = vsel %vm3673_vm5, %v14703_v23, 0.0  ;;  %v14701_v0 = vmul.f32 %v22178_v40, %v25641_v38  ;;  %v22180_v5 = vpop.eup %22179 }
0x3bf4   :  { %v14726_v59 = vsel %vm3673_vm5, %v14704_v36, 0.0  ;;  %v14702_v6 = vmul.f32 %v22180_v5, %v25641_v38  ;;  %v22182_v35 = vpop.eup %22181 }
0x3bf5   :  { %14724 = vadd.xlane.f32.xlu1 %v14723_v30  ;;  %v14717_v58 = vsel %vm3673_vm5, %v14701_v0, 0.0  ;;  %v14700_v17 = vmul.f32 %v22182_v35, %v25641_v38 }
0x3bf6   :  { %14712 = vadd.xlane.f32.xlu0 %v14711_v16  ;;  %v14720_v24 = vsel %vm3673_vm5, %v14702_v6, 0.0 }
0x3bf7   :  { %v14714_v41 = vsel %vm3673_vm5, %v14700_v17, 0.0 }
0x3bf9   :  { %14727 = vadd.xlane.f32.xlu1 %v14726_v59 }
0x3bfa   :  { %14718 = vadd.xlane.f32.xlu0 %v14717_v58 }
0x3bfe   :  { %14721 = vadd.xlane.f32.xlu0 %v14720_v24 }
0x3c02   :  { %14715 = vadd.xlane.f32.xlu0 %v14714_v41 }
0x3c7e   :  { %v14710_v51 = vpop.xlane.xlu1 %14709 }
0x3c7f   :  { %v14707_v31 = vpop.xlane.xlu0 %14706  ;;  %v14744_v42 = vrot.slane %v14710_v51, %v25680_v20 }
0x3c80   :  { %v14740_v29 = vrot.slane %v14707_v31, %v25684_v49 }
0x3c82   :  { %v14725_v43 = vpop.xlane.xlu1 %14724  ;;  %v14745_v0 = vsel %vm10025_vm8, %v14744_v42, %v14740_v29 }
0x3c83   :  { %v14713_v62 = vpop.xlane.xlu0 %14712  ;;  %v14768_v23 = vrot.slane %v14725_v43, %v25687_v56 }
0x3c84   :  { %v14749_v12 = vrot.slane %v14713_v62, %v25687_v56 }
0x3c86   :  { %v14728_v40 = vpop.xlane.xlu1 %14727  ;;  %v14750_v58 = vsel %vm10032_vm9, %v14749_v12, %v14745_v0 }
0x3c87   :  { %v14719_v60 = vpop.xlane.xlu0 %14718  ;;  %v14773_v5 = vrot.slane %v14728_v40, %v25690_v32 }
0x3c88   :  { %v14759_v7 = vrot.slane %v14719_v60, %v25684_v49 }
0x3c8b   :  { %v14722_v27 = vpop.xlane.xlu0 %14721 }
0x3c8c   :  { %v14763_v53 = vrot.slane %v14722_v27, %v25680_v20 }
0x3c8e   :  { %v14764_v30 = vsel %vm10025_vm8, %v14763_v53, %v14759_v7 }
0x3c8f   :  { %v14716_v36 = vpop.xlane.xlu0 %14715  ;;  %v14769_v16 = vsel %vm10032_vm9, %v14768_v23, %v14764_v30 }
0x3c90   :  { %v14754_v59 = vrot.slane %v14716_v36, %v25690_v32  ;;  %v14774_v35 = vsel %vm10039_vm10, %v14773_v5, %v14769_v16 }
0x3c92   :  { %v14755_v6 = vsel %vm10039_vm10, %v14754_v59, %v14750_v58 }
0x3c93   :  { %v14775_v24 = vsel %vm10060_vm11, %v14774_v35, %v14755_v6 }
0x3c94   :  { %v14777_v17 = vsel %vm10063_vm12, %v14775_v24, -inf }
0x3c95   :  { %14778 = vmax.xlane.f32.xlu0 %v14777_v17 }
0x3d22   :  { %v14779_v41 = vpop.xlane.xlu0 %14778 }
0x3d23   :  { %v14784_v7 = vrot.slane %v14779_v41, %v23590_v54  ;;  %v14788_v42 = vrot.slane %v14779_v41, %v24210_v21 }
0x3d25   :  { %v14791_v29 = vsub.f32 %v14707_v31, %v14784_v7  ;;  %v14792_v53 = vsub.f32 %v14710_v51, %v14784_v7  ;;  %v14793_v23 = vsub.f32 %v14713_v62, %v14784_v7  ;;  %v14795_v30 = vsub.f32 %v14719_v60, %v14788_v42 }
0x3d26   :  { %v14796_v0 = vsub.f32 %v14722_v27, %v14788_v42  ;;  %v14794_v16 = vsub.f32 %v14716_v36, %v14784_v7  ;;  %v14797_v58 = vsub.f32 %v14725_v43, %v14788_v42  ;;  %v14798_v24 = vsub.f32 %v14728_v40, %v14788_v42 }
0x3d27   :  { %v14799_v39 = vmul.f32 1.442695, %v14791_v29  ;;  %v14801_v12 = vmul.f32 1.442695, %v14792_v53  ;;  %v14807_v59 = vmul.f32 1.442695, %v14795_v30 }
0x3d28   :  { %v14803_v5 = vmul.f32 1.442695, %v14793_v23  ;;  %v14809_v6 = vmul.f32 1.442695, %v14796_v0  ;;  %v14805_v35 = vmul.f32 1.442695, %v14794_v16 }
0x3d29   :  { %22183 = vpow2.f32 %v14799_v39  ;;  %v14811_v17 = vmul.f32 1.442695, %v14797_v58  ;;  %v14813_v62 = vmul.f32 1.442695, %v14798_v24 }
0x3d2a   :  { %22185 = vpow2.f32 %v14801_v12 }
0x3d2b   :  { %22187 = vpow2.f32 %v14807_v59 }
0x3d2c   :  { %22189 = vpow2.f32 %v14803_v5 }
0x3d2d   :  { %22191 = vpow2.f32 %v14809_v6 }
0x3d2e   :  { %22193 = vpow2.f32 %v14805_v35 }
0x3d2f   :  { %22195 = vpow2.f32 %v14811_v17 }
0x3d30   :  { %22197 = vpow2.f32 %v14813_v62 }
0x3d33   :  { %v22184_v31 = vpop.eup %22183 }
0x3d34   :  { %v22186_v51 = vpop.eup %22185  ;;  %14824 = vperm.xlu1 %21914, %v22184_v31  }
0x3d35   :  { %14827 = vperm.xlu0 %21913, %v22186_v51   ;;  %v22188_v39 = vpop.eup %22187 }
0x3d36   :  { %v22190_v60 = vpop.eup %22189 }
0x3d37   :  { %v22192_v43 = vpop.eup %22191 }
0x3d38   :  { %14836 = vperm.xlu1 %21914, %v22188_v39   ;;  %v22194_v27 = vpop.eup %22193 }
0x3d39   :  { %14830 = vperm.xlu0 %21913, %v22190_v60   ;;  %v22196_v36 = vpop.eup %22195 }
0x3d3a   :  { %v22198_v40 = vpop.eup %22197 }
0x3d3c   :  { %14839 = vperm.xlu1 %21914, %v22192_v43  }
0x3d3d   :  { %14833 = vperm.xlu0 %21913, %v22194_v27  }
0x3d40   :  { %14842 = vperm.xlu1 %21914, %v22196_v36  }
0x3d44   :  { %14845 = vperm.xlu1 %21914, %v22198_v40  }
0x3db3   :  { %v14825_v41 = vpop.permute.xlu1 %14824 }
0x3db4   :  { %v14828_v7 = vpop.permute.xlu0 %14827  ;;  %v14850_v0 = vrot.slane %v14825_v41, %v25684_v49 }
0x3db5   :  { %v14854_v12 = vrot.slane %v14828_v7, %v25680_v20 }
0x3db7   :  { %v14837_v42 = vpop.permute.xlu1 %14836  ;;  %v14855_v24 = vsel %vm10025_vm8, %v14854_v12, %v14850_v0 }
0x3db8   :  { %v14831_v29 = vpop.permute.xlu0 %14830  ;;  %v14869_v58 = vrot.slane %v14837_v42, %v25684_v49 }
0x3db9   :  { %v14859_v16 = vrot.slane %v14831_v29, %v25687_v56 }
0x3dbb   :  { %v14840_v53 = vpop.permute.xlu1 %14839  ;;  %v14860_v7 = vsel %vm10032_vm9, %v14859_v16, %v14855_v24 }
0x3dbc   :  { %v14834_v23 = vpop.permute.xlu0 %14833  ;;  %v14873_v59 = vrot.slane %v14840_v53, %v25680_v20 }
0x3dbd   :  { %v14864_v6 = vrot.slane %v14834_v23, %v25690_v32 }
0x3dbe   :  { %v14874_v17 = vsel %vm10025_vm8, %v14873_v59, %v14869_v58 }
0x3dbf   :  { %v14843_v30 = vpop.permute.xlu1 %14842  ;;  %v14865_v53 = vsel %vm10039_vm10, %v14864_v6, %v14860_v7 }
0x3dc0   :  { %v14878_v5 = vrot.slane %v14843_v30, %v25687_v56 }
0x3dc2   :  { %v14879_v41 = vsel %vm10032_vm9, %v14878_v5, %v14874_v17 }
0x3dc3   :  { %v14846_v35 = vpop.permute.xlu1 %14845 }
0x3dc4   :  { %v14883_v62 = vrot.slane %v14846_v35, %v25690_v32 }
0x3dc6   :  { %v14884_v29 = vsel %vm10039_vm10, %v14883_v62, %v14879_v41 }
0x3dc7   :  { %v14885_v30 = vsel %vm10060_vm11, %v14884_v29, %v14865_v53 }
0x3dc8   :  { %v14887_v42 = vsel %vm10063_vm12, %v14885_v30, 0.0 }
0x3dc9   :  { %14888 = vadd.xlane.f32.xlu0 %v14887_v42 }
0x3ddf   :  { %15217 = vrot.lane.b32.xlu0 %v26575_v63, %s22542_s6 }
0x3e56   :  { %v14889_v23 = vpop.xlane.xlu0 %14888 }
0x3e57   :  { %v14898_v12 = vrot.slane %v14889_v23, %v24210_v21  ;;  %v14894_v0 = vrot.slane %v14889_v23, %v23590_v54 }
0x3e59   :  { %22199 = vrcp.f32 %v14898_v12 }
0x3e5a   :  { %22201 = vrcp.f32 %v14894_v0 }
0x3e63   :  { %v22200_v59 = vpop.eup %22199 }
0x3e64   :  { %v14907_v16 = vmul.f32 %v22200_v59, %v22188_v39  ;;  %v14908_v5 = vmul.f32 %v22200_v59, %v22192_v43  ;;  %v14909_v58 = vmul.f32 %v22200_v59, %v22196_v36  ;;  %v22202_v6 = vpop.eup %22201  ;;  %v14910_v17 = vmul.f32 %v22200_v59, %v22198_v40 }
0x3e65   :  { %v14902_v35 = vmul.f32 %v22202_v6, %v22184_v31  ;;  %v14903_v24 = vmul.f32 %v22202_v6, %v22186_v51  ;;  %v14904_v62 = vmul.f32 %v22202_v6, %v22190_v60  ;;  %v14905_v7 = vmul.f32 %v22202_v6, %v22194_v27 }
0x3e66   :  { %15023 = vperm.xlu1 %21914, %v14907_v16  }
0x3e6a   :  { %15026 = vperm.xlu1 %21914, %v14908_v5  }
0x3e6e   :  { %15029 = vperm.xlu1 %21914, %v14909_v58  }
0x3e72   :  { %14916 = vperm.xlu1 %21914, %v14902_v35  }
0x3e76   :  { %14919 = vperm.xlu1 %21914, %v14903_v24  }
0x3e7a   :  { %15032 = vperm.xlu1 %21914, %v14910_v17  }
0x3e7e   :  { %14922 = vperm.xlu1 %21914, %v14904_v62  }
0x3e82   :  { %14925 = vperm.xlu1 %21914, %v14905_v7  }
0x3e86   :  { %15227 = vrot.lane.b32.xlu1 %v26575_v63, %s22536_s9 }
0x3ee5   :  { %v15024_v39 = vpop.permute.xlu1 %15023 }
0x3ee6   :  { %v15037_v51 = vrot.slane %v15024_v39, %v25684_v49 }
0x3ee9   :  { %v15027_v41 = vpop.permute.xlu1 %15026 }
0x3eea   :  { %v15041_v29 = vrot.slane %v15027_v41, %v25680_v20  ;;  %v16880_v41 = vld [vmem:[%s15133_s7] ss:$0 sm:$0xff]  ;;  %s27008_s7 = sld [smem:[#allocation5 + $0x301]] }
0x3eec   :  { %v15042_v60 = vsel %vm10025_vm8, %v15041_v29, %v15037_v51 }
0x3eed   :  { %v15030_v43 = vpop.permute.xlu1 %15029 }
0x3eee   :  { %v15046_v31 = vrot.slane %v15030_v43, %v25687_v56 }
0x3ef0   :  { %v15047_v30 = vsel %vm10032_vm9, %v15046_v31, %v15042_v60  ;;  %v15218_v31 = vpop.permute.xlu0 %15217  ;;  %p15349_p9 = scmp.ge.s32.totalorder %s27008_s7, 0 }
0x3ef1   :  { %v14917_v53 = vpop.permute.xlu1 %14916 }
0x3ef2   :  { %v14930_v0 = vrot.slane %v14917_v53, %v25684_v49  ;;  %s15350_s13 = scalar_select %p15349_p9, 1, 0 }
0x3ef5   :  { %v14920_v36 = vpop.permute.xlu1 %14919 }
0x3ef6   :  { %v14934_v23 = vrot.slane %v14920_v36, %v25680_v20 }
0x3ef8   :  { %v14935_v16 = vsel %vm10025_vm8, %v14934_v23, %v14930_v0 }
0x3ef9   :  { %v15033_v40 = vpop.permute.xlu1 %15032 }
0x3efa   :  { %v15051_v27 = vrot.slane %v15033_v40, %v25690_v32 }
0x3efc   :  { %v15052_v63 = vsel %vm10039_vm10, %v15051_v27, %v15047_v30 }
0x3efd   :  { %20324 = vmatmul.mubr.msk.f32.vlgmr.msra.gmra.mrb[180].mxu0 %vm3673_vm5, %v15052_v63  ;;  %v14923_v42 = vpop.permute.xlu1 %14922 }
0x3efe   :  { %21541 = vmatpush3.bf16.msra.mxu0 %v25822_v50  ;;  %20349 = vmatprep.mubr.msk.f32.mxu0 %vm22538_vm7, %v27324_v44  ;;  %v14939_v12 = vrot.slane %v14923_v42, %v25687_v56 }
0x3eff   :  { %21542 = vmatprep.subr.bf16.mxu0 %v27322_v45 }
0x3f00   :  { %v14940_v58 = vsel %vm10032_vm9, %v14939_v12, %v14935_v16 }
0x3f01   :  { %v14926_v59 = vpop.permute.xlu1 %14925 }
0x3f02   :  { %v14944_v5 = vrot.slane %v14926_v59, %v25690_v32  ;;  %21544 = vmatpush3.bf16.msra.mxu0 %v25828_v57 }
0x3f03   :  { %21551 = vmatprep.subr.bf16.mxu0 %v27322_v45 }
0x3f04   :  { %v14945_v6 = vsel %vm10039_vm10, %v14944_v5, %v14940_v58 }
0x3f05   :  { %20313 = vmatmul.mubr.msk.f32.vlgmr.msra.gmra.mrb[178].mxu1 %vm3673_vm5, %v14945_v6  ;;  %v15228_v63 = vpop.permute.xlu1 %15227 }
0x3f06   :  { %21531 = vmatpush3.bf16.msra.mxu1 %v25761_v11  ;;  %20338 = vmatprep.mubr.msk.f32.mxu1 %vm22538_vm7, %v27324_v44 }
0x3f07   :  { %21532 = vmatprep.subr.bf16.mxu1 %v27322_v45 }
0x3f0a   :  { %21534 = vmatpush3.bf16.msra.mxu1 %v25779_v14 }
0x3f0b   :  { %21535 = vmatprep.subr.bf16.mxu1 %v27322_v45 }
0x3f0e   :  { %21538 = vmatpush3.bf16.msk.msra.mxu1 %vm22859_vm4, %v25785_v9 }
0x3f0f   :  { %21545 = vmatprep.subr.bf16.mxu1 %v27322_v45 }
0x3fd0   :  { %v15121_v35 = vpop.f32.mrb[180].mxu0 }
0x3fd1   :  { %v20325_v24 = vpop.f32.mrb[181].mxu0  ;;  %v15126_v17 = vrot.slane %v15121_v35, 7 }
0x3fd8   :  { %v15014_v62 = vpop.f32.mrb[178].mxu1 }
0x3fd9   :  { %v15128_v7 = vsel %vm27317_vm13, %v15014_v62, %v15126_v17  ;;  %v20314_v39 = vpop.f32.mrb[179].mxu1 }
0x3fda   :  { %20339 = vmatmul.mubr.msk.f32.vlgmr.msra.gmra.mrb[180].mxu1 %vm5244_vm6, %v15128_v7 }
0x3fdb   :  { %21547 = vmatpush3.bf16.msra.mxu1 %v25554_v4  ;;  %20360 = vmatprep.mubr.msk.f32.mxu1 %vm22538_vm7, %v27324_v44  ;;  %v15131_v4 = vld [vmem:[%s15130_s28] sm:$0x1]  ;;  %s26989_s28 = sld [smem:[#allocation5 + $0x280]] }
0x3fdc   :  { %21548 = vmatprep.subr.bf16.mxu1 %v27322_v45  ;;  %v15141_v43 = vsel %vm27317_vm13, %v15131_v4, %v16880_v41 }
0x3fdd   :  { %v15142_v53 = vadd.f32 %v15141_v43, %v25808_v22 }
0x3fdf   :  { %21550 = vmatpush3.bf16.msra.mxu1 %v25572_v26 }
0x3fe0   :  { %21557 = vmatprep.subr.bf16.mxu1 %v27322_v45 }
0x3fe1   :  { %p14553_p6 = scmp.ge.s32.totalorder %s26989_s28, 0 }
0x3fe3   :  { %s27134_s11 = scalar_select %p14553_p6, 1, 0 }
0x40ad   :  { %v15212_v36 = vpop.f32.mrb[180].mxu1 }
0x40ae   :  { %v15216_v26 = vadd.f32 %v15212_v36, %v15142_v53  ;;  %v20340_v29 = vpop.f32.mrb[181].mxu1 }
0x40b0   :  { %v15220_v51 = vadd.f32 %v15218_v31, %v15216_v26 }
0x40b2   :  { %v16883_v40 = vmul.f32 -1.442695, %v15220_v51 }
0x40b4   :  { %22203 = vpow2.f32 %v16883_v40 }
0x40be   :  { %v22204_v60 = vpop.eup %22203 }
0x40bf   :  { %v15224_v27 = vadd.f32 1.0, %v22204_v60 }
0x40c1   :  { %22205 = vrcp.f32 %v15224_v27 }
0x40cb   :  { %v22206_v30 = vpop.eup %22205 }
0x40cc   :  { %v15230_v42 = vmul.f32 %v22206_v30, %v15228_v63  ;;  %v15237_v59 = vsub.f32 1.0, %v22206_v30  ;;  %v15243_v5 = vmul.f32 %v22206_v30, %v26554_v47 }
0x40ce   :  { %15232 = vrot.lane.b32.xlu1 %v15230_v42, %s22543_s3 }
0x4140   :  { %v15233_v23 = vpop.permute.xlu1 %15232 }
0x4141   :  { %v15235_v12 = vadd.f32 %v15233_v23, %v15216_v26 }
0x4143   :  { %22207 = vtanh.f32 %v15235_v12 }
0x414d   :  { %v22208_v0 = vpop.eup %22207 }
0x414e   :  { %15239 = vrot.lane.b32.xlu1 %v22208_v0, %s22542_s6 }
0x41c0   :  { %v15240_v16 = vpop.permute.xlu1 %15239 }
0x41c1   :  { %v15242_v58 = vmul.f32 %v15240_v16, %v15237_v59 }
0x41c3   :  { %v26698_v6 = vadd.f32 %v15243_v5, %v15242_v58 }
0x41c5   :  { %15246 = vrot.lane.b32.xlu1 %v26698_v6, %s22542_s6 }
0x4237   :  { %v15247_v35 = vpop.permute.xlu1 %15246 }
0x4238   :  { %20350 = vmatmul.mubr.msk.f32.vlgmr.msra.gmra.mrb[182].mxu0 %vm3673_vm5, %v15247_v35  ;;  %20361 = vmatmul.mubr.msk.f32.vlgmr.msra.gmra.mrb[182].mxu1 %vm3673_vm5, %v15247_v35 }
0x4239   :  { %21553 = vmatpush3.bf16.msra.mxu0 %v24233_v46  ;;  %21559 = vmatpush3.bf16.msra.mxu1 %v25604_v10 }
0x423a   :  { %21554 = vmatprep.subr.bf16.mxu0 %v27322_v45  ;;  %21560 = vmatprep.subr.bf16.mxu1 %v27322_v45 }
0x423b   :  { %20382 = vmatprep.mubr.msk.f32.mxu1 %vm22538_vm7, %v27324_v44  ;;  %20371 = vmatprep.mubr.msk.f32.mxu0 %vm22538_vm7, %v27324_v44 }
0x423d   :  { %21556 = vmatpush3.bf16.msra.mxu0 %v24243_v15  ;;  %21562 = vmatpush3.bf16.msra.mxu1 %v25624_v37 }
0x423e   :  { %21563 = vmatprep.subr.bf16.mxu0 %v27322_v45  ;;  %21573 = vmatprep.subr.bf16.mxu1 %v27322_v45 }
0x430b   :  { %v26716_v46 = vpop.f32.mrb[182].mxu0  ;;  %v15427_v10 = vpop.f32.mrb[182].mxu1 }
0x430c   :  { %v26719_v47 = vadd.f32 %v15427_v10, %v25598_v61  ;;  %v20351_v24 = vpop.f32.mrb[183].mxu0  ;;  %v20362_v17 = vpop.f32.mrb[183].mxu1 }
0x430e   :  { %v15438_v62 = vrot.slane %v26719_v47, %v25607_v13 }
0x4310   :  { %v15439_v7 = vcombine.high %v15438_v62, %v15438_v62  ;;  %v15446_v15 = vrot.slane %v15438_v62, %v25607_v13 }
0x4312   :  { %v15453_v37 = vrot.slane %v15439_v7, %v25607_v13  ;;  %v15457_v39 = vrot.slane %v15446_v15, %v23590_v54 }
0x4314   :  { %v15461_v4 = vrot.slane %v15453_v37, %v23590_v54  ;;  %v15465_v41 = vadd.f32 %v24394_v52, %v15457_v39  ;;  %v15464_v43 = vadd.f32 %v15457_v39, %v24396_v1  ;;  %v15466_v61 = vadd.f32 %v15457_v39, %v24400_v2 }
0x4315   :  { %v15467_v13 = vadd.f32 %v24398_v48, %v15457_v39 }
0x4316   :  { %22209 = vtanh.f32 %v15465_v41  ;;  %v15469_v53 = vadd.f32 %v25653_v18, %v15461_v4  ;;  %v15470_v36 = vadd.f32 %v15461_v4, %v25661_v34  ;;  %v15468_v26 = vadd.f32 %v15461_v4, %v25655_v28 }
0x4317   :  { %22211 = vtanh.f32 %v15464_v43  ;;  %v15471_v52 = vadd.f32 %v25659_v19, %v15461_v4 }
0x4318   :  { %22213 = vtanh.f32 %v15466_v61 }
0x4319   :  { %22215 = vtanh.f32 %v15469_v53 }
0x431a   :  { %22217 = vtanh.f32 %v15470_v36 }
0x431b   :  { %22219 = vtanh.f32 %v15468_v26 }
0x431c   :  { %22221 = vtanh.f32 %v15467_v13 }
0x431d   :  { %22223 = vtanh.f32 %v15471_v52 }
0x4320   :  { %v22210_v1 = vpop.eup %22209 }
0x4321   :  { %v22212_v2 = vpop.eup %22211  ;;  %v15481_v29 = vmul.f32 %v22210_v1, %v25641_v38 }
0x4322   :  { %v22214_v18 = vpop.eup %22213  ;;  %v15480_v34 = vmul.f32 %v22212_v2, %v25641_v38 }
0x4323   :  { %v22216_v31 = vpop.eup %22215  ;;  %v15491_v28 = vsel %vm3673_vm5, %v15481_v29, 0.0  ;;  %v15482_v51 = vmul.f32 %v22214_v18, %v25641_v38 }
0x4324   :  { %v22218_v40 = vpop.eup %22217  ;;  %15492 = vadd.xlane.f32.xlu0 %v15491_v28  ;;  %v15488_v48 = vsel %vm3673_vm5, %v15480_v34, 0.0  ;;  %v15485_v19 = vmul.f32 %v22216_v31, %v25641_v38 }
0x4325   :  { %v22220_v60 = vpop.eup %22219  ;;  %15489 = vadd.xlane.f32.xlu1 %v15488_v48  ;;  %v15494_v27 = vsel %vm3673_vm5, %v15482_v51, 0.0  ;;  %v15486_v23 = vmul.f32 %v22218_v40, %v25641_v38 }
0x4326   :  { %v15484_v30 = vmul.f32 %v22220_v60, %v25641_v38  ;;  %v22222_v63 = vpop.eup %22221  ;;  %v15503_v42 = vsel %vm3673_vm5, %v15485_v19, 0.0 }
0x4327   :  { %v22224_v12 = vpop.eup %22223  ;;  %v15483_v59 = vmul.f32 %v22222_v63, %v25641_v38  ;;  %v15506_v16 = vsel %vm3673_vm5, %v15486_v23, 0.0 }
0x4328   :  { %15495 = vadd.xlane.f32.xlu0 %v15494_v27  ;;  %v15500_v0 = vsel %vm3673_vm5, %v15484_v30, 0.0  ;;  %v15487_v5 = vmul.f32 %v22224_v12, %v25641_v38 }
0x4329   :  { %15504 = vadd.xlane.f32.xlu1 %v15503_v42  ;;  %v15497_v58 = vsel %vm3673_vm5, %v15483_v59, 0.0 }
0x432a   :  { %v15509_v35 = vsel %vm3673_vm5, %v15487_v5, 0.0 }
0x432c   :  { %15501 = vadd.xlane.f32.xlu0 %v15500_v0 }
0x432d   :  { %15507 = vadd.xlane.f32.xlu1 %v15506_v16 }
0x4330   :  { %15498 = vadd.xlane.f32.xlu0 %v15497_v58 }
0x4331   :  { %15510 = vadd.xlane.f32.xlu1 %v15509_v35 }
0x43b1   :  { %v15493_v10 = vpop.xlane.xlu0 %15492 }
0x43b2   :  { %v15490_v24 = vpop.xlane.xlu1 %15489  ;;  %v15527_v15 = vrot.slane %v15493_v10, %v25680_v20 }
0x43b3   :  { %v15523_v37 = vrot.slane %v15490_v24, %v25684_v49 }
0x43b5   :  { %v15496_v17 = vpop.xlane.xlu0 %15495  ;;  %v15528_v36 = vsel %vm10025_vm8, %v15527_v15, %v15523_v37 }
0x43b6   :  { %v15505_v62 = vpop.xlane.xlu1 %15504  ;;  %v15532_v38 = vrot.slane %v15496_v17, %v25687_v56 }
0x43b7   :  { %v15546_v41 = vrot.slane %v15505_v62, %v25680_v20 }
0x43b8   :  { %v15533_v52 = vsel %vm10032_vm9, %v15532_v38, %v15528_v36 }
0x43b9   :  { %v15502_v7 = vpop.xlane.xlu0 %15501 }
0x43ba   :  { %v15508_v39 = vpop.xlane.xlu1 %15507  ;;  %v15542_v4 = vrot.slane %v15502_v7, %v25684_v49 }
0x43bb   :  { %v15551_v43 = vrot.slane %v15508_v39, %v25687_v56 }
0x43bc   :  { %v15547_v61 = vsel %vm10025_vm8, %v15546_v41, %v15542_v4 }
0x43bd   :  { %v15499_v53 = vpop.xlane.xlu0 %15498  ;;  %v15552_v29 = vsel %vm10032_vm9, %v15551_v43, %v15547_v61 }
0x43be   :  { %v15511_v26 = vpop.xlane.xlu1 %15510  ;;  %v15537_v13 = vrot.slane %v15499_v53, %v25690_v32 }
0x43bf   :  { %v15556_v1 = vrot.slane %v15511_v26, %v25690_v32 }
0x43c0   :  { %v15538_v2 = vsel %vm10039_vm10, %v15537_v13, %v15533_v52 }
0x43c1   :  { %v15557_v18 = vsel %vm10039_vm10, %v15556_v1, %v15552_v29 }
0x43c2   :  { %v15558_v34 = vsel %vm10060_vm11, %v15557_v18, %v15538_v2 }
0x43c3   :  { %v15560_v31 = vsel %vm10063_vm12, %v15558_v34, -inf }
0x43c4   :  { %15561 = vmax.xlane.f32.xlu0 %v15560_v31 }
0x4451   :  { %v15562_v28 = vpop.xlane.xlu0 %15561 }
0x4452   :  { %v15567_v51 = vrot.slane %v15562_v28, %v23590_v54  ;;  %v15571_v40 = vrot.slane %v15562_v28, %v24210_v21 }
0x4454   :  { %v15574_v48 = vsub.f32 %v15490_v24, %v15567_v51  ;;  %v15575_v19 = vsub.f32 %v15493_v10, %v15567_v51  ;;  %v15578_v60 = vsub.f32 %v15502_v7, %v15571_v40  ;;  %v15580_v27 = vsub.f32 %v15508_v39, %v15571_v40 }
0x4455   :  { %v15579_v42 = vsub.f32 %v15505_v62, %v15571_v40  ;;  %v15581_v12 = vsub.f32 %v15511_v26, %v15571_v40  ;;  %v15576_v59 = vsub.f32 %v15496_v17, %v15567_v51  ;;  %v15577_v58 = vsub.f32 %v15499_v53, %v15567_v51 }
0x4456   :  { %v15582_v30 = vmul.f32 1.442695, %v15574_v48  ;;  %v15584_v63 = vmul.f32 1.442695, %v15575_v19  ;;  %v15590_v23 = vmul.f32 1.442695, %v15578_v60 }
0x4457   :  { %v15594_v0 = vmul.f32 1.442695, %v15580_v27  ;;  %v15592_v16 = vmul.f32 1.442695, %v15579_v42  ;;  %v15596_v5 = vmul.f32 1.442695, %v15581_v12 }
0x4458   :  { %22225 = vpow2.f32 %v15582_v30  ;;  %v15586_v35 = vmul.f32 1.442695, %v15576_v59  ;;  %v15588_v62 = vmul.f32 1.442695, %v15577_v58  ;;  %v10542_v42 = vsub.s32 5, %v23587_v33 }
0x4459   :  { %22227 = vpow2.f32 %v15584_v63 }
0x445a   :  { %22229 = vpow2.f32 %v15590_v23  ;;  %v22480_v23 = vld [vmem:[%s27306_s1 + $0x800] sm:$0xff]  ;;  %s16890_s1 = sld [smem:[#allocation2 + $0x380]] }
0x445b   :  { %22231 = vpow2.f32 %v15594_v0  ;;  %v26797_v12 = vrot.slane %v22480_v23, %v10542_v42 }
0x445c   :  { %22233 = vpow2.f32 %v15592_v16 }
0x445d   :  { %22235 = vpow2.f32 %v15596_v5  ;;  %v26801_v0 = vadd.f32 %v25996_v8, %v26797_v12  ;;  %v26805_v59 = vadd.f32 %v26572_v25, %v26797_v12 }
0x445e   :  { %22237 = vpow2.f32 %v15586_v35 }
0x445f   :  { %22239 = vpow2.f32 %v15588_v62  ;;  %v11405_v16 = vsel %vm10619_vm14, %v26801_v0, -inf  ;;  %v14537_v33 = vsel %vm10619_vm14, %v26805_v59, -inf }
0x4460   :  { %s15913_s12 = scalar_lea.vmem %s27307_s2, %s16890_s1 }
0x4461   :  { %v15914_v55 = vld [vmem:[%s15913_s12] sm:$0x1]  ;;  %s27048_s1 = scalar_select %p13770_p4, 1, 0 }
0x4462   :  { %v26769_v24 = vpop.eup %22225  ;;  %s27186_s12 = scalar_select %p15336_p8, 1, 0 }
0x4463   :  { %v26771_v10 = vpop.eup %22227  ;;  %15607 = vperm.xlu1 %21914, %v26769_v24  }
0x4464   :  { %15610 = vperm.xlu0 %21913, %v26771_v10   ;;  %v22230_v7 = vpop.eup %22229 }
0x4465   :  { %v22232_v17 = vpop.eup %22231 }
0x4466   :  { %v22234_v15 = vpop.eup %22233 }
0x4467   :  { %15619 = vperm.xlu1 %21914, %v22230_v7   ;;  %v22236_v37 = vpop.eup %22235 }
0x4468   :  { %15625 = vperm.xlu0 %21913, %v22232_v17   ;;  %v22238_v39 = vpop.eup %22237 }
0x4469   :  { %v22240_v4 = vpop.eup %22239 }
0x446b   :  { %15622 = vperm.xlu1 %21914, %v22234_v15  }
0x446c   :  { %15628 = vperm.xlu0 %21913, %v22236_v37  }
0x446f   :  { %15613 = vperm.xlu1 %21914, %v22238_v39  }
0x4473   :  { %15616 = vperm.xlu1 %21914, %v22240_v4  }
0x44e2   :  { %v15608_v38 = vpop.permute.xlu1 %15607 }
0x44e3   :  { %v15611_v41 = vpop.permute.xlu0 %15610  ;;  %v15633_v1 = vrot.slane %v15608_v38, %v25684_v49 }
0x44e4   :  { %v15637_v52 = vrot.slane %v15611_v41, %v25680_v20 }
0x44e6   :  { %v15620_v43 = vpop.permute.xlu1 %15619  ;;  %v15638_v51 = vsel %vm10025_vm8, %v15637_v52, %v15633_v1 }
0x44e7   :  { %v15626_v61 = vpop.permute.xlu0 %15625  ;;  %v15652_v26 = vrot.slane %v15620_v43, %v25684_v49 }
0x44e8   :  { %v15661_v29 = vrot.slane %v15626_v61, %v25687_v56 }
0x44ea   :  { %v15623_v53 = vpop.permute.xlu1 %15622 }
0x44eb   :  { %v15656_v36 = vrot.slane %v15623_v53, %v25680_v20  ;;  %v15629_v18 = vpop.permute.xlu0 %15628 }
0x44ec   :  { %v15666_v40 = vrot.slane %v15629_v18, %v25690_v32 }
0x44ed   :  { %v15657_v2 = vsel %vm10025_vm8, %v15656_v36, %v15652_v26 }
0x44ee   :  { %v15614_v13 = vpop.permute.xlu1 %15613  ;;  %v15662_v28 = vsel %vm10032_vm9, %v15661_v29, %v15657_v2 }
0x44ef   :  { %v15642_v34 = vrot.slane %v15614_v13, %v25687_v56  ;;  %v15667_v27 = vsel %vm10039_vm10, %v15666_v40, %v15662_v28 }
0x44f1   :  { %v15643_v19 = vsel %vm10032_vm9, %v15642_v34, %v15638_v51 }
0x44f2   :  { %v15617_v31 = vpop.permute.xlu1 %15616 }
0x44f3   :  { %v15647_v48 = vrot.slane %v15617_v31, %v25690_v32 }
0x44f5   :  { %v15648_v60 = vsel %vm10039_vm10, %v15647_v48, %v15643_v19 }
0x44f6   :  { %v15668_v30 = vsel %vm10060_vm11, %v15667_v27, %v15648_v60 }
0x44f7   :  { %v15670_v63 = vsel %vm10063_vm12, %v15668_v30, 0.0 }
0x44f8   :  { %15671 = vadd.xlane.f32.xlu1 %v15670_v63 }
0x4509   :  { %16010 = vrot.lane.b32.xlu1 %v26719_v47, %s22536_s9  ;;  %s16891_s9 = sld [smem:[#allocation2 + $0x381]] }
0x450f   :  { %s15916_s15 = scalar_lea.vmem %s27307_s2, %s16891_s9  ;;  %s10633_s2 = sld [smem:[#allocation5]] }
0x4510   :  { %s27070_s9 = scalar_select %p13783_p5, 1, 0 }
0x4515   :  { %p10636_p10 = scmp.ge.s32.totalorder %s10633_s2, 0 }
0x452d   :  { %11406 = vmax.xlane.f32.xlu1 %v11405_v16 }
0x4531   :  { %14538 = vmax.xlane.f32.xlu1 %v14537_v33 }
0x4585   :  { %v15672_v5 = vpop.xlane.xlu1 %15671 }
0x4586   :  { %v15681_v58 = vrot.slane %v15672_v5, %v24210_v21  ;;  %v15677_v8 = vrot.slane %v15672_v5, %v23590_v54 }
0x4588   :  { %22241 = vrcp.f32 %v15681_v58 }
0x4589   :  { %22243 = vrcp.f32 %v15677_v8  ;;  %v16011_v23 = vpop.permute.xlu1 %16010 }
0x4592   :  { %v22242_v35 = vpop.eup %22241 }
0x4593   :  { %v15690_v62 = vmul.f32 %v22242_v35, %v22230_v7  ;;  %v15691_v25 = vmul.f32 %v22242_v35, %v22234_v15  ;;  %v15692_v38 = vmul.f32 %v22242_v35, %v22232_v17  ;;  %v22244_v41 = vpop.eup %22243  ;;  %v15693_v53 = vmul.f32 %v22242_v35, %v22236_v37 }
0x4594   :  { %v15685_v43 = vmul.f32 %v22244_v41, %v26769_v24  ;;  %v15686_v61 = vmul.f32 %v22244_v41, %v26771_v10  ;;  %v15687_v21 = vmul.f32 %v22244_v41, %v22238_v39  ;;  %v15688_v54 = vmul.f32 %v22244_v41, %v22240_v4  ;;  %v27326_v41 = vld [vmem:[#allocation12_spill] sm:$0xff] }
0x4595   :  { %15806 = vperm.xlu0 %21913, %v15690_v62  }
0x4599   :  { %15809 = vperm.xlu0 %21913, %v15691_v25  }
0x459d   :  { %15812 = vperm.xlu0 %21913, %v15692_v38   ;;  %v26863_v38 = vadd.f32 %v25852_v3, %v26797_v12 }
0x45a1   :  { %15699 = vperm.xlu0 %21913, %v15685_v43   ;;  %v26867_v43 = vadd.f32 %v27326_v41, %v26797_v12 }
0x45a5   :  { %15702 = vperm.xlu0 %21913, %v15686_v61   ;;  %v10620_v61 = vsel %vm10619_vm14, %v26863_v38, -inf }
0x45a9   :  { %15815 = vperm.xlu0 %21913, %v15693_v53   ;;  %v27327_v53 = vld [vmem:[#allocation13_spill] sm:$0xff] }
0x45ad   :  { %15705 = vperm.xlu0 %21913, %v15687_v21   ;;  %v26873_v21 = vadd.f32 %v27327_v53, %v26797_v12 }
0x45b1   :  { %15708 = vperm.xlu0 %21913, %v15688_v54   ;;  %v27328_v54 = vld [vmem:[#allocation14_spill] sm:$0xff] }
0x45b2   :  { %v26879_v3 = vadd.f32 %v27328_v54, %v26797_v12 }
0x45b5   :  { %16000 = vrot.lane.b32.xlu0 %v26719_v47, %s22542_s6 }
0x4614   :  { %v15807_v7 = vpop.permute.xlu0 %15806 }
0x4615   :  { %v15820_v10 = vrot.slane %v15807_v7, %v25684_v49  ;;  %v12971_v7 = vsel %vm10619_vm14, %v26873_v21, -inf }
0x4618   :  { %v15810_v15 = vpop.permute.xlu0 %15809 }
0x4619   :  { %v15824_v24 = vrot.slane %v15810_v15, %v25680_v20  ;;  %v26885_v15 = vadd.f32 %v26716_v46, %v26797_v12 }
0x461b   :  { %v15825_v39 = vsel %vm10025_vm8, %v15824_v24, %v15820_v10 }
0x461c   :  { %v15813_v17 = vpop.permute.xlu0 %15812 }
0x461d   :  { %v15829_v13 = vrot.slane %v15813_v17, %v25687_v56  ;;  %v13754_v17 = vsel %vm10619_vm14, %v26879_v3, -inf }
0x461f   :  { %v15830_v52 = vsel %vm10032_vm9, %v15829_v13, %v15825_v39 }
0x4620   :  { %v15700_v36 = vpop.permute.xlu0 %15699 }
0x4621   :  { %v15713_v18 = vrot.slane %v15700_v36, %v25684_v49  ;;  %v15320_v36 = vsel %vm10619_vm14, %v26885_v15, -inf }
0x4624   :  { %v15703_v26 = vpop.permute.xlu0 %15702 }
0x4625   :  { %v15717_v2 = vrot.slane %v15703_v26, %v25680_v20 }
0x4627   :  { %v15718_v31 = vsel %vm10025_vm8, %v15717_v2, %v15713_v18 }
0x4628   :  { %v15816_v37 = vpop.permute.xlu0 %15815 }
0x4629   :  { %v15834_v4 = vrot.slane %v15816_v37, %v25690_v32 }
0x462b   :  { %v15835_v47 = vsel %vm10039_vm10, %v15834_v4, %v15830_v52 }
0x462c   :  { %20383 = vmatmul.mubr.msk.f32.vlgmr.msra.gmra.mrb[184].mxu1 %vm3673_vm5, %v15835_v47  ;;  %v15706_v1 = vpop.permute.xlu0 %15705 }
0x462d   :  { %21575 = vmatpush3.bf16.msra.mxu1 %v25822_v50  ;;  %20408 = vmatprep.mubr.msk.f32.mxu1 %vm22538_vm7, %v27324_v44  ;;  %v15722_v29 = vrot.slane %v15706_v1, %v25687_v56 }
0x462e   :  { %21576 = vmatprep.subr.bf16.mxu1 %v27322_v45 }
0x462f   :  { %v15723_v20 = vsel %vm10032_vm9, %v15722_v29, %v15718_v31 }
0x4630   :  { %v15709_v34 = vpop.permute.xlu0 %15708 }
0x4631   :  { %v15727_v28 = vrot.slane %v15709_v34, %v25690_v32  ;;  %21578 = vmatpush3.bf16.msra.mxu1 %v25828_v57 }
0x4633   :  { %v15728_v50 = vsel %vm10039_vm10, %v15727_v28, %v15723_v20 }
0x4634   :  { %20372 = vmatmul.mubr.msk.f32.vlgmr.msra.gmra.mrb[184].mxu0 %vm3673_vm5, %v15728_v50  ;;  %v16001_v19 = vpop.permute.xlu0 %16000 }
0x4635   :  { %21565 = vmatpush3.bf16.msra.mxu0 %v25761_v11  ;;  %20397 = vmatprep.mubr.msk.f32.mxu0 %vm22538_vm7, %v27324_v44 }
0x4636   :  { %21566 = vmatprep.subr.bf16.mxu0 %v27322_v45 }
0x4639   :  { %21568 = vmatpush3.bf16.msra.mxu0 %v25779_v14  ;;  %v16892_v14 = vld [vmem:[%s15916_s15] ss:$0 sm:$0xff]  ;;  %s16897_s15 = sld [smem:[#allocation5 + $0x380]] }
0x463a   :  { %21569 = vmatprep.subr.bf16.mxu0 %v27322_v45 }
0x463d   :  { %21572 = vmatpush3.bf16.msk.msra.mxu0 %vm22859_vm4, %v25785_v9  ;;  %v15924_v9 = vsel %vm27317_vm13, %v15914_v55, %v16892_v14 }
0x463e   :  { %v15925_v45 = vadd.f32 %v15924_v9, %v25808_v22 }
0x46ff   :  { %v15904_v49 = vpop.f32.mrb[184].mxu1 }
0x4700   :  { %v20384_v56 = vpop.f32.mrb[185].mxu1  ;;  %v15909_v32 = vrot.slane %v15904_v49, 7 }
0x4707   :  { %v15797_v57 = vpop.f32.mrb[184].mxu0 }
0x4708   :  { %v15911_v51 = vsel %vm27317_vm13, %v15797_v57, %v15909_v32  ;;  %v20373_v11 = vpop.f32.mrb[185].mxu0  ;;  %v26914_v57 = vpop.xlane.xlu1 %11406 }
0x4709   :  { %20398 = vmatmul.mubr.msk.f32.vlgmr.msra.gmra.mrb[186].mxu0 %vm5244_vm6, %v15911_v51  ;;  %v11408_v51 = vsub.f32 %v26801_v0, %v26914_v57  ;;  %vm10656_vm6 = vcmask 320513  }
0x470b   :  { %v11409_v11 = vmul.f32 1.442695, %v11408_v51 }
0x470c   :  { %v26920_v14 = vpop.xlane.xlu1 %14538 }
0x470d   :  { %v14540_v9 = vsub.f32 %v26805_v59, %v26920_v14 }
0x47dc   :  { %v15995_v44 = vpop.f32.mrb[186].mxu0 }
0x47dd   :  { %v15999_v40 = vadd.f32 %v15995_v44, %v15925_v45  ;;  %v20399_v48 = vpop.f32.mrb[187].mxu0  ;;  %v14541_v44 = vmul.f32 1.442695, %v14540_v9 }
0x47df   :  { %v16003_v60 = vadd.f32 %v16001_v19, %v15999_v40 }
0x47e1   :  { %v16895_v27 = vmul.f32 -1.442695, %v16003_v60 }
0x47e3   :  { %22245 = vpow2.f32 %v16895_v27 }
0x47ed   :  { %v22246_v30 = vpop.eup %22245 }
0x47ee   :  { %v16007_v63 = vadd.f32 1.0, %v22246_v30 }
0x47f0   :  { %22247 = vrcp.f32 %v16007_v63 }
0x47fa   :  { %v22248_v42 = vpop.eup %22247 }
0x47fb   :  { %v16013_v16 = vmul.f32 %v22248_v42, %v16011_v23  ;;  %v16020_v22 = vsub.f32 1.0, %v22248_v42  ;;  %v16026_v35 = vmul.f32 %v22248_v42, %v26698_v6  ;;  %v12188_v6 = vsel %vm10619_vm14, %v26867_v43, -inf }
0x47fd   :  { %16015 = vrot.lane.b32.xlu0 %v16013_v16, %s22543_s3  ;;  %s26939_s3 = sld [smem:[#allocation5 + $0x1]] }
0x4803   :  { %p10650_p11 = scmp.ge.s32.totalorder %s26939_s3, 0 }
0x4805   :  { %s10651_s20 = scalar_select %p10650_p11, 1, 0 }
0x4806   :  { %p16119_p11 = scmp.ge.s32.totalorder %s16897_s15, 0 }
0x486f   :  { %v16016_v33 = vpop.permute.xlu0 %16015 }
0x4870   :  { %v16018_v5 = vadd.f32 %v16016_v33, %v15999_v40 }
0x4872   :  { %22249 = vtanh.f32 %v16018_v5 }
0x487c   :  { %v22250_v58 = vpop.eup %22249 }
0x487d   :  { %16022 = vrot.lane.b32.xlu0 %v22250_v58, %s22542_s6 }
0x48ef   :  { %v16023_v8 = vpop.permute.xlu0 %16022 }
0x48f0   :  { %v16025_v62 = vmul.f32 %v16023_v8, %v16020_v22  ;;  %v27329_v8 = vld [vmem:[#allocation11_spill] sm:$0xff] }
0x48f2   :  { %v16027_v25 = vadd.f32 %v16026_v35, %v16025_v62 }
0x48f4   :  { %16029 = vrot.lane.b32.xlu0 %v16027_v25, %s22542_s6  ;;  %s10637_s6 = scalar_select %p10636_p10, 1, 0 }
0x48f5   :  { %p16132_p10 = scmp.ge.s32.totalorder %s16898_s14, 0 }
0x48f6   :  { %v10638_v33 = vstv %s10637_s6  ;;  %s16120_s6 = scalar_select %p16119_p11, 1, 0 }
0x48f7   :  { %vm10639_vm0 = vcmp.eq.s32.totalorder %v10638_v33, 1 }
0x4913   :  { %10621 = vmax.xlane.f32.xlu0 %v10620_v61 }
0x4917   :  { %12189 = vmax.xlane.f32.xlu0 %v12188_v6 }
0x491b   :  { %12972 = vmax.xlane.f32.xlu0 %v12971_v7 }
0x491f   :  { %13755 = vmax.xlane.f32.xlu0 %v13754_v17  ;;  %v10648_v17 = vstv %s26939_s3 }
0x4920   :  { %vm26978_vm3 = vcmp.eq.s32.totalorder %v27329_v8, %v10648_v17 }
0x4923   :  { %15321 = vmax.xlane.f32.xlu0 %v15320_v36  ;;  %v10652_v36 = vstv %s10651_s20 }
0x4924   :  { %vm26982_vm4 = vcmp.eq.s32.totalorder %v10652_v36, 1 }
0x4966   :  { %v16030_v26 = vpop.permute.xlu0 %16029 }
0x4967   :  { %20409 = vmatmul.mubr.msk.f32.vlgmr.msra.gmra.mrb[186].mxu1 %vm3673_vm5, %v16030_v26  ;;  %vm10654_vm5 = vmand %vm26978_vm3, %vm26982_vm4 }
0x49a0   :  { %v26892_v24 = vpop.xlane.xlu0 %10621 }
0x49a1   :  { %v10623_v13 = vsub.f32 %v26863_v38, %v26892_v24 }
0x49a3   :  { %v10624_v10 = vmul.f32 1.442695, %v10623_v13 }
0x49a4   :  { %v26896_v37 = vpop.xlane.xlu0 %12189 }
0x49a5   :  { %22251 = vpow2.f32 %v10624_v10  ;;  %v12191_v46 = vsub.f32 %v26867_v43, %v26896_v37 }
0x49a7   :  { %v12192_v39 = vmul.f32 1.442695, %v12191_v46 }
0x49a8   :  { %v26900_v4 = vpop.xlane.xlu0 %12972 }
0x49a9   :  { %22253 = vpow2.f32 %v12192_v39  ;;  %v12974_v55 = vsub.f32 %v26873_v21, %v26900_v4 }
0x49ab   :  { %v12975_v45 = vmul.f32 1.442695, %v12974_v55 }
0x49ac   :  { %v26902_v52 = vpop.xlane.xlu0 %13755 }
0x49ad   :  { %v13757_v47 = vsub.f32 %v26879_v3, %v26902_v52 }
0x49af   :  { %v22252_v1 = vpop.eup %22251  ;;  %v13758_v2 = vmul.f32 1.442695, %v13757_v47 }
0x49b0   :  { %v26906_v29 = vpop.xlane.xlu0 %15321  ;;  %v10626_v18 = vsel %vm10619_vm14, %v22252_v1, 0.0  ;;  %v11419_v1 = vstv %s26945_s18 }
0x49b1   :  { %22255 = vpow2.f32 %v13758_v2  ;;  %v15323_v34 = vsub.f32 %v26885_v15, %v26906_v29  ;;  %10627 = vadd.xlane.f32.xlu0 %v10626_v18  ;;  %v11423_v2 = vstv %s26975_s4  ;;  %v11432_v18 = vstv %s26948_s19 }
0x49b2   :  { %vm27025_vm7 = vcmp.eq.s32.totalorder %v27329_v8, %v11419_v1  ;;  %vm27029_vm8 = vcmp.eq.s32.totalorder %v11423_v2, 1  ;;  %vm27038_vm9 = vcmp.eq.s32.totalorder %v27329_v8, %v11432_v18 }
0x49b3   :  { %v22254_v31 = vpop.eup %22253  ;;  %v15324_v28 = vmul.f32 1.442695, %v15323_v34  ;;  %v11436_v34 = vstv %s26986_s27 }
0x49b4   :  { %v12194_v20 = vsel %vm10619_vm14, %v22254_v31, 0.0  ;;  %v12202_v31 = vstv %s26941_s16  ;;  %vm27042_vm10 = vcmp.eq.s32.totalorder %v11436_v34, 1  ;;  %v14551_v34 = vstv %s26989_s28 }
0x49b5   :  { %22257 = vpow2.f32 %v15324_v28  ;;  %12195 = vadd.xlane.f32.xlu0 %v12194_v20  ;;  %v12206_v28 = vstv %s26969_s25  ;;  %vm27051_vm11 = vcmp.eq.s32.totalorder %v27329_v8, %v12202_v31  ;;  %v14555_v31 = vstv %s27134_s11 }
0x49b6   :  { %22259 = vpow2.f32 %v11409_v11  ;;  %vm27055_vm12 = vcmp.eq.s32.totalorder %v12206_v28, 1 }
0x49b7   :  { %22261 = vpow2.f32 %v12975_v45  ;;  %v15338_v45 = vstv %s27186_s12 }
0x49b8   :  { %22263 = vpow2.f32 %v14541_v44 }
0x49bb   :  { %v22256_v50 = vpop.eup %22255 }
0x49bc   :  { %v13760_v49 = vsel %vm10619_vm14, %v22256_v50, 0.0 }
0x49bd   :  { %13761 = vadd.xlane.f32.xlu0 %v13760_v49  ;;  %v12215_v49 = vstv %s26943_s17  ;;  %s22544_s17 = smov [#allocation7]  }
0x49be   :  { %s16168_s18 = sshll.u32 %s22544_s17, 4  ;;  %s16169_s18 = int_to_ptr.vmem [resolvable:$true] %s16168_s18 }
0x49bf   :  { %v22258_v56 = vpop.eup %22257  ;;  %s22505_s20 = scalar_lea.vmem %s16169_s18, 16  ;;  %p22510_p13 = scmp.lt.s32.totalorder %s16169_s18, %s16169_s18 }
0x49c0   :  { %v15326_v32 = vsel %vm10619_vm14, %v22258_v56, 0.0  ;;  %v22260_v27 = vpop.eup %22259  ;;  %v12219_v56 = vstv %s26973_s26  ;;  %p22506_p12 = scmp.ne.s32.totalorder %s16169_s18, %s22505_s20 }
0x49c1   :  { %15327 = vadd.xlane.f32.xlu0 %v15326_v32  ;;  %v11411_v63 = vsel %vm10619_vm14, %v22260_v27, 0.0  ;;  %v22262_v42 = vpop.eup %22261 }
0x49c2   :  { %v12977_v23 = vsel %vm10619_vm14, %v22262_v42, 0.0  ;;  %v22264_v16 = vpop.eup %22263 }
0x49c3   :  { %v14543_v58 = vsel %vm10619_vm14, %v22264_v16, 0.0  ;;  %v12985_v16 = vstv %s26955_s21  ;;  %s22509_s21 = scalar_lea.vmem %s16169_s18, 32 }
0x49c4   :  { %p22511_p0 = scmp.lt.s32.totalorder %s22509_s21, %s22505_s20 }
0x49c6   :  { %p22512_p1 = por %p22511_p0, %p22510_p13 }
0x49c8   :  { %p22513_p2 = pnand %p22512_p1, %p22506_p12 }
0x4a3a   :  { %v16099_v40 = vpop.f32.mrb[186].mxu1 }
0x4a3b   :  { %v26925_v48 = vadd.f32 %v16099_v40, %v26797_v12  ;;  %v20410_v19 = vpop.f32.mrb[187].mxu1  ;;  %v10634_v12 = vstv %s10633_s2  ;;  %s16133_s2 = scalar_select %p16132_p10, 1, 0 }
0x4a3c   :  { %vm10635_vm15 = vcmp.eq.s32.totalorder %v27329_v8, %v10634_v12  ;;  %v12989_v12 = vstv %s27015_s8  ;;  %v15347_v19 = vstv %s27008_s7 }
0x4a3d   :  { %v16103_v60 = vsel %vm10619_vm14, %v26925_v48, -inf  ;;  %vm10640_vm1 = vmand %vm10635_vm15, %vm10639_vm0  ;;  %vm27064_vm15 = vcmp.eq.s32.totalorder %v12219_v56, 1  ;;  %vm27106_vm13 = vcmp.eq.s32.totalorder %v12989_v12, 1 }
0x4a3e   :  { %16104 = vmax.xlane.f32.xlu1 %v16103_v60  ;;  %v10628_v30 = vpop.xlane.xlu0 %10627  ;;  %vm11425_vm0 = vmand %vm27025_vm7, %vm27029_vm8  ;;  %v15351_v60 = vstv %s15350_s13 }
0x4a3f   :  { %22265 = vlog2.f32 %v10628_v30  ;;  %vm27358_vm7 = vmand %vm27051_vm11, %vm27055_vm12 }
0x4a42   :  { %11412 = vadd.xlane.f32.xlu1 %v11411_v63  ;;  %v12196_v61 = vpop.xlane.xlu0 %12195 }
0x4a43   :  { %22267 = vlog2.f32 %v12196_v61  ;;  %v13772_v61 = vstv %s27048_s1 }
0x4a44   :  { %vm27168_vm12 = vcmp.eq.s32.totalorder %v13772_v61, 1  ;;  %v16134_v61 = vstv %s16133_s2 }
0x4a46   :  { %12978 = vadd.xlane.f32.xlu1 %v12977_v23 }
0x4a49   :  { %v22266_v5 = vpop.eup %22265 }
0x4a4a   :  { %v10630_v22 = vmul.f32 0.6931472, %v22266_v5  ;;  %14544 = vadd.xlane.f32.xlu1 %v14543_v58  ;;  %v13762_v7 = vpop.xlane.xlu0 %13761  ;;  %v12998_v5 = vstv %s26958_s22  ;;  %v13002_v58 = vstv %s27035_s10 }
0x4a4b   :  { %vm27124_vm4 = vcmp.eq.s32.totalorder %v27329_v8, %v12998_v5  ;;  %vm27128_vm3 = vcmp.eq.s32.totalorder %v13002_v58, 1 }
0x4a4c   :  { %v10631_v35 = vadd.f32 %v10630_v22, %v26892_v24 }
0x4a4d   :  { %v22268_v26 = vpop.eup %22267 }
0x4a4e   :  { %v26935_v62 = vsub.f32 %v26863_v38, %v10631_v35  ;;  %v12198_v46 = vmul.f32 0.6931472, %v22268_v26  ;;  %v15328_v39 = vpop.xlane.xlu0 %15327 }
0x4a50   :  { %v10641_v25 = vsel %vm10640_vm1, %v26935_v62, 0.0  ;;  %v12199_v50 = vadd.f32 %v12198_v46, %v26896_v37  ;;  %v10655_v11 = vsel %vm10654_vm5, %v26935_v62, 0.0  ;;  %vm11438_vm1 = vmand %vm27038_vm9, %vm27042_vm10  ;;  %v13768_v62 = vstv %s26961_s23 }
0x4a51   :  { %v10643_v41 = vsel %vm10642_vm2, %v10641_v25, 0.0  ;;  %v10657_v23 = vsel %vm10656_vm6, %v10655_v11, 0.0  ;;  %v13781_v25 = vstv %s26964_s24  ;;  %vm27102_vm5 = vcmp.eq.s32.totalorder %v27329_v8, %v12985_v16  ;;  %vm13004_vm10 = vmand %vm27124_vm4, %vm27128_vm3 }
0x4a52   :  { %10644 = vadd.xlane.f32.xlu0 %v10643_v41  ;;  %vm12991_vm9 = vmand %vm27102_vm5, %vm27106_vm13  ;;  %vm27164_vm11 = vcmp.eq.s32.totalorder %v27329_v8, %v13768_v62  ;;  %vm27214_vm13 = vcmp.eq.s32.totalorder %v27329_v8, %v14551_v34  ;;  %vm27218_vm5 = vcmp.eq.s32.totalorder %v14555_v31, 1 }
0x4acb   :  { %v26950_v38 = vpop.xlane.xlu1 %16104 }
0x4acc   :  { %v16106_v53 = vsub.f32 %v26925_v48, %v26950_v38 }
0x4ace   :  { %v16107_v6 = vmul.f32 1.442695, %v16106_v53 }
0x4acf   :  { %v11413_v54 = vpop.xlane.xlu1 %11412 }
0x4ad0   :  { %22269 = vpow2.f32 %v16107_v6 }
0x4ad1   :  { %22271 = vlog2.f32 %v11413_v54 }
0x4ad2   :  { %22273 = vlog2.f32 %v13762_v7 }
0x4ad3   :  { %v12979_v24 = vpop.xlane.xlu1 %12978 }
0x4ad4   :  { %22275 = vlog2.f32 %v12979_v24  ;;  %v13785_v24 = vstv %s27070_s9 }
0x4ad7   :  { %v14545_v47 = vpop.xlane.xlu1 %14544 }
0x4ad8   :  { %22277 = vlog2.f32 %v14545_v47 }
0x4ad9   :  { %22279 = vlog2.f32 %v15328_v39 }
0x4ada   :  { %v22270_v20 = vpop.eup %22269 }
0x4adb   :  { %v22272_v32 = vpop.eup %22271  ;;  %v16109_v51 = vsel %vm10619_vm14, %v22270_v20, 0.0  ;;  %vm27060_vm14 = vcmp.eq.s32.totalorder %v27329_v8, %v12215_v49  ;;  %v14568_v49 = vstv %s27146_s0 }
0x4adc   :  { %v11415_v9 = vmul.f32 0.6931472, %v22272_v32  ;;  %16110 = vadd.xlane.f32.xlu1 %v16109_v51  ;;  %v22274_v40 = vpop.eup %22273  ;;  %vm27359_vm8 = vmand %vm27060_vm14, %vm27064_vm15  ;;  %vm27173_vm14 = vcmp.eq.s32.totalorder %v27329_v8, %v13781_v25  ;;  %vm27178_vm15 = vcmp.eq.s32.totalorder %v13785_v24, 1  ;;  %vm27227_vm4 = vcmp.eq.s32.totalorder %v14568_v49, 1 }
0x4add   :  { %v13764_v22 = vmul.f32 0.6931472, %v22274_v40 }
0x4ade   :  { %v22276_v63 = vpop.eup %22275  ;;  %v11416_v42 = vadd.f32 %v11415_v9, %v26914_v57  ;;  %v12200_v57 = vsub.f32 %v26867_v43, %v12199_v50  ;;  %v14564_v50 = vstv %s26992_s29  ;;  %v15334_v9 = vstv %s27001_s30 }
0x4adf   :  { %v12981_v33 = vmul.f32 0.6931472, %v22276_v63  ;;  %v13765_v10 = vadd.f32 %v13764_v22, %v26902_v52  ;;  %vm27223_vm3 = vcmp.eq.s32.totalorder %v27329_v8, %v14564_v50  ;;  %v16130_v43 = vstv %s16898_s14 }
0x4ae0   :  { %10658 = vadd.xlane.f32.xlu1 %v10657_v23  ;;  %v11417_v35 = vsub.f32 %v26801_v0, %v11416_v42  ;;  %v12209_v26 = vsel %vm27358_vm7, %v12200_v57, 0.0  ;;  %v12222_v39 = vsel %vm27359_vm8, %v12200_v57, 0.0  ;;  %vm14557_vm7 = vmand %vm27214_vm13, %vm27218_vm5 }
0x4ae1   :  { %v12982_v41 = vadd.f32 %v12981_v33, %v26900_v4  ;;  %v12210_v2 = vsel %vm10642_vm2, %v12209_v26, 0.0  ;;  %v12223_v20 = vsel %vm10656_vm6, %v12222_v39, 0.0  ;;  %v13766_v11 = vsub.f32 %v26879_v3, %v13765_v10  ;;  %vm14570_vm8 = vmand %vm27223_vm3, %vm27227_vm4 }
0x4ae2   :  { %v22278_v4 = vpop.eup %22277  ;;  %v11426_v53 = vsel %vm11425_vm0, %v11417_v35, 0.0  ;;  %v11439_v6 = vsel %vm11438_vm1, %v11417_v35, 0.0  ;;  %vm13774_vm0 = vmand %vm27164_vm11, %vm27168_vm12  ;;  %vm27256_vm11 = vcmp.eq.s32.totalorder %v27329_v8, %v15347_v19  ;;  %vm27260_vm12 = vcmp.eq.s32.totalorder %v15351_v60, 1 }
0x4ae3   :  { %v11427_v17 = vsel %vm10642_vm2, %v11426_v53, 0.0  ;;  %v11440_v36 = vsel %vm10656_vm6, %v11439_v6, 0.0  ;;  %v22280_v13 = vpop.eup %22279  ;;  %v14547_v46 = vmul.f32 0.6931472, %v22278_v4  ;;  %v12983_v47 = vsub.f32 %v26873_v21, %v12982_v41  ;;  %vm13787_vm1 = vmand %vm27173_vm14, %vm27178_vm15 }
0x4ae4   :  { %11428 = vadd.xlane.f32.xlu0 %v11427_v17  ;;  %11441 = vadd.xlane.f32.xlu1 %v11440_v36  ;;  %v15330_v28 = vmul.f32 0.6931472, %v22280_v13  ;;  %v13775_v30 = vsel %vm13774_vm0, %v13766_v11, 0.0  ;;  %v13788_v63 = vsel %vm13787_vm1, %v13766_v11, 0.0  ;;  %vm15353_vm15 = vmand %vm27256_vm11, %vm27260_vm12  ;;  %v16117_v4 = vstv %s16897_s15 }
0x4ae5   :  { %v14548_v56 = vadd.f32 %v14547_v46, %v26920_v14  ;;  %v12992_v32 = vsel %vm12991_vm9, %v12983_v47, 0.0  ;;  %v13005_v51 = vsel %vm13004_vm10, %v12983_v47, 0.0  ;;  %vm27247_vm9 = vcmp.eq.s32.totalorder %v27329_v8, %v15334_v9  ;;  %v10645_v46 = vpop.xlane.xlu0 %10644 }
0x4ae6   :  { %v12993_v44 = vsel %vm10642_vm2, %v12992_v32, 0.0  ;;  %v13006_v40 = vsel %vm10656_vm6, %v13005_v51, 0.0  ;;  %v15331_v27 = vadd.f32 %v15330_v28, %v26906_v29  ;;  %vm27251_vm10 = vcmp.eq.s32.totalorder %v15338_v45, 1 }
0x4ae7   :  { %v14549_v42 = vsub.f32 %v26805_v59, %v14548_v56  ;;  %v13776_v12 = vsel %vm10642_vm2, %v13775_v30, 0.0  ;;  %v13789_v33 = vsel %vm10656_vm6, %v13788_v63, 0.0  ;;  %vm15340_vm14 = vmand %vm27247_vm9, %vm27251_vm10  ;;  %v16121_v53 = vstv %s16120_s6 }
0x4ae8   :  { %12211 = vadd.xlane.f32.xlu0 %v12210_v2  ;;  %12224 = vadd.xlane.f32.xlu1 %v12223_v20  ;;  %v15332_v58 = vsub.f32 %v26885_v15, %v15331_v27  ;;  %vm16131_vm0 = vcmp.eq.s32.totalorder %v27329_v8, %v16130_v43  ;;  %vm16135_vm1 = vcmp.eq.s32.totalorder %v16134_v61, 1  ;;  %vm16118_vm13 = vcmp.eq.s32.totalorder %v27329_v8, %v16117_v4 }
0x4ae9   :  { %v14558_v57 = vsel %vm14557_vm7, %v14549_v42, 0.0  ;;  %v14571_v5 = vsel %vm14570_vm8, %v14549_v42, 0.0  ;;  %vm16122_vm5 = vcmp.eq.s32.totalorder %v16121_v53, 1  ;;  %vm16136_vm3 = vmand %vm16131_vm0, %vm16135_vm1  ;;  %v10646_v49 = vsub.f32 0.0, %v10645_v46 }
0x4aea   :  { %v14559_v22 = vsel %vm10642_vm2, %v14558_v57, 0.0  ;;  %v14572_v35 = vsel %vm10656_vm6, %v14571_v5, 0.0  ;;  %v15341_v62 = vsel %vm15340_vm14, %v15332_v58, 0.0  ;;  %v15354_v25 = vsel %vm15353_vm15, %v15332_v58, 0.0  ;;  %vm16123_vm4 = vmand %vm16118_vm13, %vm16122_vm5 }
0x4aeb   :  { %v15342_v15 = vsel %vm10642_vm2, %v15341_v62, 0.0  ;;  %v15355_v41 = vsel %vm10656_vm6, %v15354_v25, 0.0  ;;  %vm16144_vm14 = vcmask 1024   ;;  %vm16160_vm15 = vcmask 0  }
0x4aec   :  { %12994 = vadd.xlane.f32.xlu0 %v12993_v44  ;;  %13007 = vadd.xlane.f32.xlu1 %v13006_v40 }
0x4af0   :  { %13777 = vadd.xlane.f32.xlu0 %v13776_v12  ;;  %13790 = vadd.xlane.f32.xlu1 %v13789_v33 }
0x4af4   :  { %14560 = vadd.xlane.f32.xlu0 %v14559_v22  ;;  %14573 = vadd.xlane.f32.xlu1 %v14572_v35 }
0x4af8   :  { %15343 = vadd.xlane.f32.xlu0 %v15342_v15  ;;  %15356 = vadd.xlane.f32.xlu1 %v15355_v41 }
0x4b69   :  { %v16111_v0 = vpop.xlane.xlu1 %16110 }
0x4b6a   :  { %22281 = vlog2.f32 %v16111_v0 }
0x4b6d   :  { %v10659_v10 = vpop.xlane.xlu1 %10658 }
0x4b6e   :  { %v10660_v28 = vsub.f32 0.0, %v10659_v10 }
0x4b71   :  { %v11429_v39 = vpop.xlane.xlu0 %11428  ;;  %v11442_v47 = vpop.xlane.xlu1 %11441 }
0x4b72   :  { %v11430_v18 = vsub.f32 0.0, %v11429_v39 }
0x4b74   :  { %v22282_v6 = vpop.eup %22281 }
0x4b75   :  { %v16113_v54 = vmul.f32 0.6931472, %v22282_v6  ;;  %v12212_v8 = vpop.xlane.xlu0 %12211  ;;  %v12225_v52 = vpop.xlane.xlu1 %12224 }
0x4b76   :  { %v12213_v20 = vsub.f32 0.0, %v12212_v8  ;;  %v12226_v50 = vsub.f32 0.0, %v12225_v52 }
0x4b77   :  { %v16114_v7 = vadd.f32 %v16113_v54, %v26950_v38 }
0x4b79   :  { %v16115_v17 = vsub.f32 %v26925_v48, %v16114_v7  ;;  %v12995_v1 = vpop.xlane.xlu0 %12994  ;;  %v13008_v38 = vpop.xlane.xlu1 %13007  ;;  %v11443_v48 = vsub.f32 0.0, %v11442_v47 }
0x4b7a   :  { %v12996_v32 = vsub.f32 0.0, %v12995_v1  ;;  %v13009_v51 = vsub.f32 0.0, %v13008_v38 }
0x4b7b   :  { %v16137_v36 = vsel %vm16136_vm3, %v16115_v17, 0.0  ;;  %v16124_v26 = vsel %vm16123_vm4, %v16115_v17, 0.0 }
0x4b7c   :  { %v16138_v24 = vsel %vm10656_vm6, %v16137_v36, 0.0  ;;  %v16125_v13 = vsel %vm10642_vm2, %v16124_v26, 0.0  ;;  %vm27384_vm2 = vcmask 1040384  }
0x4b7d   :  { %16139 = vadd.xlane.f32.xlu1 %v16138_v24  ;;  %16126 = vadd.xlane.f32.xlu0 %v16125_v13  ;;  %v13778_v21 = vpop.xlane.xlu0 %13777  ;;  %v13791_v2 = vpop.xlane.xlu1 %13790  ;;  %v11444_v56 = vsel %vm27384_vm2, %v11430_v18, %v11443_v48  ;;  %vm27385_vm6 = vmmov %vm27384_vm2 }
0x4b7e   :  { %v10661_v11 = vsel %vm27385_vm6, %v10646_v49, %v10660_v28  ;;  %vm27386_vm7 = vmmov %vm27384_vm2  ;;  %v13779_v37 = vsub.f32 0.0, %v13778_v21  ;;  %v13792_v3 = vsub.f32 0.0, %v13791_v2 }
0x4b7f   :  { %v12227_v14 = vsel %vm27386_vm7, %v12213_v20, %v12226_v50  ;;  %v11445_v55 = vadd.f32 %v11444_v56, %v10661_v11  ;;  %vm27387_vm8 = vmmov %vm27384_vm2 }
0x4b80   :  { %v13010_v44 = vsel %vm27387_vm8, %v12996_v32, %v13009_v51  ;;  %vm27388_vm9 = vmmov %vm27384_vm2 }
0x4b81   :  { %v14561_v34 = vpop.xlane.xlu0 %14560  ;;  %v14574_v31 = vpop.xlane.xlu1 %14573  ;;  %v12228_v60 = vadd.f32 %v12227_v14, %v11445_v55  ;;  %v13793_v27 = vsel %vm27388_vm9, %v13779_v37, %v13792_v3  ;;  %vm27389_vm10 = vmmov %vm27384_vm2 }
0x4b82   :  { %v14562_v40 = vsub.f32 0.0, %v14561_v34  ;;  %v14575_v19 = vsub.f32 0.0, %v14574_v31  ;;  %vm27390_vm11 = vmmov %vm27384_vm2 }
0x4b83   :  { %v13011_v42 = vadd.f32 %v13010_v44, %v12228_v60  ;;  %vm27391_vm12 = vmmov %vm27384_vm2 }
0x4b84   :  { %v14576_v23 = vsel %vm27389_vm10, %v14562_v40, %v14575_v19 }
0x4b85   :  { %v15344_v9 = vpop.xlane.xlu0 %15343  ;;  %v15357_v45 = vpop.xlane.xlu1 %15356  ;;  %v13794_v29 = vadd.f32 %v13793_v27, %v13011_v42 }
0x4b86   :  { %v15345_v30 = vsub.f32 0.0, %v15344_v9  ;;  %v15358_v63 = vsub.f32 0.0, %v15357_v45 }
0x4b87   :  { %v14577_v16 = vadd.f32 %v14576_v23, %v13794_v29 }
0x4b88   :  { %v15359_v59 = vsel %vm27390_vm11, %v15345_v30, %v15358_v63 }
0x4b89   :  { %v15360_v58 = vadd.f32 %v15359_v59, %v14577_v16 }
0x4c0a   :  { %v16140_v12 = vpop.xlane.xlu1 %16139  ;;  %v16127_v33 = vpop.xlane.xlu0 %16126 }
0x4c0b   :  { %v16141_v57 = vsub.f32 0.0, %v16140_v12  ;;  %v16128_v5 = vsub.f32 0.0, %v16127_v33 }
0x4c0d   :  { %v16142_v22 = vsel %vm27391_vm12, %v16128_v5, %v16141_v57 }
0x4c0e   :  { %v16143_v35 = vadd.f32 %v16142_v22, %v15360_v58 }
0x4c10   :  { %v16145_v62 = vsel %vm16144_vm14, %v16143_v35, 0.0 }
0x4c11   :  { %16146 = vadd.xlane.f32.xlu0 %v16145_v62 }
0x4c9e   :  { %v16147_v25 = vpop.xlane.xlu0 %16146 }
0x4c9f   :  { %v16148_v15 = vrot.slane %v16147_v25, 4 }
0x4ca1   :  { %v16149_v41 = vadd.f32 %v16148_v15, %v16147_v25 }
0x4ca3   :  { %v16150_v0 = vrot.slane %v16149_v41, 2 }
0x4ca5   :  { %v16151_v43 = vadd.f32 %v16150_v0, %v16149_v41 }
0x4ca7   :  { %v16152_v61 = vrot.slane %v16151_v43, 1 }
0x4ca9   :  { %v16153_v4 = vadd.f32 %v16152_v61, %v16151_v43 }
0x4cab   :  { %21899 = vpush %v16153_v4 }
0x4cdc   :  { %s21900_s3 = spop %21899 }
0x4cdd   :  { %s16155_s16 = smul.f32 0.02, %s21900_s3 }
0x4cdf   :  { %s16158_s19 = smul.f32 0.5, %s16155_s16 }
0x4ce1   :  { %v16159_v53 = vstv %s16158_s19 }
0x4ce2   :  { %16161 = vst.msk [vmem:[#allocation7] sm:$0x1] %vm16160_vm15, %v16159_v53 }
0x4ce3   :  { %22516 = shalt.err (!%p22513_p2)
}
0x4ce4   :  { %s22517_s24 = scalar_lea.hbm %s27310_s5, 16 }
0x4ce5   :  { %p22518_p3 = scmp.ne.s32.totalorder %s27310_s5, %s22517_s24  ;;  %p22521_p4 = scmp.lt.u32.totalorder %s22517_s24, %s27310_s5 }
0x4ce7   :  { %p22523_p5 = pnand %p22521_p4, %p22518_p3 }
0x4ce9   :  { %22526 = shalt.err (!%p22523_p5)
}
0x4cea   :  { %16171 = dma.vmem_to_hbm [thread:$0]  %s16169_s18, 16, %s27310_s5, [#allocation3]  }
0x4ceb   :  { %22531 = dma.done.wait [#allocation3], 16  }
0x4cec   :  { %22532 = vsyncadd [#allocation3], 4294967280 }
0x4ced   :  { %16175 = vsyncpa [#allocation3], 1 }
0x4cee   :  { %16176 = vsyncpa [#allocation4], 1 }
0x4cef   :  { %16177 = vsyncpa [#allocation6], 1 }

</bundles_post_ra>
